<compile_context>
chip_gen: v5e
topology: v5e:2x2
jax: 0.10.0
libtpu: 0.0.40
codegen_flags: <defaults>
</compile_context>

<pallas_src>
import jax
import jax.numpy as jnp
from jax.experimental import pallas as pl
from jax.experimental.pallas import tpu as pltpu


def _pad_into(p_ref, act):
    """Zero a (H+2, W+2, C) VMEM scratch and write `act` into its interior."""
    H, W, _ = act.shape
    p_ref[...] = jnp.zeros_like(p_ref)
    p_ref[1:H + 1, 1:W + 1, :] = act


def _conv3x3_relu(p_ref, w_ref, b_ref):
    """3x3 conv on an already-padded VMEM buffer + bias + ReLU.

    p_ref: (H+2, W+2, C) f32    padded activations
    w_ref: (9*C, Cout)   bf16   im2col weights, (ky, kx, cin) row order
    b_ref: (1, Cout)     f32
    returns (H*W, Cout) f32
    """
    Hp, Wp, C = p_ref.shape
    H, W = Hp - 2, Wp - 2
    taps = [(ky, kx) for ky in range(3) for kx in range(3)]

    if C >= 8:
        # im2col once, one well-shaped MXU matmul (contraction = 9*C).
        cols = []
        for ky, kx in taps:
            patch = p_ref[ky:ky + H, kx:kx + W, :].reshape(H * W, C)
            cols.append(patch.astype(jnp.bfloat16))
        col = jnp.concatenate(cols, axis=-1)                  # (H*W, 9*C) bf16
        acc = jnp.dot(col, w_ref[...], preferred_element_type=jnp.float32)
    else:
        # Tiny channel count (first layer): 9 shifted matmuls, still bf16.
        acc = jnp.zeros((H * W, w_ref.shape[-1]), jnp.float32)
        for j, (ky, kx) in enumerate(taps):
            patch = p_ref[ky:ky + H, kx:kx + W, :].reshape(H * W, C)
            acc = acc + jnp.dot(patch.astype(jnp.bfloat16),
                                w_ref[j * C:(j + 1) * C, :],
                                preferred_element_type=jnp.float32)
    return jnp.maximum(acc + b_ref[...], 0.0)                 # (H*W, Cout) f32


def _fused_baseline_kernel(x_ref, w1_ref, b1_ref, w2_ref, b2_ref,
                           w3_ref, b3_ref, w4t_ref, b4_ref, o_ref,
                           p0_ref, p1_ref, p2_ref):
    """One batch element: all four layers, intermediates never leave VMEM.

    x_ref : (1, H, W, Cin) f32
    wK_ref: im2col weights (9*Cin_k, Cout_k) bf16 ; bK_ref: (1, Cout_k) f32
    w4t_ref: (Cout4, 128) bf16 ; b4_ref: (Cout4, 1) f32
    o_ref : (1, Cout4, H*W) f32   (lane-dense output slab)
    """
    _, H, W, _ = x_ref.shape

    # Layer 1: Cin -> 32, ReLU
    _pad_into(p0_ref, x_ref[0])
    a1 = _conv3x3_relu(p0_ref, w1_ref, b1_ref)                # (H*W, 32)

    # Layer 2: 32 -> 64, ReLU
    _pad_into(p1_ref, a1.reshape(H, W, a1.shape[-1]))
    a2 = _conv3x3_relu(p1_ref, w2_ref, b2_ref)                # (H*W, 64)

    # Layer 3: 64 -> 128, ReLU
    _pad_into(p2_ref, a2.reshape(H, W, a2.shape[-1]))
    a3 = _conv3x3_relu(p2_ref, w3_ref, b3_ref)                # (H*W, 128)

    # Layer 4 (1x1 conv, no ReLU) fused as epilogue, lane-dense:
    # (Cout4, 128) contracted with (H*W, 128) on the 128 axis -> (Cout4, H*W)
    y = jax.lax.dot_general(
        w4t_ref[...], a3.astype(jnp.bfloat16),
        dimension_numbers=(((1,), (1,)), ((), ())),
        preferred_element_type=jnp.float32)
    o_ref[0] = y + b4_ref[...]


def baseline_pallas(params, x_nchw):
    """Equivalent of Baseline.forward, as a single fused pallas_call."""
    (w1, b1), (w2, b2), (w3, b3), (w4, b4) = params
    N, Cin, H, W = x_nchw.shape
    Cout = w4.shape[-1]
    x_nhwc = jnp.transpose(x_nchw, (0, 2, 3, 1)).astype(jnp.float32)

    def colw(w):  # (3, 3, ci, co) HWIO -> (9*ci, co) bf16, (ky, kx, ci) order
        k, _, ci, co = w.shape
        return w.reshape(k * k * ci, co).astype(jnp.bfloat16)

    w1c, w2c, w3c = colw(w1), colw(w2), colw(w3)
    w4t = w4.reshape(w4.shape[2], Cout).T.astype(jnp.bfloat16)   # (Cout, 128)
    b1r = b1.reshape(1, -1).astype(jnp.float32)
    b2r = b2.reshape(1, -1).astype(jnp.float32)
    b3r = b3.reshape(1, -1).astype(jnp.float32)
    b4r = b4.reshape(Cout, 1).astype(jnp.float32)

    def full(a):  # whole (small) array resident in VMEM every grid step
        return pl.BlockSpec(a.shape, lambda n: (0,) * a.ndim)

    out = pl.pallas_call(
        _fused_baseline_kernel,
        out_shape=jax.ShapeDtypeStruct((N, Cout, H * W), jnp.float32),
        grid=(N,),
        in_specs=[
            pl.BlockSpec((1, H, W, Cin), lambda n: (n, 0, 0, 0)),
            full(w1c), full(b1r),
            full(w2c), full(b2r),
            full(w3c), full(b3r),
            full(w4t), full(b4r),
        ],
        out_specs=pl.BlockSpec((1, Cout, H * W), lambda n: (n, 0, 0)),
        scratch_shapes=[
            pltpu.VMEM((H + 2, W + 2, Cin), jnp.float32),
            pltpu.VMEM((H + 2, W + 2, 32), jnp.float32),
            pltpu.VMEM((H + 2, W + 2, 64), jnp.float32),
        ],
        compiler_params=pltpu.CompilerParams(
            dimension_semantics=("parallel",)),
    )(x_nhwc, w1c, b1r, w2c, b2r, w3c, b3r, w4t, b4r)

    return out.reshape(N, Cout, H, W)   # already NCHW


def init_baseline_params(key, in_channels, out_channels=1):
    """Deterministic init matching the PyTorch layer shapes (HWIO weights)."""
    layer_defs = [
        (in_channels, 32, 3),
        (32, 64, 3),
        (64, 128, 3),
        (128, out_channels, 1),
    ]
    params = []
    for i, (cin, cout, k) in enumerate(layer_defs):
        kw, kb = jax.random.split(jax.random.fold_in(key, i))
        bound = 1.0 / float(jnp.sqrt(cin * k * k))
        w = jax.random.uniform(kw, (k, k, cin, cout), jnp.float32, -bound, bound)
        b = jax.random.uniform(kb, (cout,), jnp.float32, -bound, bound)
        params.append((w, b))
    return params


def _reference_forward(params, x_nchw):
    """Pure-JAX reference (lax conv, f32) for correctness checking."""
    x = jnp.transpose(x_nchw, (0, 2, 3, 1))
    for i, (w, b) in enumerate(params):
        pad = "SAME" if w.shape[0] == 3 else "VALID"
        x = jax.lax.conv_general_dilated(
            x, w, window_strides=(1, 1), padding=pad,
            dimension_numbers=("NHWC", "HWIO", "NHWC"))
        x = x + b
        if i < len(params) - 1:
            x = jnp.maximum(x, 0.0)
    return jnp.transpose(x, (0, 3, 1, 2))


if __name__ == "__main__":
    key = jax.random.PRNGKey(0)
    pkey, xkey = jax.random.split(key)

    in_channels, out_channels = 4, 1
    params = init_baseline_params(pkey, in_channels, out_channels)

    # Small NCHW input, matching the PyTorch module's convention.
    x = jax.random.normal(xkey, (2, in_channels, 16, 16), jnp.float32)

    out = baseline_pallas(params, x)
    out = jax.block_until_ready(out)
    assert out.shape == (2, out_channels, 16, 16), out.shape

    ref = jax.block_until_ready(_reference_forward(params, x))
    # bf16 MXU operands with f32 accumulation: 2e-2 tolerance is ample.
    assert jnp.allclose(out, ref, atol=2e-2, rtol=2e-2), float(
        jnp.max(jnp.abs(out - ref)))

    print("KERNEL_OK")
</pallas_src>

<mosaic_0001>
module attributes {stable_mosaic.version = 11 : i64} {
  func.func @_fused_baseline_kernel(%arg0: i32, %arg1: memref<1x16x16x4xf32, #tpu.memory_space<vmem>>, %arg2: memref<36x32xbf16, #tpu.memory_space<vmem>>, %arg3: memref<1x32xf32, #tpu.memory_space<vmem>>, %arg4: memref<288x64xbf16, #tpu.memory_space<vmem>>, %arg5: memref<1x64xf32, #tpu.memory_space<vmem>>, %arg6: memref<576x128xbf16, #tpu.memory_space<vmem>>, %arg7: memref<1x128xf32, #tpu.memory_space<vmem>>, %arg8: memref<1x128xbf16, #tpu.memory_space<vmem>>, %arg9: memref<1x1xf32, #tpu.memory_space<vmem>>, %arg10: memref<1x1x256xf32, #tpu.memory_space<vmem>>, %arg11: memref<18x18x4xf32, #tpu.memory_space<vmem>>, %arg12: memref<18x18x32xf32, #tpu.memory_space<vmem>>, %arg13: memref<18x18x64xf32, #tpu.memory_space<vmem>>) attributes {dimension_semantics = [#tpu.dimension_semantics<parallel>], iteration_bounds = array<i64: 2>, scalar_prefetch = 0 : i64, scratch_operands = 3 : i64, tpu.core_type = #tpu.core_type<tc>, window_params = [{transform_indices = @transform_0, window_bounds = array<i64: 1, 16, 16, 4>}, {pipeline_mode = #tpu.pipeline_mode<synchronous>, transform_indices = @transform_1, window_bounds = array<i64: 36, 32>}, {pipeline_mode = #tpu.pipeline_mode<synchronous>, transform_indices = @transform_2, window_bounds = array<i64: 1, 32>}, {pipeline_mode = #tpu.pipeline_mode<synchronous>, transform_indices = @transform_3, window_bounds = array<i64: 288, 64>}, {pipeline_mode = #tpu.pipeline_mode<synchronous>, transform_indices = @transform_4, window_bounds = array<i64: 1, 64>}, {pipeline_mode = #tpu.pipeline_mode<synchronous>, transform_indices = @transform_5, window_bounds = array<i64: 576, 128>}, {pipeline_mode = #tpu.pipeline_mode<synchronous>, transform_indices = @transform_6, window_bounds = array<i64: 1, 128>}, {pipeline_mode = #tpu.pipeline_mode<synchronous>, transform_indices = @transform_7, window_bounds = array<i64: 1, 128>}, {pipeline_mode = #tpu.pipeline_mode<synchronous>, transform_indices = @transform_8, window_bounds = array<i64: 1, 1>}, {transform_indices = @transform_9, window_bounds = array<i64: 1, 1, 256>}]} {
    %c0 = arith.constant 0 : index
    %c0_0 = arith.constant 0 : index
    %c0_1 = arith.constant 0 : index
    %c0_2 = arith.constant 0 : index
    %0 = vector.load %arg1[%c0, %c0_0, %c0_1, %c0_2] : memref<1x16x16x4xf32, #tpu.memory_space<vmem>>, vector<1x16x16x4xf32>
    %1 = vector.shape_cast %0 : vector<1x16x16x4xf32> to vector<16x16x4xf32>
    %cst = arith.constant 0.000000e+00 : f32
    %2 = vector.broadcast %cst : f32 to vector<18x18x4xf32>
    %c0_3 = arith.constant 0 : index
    %c0_4 = arith.constant 0 : index
    %c0_5 = arith.constant 0 : index
    %3 = vector.load %arg11[%c0_3, %c0_4, %c0_5] : memref<18x18x4xf32, #tpu.memory_space<vmem>>, vector<18x18x4xf32>
    tpu.vector_store %arg11[%c0_3, %c0_4, %c0_5], %2 {strides = array<i32>} : memref<18x18x4xf32, #tpu.memory_space<vmem>>, vector<18x18x4xf32>,
    %c1 = arith.constant 1 : index
    %c1_6 = arith.constant 1 : index
    %c0_7 = arith.constant 0 : index
    %4 = vector.load %arg11[%c1, %c1_6, %c0_7] : memref<18x18x4xf32, #tpu.memory_space<vmem>>, vector<16x16x4xf32>
    tpu.vector_store %arg11[%c1, %c1_6, %c0_7], %1 {strides = array<i32>} : memref<18x18x4xf32, #tpu.memory_space<vmem>>, vector<16x16x4xf32>,
    %cst_8 = arith.constant 0.000000e+00 : f32
    %5 = vector.broadcast %cst_8 : f32 to vector<256x32xf32>
    %c0_9 = arith.constant 0 : index
    %c0_10 = arith.constant 0 : index
    %c0_11 = arith.constant 0 : index
    %6 = vector.load %arg11[%c0_9, %c0_10, %c0_11] : memref<18x18x4xf32, #tpu.memory_space<vmem>>, vector<16x16x4xf32>
    %7 = vector.shape_cast %6 : vector<16x16x4xf32> to vector<256x4xf32>
    %8 = arith.truncf %7 : vector<256x4xf32> to vector<256x4xbf16>
    %c0_12 = arith.constant 0 : index
    %c0_13 = arith.constant 0 : index
    %9 = vector.load %arg2[%c0_12, %c0_13] : memref<36x32xbf16, #tpu.memory_space<vmem>>, vector<4x32xbf16>
    %cst_14 = arith.constant dense<0.000000e+00> : vector<256x32xf32>
    %10 = tpu.matmul %8, %9, %cst_14 {dimension_numbers = #tpu.dot_dimension_numbers<[1], [0], [0], [1], [0, 0, 1, 1], [], []>} : vector<256x4xbf16>, vector<4x32xbf16>, vector<256x32xf32> -> vector<256x32xf32>
    %11 = arith.addf %5, %10 : vector<256x32xf32>
    %c0_15 = arith.constant 0 : index
    %c1_16 = arith.constant 1 : index
    %c0_17 = arith.constant 0 : index
    %12 = vector.load %arg11[%c0_15, %c1_16, %c0_17] : memref<18x18x4xf32, #tpu.memory_space<vmem>>, vector<16x16x4xf32>
    %13 = vector.shape_cast %12 : vector<16x16x4xf32> to vector<256x4xf32>
    %14 = arith.truncf %13 : vector<256x4xf32> to vector<256x4xbf16>
    %c4 = arith.constant 4 : index
    %c0_18 = arith.constant 0 : index
    %15 = vector.load %arg2[%c4, %c0_18] : memref<36x32xbf16, #tpu.memory_space<vmem>>, vector<4x32xbf16>
    %cst_19 = arith.constant dense<0.000000e+00> : vector<256x32xf32>
    %16 = tpu.matmul %14, %15, %cst_19 {dimension_numbers = #tpu.dot_dimension_numbers<[1], [0], [0], [1], [0, 0, 1, 1], [], []>} : vector<256x4xbf16>, vector<4x32xbf16>, vector<256x32xf32> -> vector<256x32xf32>
    %17 = arith.addf %11, %16 : vector<256x32xf32>
    %c0_20 = arith.constant 0 : index
    %c2 = arith.constant 2 : index
    %c0_21 = arith.constant 0 : index
    %18 = vector.load %arg11[%c0_20, %c2, %c0_21] : memref<18x18x4xf32, #tpu.memory_space<vmem>>, vector<16x16x4xf32>
    %19 = vector.shape_cast %18 : vector<16x16x4xf32> to vector<256x4xf32>
    %20 = arith.truncf %19 : vector<256x4xf32> to vector<256x4xbf16>
    %c8 = arith.constant 8 : index
    %c0_22 = arith.constant 0 : index
    %21 = vector.load %arg2[%c8, %c0_22] : memref<36x32xbf16, #tpu.memory_space<vmem>>, vector<4x32xbf16>
    %cst_23 = arith.constant dense<0.000000e+00> : vector<256x32xf32>
    %22 = tpu.matmul %20, %21, %cst_23 {dimension_numbers = #tpu.dot_dimension_numbers<[1], [0], [0], [1], [0, 0, 1, 1], [], []>} : vector<256x4xbf16>, vector<4x32xbf16>, vector<256x32xf32> -> vector<256x32xf32>
    %23 = arith.addf %17, %22 : vector<256x32xf32>
    %c1_24 = arith.constant 1 : index
    %c0_25 = arith.constant 0 : index
    %c0_26 = arith.constant 0 : index
    %24 = vector.load %arg11[%c1_24, %c0_25, %c0_26] : memref<18x18x4xf32, #tpu.memory_space<vmem>>, vector<16x16x4xf32>
    %25 = vector.shape_cast %24 : vector<16x16x4xf32> to vector<256x4xf32>
    %26 = arith.truncf %25 : vector<256x4xf32> to vector<256x4xbf16>
    %c12 = arith.constant 12 : index
    %c0_27 = arith.constant 0 : index
    %27 = vector.load %arg2[%c12, %c0_27] : memref<36x32xbf16, #tpu.memory_space<vmem>>, vector<4x32xbf16>
    %cst_28 = arith.constant dense<0.000000e+00> : vector<256x32xf32>
    %28 = tpu.matmul %26, %27, %cst_28 {dimension_numbers = #tpu.dot_dimension_numbers<[1], [0], [0], [1], [0, 0, 1, 1], [], []>} : vector<256x4xbf16>, vector<4x32xbf16>, vector<256x32xf32> -> vector<256x32xf32>
    %29 = arith.addf %23, %28 : vector<256x32xf32>
    %c1_29 = arith.constant 1 : index
    %c1_30 = arith.constant 1 : index
    %c0_31 = arith.constant 0 : index
    %30 = vector.load %arg11[%c1_29, %c1_30, %c0_31] : memref<18x18x4xf32, #tpu.memory_space<vmem>>, vector<16x16x4xf32>
    %31 = vector.shape_cast %30 : vector<16x16x4xf32> to vector<256x4xf32>
    %32 = arith.truncf %31 : vector<256x4xf32> to vector<256x4xbf16>
    %c16 = arith.constant 16 : index
    %c0_32 = arith.constant 0 : index
    %33 = vector.load %arg2[%c16, %c0_32] : memref<36x32xbf16, #tpu.memory_space<vmem>>, vector<4x32xbf16>
    %cst_33 = arith.constant dense<0.000000e+00> : vector<256x32xf32>
    %34 = tpu.matmul %32, %33, %cst_33 {dimension_numbers = #tpu.dot_dimension_numbers<[1], [0], [0], [1], [0, 0, 1, 1], [], []>} : vector<256x4xbf16>, vector<4x32xbf16>, vector<256x32xf32> -> vector<256x32xf32>
    %35 = arith.addf %29, %34 : vector<256x32xf32>
    %c1_34 = arith.constant 1 : index
    %c2_35 = arith.constant 2 : index
    %c0_36 = arith.constant 0 : index
    %36 = vector.load %arg11[%c1_34, %c2_35, %c0_36] : memref<18x18x4xf32, #tpu.memory_space<vmem>>, vector<16x16x4xf32>
    %37 = vector.shape_cast %36 : vector<16x16x4xf32> to vector<256x4xf32>
    %38 = arith.truncf %37 : vector<256x4xf32> to vector<256x4xbf16>
    %c20 = arith.constant 20 : index
    %c0_37 = arith.constant 0 : index
    %39 = vector.load %arg2[%c20, %c0_37] : memref<36x32xbf16, #tpu.memory_space<vmem>>, vector<4x32xbf16>
    %cst_38 = arith.constant dense<0.000000e+00> : vector<256x32xf32>
    %40 = tpu.matmul %38, %39, %cst_38 {dimension_numbers = #tpu.dot_dimension_numbers<[1], [0], [0], [1], [0, 0, 1, 1], [], []>} : vector<256x4xbf16>, vector<4x32xbf16>, vector<256x32xf32> -> vector<256x32xf32>
    %41 = arith.addf %35, %40 : vector<256x32xf32>
    %c2_39 = arith.constant 2 : index
    %c0_40 = arith.constant 0 : index
    %c0_41 = arith.constant 0 : index
    %42 = vector.load %arg11[%c2_39, %c0_40, %c0_41] : memref<18x18x4xf32, #tpu.memory_space<vmem>>, vector<16x16x4xf32>
    %43 = vector.shape_cast %42 : vector<16x16x4xf32> to vector<256x4xf32>
    %44 = arith.truncf %43 : vector<256x4xf32> to vector<256x4xbf16>
    %c24 = arith.constant 24 : index
    %c0_42 = arith.constant 0 : index
    %45 = vector.load %arg2[%c24, %c0_42] : memref<36x32xbf16, #tpu.memory_space<vmem>>, vector<4x32xbf16>
    %cst_43 = arith.constant dense<0.000000e+00> : vector<256x32xf32>
    %46 = tpu.matmul %44, %45, %cst_43 {dimension_numbers = #tpu.dot_dimension_numbers<[1], [0], [0], [1], [0, 0, 1, 1], [], []>} : vector<256x4xbf16>, vector<4x32xbf16>, vector<256x32xf32> -> vector<256x32xf32>
    %47 = arith.addf %41, %46 : vector<256x32xf32>
    %c2_44 = arith.constant 2 : index
    %c1_45 = arith.constant 1 : index
    %c0_46 = arith.constant 0 : index
    %48 = vector.load %arg11[%c2_44, %c1_45, %c0_46] : memref<18x18x4xf32, #tpu.memory_space<vmem>>, vector<16x16x4xf32>
    %49 = vector.shape_cast %48 : vector<16x16x4xf32> to vector<256x4xf32>
    %50 = arith.truncf %49 : vector<256x4xf32> to vector<256x4xbf16>
    %c28 = arith.constant 28 : index
    %c0_47 = arith.constant 0 : index
    %51 = vector.load %arg2[%c28, %c0_47] : memref<36x32xbf16, #tpu.memory_space<vmem>>, vector<4x32xbf16>
    %cst_48 = arith.constant dense<0.000000e+00> : vector<256x32xf32>
    %52 = tpu.matmul %50, %51, %cst_48 {dimension_numbers = #tpu.dot_dimension_numbers<[1], [0], [0], [1], [0, 0, 1, 1], [], []>} : vector<256x4xbf16>, vector<4x32xbf16>, vector<256x32xf32> -> vector<256x32xf32>
    %53 = arith.addf %47, %52 : vector<256x32xf32>
    %c2_49 = arith.constant 2 : index
    %c2_50 = arith.constant 2 : index
    %c0_51 = arith.constant 0 : index
    %54 = vector.load %arg11[%c2_49, %c2_50, %c0_51] : memref<18x18x4xf32, #tpu.memory_space<vmem>>, vector<16x16x4xf32>
    %55 = vector.shape_cast %54 : vector<16x16x4xf32> to vector<256x4xf32>
    %56 = arith.truncf %55 : vector<256x4xf32> to vector<256x4xbf16>
    %c32 = arith.constant 32 : index
    %c0_52 = arith.constant 0 : index
    %57 = vector.load %arg2[%c32, %c0_52] : memref<36x32xbf16, #tpu.memory_space<vmem>>, vector<4x32xbf16>
    %cst_53 = arith.constant dense<0.000000e+00> : vector<256x32xf32>
    %58 = tpu.matmul %56, %57, %cst_53 {dimension_numbers = #tpu.dot_dimension_numbers<[1], [0], [0], [1], [0, 0, 1, 1], [], []>} : vector<256x4xbf16>, vector<4x32xbf16>, vector<256x32xf32> -> vector<256x32xf32>
    %59 = arith.addf %53, %58 : vector<256x32xf32>
    %c0_54 = arith.constant 0 : index
    %c0_55 = arith.constant 0 : index
    %60 = vector.load %arg3[%c0_54, %c0_55] : memref<1x32xf32, #tpu.memory_space<vmem>>, vector<1x32xf32>
    %61 = vector.broadcast %60 : vector<1x32xf32> to vector<256x32xf32>
    %62 = arith.addf %59, %61 : vector<256x32xf32>
    %cst_56 = arith.constant 0.000000e+00 : f32
    %63 = vector.broadcast %cst_56 : f32 to vector<256x32xf32>
    %64 = arith.maximumf %62, %63 : vector<256x32xf32>
    %65 = vector.shape_cast %64 : vector<256x32xf32> to vector<16x16x32xf32>
    %cst_57 = arith.constant 0.000000e+00 : f32
    %66 = vector.broadcast %cst_57 : f32 to vector<18x18x32xf32>
    %c0_58 = arith.constant 0 : index
    %c0_59 = arith.constant 0 : index
    %c0_60 = arith.constant 0 : index
    %67 = vector.load %arg12[%c0_58, %c0_59, %c0_60] : memref<18x18x32xf32, #tpu.memory_space<vmem>>, vector<18x18x32xf32>
    tpu.vector_store %arg12[%c0_58, %c0_59, %c0_60], %66 {strides = array<i32>} : memref<18x18x32xf32, #tpu.memory_space<vmem>>, vector<18x18x32xf32>,
    %c1_61 = arith.constant 1 : index
    %c1_62 = arith.constant 1 : index
    %c0_63 = arith.constant 0 : index
    %68 = vector.load %arg12[%c1_61, %c1_62, %c0_63] : memref<18x18x32xf32, #tpu.memory_space<vmem>>, vector<16x16x32xf32>
    tpu.vector_store %arg12[%c1_61, %c1_62, %c0_63], %65 {strides = array<i32>} : memref<18x18x32xf32, #tpu.memory_space<vmem>>, vector<16x16x32xf32>,
    %c0_64 = arith.constant 0 : index
    %c0_65 = arith.constant 0 : index
    %c0_66 = arith.constant 0 : index
    %69 = vector.load %arg12[%c0_64, %c0_65, %c0_66] : memref<18x18x32xf32, #tpu.memory_space<vmem>>, vector<16x16x32xf32>
    %70 = vector.shape_cast %69 : vector<16x16x32xf32> to vector<256x32xf32>
    %71 = arith.truncf %70 : vector<256x32xf32> to vector<256x32xbf16>
    %c0_67 = arith.constant 0 : index
    %c1_68 = arith.constant 1 : index
    %c0_69 = arith.constant 0 : index
    %72 = vector.load %arg12[%c0_67, %c1_68, %c0_69] : memref<18x18x32xf32, #tpu.memory_space<vmem>>, vector<16x16x32xf32>
    %73 = vector.shape_cast %72 : vector<16x16x32xf32> to vector<256x32xf32>
    %74 = arith.truncf %73 : vector<256x32xf32> to vector<256x32xbf16>
    %c0_70 = arith.constant 0 : index
    %c2_71 = arith.constant 2 : index
    %c0_72 = arith.constant 0 : index
    %75 = vector.load %arg12[%c0_70, %c2_71, %c0_72] : memref<18x18x32xf32, #tpu.memory_space<vmem>>, vector<16x16x32xf32>
    %76 = vector.shape_cast %75 : vector<16x16x32xf32> to vector<256x32xf32>
    %77 = arith.truncf %76 : vector<256x32xf32> to vector<256x32xbf16>
    %c1_73 = arith.constant 1 : index
    %c0_74 = arith.constant 0 : index
    %c0_75 = arith.constant 0 : index
    %78 = vector.load %arg12[%c1_73, %c0_74, %c0_75] : memref<18x18x32xf32, #tpu.memory_space<vmem>>, vector<16x16x32xf32>
    %79 = vector.shape_cast %78 : vector<16x16x32xf32> to vector<256x32xf32>
    %80 = arith.truncf %79 : vector<256x32xf32> to vector<256x32xbf16>
    %c1_76 = arith.constant 1 : index
    %c1_77 = arith.constant 1 : index
    %c0_78 = arith.constant 0 : index
    %81 = vector.load %arg12[%c1_76, %c1_77, %c0_78] : memref<18x18x32xf32, #tpu.memory_space<vmem>>, vector<16x16x32xf32>
    %82 = vector.shape_cast %81 : vector<16x16x32xf32> to vector<256x32xf32>
    %83 = arith.truncf %82 : vector<256x32xf32> to vector<256x32xbf16>
    %c1_79 = arith.constant 1 : index
    %c2_80 = arith.constant 2 : index
    %c0_81 = arith.constant 0 : index
    %84 = vector.load %arg12[%c1_79, %c2_80, %c0_81] : memref<18x18x32xf32, #tpu.memory_space<vmem>>, vector<16x16x32xf32>
    %85 = vector.shape_cast %84 : vector<16x16x32xf32> to vector<256x32xf32>
    %86 = arith.truncf %85 : vector<256x32xf32> to vector<256x32xbf16>
    %c2_82 = arith.constant 2 : index
    %c0_83 = arith.constant 0 : index
    %c0_84 = arith.constant 0 : index
    %87 = vector.load %arg12[%c2_82, %c0_83, %c0_84] : memref<18x18x32xf32, #tpu.memory_space<vmem>>, vector<16x16x32xf32>
    %88 = vector.shape_cast %87 : vector<16x16x32xf32> to vector<256x32xf32>
    %89 = arith.truncf %88 : vector<256x32xf32> to vector<256x32xbf16>
    %c2_85 = arith.constant 2 : index
    %c1_86 = arith.constant 1 : index
    %c0_87 = arith.constant 0 : index
    %90 = vector.load %arg12[%c2_85, %c1_86, %c0_87] : memref<18x18x32xf32, #tpu.memory_space<vmem>>, vector<16x16x32xf32>
    %91 = vector.shape_cast %90 : vector<16x16x32xf32> to vector<256x32xf32>
    %92 = arith.truncf %91 : vector<256x32xf32> to vector<256x32xbf16>
    %c2_88 = arith.constant 2 : index
    %c2_89 = arith.constant 2 : index
    %c0_90 = arith.constant 0 : index
    %93 = vector.load %arg12[%c2_88, %c2_89, %c0_90] : memref<18x18x32xf32, #tpu.memory_space<vmem>>, vector<16x16x32xf32>
    %94 = vector.shape_cast %93 : vector<16x16x32xf32> to vector<256x32xf32>
    %95 = arith.truncf %94 : vector<256x32xf32> to vector<256x32xbf16>
    %96 = tpu.concatenate %71, %74, %77, %80, %83, %86, %89, %92, %95 in 1 : vector<256x32xbf16>, vector<256x32xbf16>, vector<256x32xbf16>, vector<256x32xbf16>, vector<256x32xbf16>, vector<256x32xbf16>, vector<256x32xbf16>, vector<256x32xbf16>, vector<256x32xbf16> -> vector<256x288xbf16>
    %c0_91 = arith.constant 0 : index
    %c0_92 = arith.constant 0 : index
    %97 = vector.load %arg4[%c0_91, %c0_92] : memref<288x64xbf16, #tpu.memory_space<vmem>>, vector<288x64xbf16>
    %cst_93 = arith.constant dense<0.000000e+00> : vector<256x64xf32>
    %98 = tpu.matmul %96, %97, %cst_93 {dimension_numbers = #tpu.dot_dimension_numbers<[1], [0], [0], [1], [0, 0, 1, 1], [], []>} : vector<256x288xbf16>, vector<288x64xbf16>, vector<256x64xf32> -> vector<256x64xf32>
    %c0_94 = arith.constant 0 : index
    %c0_95 = arith.constant 0 : index
    %99 = vector.load %arg5[%c0_94, %c0_95] : memref<1x64xf32, #tpu.memory_space<vmem>>, vector<1x64xf32>
    %100 = vector.broadcast %99 : vector<1x64xf32> to vector<256x64xf32>
    %101 = arith.addf %98, %100 : vector<256x64xf32>
    %cst_96 = arith.constant 0.000000e+00 : f32
    %102 = vector.broadcast %cst_96 : f32 to vector<256x64xf32>
    %103 = arith.maximumf %101, %102 : vector<256x64xf32>
    %104 = vector.shape_cast %103 : vector<256x64xf32> to vector<16x16x64xf32>
    %cst_97 = arith.constant 0.000000e+00 : f32
    %105 = vector.broadcast %cst_97 : f32 to vector<18x18x64xf32>
    %c0_98 = arith.constant 0 : index
    %c0_99 = arith.constant 0 : index
    %c0_100 = arith.constant 0 : index
    %106 = vector.load %arg13[%c0_98, %c0_99, %c0_100] : memref<18x18x64xf32, #tpu.memory_space<vmem>>, vector<18x18x64xf32>
    tpu.vector_store %arg13[%c0_98, %c0_99, %c0_100], %105 {strides = array<i32>} : memref<18x18x64xf32, #tpu.memory_space<vmem>>, vector<18x18x64xf32>,
    %c1_101 = arith.constant 1 : index
    %c1_102 = arith.constant 1 : index
    %c0_103 = arith.constant 0 : index
    %107 = vector.load %arg13[%c1_101, %c1_102, %c0_103] : memref<18x18x64xf32, #tpu.memory_space<vmem>>, vector<16x16x64xf32>
    tpu.vector_store %arg13[%c1_101, %c1_102, %c0_103], %104 {strides = array<i32>} : memref<18x18x64xf32, #tpu.memory_space<vmem>>, vector<16x16x64xf32>,
    %c0_104 = arith.constant 0 : index
    %c0_105 = arith.constant 0 : index
    %c0_106 = arith.constant 0 : index
    %108 = vector.load %arg13[%c0_104, %c0_105, %c0_106] : memref<18x18x64xf32, #tpu.memory_space<vmem>>, vector<16x16x64xf32>
    %109 = vector.shape_cast %108 : vector<16x16x64xf32> to vector<256x64xf32>
    %110 = arith.truncf %109 : vector<256x64xf32> to vector<256x64xbf16>
    %c0_107 = arith.constant 0 : index
    %c1_108 = arith.constant 1 : index
    %c0_109 = arith.constant 0 : index
    %111 = vector.load %arg13[%c0_107, %c1_108, %c0_109] : memref<18x18x64xf32, #tpu.memory_space<vmem>>, vector<16x16x64xf32>
    %112 = vector.shape_cast %111 : vector<16x16x64xf32> to vector<256x64xf32>
    %113 = arith.truncf %112 : vector<256x64xf32> to vector<256x64xbf16>
    %c0_110 = arith.constant 0 : index
    %c2_111 = arith.constant 2 : index
    %c0_112 = arith.constant 0 : index
    %114 = vector.load %arg13[%c0_110, %c2_111, %c0_112] : memref<18x18x64xf32, #tpu.memory_space<vmem>>, vector<16x16x64xf32>
    %115 = vector.shape_cast %114 : vector<16x16x64xf32> to vector<256x64xf32>
    %116 = arith.truncf %115 : vector<256x64xf32> to vector<256x64xbf16>
    %c1_113 = arith.constant 1 : index
    %c0_114 = arith.constant 0 : index
    %c0_115 = arith.constant 0 : index
    %117 = vector.load %arg13[%c1_113, %c0_114, %c0_115] : memref<18x18x64xf32, #tpu.memory_space<vmem>>, vector<16x16x64xf32>
    %118 = vector.shape_cast %117 : vector<16x16x64xf32> to vector<256x64xf32>
    %119 = arith.truncf %118 : vector<256x64xf32> to vector<256x64xbf16>
    %c1_116 = arith.constant 1 : index
    %c1_117 = arith.constant 1 : index
    %c0_118 = arith.constant 0 : index
    %120 = vector.load %arg13[%c1_116, %c1_117, %c0_118] : memref<18x18x64xf32, #tpu.memory_space<vmem>>, vector<16x16x64xf32>
    %121 = vector.shape_cast %120 : vector<16x16x64xf32> to vector<256x64xf32>
    %122 = arith.truncf %121 : vector<256x64xf32> to vector<256x64xbf16>
    %c1_119 = arith.constant 1 : index
    %c2_120 = arith.constant 2 : index
    %c0_121 = arith.constant 0 : index
    %123 = vector.load %arg13[%c1_119, %c2_120, %c0_121] : memref<18x18x64xf32, #tpu.memory_space<vmem>>, vector<16x16x64xf32>
    %124 = vector.shape_cast %123 : vector<16x16x64xf32> to vector<256x64xf32>
    %125 = arith.truncf %124 : vector<256x64xf32> to vector<256x64xbf16>
    %c2_122 = arith.constant 2 : index
    %c0_123 = arith.constant 0 : index
    %c0_124 = arith.constant 0 : index
    %126 = vector.load %arg13[%c2_122, %c0_123, %c0_124] : memref<18x18x64xf32, #tpu.memory_space<vmem>>, vector<16x16x64xf32>
    %127 = vector.shape_cast %126 : vector<16x16x64xf32> to vector<256x64xf32>
    %128 = arith.truncf %127 : vector<256x64xf32> to vector<256x64xbf16>
    %c2_125 = arith.constant 2 : index
    %c1_126 = arith.constant 1 : index
    %c0_127 = arith.constant 0 : index
    %129 = vector.load %arg13[%c2_125, %c1_126, %c0_127] : memref<18x18x64xf32, #tpu.memory_space<vmem>>, vector<16x16x64xf32>
    %130 = vector.shape_cast %129 : vector<16x16x64xf32> to vector<256x64xf32>
    %131 = arith.truncf %130 : vector<256x64xf32> to vector<256x64xbf16>
    %c2_128 = arith.constant 2 : index
    %c2_129 = arith.constant 2 : index
    %c0_130 = arith.constant 0 : index
    %132 = vector.load %arg13[%c2_128, %c2_129, %c0_130] : memref<18x18x64xf32, #tpu.memory_space<vmem>>, vector<16x16x64xf32>
    %133 = vector.shape_cast %132 : vector<16x16x64xf32> to vector<256x64xf32>
    %134 = arith.truncf %133 : vector<256x64xf32> to vector<256x64xbf16>
    %135 = tpu.concatenate %110, %113, %116, %119, %122, %125, %128, %131, %134 in 1 : vector<256x64xbf16>, vector<256x64xbf16>, vector<256x64xbf16>, vector<256x64xbf16>, vector<256x64xbf16>, vector<256x64xbf16>, vector<256x64xbf16>, vector<256x64xbf16>, vector<256x64xbf16> -> vector<256x576xbf16>
    %c0_131 = arith.constant 0 : index
    %c0_132 = arith.constant 0 : index
    %136 = vector.load %arg6[%c0_131, %c0_132] : memref<576x128xbf16, #tpu.memory_space<vmem>>, vector<576x128xbf16>
    %cst_133 = arith.constant dense<0.000000e+00> : vector<256x128xf32>
    %137 = tpu.matmul %135, %136, %cst_133 {dimension_numbers = #tpu.dot_dimension_numbers<[1], [0], [0], [1], [0, 0, 1, 1], [], []>} : vector<256x576xbf16>, vector<576x128xbf16>, vector<256x128xf32> -> vector<256x128xf32>
    %c0_134 = arith.constant 0 : index
    %c0_135 = arith.constant 0 : index
    %138 = vector.load %arg7[%c0_134, %c0_135] : memref<1x128xf32, #tpu.memory_space<vmem>>, vector<1x128xf32>
    %139 = vector.broadcast %138 : vector<1x128xf32> to vector<256x128xf32>
    %140 = arith.addf %137, %139 : vector<256x128xf32>
    %cst_136 = arith.constant 0.000000e+00 : f32
    %141 = vector.broadcast %cst_136 : f32 to vector<256x128xf32>
    %142 = arith.maximumf %140, %141 : vector<256x128xf32>
    %c0_137 = arith.constant 0 : index
    %c0_138 = arith.constant 0 : index
    %143 = vector.load %arg8[%c0_137, %c0_138] : memref<1x128xbf16, #tpu.memory_space<vmem>>, vector<1x128xbf16>
    %144 = arith.truncf %142 : vector<256x128xf32> to vector<256x128xbf16>
    %cst_139 = arith.constant dense<0.000000e+00> : vector<1x256xf32>
    %145 = tpu.matmul %143, %144, %cst_139 {dimension_numbers = #tpu.dot_dimension_numbers<[1], [1], [0], [0], [0, 0, 1, 0], [], []>} : vector<1x128xbf16>, vector<256x128xbf16>, vector<1x256xf32> -> vector<1x256xf32>
    %c0_140 = arith.constant 0 : index
    %c0_141 = arith.constant 0 : index
    %146 = vector.load %arg9[%c0_140, %c0_141] : memref<1x1xf32, #tpu.memory_space<vmem>>, vector<1x1xf32>
    %147 = vector.broadcast %146 : vector<1x1xf32> to vector<1x256xf32>
    %148 = arith.addf %145, %147 : vector<1x256xf32>
    %c0_142 = arith.constant 0 : index
    %c0_143 = arith.constant 0 : index
    %c0_144 = arith.constant 0 : index
    %149 = vector.load %arg10[%c0_142, %c0_143, %c0_144] : memref<1x1x256xf32, #tpu.memory_space<vmem>>, vector<1x1x256xf32>
    %150 = vector.shape_cast %149 : vector<1x1x256xf32> to vector<1x256xf32>
    %151 = vector.shape_cast %148 : vector<1x256xf32> to vector<1x1x256xf32>
    tpu.vector_store %arg10[%c0_142, %c0_143, %c0_144], %151 {strides = array<i32>} : memref<1x1x256xf32, #tpu.memory_space<vmem>>, vector<1x1x256xf32>,
    return
  }
  func.func @transform_0(%arg0: i32) -> (i32, i32, i32, i32) {
    %c0_i32 = arith.constant 0 : i32
    %c0_i32_0 = arith.constant 0 : i32
    %c0_i32_1 = arith.constant 0 : i32
    %c0_i32_2 = arith.constant 0 : i32
    return %arg0, %c0_i32, %c0_i32_0, %c0_i32_1 : i32, i32, i32, i32
  }
  func.func @transform_1(%arg0: i32) -> (i32, i32) {
    %c0_i32 = arith.constant 0 : i32
    %c0_i32_0 = arith.constant 0 : i32
    %c0_i32_1 = arith.constant 0 : i32
    return %c0_i32, %c0_i32_0 : i32, i32
  }
  func.func @transform_2(%arg0: i32) -> (i32, i32) {
    %c0_i32 = arith.constant 0 : i32
    %c0_i32_0 = arith.constant 0 : i32
    %c0_i32_1 = arith.constant 0 : i32
    return %c0_i32, %c0_i32_0 : i32, i32
  }
  func.func @transform_3(%arg0: i32) -> (i32, i32) {
    %c0_i32 = arith.constant 0 : i32
    %c0_i32_0 = arith.constant 0 : i32
    %c0_i32_1 = arith.constant 0 : i32
    return %c0_i32, %c0_i32_0 : i32, i32
  }
  func.func @transform_4(%arg0: i32) -> (i32, i32) {
    %c0_i32 = arith.constant 0 : i32
    %c0_i32_0 = arith.constant 0 : i32
    %c0_i32_1 = arith.constant 0 : i32
    return %c0_i32, %c0_i32_0 : i32, i32
  }
  func.func @transform_5(%arg0: i32) -> (i32, i32) {
    %c0_i32 = arith.constant 0 : i32
    %c0_i32_0 = arith.constant 0 : i32
    %c0_i32_1 = arith.constant 0 : i32
    return %c0_i32, %c0_i32_0 : i32, i32
  }
  func.func @transform_6(%arg0: i32) -> (i32, i32) {
    %c0_i32 = arith.constant 0 : i32
    %c0_i32_0 = arith.constant 0 : i32
    %c0_i32_1 = arith.constant 0 : i32
    return %c0_i32, %c0_i32_0 : i32, i32
  }
  func.func @transform_7(%arg0: i32) -> (i32, i32) {
    %c0_i32 = arith.constant 0 : i32
    %c0_i32_0 = arith.constant 0 : i32
    %c0_i32_1 = arith.constant 0 : i32
    return %c0_i32, %c0_i32_0 : i32, i32
  }
  func.func @transform_8(%arg0: i32) -> (i32, i32) {
    %c0_i32 = arith.constant 0 : i32
    %c0_i32_0 = arith.constant 0 : i32
    %c0_i32_1 = arith.constant 0 : i32
    return %c0_i32, %c0_i32_0 : i32, i32
  }
  func.func @transform_9(%arg0: i32) -> (i32, i32, i32) {
    %c0_i32 = arith.constant 0 : i32
    %c0_i32_0 = arith.constant 0 : i32
    %c0_i32_1 = arith.constant 0 : i32
    return %arg0, %c0_i32, %c0_i32_0 : i32, i32, i32
  }
}

</mosaic_0001>

<bundles_post_ra>
// kernel: tpu_custom_call.1
= control target key start
LH: loop header
LB: loop body
LE: loop exit
PB: predicated region body
PF: predicated region fallthrough
CT: control target
= control target key end

     0   :  { %s10666_s0 = inlined_call_operand.vmem [shape: f32[2,16,16,4], index: 0, kind: input, shape index: {}]   ;;  %s10667_s1 = inlined_call_operand.vmem [shape: bf16[36,32], index: 1, kind: input, shape index: {}]   ;;  %s10668_s2 = inlined_call_operand.vmem [shape: f32[1,32], index: 2, kind: input, shape index: {}]   ;;  %s10669_s3 = inlined_call_operand.vmem [shape: bf16[288,64], index: 3, kind: input, shape index: {}]   ;;  %s10670_s4 = inlined_call_operand.vmem [shape: f32[1,64], index: 4, kind: input, shape index: {}]   ;;  %s10671_s5 = inlined_call_operand.vmem [shape: bf16[576,128], index: 5, kind: input, shape index: {}]   ;;  %s10672_s6 = inlined_call_operand.vmem [shape: f32[1,128], index: 6, kind: input, shape index: {}]   ;;  %s10673_s7 = inlined_call_operand.vmem [shape: bf16[1,128], index: 7, kind: input, shape index: {}]   ;;  %s10674_s8 = inlined_call_operand.<no memory space> [shape: f32[1,1], index: 8, kind: input, shape index: {}]   ;;  %s10675_s9 = inlined_call_operand.hbm [shape: f32[2,1,256], index: 9, kind: output, shape index: {}]  }
   0x1   :  { %v14_v0 = vstv %s10674_s8 }
   0x2   :  { %15 = vst [vmem:[#allocation5] sm:$0x1] %v14_v0 }
   0x3   :  { %16 = vsyncpa [#allocation7], 0 }
   0x4   :  { %18 = vsyncpa [#allocation7 + $0x1], 0  ;;  %s8156_s11 = smov 0   ;;  %s8158_s12 = smov 0  }
   0x5   :  { %s8160_s13 = smov 0   ;;  %s8162_s14 = smov 0  }
   0x6 LB: > { %s8177_s8 = sadd.s32 4294967295, %s8096_s14   ;;  %s7519_s15 = sadd.s32 4294967294, %s8096_s14   ;;  %s8096_s14 = sphi %s8162_s14, %s10735_s14   ;;  %s8092_s13 = sphi %s8160_s13, %s10734_s13   ;;  %s8088_s12 = sphi %s8158_s12, %s10733_s12   ;;  %s8084_s11 = sphi %s8156_s11, %s10732_s11  }
   0x7   : > { %s8181_s16 = sadd.s32 1, %s8096_s14   ;;  %s225_s17 = sadd.s32 1, %s8092_s13 }
   0x8   : > { %s222_s18 = ssub.s32 %s8096_s14, %s8181_s16  ;;  %p235_p0 = scmp.ne.s32.totalorder %s8092_s13, %s8088_s12 }
   0x9   : > { %p223_p1 = scmp.eq.s32.totalorder %s222_s18, 0  ;;  %p236_p2 = scmp.eq.s32.totalorder %s8177_s8, 1 }
   0xa   : > { %p241_p3 = scmp.ne.s32.totalorder %s8088_s12, %s8084_s11  ;;  %p242_p4 = scmp.eq.s32.totalorder %s7519_s15, 1 }
   0xb   : > { %s8192_s19 = scalar_select %p223_p1, %s8092_s13, %s225_s17  }
   0xc   : > { %p8194_p5 = por %p236_p2, %p235_p0  ;;  %p8198_p6 = por %p242_p4, %p241_p3 }
   0xd   : > { %p7522_p7 = scmp.ge.s32.totalorder %s8096_s14, 1  ;;  %p292_p8 = scmp.lt.s32.totalorder %s8096_s14, 3 }
   0xf   : > { %p293_p9 = pnand %p7522_p7, %p292_p8 }
  0x11   : > { %296 = sbr.rel (%p293_p9) target bundleno = 1904 (0x770), region = 56 }
  0x16   : > { %v552_v1 = vld [vmem:[%s10667_s1] sm:$0xc]  ;;  %vm366_vm0 = vcmask 31744   ;;  %vm369_vm1 = vcmask 25600   ;;  %v10676_v3 = vmov 0.0   ;;  %vm605_vm2 = vcmask 1041408  }
  0x17   : > { %v554_v2 = vunpack.c.l.b16 %v552_v1  ;;  %367 = vst.msk [vmem:[#allocation2] sm:$0xff] %vm366_vm0, %v10676_v3  ;;  %p328_p10 = scmp.lt.s32.totalorder %s8177_s8, 1  ;;  %v886_v57 = vld [vmem:[%s10667_s1 + $0x4] sm:$0x3]  ;;  %v503_v61 = vld [vmem:[%s10667_s1] sm:$0x3] }
  0x18   : > { %368 = vst.msk [vmem:[#allocation2 + $0x8] sm:$0xff] %vm366_vm0, %v10676_v3  ;;  %v936_v60 = vsel %vm605_vm2, %v886_v57, 0  ;;  %v747_v62 = vsel %vm605_vm2, %v503_v61, 0  ;;  %vm2466_vm3 = vcmask 261120   ;;  %vm2469_vm4 = vcmask 254976   ;;  %s8099_s18 = smov 32  }
  0x19   : > { %v555_v4 = vpack.c.b16 %v554_v2, %v554_v2  ;;  %370 = vst.msk [vmem:[#allocation2 + $0x10] sm:$0x3] %vm369_vm1, %v10676_v3  ;;  %s329_s24 = scalar_select %p328_p10, %s8177_s8, 1  ;;  %vm4092_vm5 = vcmask 523264   ;;  %vm4125_vm6 = vcmask 785408   ;;  %vm4799_vm7 = vcmask 517120  }
  0x1a   : > { %371 = vst.msk [vmem:[#allocation2 + $0x18] sm:$0xff] %vm366_vm0, %v10676_v3  ;;  %s8100_s22 = smov 64   ;;  %s8101_s23 = smov 96   ;;  %vm7436_vm8 = vcmask 1040384  }
  0x1b   : > { %v556_v5 = vrot.slane %v555_v4, 2  ;;  %372 = vst.msk [vmem:[#allocation2 + $0x20] sm:$0xff] %vm366_vm0, %v10676_v3  ;;  %s7922_s25 = sshll.u32 %s329_s24, 8  ;;  %s7919_s27 = sshll.u32 %s8177_s8, 1 }
  0x1c   : > { %373 = vst.msk [vmem:[#allocation2 + $0x28] sm:$0x3] %vm369_vm1, %v10676_v3  ;;  %s8312_s28 = scalar_lea.vmem %s10666_s0, %s7922_s25  ;;  %s325_s25 = sand.u32 1, %s8088_s12  }
  0x1d   : > { %v607_v6 = vsel %vm605_vm2, %v556_v5, 0  ;;  %374 = vst.msk [vmem:[#allocation2 + $0x30] sm:$0xff] %vm366_vm0, %v10676_v3  ;;  %v342_v10 = vld [vmem:[%s8312_s28 + $0x40] sm:$0xff]  ;;  %v343_v11 = vld [vmem:[%s8312_s28 + $0x48] sm:$0xff]  ;;  %v344_v16 = vld [vmem:[%s8312_s28 + $0x50] sm:$0xff]  ;;  %s7523_s26 = sshll.u32 %s325_s25, 1  ;;  %s7455_s10 = scalar_lea.hbm %s10675_s9, %s7919_s27 }
  0x1e   : > { %616 = vmatpush.bf16.msra.mxu0 %v607_v6  ;;  %7977 = vmatpush.bf16.msra.mxu1 %v607_v6  ;;  %375 = vst.msk [vmem:[#allocation2 + $0x38] sm:$0xff] %vm366_vm0, %v10676_v3  ;;  %v354_v12 = vld [vmem:[%s8312_s28 + $0xa0] sm:$0xff]  ;;  %v355_v13 = vld [vmem:[%s8312_s28 + $0xa8] sm:$0xff]  ;;  %v345_v17 = vld [vmem:[%s8312_s28 + $0x58] sm:$0xff]  ;;  %s327_s15 = scalar_lea.vmem [#allocation6], %s7523_s26  ;;  %s7459_s17 = sshll.u32 %s7455_s10, 4  ;;  %s7460_s17 = int_to_ptr.hbm [resolvable:$true] %s7459_s17 }
  0x1f   : > { %7979 = vmatpush.bf16.msra.mxu3 %v607_v6  ;;  %v504_v7 = vld [vmem:[#allocation2 + $0x1] sm:$0xff]  ;;  %376 = vst.msk [vmem:[#allocation2 + $0x40] sm:$0x3] %vm369_vm1, %v10676_v3  ;;  %7978 = vmatpush.bf16.msra.mxu2 %v607_v6  ;;  %v356_v18 = vld [vmem:[%s8312_s28 + $0xb0] sm:$0xff]  ;;  %v357_v19 = vld [vmem:[%s8312_s28 + $0xb8] sm:$0xff]  ;;  %s7445_s8 = scalar_lea.sflag [#allocation7], %s325_s25 }
  0x20   : > { %v505_v8 = vld [vmem:[#allocation2 + $0x9] sm:$0xff]  ;;  %377 = vst.msk [vmem:[#allocation2 + $0x48] sm:$0xff] %vm366_vm0, %v10676_v3  ;;  %v334_v14 = vld [vmem:[%s8312_s28] sm:$0xff]  ;;  %v337_v28 = vld [vmem:[%s8312_s28 + $0x18] sm:$0xff]  ;;  %s8054_s26 = scalar_lea.hbm %s10675_s9, 4 }
  0x21   : > { %v536_v9 = vpack.c.bf16 %v505_v8, %v504_v7  ;;  %378 = vst.msk [vmem:[#allocation2 + $0x50] sm:$0xff] %vm366_vm0, %v10676_v3  ;;  %v335_v15 = vld [vmem:[%s8312_s28 + $0x8] sm:$0xff]  ;;  %v350_v21 = vld [vmem:[%s8312_s28 + $0x80] sm:$0xff]  ;;  %v336_v26 = vld [vmem:[%s8312_s28 + $0x10] sm:$0xff] }
  0x22   : > { %379 = vst.msk [vmem:[#allocation2 + $0x58] sm:$0x3] %vm369_vm1, %v10676_v3  ;;  %v351_v23 = vld [vmem:[%s8312_s28 + $0x88] sm:$0xff]  ;;  %v346_v31 = vld [vmem:[%s8312_s28 + $0x60] sm:$0xff]  ;;  %v352_v37 = vld [vmem:[%s8312_s28 + $0x90] sm:$0xff]  ;;  %756 = vmatpush.bf16.msrb.mxu1 %v747_v62 }
  0x23   : > { %7526 = vmatmul.msk.bf16.vlgmr.msra.gmra.mxu0 %vm366_vm0, %v536_v9  ;;  %380 = vst.msk [vmem:[#allocation2 + $0x60] sm:$0xff] %vm366_vm0, %v10676_v3  ;;  %v347_v33 = vld [vmem:[%s8312_s28 + $0x68] sm:$0xff]  ;;  %v358_v35 = vld [vmem:[%s8312_s28 + $0xc0] sm:$0xff]  ;;  %v353_v38 = vld [vmem:[%s8312_s28 + $0x98] sm:$0xff]  ;;  %945 = vmatpush.bf16.msrb.mxu2 %v936_v60 }
  0x24   : > { %381 = vst.msk [vmem:[#allocation2 + $0x68] sm:$0xff] %vm366_vm0, %v10676_v3  ;;  %v359_v36 = vld [vmem:[%s8312_s28 + $0xc8] sm:$0xff]  ;;  %v338_v40 = vld [vmem:[%s8312_s28 + $0x20] sm:$0xff]  ;;  %v348_v44 = vld [vmem:[%s8312_s28 + $0x70] sm:$0xff] }
  0x25   : > { %382 = vst.msk [vmem:[#allocation2 + $0x70] sm:$0x3] %vm369_vm1, %v10676_v3  ;;  %v339_v42 = vld [vmem:[%s8312_s28 + $0x28] sm:$0xff]  ;;  %v349_v47 = vld [vmem:[%s8312_s28 + $0x78] sm:$0xff]  ;;  %v360_v48 = vld [vmem:[%s8312_s28 + $0xd0] sm:$0xff] }
  0x26   : > { %383 = vst.msk [vmem:[#allocation2 + $0x78] sm:$0xff] %vm366_vm0, %v10676_v3  ;;  %v361_v51 = vld [vmem:[%s8312_s28 + $0xd8] sm:$0xff]  ;;  %v340_v63 = vld [vmem:[%s8312_s28 + $0x30] sm:$0xff]  ;;  %v362_v1 = vld [vmem:[%s8312_s28 + $0xe0] sm:$0xff] }
  0x27   : > { %384 = vst.msk [vmem:[#allocation2 + $0x80] sm:$0xff] %vm366_vm0, %v10676_v3  ;;  %v341_v0 = vld [vmem:[%s8312_s28 + $0x38] sm:$0xff]  ;;  %v363_v2 = vld [vmem:[%s8312_s28 + $0xe8] sm:$0xff] }
  0x28   : > { %385 = vst.msk [vmem:[#allocation2 + $0x88] sm:$0x3] %vm369_vm1, %v10676_v3 }
  0x29   : > { %386 = vst.msk [vmem:[#allocation2 + $0x90] sm:$0xff] %vm366_vm0, %v10676_v3 }
  0x2a   : > { %387 = vst.msk [vmem:[#allocation2 + $0x98] sm:$0xff] %vm366_vm0, %v10676_v3 }
  0x2b   : > { %388 = vst.msk [vmem:[#allocation2 + $0xa0] sm:$0x3] %vm369_vm1, %v10676_v3 }
  0x2c   : > { %389 = vst.msk [vmem:[#allocation2 + $0xa8] sm:$0xff] %vm366_vm0, %v10676_v3 }
  0x2d   : > { %390 = vst.msk [vmem:[#allocation2 + $0xb0] sm:$0xff] %vm366_vm0, %v10676_v3 }
  0x2e   : > { %391 = vst.msk [vmem:[#allocation2 + $0xb8] sm:$0x3] %vm369_vm1, %v10676_v3 }
  0x2f   : > { %392 = vst.msk [vmem:[#allocation2 + $0xc0] sm:$0xff] %vm366_vm0, %v10676_v3 }
  0x30   : > { %393 = vst.msk [vmem:[#allocation2 + $0xc8] sm:$0xff] %vm366_vm0, %v10676_v3 }
  0x31   : > { %394 = vst.msk [vmem:[#allocation2 + $0xd0] sm:$0x3] %vm369_vm1, %v10676_v3 }
  0x32   : > { %395 = vst.msk [vmem:[#allocation2 + $0xd8] sm:$0xff] %vm366_vm0, %v10676_v3 }
  0x33   : > { %396 = vst.msk [vmem:[#allocation2 + $0xe0] sm:$0xff] %vm366_vm0, %v10676_v3 }
  0x34   : > { %397 = vst.msk [vmem:[#allocation2 + $0xe8] sm:$0x3] %vm369_vm1, %v10676_v3 }
  0x35   : > { %398 = vst.msk [vmem:[#allocation2 + $0xf0] sm:$0xff] %vm366_vm0, %v10676_v3 }
  0x36   : > { %399 = vst.msk [vmem:[#allocation2 + $0xf8] sm:$0xff] %vm366_vm0, %v10676_v3 }
  0x37   : > { %400 = vst.msk [vmem:[#allocation2 + $0x100] sm:$0x3] %vm369_vm1, %v10676_v3 }
  0x38   : > { %401 = vst.msk [vmem:[#allocation2 + $0x108] sm:$0xff] %vm366_vm0, %v10676_v3 }
  0x39   : > { %402 = vst.msk [vmem:[#allocation2 + $0x110] sm:$0xff] %vm366_vm0, %v10676_v3 }
  0x3a   : > { %403 = vst.msk [vmem:[#allocation2 + $0x118] sm:$0x3] %vm369_vm1, %v10676_v3 }
  0x3b   : > { %404 = vst.msk [vmem:[#allocation2 + $0x120] sm:$0xff] %vm366_vm0, %v10676_v3 }
  0x3c   : > { %405 = vst.msk [vmem:[#allocation2 + $0x128] sm:$0xff] %vm366_vm0, %v10676_v3 }
  0x3d   : > { %406 = vst.msk [vmem:[#allocation2 + $0x130] sm:$0x3] %vm369_vm1, %v10676_v3 }
  0x3e   : > { %407 = vst.msk [vmem:[#allocation2 + $0x138] sm:$0xff] %vm366_vm0, %v10676_v3 }
  0x3f   : > { %408 = vst.msk [vmem:[#allocation2 + $0x140] sm:$0xff] %vm366_vm0, %v10676_v3 }
  0x40   : > { %409 = vst.msk [vmem:[#allocation2 + $0x148] sm:$0x3] %vm369_vm1, %v10676_v3 }
  0x41   : > { %410 = vst.msk [vmem:[#allocation2 + $0x150] sm:$0xff] %vm366_vm0, %v10676_v3 }
  0x42   : > { %411 = vst.msk [vmem:[#allocation2 + $0x158] sm:$0xff] %vm366_vm0, %v10676_v3 }
  0x43   : > { %412 = vst.msk [vmem:[#allocation2 + $0x160] sm:$0x3] %vm369_vm1, %v10676_v3 }
  0x44   : > { %413 = vst.msk [vmem:[#allocation2 + $0x168] sm:$0xff] %vm366_vm0, %v10676_v3 }
  0x45   : > { %414 = vst.msk [vmem:[#allocation2 + $0x170] sm:$0xff] %vm366_vm0, %v10676_v3 }
  0x46   : > { %415 = vst.msk [vmem:[#allocation2 + $0x178] sm:$0x3] %vm369_vm1, %v10676_v3 }
  0x47   : > { %416 = vst.msk [vmem:[#allocation2 + $0x180] sm:$0xff] %vm366_vm0, %v10676_v3 }
  0x48   : > { %417 = vst.msk [vmem:[#allocation2 + $0x188] sm:$0xff] %vm366_vm0, %v10676_v3 }
  0x49   : > { %418 = vst.msk [vmem:[#allocation2 + $0x190] sm:$0x3] %vm369_vm1, %v10676_v3 }
  0x4a   : > { %419 = vst.msk [vmem:[#allocation2 + $0x198] sm:$0xff] %vm366_vm0, %v10676_v3 }
  0x4b   : > { %420 = vst.msk [vmem:[#allocation2 + $0x1a0] sm:$0xff] %vm366_vm0, %v10676_v3 }
  0x4c   : > { %421 = vst.msk [vmem:[#allocation2 + $0x1a8] sm:$0x3] %vm369_vm1, %v10676_v3 }
  0x4d   : > { %431 = vst.msk [vmem:[#allocation2 + $0x79] sm:$0xff] %vm366_vm0, %v342_v10 }
  0x4e   : > { %432 = vst.msk [vmem:[#allocation2 + $0x81] sm:$0xff] %vm366_vm0, %v343_v11 }
  0x4f   : > { %443 = vst.msk [vmem:[#allocation2 + $0x109] sm:$0xff] %vm366_vm0, %v354_v12 }
  0x50   : > { %444 = vst.msk [vmem:[#allocation2 + $0x111] sm:$0xff] %vm366_vm0, %v355_v13 }
  0x51   : > { %423 = vst.msk [vmem:[#allocation2 + $0x19] sm:$0xff] %vm366_vm0, %v334_v14  ;;  %v1107_v14 = vld [vmem:[%s10667_s1 + $0x4] sm:$0xc] }
  0x52   : > { %424 = vst.msk [vmem:[#allocation2 + $0x21] sm:$0xff] %vm366_vm0, %v335_v15  ;;  %v838_v15 = vld [vmem:[#allocation2 + $0x2] sm:$0xff] }
  0x53   : > { %433 = vst.msk [vmem:[#allocation2 + $0x91] sm:$0xff] %vm366_vm0, %v344_v16  ;;  %v839_v16 = vld [vmem:[#allocation2 + $0xa] sm:$0xff] }
  0x54   : > { %v514_v20 = vld [vmem:[#allocation2 + $0x79] sm:$0xff]  ;;  %434 = vst.msk [vmem:[#allocation2 + $0x99] sm:$0xff] %vm366_vm0, %v345_v17  ;;  %v1109_v17 = vunpack.c.l.b16 %v1107_v14 }
  0x55   : > { %v515_v22 = vld [vmem:[#allocation2 + $0x81] sm:$0xff]  ;;  %445 = vst.msk [vmem:[#allocation2 + $0x121] sm:$0xff] %vm366_vm0, %v356_v18 }
  0x56   : > { %v8345_v24 = vpack.c.bf16 %v515_v22, %v514_v20  ;;  %v526_v25 = vld [vmem:[#allocation2 + $0x109] sm:$0xff]  ;;  %446 = vst.msk [vmem:[#allocation2 + $0x129] sm:$0xff] %vm366_vm0, %v357_v19  ;;  %v1110_v20 = vpack.c.b16 %v1109_v17, %v1109_v17 }
  0x57   : > { %v527_v27 = vld [vmem:[#allocation2 + $0x111] sm:$0xff]  ;;  %439 = vst.msk [vmem:[#allocation2 + $0xd9] sm:$0xff] %vm366_vm0, %v350_v21  ;;  %v1332_v18 = vld [vmem:[%s10667_s1 + $0x8] sm:$0x3]  ;;  %v870_v21 = vpack.c.bf16 %v839_v16, %v838_v15 }
  0x58   : > { %7531 = vmatmul.msk.bf16.vlgmr.msra.gmra.mxu1 %vm366_vm0, %v8345_v24  ;;  %v8353_v29 = vpack.c.bf16 %v527_v27, %v526_v25  ;;  %v506_v30 = vld [vmem:[#allocation2 + $0x19] sm:$0xff]  ;;  %440 = vst.msk [vmem:[#allocation2 + $0xe1] sm:$0xff] %vm366_vm0, %v351_v23  ;;  %v1382_v19 = vsel %vm605_vm2, %v1332_v18, 0  ;;  %v1111_v22 = vrot.slane %v1110_v20, 2 }
  0x59   : > { %v507_v32 = vld [vmem:[#allocation2 + $0x21] sm:$0xff]  ;;  %425 = vst.msk [vmem:[#allocation2 + $0x31] sm:$0xff] %vm366_vm0, %v336_v26  ;;  %1391 = vmatpush.bf16.msrb.mxu0 %v1382_v19  ;;  %v465_v20 = vld [vmem:[#allocation2 + $0x78] sm:$0xff] }
  0x5a   : > { %7537 = vmatmul.msk.bf16.vlgmr.msra.gmra.mxu3 %vm366_vm0, %v8353_v29  ;;  %v8361_v34 = vpack.c.bf16 %v507_v32, %v506_v30  ;;  %426 = vst.msk [vmem:[#allocation2 + $0x39] sm:$0xff] %vm366_vm0, %v337_v28  ;;  %v516_v45 = vld [vmem:[#allocation2 + $0x91] sm:$0xff]  ;;  %v1161_v26 = vsel %vm605_vm2, %v1111_v22, 0 }
  0x5b   : > { %435 = vst.msk [vmem:[#allocation2 + $0xa9] sm:$0xff] %vm366_vm0, %v346_v31  ;;  %v517_v46 = vld [vmem:[#allocation2 + $0x99] sm:$0xff]  ;;  %1170 = vmatpush.bf16.msrb.mxu3 %v1161_v26 }
  0x5c   : > { %7527 = vmatmul.msk.bf16.gmra.mxu0 %vm366_vm0, %v8361_v34  ;;  %436 = vst.msk [vmem:[#allocation2 + $0xb1] sm:$0xff] %vm366_vm0, %v347_v33  ;;  %v528_v49 = vld [vmem:[#allocation2 + $0x121] sm:$0xff]  ;;  %v8389_v52 = vpack.c.bf16 %v517_v46, %v516_v45  ;;  %v850_v15 = vld [vmem:[#allocation2 + $0x92] sm:$0xff] }
  0x5d   : > { %447 = vst.msk [vmem:[#allocation2 + $0x139] sm:$0xff] %vm366_vm0, %v358_v35  ;;  %v529_v50 = vld [vmem:[#allocation2 + $0x129] sm:$0xff]  ;;  %v851_v16 = vld [vmem:[#allocation2 + $0x9a] sm:$0xff] }
  0x5e   : > { %v522_v39 = vld [vmem:[#allocation2 + $0xd9] sm:$0xff]  ;;  %448 = vst.msk [vmem:[#allocation2 + $0x141] sm:$0xff] %vm366_vm0, %v359_v36  ;;  %v8393_v55 = vpack.c.bf16 %v529_v50, %v528_v49  ;;  %v8516_v19 = vpack.c.bf16 %v851_v16, %v850_v15 }
  0x5f   : > { %v523_v41 = vld [vmem:[#allocation2 + $0xe1] sm:$0xff]  ;;  %441 = vst.msk [vmem:[#allocation2 + $0xf1] sm:$0xff] %vm366_vm0, %v352_v37  ;;  %v457_v49 = vld [vmem:[#allocation2 + $0x18] sm:$0xff] }
  0x60   : > { %v8377_v43 = vpack.c.bf16 %v523_v41, %v522_v39  ;;  %442 = vst.msk [vmem:[#allocation2 + $0xf9] sm:$0xff] %vm366_vm0, %v353_v38  ;;  %v508_v53 = vld [vmem:[#allocation2 + $0x31] sm:$0xff]  ;;  %v840_v36 = vld [vmem:[#allocation2 + $0x1a] sm:$0xff]  ;;  %v841_v37 = vld [vmem:[#allocation2 + $0x22] sm:$0xff] }
  0x61   : > { %427 = vst.msk [vmem:[#allocation2 + $0x49] sm:$0xff] %vm366_vm0, %v338_v40  ;;  %v509_v54 = vld [vmem:[#allocation2 + $0x39] sm:$0xff]  ;;  %v8451_v38 = vpack.c.bf16 %v841_v37, %v840_v36  ;;  %v456_v40 = vld [vmem:[#allocation2 + $0x8] sm:$0xff] }
  0x62   : > { %7535 = vmatmul.msk.bf16.vlgmr.msra.gmra.mxu2 %vm366_vm0, %v8377_v43  ;;  %428 = vst.msk [vmem:[#allocation2 + $0x51] sm:$0xff] %vm366_vm0, %v339_v42  ;;  %v8398_v56 = vpack.c.bf16 %v509_v54, %v508_v53  ;;  %v518_v5 = vld [vmem:[#allocation2 + $0xa9] sm:$0xff]  ;;  %v455_v39 = vld [vmem:[#allocation2] sm:$0xff]  ;;  %v842_v46 = vld [vmem:[#allocation2 + $0x32] sm:$0xff] }
  0x63   : > { %437 = vst.msk [vmem:[#allocation2 + $0xc1] sm:$0xff] %vm366_vm0, %v348_v44  ;;  %v519_v6 = vld [vmem:[#allocation2 + $0xb1] sm:$0xff]  ;;  %v487_v44 = vpack.c.bf16 %v456_v40, %v455_v39  ;;  %v458_v50 = vld [vmem:[#allocation2 + $0x20] sm:$0xff] }
  0x64   : > { %438 = vst.msk [vmem:[#allocation2 + $0xc9] sm:$0xff] %vm366_vm0, %v349_v47  ;;  %v530_v7 = vld [vmem:[#allocation2 + $0x139] sm:$0xff]  ;;  %v8424_v9 = vpack.c.bf16 %v519_v6, %v518_v5  ;;  %v849_v5 = vld [vmem:[#allocation2 + $0x82] sm:$0xff]  ;;  %v467_v39 = vld [vmem:[#allocation2 + $0x90] sm:$0xff] }
  0x65   : > { %449 = vst.msk [vmem:[#allocation2 + $0x151] sm:$0xff] %vm366_vm0, %v360_v48  ;;  %v531_v8 = vld [vmem:[#allocation2 + $0x141] sm:$0xff]  ;;  %v468_v40 = vld [vmem:[#allocation2 + $0x98] sm:$0xff] }
  0x66   : > { %450 = vst.msk [vmem:[#allocation2 + $0x159] sm:$0xff] %vm366_vm0, %v361_v51  ;;  %v524_v58 = vld [vmem:[#allocation2 + $0xf1] sm:$0xff]  ;;  %v8426_v12 = vpack.c.bf16 %v531_v8, %v530_v7  ;;  %v843_v47 = vld [vmem:[#allocation2 + $0x3a] sm:$0xff]  ;;  %v488_v51 = vpack.c.bf16 %v458_v50, %v457_v49 }
  0x67   : > { %v525_v59 = vld [vmem:[#allocation2 + $0xf9] sm:$0xff]  ;;  %429 = vst.msk [vmem:[#allocation2 + $0x61] sm:$0xff] %vm366_vm0, %v340_v63  ;;  %v8462_v48 = vpack.c.bf16 %v843_v47, %v842_v46 }
  0x68   : > { %7532 = vmatmul.msk.bf16.gmra.mxu1 %vm366_vm0, %v8389_v52  ;;  %v8417_v4 = vpack.c.bf16 %v525_v59, %v524_v58  ;;  %430 = vst.msk [vmem:[#allocation2 + $0x69] sm:$0xff] %vm366_vm0, %v341_v0  ;;  %v510_v10 = vld [vmem:[#allocation2 + $0x49] sm:$0xff]  ;;  %v460_v58 = vld [vmem:[#allocation2 + $0x38] sm:$0xff] }
  0x69   : > { %451 = vst.msk [vmem:[#allocation2 + $0x169] sm:$0xff] %vm366_vm0, %v362_v1  ;;  %v511_v11 = vld [vmem:[#allocation2 + $0x51] sm:$0xff]  ;;  %v461_v62 = vld [vmem:[#allocation2 + $0x48] sm:$0xff]  ;;  %v859_v3 = vld [vmem:[#allocation2 + $0xfa] sm:$0xff] }
  0x6a   : > { %7538 = vmatmul.msk.bf16.gmra.mxu3 %vm366_vm0, %v8393_v55  ;;  %452 = vst.msk [vmem:[#allocation2 + $0x171] sm:$0xff] %vm366_vm0, %v363_v2  ;;  %v539_v13 = vpack.c.bf16 %v511_v11, %v510_v10  ;;  %v520_v23 = vld [vmem:[#allocation2 + $0xc1] sm:$0xff]  ;;  %v844_v53 = vld [vmem:[#allocation2 + $0x4a] sm:$0xff]  ;;  %v845_v54 = vld [vmem:[#allocation2 + $0x52] sm:$0xff] }
  0x6b   : > { %v521_v25 = vld [vmem:[#allocation2 + $0xc9] sm:$0xff]  ;;  %v8470_v57 = vpack.c.bf16 %v845_v54, %v844_v53  ;;  %v848_v2 = vld [vmem:[#allocation2 + $0x7a] sm:$0xff]  ;;  %10691 = vst [vmem:[#allocation9_spill] sm:$0xff] %v8516_v19 }
  0x6c   : > { %7528 = vmatmul.msk.bf16.gmra.mxu0 %vm366_vm0, %v8398_v56  ;;  %v532_v27 = vld [vmem:[#allocation2 + $0x151] sm:$0xff]  ;;  %v8442_v30 = vpack.c.bf16 %v521_v25, %v520_v23  ;;  %v8494_v6 = vpack.c.bf16 %v849_v5, %v848_v2  ;;  %v854_v49 = vld [vmem:[#allocation2 + $0xc2] sm:$0xff] }
  0x6d   : > { %v533_v28 = vld [vmem:[#allocation2 + $0x159] sm:$0xff]  ;;  %v462_v63 = vld [vmem:[#allocation2 + $0x50] sm:$0xff] }
  0x6e   : > { %v512_v31 = vld [vmem:[#allocation2 + $0x61] sm:$0xff]  ;;  %v8444_v33 = vpack.c.bf16 %v533_v28, %v532_v27  ;;  %v8485_v0 = vpack.c.bf16 %v462_v63, %v461_v62  ;;  %v852_v28 = vld [vmem:[#allocation2 + $0xaa] sm:$0xff] }
  0x6f   : > { %v513_v32 = vld [vmem:[#allocation2 + $0x69] sm:$0xff]  ;;  %v463_v8 = vld [vmem:[#allocation2 + $0x60] sm:$0xff] }
  0x70   : > { %v540_v35 = vpack.c.bf16 %v513_v32, %v512_v31  ;;  %v534_v41 = vld [vmem:[#allocation2 + $0x169] sm:$0xff]  ;;  %v853_v31 = vld [vmem:[#allocation2 + $0xb2] sm:$0xff] }
  0x71   : > { %v535_v42 = vld [vmem:[#allocation2 + $0x171] sm:$0xff]  ;;  %v846_v60 = vld [vmem:[#allocation2 + $0x62] sm:$0xff]  ;;  %v8544_v37 = vpack.c.bf16 %v853_v31, %v852_v28 }
  0x72   : > { %7536 = vmatmul.msk.bf16.gmra.mxu2 %vm366_vm0, %v8417_v4  ;;  %v8455_v45 = vpack.c.bf16 %v535_v42, %v534_v41  ;;  %v847_v61 = vld [vmem:[#allocation2 + $0x6a] sm:$0xff]  ;;  %v8550_v42 = vpack.c.bf16 %v468_v40, %v467_v39  ;;  %v471_v28 = vld [vmem:[#allocation2 + $0xc0] sm:$0xff] }
  0x73   : > { %v464_v10 = vld [vmem:[#allocation2 + $0x68] sm:$0xff]  ;;  %10692 = vst [vmem:[#allocation10_spill] sm:$0xff] %v8544_v37 }
  0x74   : > { %v8500_v11 = vpack.c.bf16 %v464_v10, %v463_v8  ;;  %v855_v50 = vld [vmem:[#allocation2 + $0xca] sm:$0xff]  ;;  %v856_v8 = vld [vmem:[#allocation2 + $0xda] sm:$0xff]  ;;  %v857_v10 = vld [vmem:[#allocation2 + $0xe2] sm:$0xff] }
  0x75   : > { %v472_v31 = vld [vmem:[#allocation2 + $0xc8] sm:$0xff] }
  0x76   : > { %v8602_v40 = vpack.c.bf16 %v472_v31, %v471_v28 }
  0x78   : > { %7533 = vmatmul.msk.bf16.gmra.mxu1 %vm366_vm0, %v8424_v9  ;;  %10699 = vst [vmem:[#allocation17_spill] sm:$0xff] %v8602_v40 }
  0x7a   : > { %7539 = vmatmul.msk.bf16.gmra.mxu3 %vm366_vm0, %v8426_v12 }
  0x7c   : > { %7529 = vmatmul.msk.bf16.gmra.mxu0 %vm366_vm0, %v539_v13 }
  0x82   : > { %7558 = vmatmul.msk.bf16.vlgmr.msrb.gmra.mxu2 %vm366_vm0, %v870_v21  ;;  %v466_v21 = vld [vmem:[#allocation2 + $0x80] sm:$0xff] }
  0x83   : > { %v8522_v23 = vpack.c.bf16 %v466_v21, %v465_v20  ;;  %v8596_v21 = vpack.c.bf16 %v857_v10, %v856_v8  ;;  %v858_v10 = vld [vmem:[#allocation2 + $0xf2] sm:$0xff] }
  0x85   : > { %10698 = vst [vmem:[#allocation16_spill] sm:$0xff] %v8596_v21 }
  0x88   : > { %7534 = vmatmul.msk.bf16.gmra.mxu1 %vm366_vm0, %v8442_v30 }
  0x8a   : > { %7540 = vmatmul.msk.bf16.gmra.mxu3 %vm366_vm0, %v8444_v33 }
  0x8c   : > { %7530 = vmatmul.msk.bf16.gmra.mxu0 %vm366_vm0, %v540_v35 }
  0x92   : > { %7559 = vmatmul.msk.bf16.gmra.mxu2 %vm366_vm0, %v8451_v38 }
  0x98   : > { %7542 = vmatmul.msk.bf16.vlgmr.msrb.gmra.mxu1 %vm366_vm0, %v487_v44 }
  0x9a   : > { %7541 = vmatmul.msk.bf16.gmra.mxu3 %vm366_vm0, %v8455_v45 }
  0x9c   : > { %7590 = vmatmul.msk.bf16.vlgmr.msrb.gmra.mxu0 %vm366_vm0, %v8361_v34  ;;  %v459_v34 = vld [vmem:[#allocation2 + $0x30] sm:$0xff] }
  0x9d   : > { %v8474_v59 = vpack.c.bf16 %v460_v58, %v459_v34  ;;  %v8572_v34 = vpack.c.bf16 %v855_v50, %v854_v49  ;;  %v469_v58 = vld [vmem:[#allocation2 + $0xa8] sm:$0xff] }
  0x9f   : > { %10695 = vst [vmem:[#allocation13_spill] sm:$0xff] %v8572_v34 }
  0xa0   : > { %v8487_v1 = vpop.f32.mrf.mxu0 }
  0xa2   : > { %7560 = vmatmul.msk.bf16.gmra.mxu2 %vm366_vm0, %v8462_v48 }
  0xa8   : > { %7543 = vmatmul.msk.bf16.gmra.mxu1 %vm366_vm0, %v488_v51  ;;  %v8496_v7 = vpop.f32.mrf.mxu0 }
  0xaa   : > { %7574 = vmatmul.msk.bf16.vlgmr.msrb.gmra.mxu3 %vm366_vm0, %v488_v51 }
  0xac   : > { %7591 = vmatmul.msk.bf16.gmra.mxu0 %vm366_vm0, %v8398_v56  ;;  %v8481_v56 = vpack.c.bf16 %v847_v61, %v846_v60  ;;  %v470_v60 = vld [vmem:[#allocation2 + $0xb0] sm:$0xff] }
  0xad   : > { %v8578_v62 = vpack.c.bf16 %v470_v60, %v469_v58 }
  0xb2   : > { %7561 = vmatmul.msk.bf16.gmra.mxu2 %vm366_vm0, %v8470_v57 }
  0xb8   : > { %7544 = vmatmul.msk.bf16.gmra.mxu1 %vm366_vm0, %v8474_v59 }
  0xba   : > { %7575 = vmatmul.msk.bf16.gmra.mxu3 %vm366_vm0, %v8474_v59 }
  0xbc   : > { %7592 = vmatmul.msk.bf16.gmra.mxu0 %vm366_vm0, %v539_v13 }
  0xc2   : > { %7562 = vmatmul.msk.bf16.gmra.mxu2 %vm366_vm0, %v8481_v56 }
  0xc8   : > { %7545 = vmatmul.msk.bf16.gmra.mxu1 %vm366_vm0, %v8485_v0 }
  0xca   : > { %7576 = vmatmul.msk.bf16.gmra.mxu3 %vm366_vm0, %v8485_v0 }
  0xcc   : > { %7593 = vmatmul.msk.bf16.gmra.mxu0 %vm366_vm0, %v540_v35 }
  0xd2   : > { %7563 = vmatmul.msk.bf16.gmra.mxu2 %vm366_vm0, %v8494_v6 }
  0xd5   : > { %v8502_v13 = vpop.f32.mrf.mxu1 }
  0xd8   : > { %7546 = vmatmul.msk.bf16.gmra.mxu1 %vm366_vm0, %v8500_v11 }
  0xd9   : > { %v8506_v14 = vpop.f32.mrf.mxu0 }
  0xda   : > { %7577 = vmatmul.msk.bf16.gmra.mxu3 %vm366_vm0, %v8500_v11 }
  0xdc   : > { %7594 = vmatmul.msk.bf16.gmra.mxu0 %vm366_vm0, %v8345_v24 }
  0xdd   : > { %v8512_v17 = vpop.f32.mrf.mxu3  ;;  %v8514_v18 = vpop.f32.mrf.mxu1 }
  0xe1   : > { %v8518_v22 = vpop.f32.mrf.mxu0 }
  0xe2   : > { %7564 = vmatmul.msk.bf16.gmra.mxu2 %vm366_vm0, %v8516_v19 }
  0xe5   : > { %v8524_v25 = vpop.f32.mrf.mxu3  ;;  %v8526_v26 = vpop.f32.mrf.mxu1 }
  0xe6   : > { %v8528_v24 = vpop.f32.mrf.mxu2 }
  0xe8   : > { %7547 = vmatmul.msk.bf16.gmra.mxu1 %vm366_vm0, %v8522_v23 }
  0xe9   : > { %v8532_v27 = vpop.f32.mrf.mxu0 }
  0xea   : > { %7578 = vmatmul.msk.bf16.gmra.mxu3 %vm366_vm0, %v8522_v23 }
  0xec   : > { %7595 = vmatmul.msk.bf16.gmra.mxu0 %vm366_vm0, %v8389_v52 }
  0xed   : > { %v8538_v32 = vpop.f32.mrf.mxu3  ;;  %v8540_v35 = vpop.f32.mrf.mxu1 }
  0xee   : > { %v8542_v36 = vpop.f32.mrf.mxu2 }
  0xf1   : > { %v8546_v41 = vpop.f32.mrf.mxu0 }
  0xf2   : > { %7565 = vmatmul.msk.bf16.gmra.mxu2 %vm366_vm0, %v8544_v37 }
  0xf5   : > { %v8552_v44 = vpop.f32.mrf.mxu3  ;;  %v8554_v52 = vpop.f32.mrf.mxu1 }
  0xf6   : > { %10693 = vst [vmem:[#allocation11_spill] sm:$0xff] %v8552_v44  ;;  %v8556_v46 = vpop.f32.mrf.mxu2 }
  0xf8   : > { %7548 = vmatmul.msk.bf16.gmra.mxu1 %vm366_vm0, %v8550_v42 }
  0xf9   : > { %v8560_v47 = vpop.f32.mrf.mxu0 }
  0xfa   : > { %7579 = vmatmul.msk.bf16.gmra.mxu3 %vm366_vm0, %v8550_v42 }
  0xfc   : > { %7596 = vmatmul.msk.bf16.gmra.mxu0 %vm366_vm0, %v8424_v9 }
  0xfd   : > { %v8566_v51 = vpop.f32.mrf.mxu3  ;;  %v8568_v53 = vpop.f32.mrf.mxu1 }
  0xfe   : > { %10694 = vst [vmem:[#allocation12_spill] sm:$0xff] %v8566_v51  ;;  %v8570_v54 = vpop.f32.mrf.mxu2 }
 0x101   : > { %v8574_v61 = vpop.f32.mrf.mxu0 }
 0x102   : > { %7566 = vmatmul.msk.bf16.gmra.mxu2 %vm366_vm0, %v8572_v34 }
 0x105   : > { %v8580_v63 = vpop.f32.mrf.mxu3  ;;  %v8582_v9 = vpop.f32.mrf.mxu1 }
 0x106   : > { %10696 = vst [vmem:[#allocation14_spill] sm:$0xff] %v8580_v63  ;;  %v947_v2 = vpop.f32.mrf.mxu2 }
 0x108   : > { %7549 = vmatmul.msk.bf16.gmra.mxu1 %vm366_vm0, %v8578_v62 }
 0x109   : > { %v8586_v5 = vpop.f32.mrf.mxu0 }
 0x10a   : > { %7580 = vmatmul.msk.bf16.gmra.mxu3 %vm366_vm0, %v8578_v62 }
 0x10c   : > { %7597 = vmatmul.msk.bf16.gmra.mxu0 %vm366_vm0, %v8442_v30 }
 0x10d   : > { %v8592_v15 = vpop.f32.mrf.mxu3  ;;  %v8594_v16 = vpop.f32.mrf.mxu1 }
 0x10e   : > { %10697 = vst [vmem:[#allocation15_spill] sm:$0xff] %v8592_v15  ;;  %v949_v20 = vpop.f32.mrf.mxu2 }
 0x111   : > { %v8598_v39 = vpop.f32.mrf.mxu0 }
 0x112   : > { %7567 = vmatmul.msk.bf16.gmra.mxu2 %vm366_vm0, %v8596_v21 }
 0x115   : > { %v8604_v49 = vpop.f32.mrf.mxu3  ;;  %v758_v50 = vpop.f32.mrf.mxu1 }
 0x116   : > { %10700 = vst [vmem:[#allocation18_spill] sm:$0xff] %v8604_v49  ;;  %v759_v30 = vadd.f32 %v758_v50, %v8487_v1  ;;  %v952_v58 = vpop.f32.mrf.mxu2  ;;  %v8616_v50 = vpack.c.bf16 %v859_v3, %v858_v10  ;;  %v474_v49 = vld [vmem:[#allocation2 + $0xe0] sm:$0xff] }
 0x118   : > { %v1027_v60 = vadd.f32 %v947_v2, %v759_v30  ;;  %7550 = vmatmul.msk.bf16.gmra.mxu1 %vm366_vm0, %v8602_v40  ;;  %10702 = vst [vmem:[#allocation20_spill] sm:$0xff] %v8616_v50  ;;  %v473_v30 = vld [vmem:[#allocation2 + $0xd8] sm:$0xff] }
 0x119   : > { %v1393_v8 = vpop.f32.mrf.mxu0  ;;  %v8620_v15 = vpack.c.bf16 %v474_v49, %v473_v30 }
 0x11a   : > { %7581 = vmatmul.msk.bf16.gmra.mxu3 %vm366_vm0, %v8602_v40 }
 0x11b   : > { %10703 = vst [vmem:[#allocation21_spill] sm:$0xff] %v8620_v15 }
 0x11c   : > { %7598 = vmatmul.msk.bf16.gmra.mxu0 %vm366_vm0, %v8377_v43 }
 0x11d   : > { %v8613_v28 = vpop.f32.mrf.mxu3  ;;  %v760_v31 = vpop.f32.mrf.mxu1 }
 0x11e   : > { %10701 = vst [vmem:[#allocation19_spill] sm:$0xff] %v8613_v28  ;;  %v761_v21 = vadd.f32 %v760_v31, %v8496_v7  ;;  %v954_v1 = vpop.f32.mrf.mxu2  ;;  %v860_v7 = vld [vmem:[#allocation2 + $0x10a] sm:$0xff] }
 0x120   : > { %v1028_v2 = vadd.f32 %v949_v20, %v761_v21  ;;  %v861_v20 = vld [vmem:[#allocation2 + $0x112] sm:$0xff] }
 0x121   : > { %v1395_v34 = vpop.f32.mrf.mxu0  ;;  %v881_v30 = vpack.c.bf16 %v861_v20, %v860_v7  ;;  %v863_v7 = vld [vmem:[#allocation2 + $0x12a] sm:$0xff] }
 0x122   : > { %7568 = vmatmul.msk.bf16.gmra.mxu2 %vm366_vm0, %v8616_v50  ;;  %v476_v50 = vld [vmem:[#allocation2 + $0xf8] sm:$0xff] }
 0x125   : > { %v8622_v63 = vpop.f32.mrf.mxu3  ;;  %v763_v43 = vpop.f32.mrf.mxu1 }
 0x126   : > { %10704 = vst [vmem:[#allocation22_spill] sm:$0xff] %v8622_v63  ;;  %v764_v28 = vadd.f32 %v763_v43, %v8506_v14  ;;  %v957_v37 = vpop.f32.mrf.mxu2  ;;  %v475_v43 = vld [vmem:[#allocation2 + $0xf0] sm:$0xff] }
 0x128   : > { %v1029_v51 = vadd.f32 %v952_v58, %v764_v28  ;;  %7551 = vmatmul.msk.bf16.gmra.mxu1 %vm366_vm0, %v8620_v15 }
 0x129   : > { %v1398_v3 = vpop.f32.mrf.mxu0 }
 0x12a   : > { %7582 = vmatmul.msk.bf16.gmra.mxu3 %vm366_vm0, %v8620_v15  ;;  %v8635_v15 = vpack.c.bf16 %v476_v50, %v475_v43 }
 0x12c   : > { %7599 = vmatmul.msk.bf16.gmra.mxu0 %vm366_vm0, %v8417_v4 }
 0x12d   : > { %v1172_v21 = vpop.f32.mrf.mxu3  ;;  %v765_v49 = vpop.f32.mrf.mxu1 }
 0x12e   : > { %v1252_v10 = vadd.f32 %v1172_v21, %v1027_v60  ;;  %v766_v31 = vadd.f32 %v765_v49, %v8518_v22  ;;  %v959_v14 = vpop.f32.mrf.mxu2  ;;  %v478_v49 = vld [vmem:[#allocation2 + $0x110] sm:$0xff] }
 0x130   : > { %v1030_v58 = vadd.f32 %v954_v1, %v766_v31  ;;  %v8632_v28 = vadd.f32 %v1393_v8, %v1252_v10  ;;  %v862_v1 = vld [vmem:[#allocation2 + $0x122] sm:$0xff] }
 0x131   : > { %v1400_v63 = vpop.f32.mrf.mxu0 }
 0x132   : > { %7569 = vmatmul.msk.bf16.gmra.mxu2 %vm366_vm0, %v881_v30 }
 0x135   : > { %v1174_v40 = vpop.f32.mrf.mxu3  ;;  %v768_v44 = vpop.f32.mrf.mxu1 }
 0x136   : > { %v1253_v4 = vadd.f32 %v1174_v40, %v1028_v2  ;;  %v769_v19 = vadd.f32 %v768_v44, %v8532_v27  ;;  %v962_v60 = vpop.f32.mrf.mxu2 }
 0x138   : > { %v1031_v21 = vadd.f32 %v957_v37, %v769_v19  ;;  %7552 = vmatmul.msk.bf16.gmra.mxu1 %vm366_vm0, %v8635_v15  ;;  %v8640_v22 = vadd.f32 %v1395_v34, %v1253_v4  ;;  %v882_v37 = vpack.c.bf16 %v863_v7, %v862_v1  ;;  %v477_v34 = vld [vmem:[#allocation2 + $0x108] sm:$0xff] }
 0x139   : > { %v1403_v8 = vpop.f32.mrf.mxu0  ;;  %v8650_v31 = vpack.c.bf16 %v478_v49, %v477_v34 }
 0x13a   : > { %7583 = vmatmul.msk.bf16.gmra.mxu3 %vm366_vm0, %v8635_v15 }
 0x13c   : > { %7600 = vmatmul.msk.bf16.gmra.mxu0 %vm366_vm0, %v8353_v29 }
 0x13d   : > { %v1177_v50 = vpop.f32.mrf.mxu3  ;;  %v770_v40 = vpop.f32.mrf.mxu1 }
 0x13e   : > { %v1254_v2 = vadd.f32 %v1177_v50, %v1029_v51  ;;  %v771_v27 = vadd.f32 %v770_v40, %v8546_v41  ;;  %v964_v19 = vpop.f32.mrf.mxu2  ;;  %v1779_v41 = vld [vmem:[%s10667_s1 + $0xc] sm:$0x3] }
 0x13f   : > { %v1829_v1 = vsel %vm605_vm2, %v1779_v41, 0  ;;  %v2225_v41 = vld [vmem:[%s10667_s1 + $0x10] sm:$0x3] }
 0x140   : > { %v1032_v44 = vadd.f32 %v959_v14, %v771_v27  ;;  %v8647_v20 = vadd.f32 %v1398_v3, %v1254_v2  ;;  %1838 = vmatpush.bf16.msra.mxu2 %v1829_v1  ;;  %v479_v1 = vld [vmem:[#allocation2 + $0x120] sm:$0xff] }
 0x141   : > { %v1405_v10 = vpop.f32.mrf.mxu0 }
 0x142   : > { %7570 = vmatmul.msk.bf16.gmra.mxu2 %vm366_vm0, %v882_v37 }
 0x145   : > { %v1179_v30 = vpop.f32.mrf.mxu3  ;;  %v773_v43 = vpop.f32.mrf.mxu1 }
 0x146   : > { %v1255_v29 = vadd.f32 %v1179_v30, %v1030_v58  ;;  %v774_v4 = vadd.f32 %v773_v43, %v8560_v47  ;;  %v967_v51 = vpop.f32.mrf.mxu2  ;;  %v2000_v47 = vld [vmem:[%s10667_s1 + $0xc] sm:$0xc]  ;;  %v864_v58 = vld [vmem:[#allocation2 + $0x13a] sm:$0xff]  ;;  %v1553_v30 = vld [vmem:[%s10667_s1 + $0x8] sm:$0xc] }
 0x147   : > { %v2002_v7 = vunpack.c.l.b16 %v2000_v47  ;;  %v480_v47 = vld [vmem:[#allocation2 + $0x128] sm:$0xff] }
 0x148   : > { %v1033_v50 = vadd.f32 %v962_v60, %v774_v4  ;;  %7553 = vmatmul.msk.bf16.gmra.mxu1 %vm366_vm0, %v8650_v31  ;;  %v8658_v3 = vadd.f32 %v1400_v63, %v1255_v29  ;;  %v865_v60 = vld [vmem:[#allocation2 + $0x142] sm:$0xff]  ;;  %v1555_v29 = vunpack.c.l.b16 %v1553_v30 }
 0x149   : > { %v1408_v14 = vpop.f32.mrf.mxu0  ;;  %v2003_v2 = vpack.c.b16 %v2002_v7, %v2002_v7  ;;  %v883_v49 = vpack.c.bf16 %v865_v60, %v864_v58  ;;  %v2275_v58 = vsel %vm605_vm2, %v2225_v41, 0  ;;  %v867_v41 = vld [vmem:[#allocation2 + $0x15a] sm:$0xff] }
 0x14a   : > { %7584 = vmatmul.msk.bf16.gmra.mxu3 %vm366_vm0, %v8650_v31  ;;  %v1556_v7 = vpack.c.b16 %v1555_v29, %v1555_v29  ;;  %2284 = vmatpush.bf16.msra.mxu0 %v2275_v58  ;;  %v866_v29 = vld [vmem:[#allocation2 + $0x152] sm:$0xff] }
 0x14b   : > { %v2004_v43 = vrot.slane %v2003_v2, 2 }
 0x14c   : > { %7601 = vmatmul.msk.bf16.gmra.mxu0 %vm366_vm0, %v8393_v55  ;;  %v1557_v60 = vrot.slane %v1556_v7, 2 }
 0x14d   : > { %v1182_v40 = vpop.f32.mrf.mxu3  ;;  %v775_v63 = vpop.f32.mrf.mxu1 }
 0x14e   : > { %v1256_v27 = vadd.f32 %v1182_v40, %v1031_v21  ;;  %v776_v37 = vadd.f32 %v775_v63, %v8574_v61  ;;  %v969_v34 = vpop.f32.mrf.mxu2  ;;  %v2054_v61 = vsel %vm605_vm2, %v2004_v43, 0 }
 0x14f   : > { %2063 = vmatpush.bf16.msra.mxu3 %v2054_v61  ;;  %v884_v61 = vpack.c.bf16 %v867_v41, %v866_v29  ;;  %v868_v29 = vld [vmem:[#allocation2 + $0x16a] sm:$0xff]  ;;  %v869_v41 = vld [vmem:[#allocation2 + $0x172] sm:$0xff] }
 0x150   : > { %v1034_v4 = vadd.f32 %v964_v19, %v776_v37  ;;  %v8675_v55 = vadd.f32 %v1403_v8, %v1256_v27  ;;  %v8680_v19 = vpack.c.bf16 %v480_v47, %v479_v1  ;;  %v1607_v8 = vsel %vm605_vm2, %v1557_v60, 0  ;;  %v482_v60 = vld [vmem:[#allocation2 + $0x140] sm:$0xff] }
 0x151   : > { %v1410_v21 = vpop.f32.mrf.mxu0  ;;  %1616 = vmatpush.bf16.msra.mxu1 %v1607_v8 }
 0x152   : > { %7571 = vmatmul.msk.bf16.gmra.mxu2 %vm366_vm0, %v883_v49 }
 0x155   : > { %v1184_v40 = vpop.f32.mrf.mxu3  ;;  %v778_v63 = vpop.f32.mrf.mxu1 }
 0x156   : > { %v1257_v2 = vadd.f32 %v1184_v40, %v1032_v44  ;;  %v779_v27 = vadd.f32 %v778_v63, %v8586_v5  ;;  %v972_v37 = vpop.f32.mrf.mxu2 }
 0x158   : > { %v1035_v30 = vadd.f32 %v967_v51, %v779_v27  ;;  %7554 = vmatmul.msk.bf16.gmra.mxu1 %vm366_vm0, %v8680_v19  ;;  %v8686_v43 = vadd.f32 %v1405_v10, %v1257_v2  ;;  %v481_v10 = vld [vmem:[#allocation2 + $0x138] sm:$0xff] }
 0x159   : > { %v1413_v49 = vpop.f32.mrf.mxu0  ;;  %v500_v63 = vpack.c.bf16 %v482_v60, %v481_v10  ;;  %v483_v60 = vld [vmem:[#allocation2 + $0x150] sm:$0xff] }
 0x15a   : > { %7585 = vmatmul.msk.bf16.gmra.mxu3 %vm366_vm0, %v8680_v19 }
 0x15c   : > { %7602 = vmatmul.msk.bf16.gmra.mxu0 %vm366_vm0, %v8426_v12 }
 0x15d   : > { %v1187_v44 = vpop.f32.mrf.mxu3  ;;  %v780_v1 = vpop.f32.mrf.mxu1 }
 0x15e   : > { %v1258_v5 = vadd.f32 %v1187_v44, %v1033_v50  ;;  %v781_v47 = vadd.f32 %v780_v1, %v8598_v39  ;;  %v974_v51 = vpop.f32.mrf.mxu2 }
 0x160   : > { %v1036_v7 = vadd.f32 %v969_v34, %v781_v47  ;;  %v8693_v58 = vadd.f32 %v1408_v14, %v1258_v5  ;;  %v885_v47 = vpack.c.bf16 %v869_v41, %v868_v29 }
 0x161   : > { %v1415_v40 = vpop.f32.mrf.mxu0 }
 0x162   : > { %7572 = vmatmul.msk.bf16.gmra.mxu2 %vm366_vm0, %v884_v61  ;;  %v365_v61 = vld [vmem:[%s8312_s28 + $0xf8] sm:$0xff] }
 0x163   : > { %454 = vst.msk [vmem:[#allocation2 + $0x189] sm:$0xff] %vm366_vm0, %v365_v61 }
 0x165   : > { %v1189_v8 = vpop.f32.mrf.mxu3  ;;  %v783_v2 = vpop.f32.mrf.mxu1 }
 0x166   : > { %v1259_v27 = vadd.f32 %v1189_v8, %v1034_v4  ;;  %v784_v12 = vadd.f32 %v783_v2, %v8502_v13  ;;  %v977_v50 = vpop.f32.mrf.mxu2 }
 0x168   : > { %v1037_v39 = vadd.f32 %v972_v37, %v784_v12  ;;  %7555 = vmatmul.msk.bf16.gmra.mxu1 %vm366_vm0, %v500_v63  ;;  %v8698_v34 = vadd.f32 %v1410_v21, %v1259_v27  ;;  %v364_v37 = vld [vmem:[%s8312_s28 + $0xf0] sm:$0xff]  ;;  %s7457_s28 = sshll.u32 %s327_s15, 4  ;;  %s7458_s28 = int_to_ptr.vmem [resolvable:$true] %s7457_s28 }
 0x169   : > { %v1418_v14 = vpop.f32.mrf.mxu0  ;;  %453 = vst.msk [vmem:[#allocation2 + $0x181] sm:$0xff] %vm366_vm0, %v364_v37 }
 0x16a   : > { %7586 = vmatmul.msk.bf16.gmra.mxu3 %vm366_vm0, %v500_v63  ;;  %v484_v63 = vld [vmem:[#allocation2 + $0x158] sm:$0xff] }
 0x16c   : > { %7603 = vmatmul.msk.bf16.gmra.mxu0 %vm366_vm0, %v8444_v33  ;;  %v501_v33 = vpack.c.bf16 %v484_v63, %v483_v60 }
 0x16d   : > { %v1192_v44 = vpop.f32.mrf.mxu3  ;;  %v785_v4 = vpop.f32.mrf.mxu1 }
 0x16e   : > { %v1260_v1 = vadd.f32 %v1192_v44, %v1035_v30  ;;  %v786_v13 = vadd.f32 %v785_v4, %v8514_v18  ;;  %v979_v5 = vpop.f32.mrf.mxu2 }
 0x170   : > { %v1038_v10 = vadd.f32 %v974_v51, %v786_v13  ;;  %v8707_v21 = vadd.f32 %v1413_v49, %v1260_v1  ;;  %v1314_v63 = vld [vmem:[#allocation2 + $0x181] sm:$0xff] }
 0x171   : > { %v1420_v8 = vpop.f32.mrf.mxu0 }
 0x172   : > { %7573 = vmatmul.msk.bf16.gmra.mxu2 %vm366_vm0, %v885_v47  ;;  %v486_v47 = vld [vmem:[#allocation2 + $0x170] sm:$0xff] }
 0x175   : > { %v1194_v30 = vpop.f32.mrf.mxu3  ;;  %v788_v2 = vpop.f32.mrf.mxu1 }
 0x176   : > { %v1261_v18 = vadd.f32 %v1194_v30, %v1036_v7  ;;  %v789_v27 = vadd.f32 %v788_v2, %v8526_v26  ;;  %v982_v12 = vpop.f32.mrf.mxu2 }
 0x178   : > { %v1039_v29 = vadd.f32 %v977_v50, %v789_v27  ;;  %7556 = vmatmul.msk.bf16.gmra.mxu1 %vm366_vm0, %v501_v33  ;;  %v8713_v51 = vadd.f32 %v1415_v40, %v1261_v18  ;;  %v485_v50 = vld [vmem:[#allocation2 + $0x168] sm:$0xff] }
 0x179   : > { %v1423_v49 = vpop.f32.mrf.mxu0  ;;  %v502_v40 = vpack.c.bf16 %v486_v47, %v485_v50 }
 0x17a   : > { %7587 = vmatmul.msk.bf16.gmra.mxu3 %vm366_vm0, %v501_v33 }
 0x17c   : > { %7604 = vmatmul.msk.bf16.gmra.mxu0 %vm366_vm0, %v8455_v45  ;;  %v1315_v45 = vld [vmem:[#allocation2 + $0x189] sm:$0xff] }
 0x17d   : > { %v1197_v41 = vpop.f32.mrf.mxu3  ;;  %v790_v44 = vpop.f32.mrf.mxu1 }
 0x17e   : > { %v1262_v4 = vadd.f32 %v1197_v41, %v1037_v39  ;;  %v791_v1 = vadd.f32 %v790_v44, %v8540_v35  ;;  %v984_v7 = vpop.f32.mrf.mxu2 }
 0x180   : > { %v1040_v13 = vadd.f32 %v979_v5, %v791_v1  ;;  %v8719_v26 = vadd.f32 %v1418_v14, %v1262_v4  ;;  %v1331_v14 = vpack.c.bf16 %v1315_v45, %v1314_v63  ;;  %v1090_v4 = vld [vmem:[#allocation2 + $0x188] sm:$0xff] }
 0x181   : > { %v1425_v37 = vpop.f32.mrf.mxu0 }
 0x182   : > { %7622 = vmatmul.msk.bf16.vlgmr.msra.gmra.mxu2 %vm366_vm0, %v8474_v59 }
 0x185   : > { %v1199_v61 = vpop.f32.mrf.mxu3  ;;  %v793_v60 = vpop.f32.mrf.mxu1 }
 0x186   : > { %v1263_v33 = vadd.f32 %v1199_v61, %v1038_v10  ;;  %v794_v39 = vadd.f32 %v793_v60, %v8554_v52  ;;  %v987_v30 = vpop.f32.mrf.mxu2 }
 0x188   : > { %v1041_v35 = vadd.f32 %v982_v12, %v794_v39  ;;  %7557 = vmatmul.msk.bf16.gmra.mxu1 %vm366_vm0, %v502_v40  ;;  %v8725_v5 = vadd.f32 %v1420_v8, %v1263_v33  ;;  %v1089_v8 = vld [vmem:[#allocation2 + $0x180] sm:$0xff] }
 0x189   : > { %v1428_v2 = vpop.f32.mrf.mxu0  ;;  %v1106_v61 = vpack.c.bf16 %v1090_v4, %v1089_v8 }
 0x18a   : > { %7588 = vmatmul.msk.bf16.gmra.mxu3 %vm366_vm0, %v502_v40 }
 0x18c   : > { %7605 = vmatmul.msk.bf16.gmra.mxu0 %vm366_vm0, %v1331_v14 }
 0x18d   : > { %v1202_v59 = vpop.f32.mrf.mxu3  ;;  %v795_v18 = vpop.f32.mrf.mxu1 }
 0x18e   : > { %v1264_v27 = vadd.f32 %v1202_v59, %v1039_v29  ;;  %v796_v41 = vadd.f32 %v795_v18, %v8568_v53  ;;  %v989_v10 = vpop.f32.mrf.mxu2 }
 0x190   : > { %v1042_v44 = vadd.f32 %v984_v7, %v796_v41  ;;  %v8730_v52 = vadd.f32 %v1423_v49, %v1264_v27 }
 0x191   : > { %v1430_v12 = vpop.f32.mrf.mxu0 }
 0x192   : > { %7623 = vmatmul.msk.bf16.gmra.mxu2 %vm366_vm0, %v8485_v0 }
 0x195   : > { %v1204_v1 = vpop.f32.mrf.mxu3  ;;  %v798_v50 = vpop.f32.mrf.mxu1 }
 0x196   : > { %v1265_v47 = vadd.f32 %v1204_v1, %v1040_v13  ;;  %v799_v40 = vadd.f32 %v798_v50, %v8582_v9  ;;  %v992_v60 = vpop.f32.mrf.mxu2 }
 0x198   : > { %v1043_v29 = vadd.f32 %v987_v30, %v799_v40  ;;  %7606 = vmatmul.msk.bf16.vlgmr.msra.gmra.mxu1 %vm366_vm0, %v8451_v38  ;;  %v8737_v53 = vadd.f32 %v1425_v37, %v1265_v47  ;;  %v1952_v38 = vld [vmem:[#allocation2 + $0x31] sm:$0xff]  ;;  %v1953_v37 = vld [vmem:[#allocation2 + $0x39] sm:$0xff] }
 0x199   : > { %v1433_v49 = vpop.f32.mrf.mxu0  ;;  %v1984_v27 = vpack.c.bf16 %v1953_v37, %v1952_v38 }
 0x19a   : > { %7589 = vmatmul.msk.bf16.gmra.mxu3 %vm366_vm0, %v1106_v61 }
 0x19c   : > { %7654 = vmatmul.msk.bf16.vlgmr.msra.gmra.mxu0 %vm366_vm0, %v8462_v48 }
 0x19d   : > { %v1207_v0 = vpop.f32.mrf.mxu3  ;;  %v800_v7 = vpop.f32.mrf.mxu1 }
 0x19e   : > { %v1266_v63 = vadd.f32 %v1207_v0, %v1041_v35  ;;  %v801_v13 = vadd.f32 %v800_v7, %v8594_v16  ;;  %v994_v9 = vpop.f32.mrf.mxu2 }
 0x1a0   : > { %v1044_v45 = vadd.f32 %v989_v10, %v801_v13  ;;  %v8743_v33 = vadd.f32 %v1428_v2, %v1266_v63 }
 0x1a1   : > { %v1435_v39 = vpop.f32.mrf.mxu0 }
 0x1a2   : > { %7624 = vmatmul.msk.bf16.gmra.mxu2 %vm366_vm0, %v8500_v11 }
 0x1a5   : > { %v1209_v30 = vpop.f32.mrf.mxu3  ;;  %v803_v14 = vpop.f32.mrf.mxu1 }
 0x1a6   : > { %v1267_v59 = vadd.f32 %v1209_v30, %v1042_v44  ;;  %v804_v18 = vadd.f32 %v803_v14, %v8528_v24  ;;  %v997_v41 = vpop.f32.mrf.mxu2 }
 0x1a8   : > { %v1045_v35 = vadd.f32 %v992_v60, %v804_v18  ;;  %7607 = vmatmul.msk.bf16.gmra.mxu1 %vm366_vm0, %v8462_v48  ;;  %v8750_v16 = vadd.f32 %v1430_v12, %v1267_v59  ;;  %v1954_v48 = vld [vmem:[#allocation2 + $0x49] sm:$0xff]  ;;  %v1955_v12 = vld [vmem:[#allocation2 + $0x51] sm:$0xff] }
 0x1a9   : > { %v1438_v2 = vpop.f32.mrf.mxu0  ;;  %v1985_v0 = vpack.c.bf16 %v1955_v12, %v1954_v48 }
 0x1aa   : > { %7638 = vmatmul.msk.bf16.vlgmr.msra.gmra.mxu3 %vm366_vm0, %v1984_v27 }
 0x1ac   : > { %7655 = vmatmul.msk.bf16.gmra.mxu0 %vm366_vm0, %v8470_v57 }
 0x1ad   : > { %v1212_v11 = vpop.f32.mrf.mxu3  ;;  %v805_v10 = vpop.f32.mrf.mxu1 }
 0x1ae   : > { %v1268_v8 = vadd.f32 %v1212_v11, %v1043_v29  ;;  %v806_v44 = vadd.f32 %v805_v10, %v8542_v36  ;;  %v999_v24 = vpop.f32.mrf.mxu2 }
 0x1b0   : > { %v1046_v4 = vadd.f32 %v994_v9, %v806_v44  ;;  %v8756_v1 = vadd.f32 %v1433_v49, %v1268_v8 }
 0x1b1   : > { %v1440_v50 = vpop.f32.mrf.mxu0 }
 0x1b2   : > { %7625 = vmatmul.msk.bf16.gmra.mxu2 %vm366_vm0, %v8522_v23 }
 0x1b5   : > { %v1214_v47 = vpop.f32.mrf.mxu3  ;;  %v808_v40 = vpop.f32.mrf.mxu1 }
 0x1b6   : > { %v1269_v61 = vadd.f32 %v1214_v47, %v1044_v45  ;;  %v809_v60 = vadd.f32 %v808_v40, %v8556_v46  ;;  %v1002_v7 = vpop.f32.mrf.mxu2 }
 0x1b8   : > { %v1047_v29 = vadd.f32 %v997_v41, %v809_v60  ;;  %7608 = vmatmul.msk.bf16.gmra.mxu1 %vm366_vm0, %v8470_v57  ;;  %v8763_v36 = vadd.f32 %v1435_v39, %v1269_v61  ;;  %v1956_v57 = vld [vmem:[#allocation2 + $0x61] sm:$0xff]  ;;  %v1957_v39 = vld [vmem:[#allocation2 + $0x69] sm:$0xff] }
 0x1b9   : > { %v1443_v49 = vpop.f32.mrf.mxu0  ;;  %v1986_v27 = vpack.c.bf16 %v1957_v39, %v1956_v57  ;;  %v10707_v57 = vld [vmem:[#allocation17_spill] sm:$0xff] }
 0x1ba   : > { %7639 = vmatmul.msk.bf16.gmra.mxu3 %vm366_vm0, %v1985_v0 }
 0x1bc   : > { %7656 = vmatmul.msk.bf16.gmra.mxu0 %vm366_vm0, %v8481_v56 }
 0x1bd   : > { %v1217_v23 = vpop.f32.mrf.mxu3  ;;  %v810_v63 = vpop.f32.mrf.mxu1 }
 0x1be   : > { %v1270_v13 = vadd.f32 %v1217_v23, %v1045_v35  ;;  %v811_v9 = vadd.f32 %v810_v63, %v8570_v54  ;;  %v1004_v46 = vpop.f32.mrf.mxu2  ;;  %v10706_v63 = vld [vmem:[#allocation11_spill] sm:$0xff] }
 0x1c0   : > { %v1048_v45 = vadd.f32 %v999_v24, %v811_v9  ;;  %v8769_v38 = vadd.f32 %v1438_v2, %v1270_v13 }
 0x1c1   : > { %v1445_v37 = vpop.f32.mrf.mxu0 }
 0x1c2   : > { %7626 = vmatmul.msk.bf16.gmra.mxu2 %vm366_vm0, %v8550_v42 }
 0x1c5   : > { %v1219_v30 = vpop.f32.mrf.mxu3  ;;  %v813_v14 = vpop.f32.mrf.mxu1 }
 0x1c6   : > { %v1271_v59 = vadd.f32 %v1219_v30, %v1046_v4  ;;  %v814_v18 = vadd.f32 %v813_v14, %v8512_v17  ;;  %v1007_v41 = vpop.f32.mrf.mxu2 }
 0x1c8   : > { %v1049_v35 = vadd.f32 %v1002_v7, %v814_v18  ;;  %7609 = vmatmul.msk.bf16.gmra.mxu1 %vm366_vm0, %v8481_v56  ;;  %v8776_v54 = vadd.f32 %v1440_v50, %v1271_v59  ;;  %v1958_v56 = vld [vmem:[#allocation2 + $0x79] sm:$0xff]  ;;  %v1959_v50 = vld [vmem:[#allocation2 + $0x81] sm:$0xff]  ;;  %v10708_v59 = vld [vmem:[#allocation12_spill] sm:$0xff] }
 0x1c9   : > { %v1448_v2 = vpop.f32.mrf.mxu0  ;;  %v1987_v61 = vpack.c.bf16 %v1959_v50, %v1958_v56 }
 0x1ca   : > { %7640 = vmatmul.msk.bf16.gmra.mxu3 %vm366_vm0, %v1986_v27 }
 0x1cc   : > { %7657 = vmatmul.msk.bf16.gmra.mxu0 %vm366_vm0, %v8494_v6 }
 0x1cd   : > { %v1222_v42 = vpop.f32.mrf.mxu3  ;;  %v815_v11 = vpop.f32.mrf.mxu1 }
 0x1ce   : > { %v1272_v10 = vadd.f32 %v1222_v42, %v1047_v29  ;;  %v816_v8 = vadd.f32 %v815_v11, %v8524_v25  ;;  %v1009_v17 = vpop.f32.mrf.mxu2  ;;  %v10705_v29 = vld [vmem:[#allocation9_spill] sm:$0xff]  ;;  %v10709_v11 = vld [vmem:[#allocation10_spill] sm:$0xff] }
 0x1d0   : > { %v1050_v44 = vadd.f32 %v1004_v46, %v816_v8  ;;  %v8782_v24 = vadd.f32 %v1443_v49, %v1272_v10 }
 0x1d1   : > { %v1450_v4 = vpop.f32.mrf.mxu0 }
 0x1d2   : > { %7627 = vmatmul.msk.bf16.gmra.mxu2 %vm366_vm0, %v8578_v62 }
 0x1d5   : > { %v1224_v48 = vpop.f32.mrf.mxu3  ;;  %v818_v12 = vpop.f32.mrf.mxu1 }
 0x1d6   : > { %v1273_v47 = vadd.f32 %v1224_v48, %v1048_v45  ;;  %v819_v40 = vadd.f32 %v818_v12, %v8538_v32  ;;  %v1012_v60 = vpop.f32.mrf.mxu2 }
 0x1d8   : > { %v1051_v0 = vadd.f32 %v1007_v41, %v819_v40  ;;  %7610 = vmatmul.msk.bf16.gmra.mxu1 %vm366_vm0, %v8494_v6  ;;  %v8789_v25 = vadd.f32 %v1445_v37, %v1273_v47  ;;  %v1960_v6 = vld [vmem:[#allocation2 + $0x91] sm:$0xff]  ;;  %v1961_v37 = vld [vmem:[#allocation2 + $0x99] sm:$0xff] }
 0x1d9   : > { %v1453_v7 = vpop.f32.mrf.mxu0  ;;  %v1988_v27 = vpack.c.bf16 %v1961_v37, %v1960_v6  ;;  %v10711_v40 = vld [vmem:[#allocation21_spill] sm:$0xff] }
 0x1da   : > { %7641 = vmatmul.msk.bf16.gmra.mxu3 %vm366_vm0, %v1987_v61  ;;  %v1963_v61 = vld [vmem:[#allocation2 + $0xb1] sm:$0xff] }
 0x1dc   : > { %7658 = vmatmul.msk.bf16.gmra.mxu0 %vm366_vm0, %v10705_v29 }
 0x1dd   : > { %v1227_v62 = vpop.f32.mrf.mxu3  ;;  %v820_v49 = vpop.f32.mrf.mxu1 }
 0x1de   : > { %v1274_v23 = vadd.f32 %v1227_v62, %v1049_v35  ;;  %v821_v13 = vadd.f32 %v820_v49, %v10706_v63  ;;  %v1014_v32 = vpop.f32.mrf.mxu2  ;;  %v10712_v49 = vld [vmem:[#allocation15_spill] sm:$0xff] }
 0x1e0   : > { %v1052_v9 = vadd.f32 %v1009_v17, %v821_v13  ;;  %v8795_v46 = vadd.f32 %v1448_v2, %v1274_v23 }
 0x1e1   : > { %v1455_v45 = vpop.f32.mrf.mxu0 }
 0x1e2   : > { %7628 = vmatmul.msk.bf16.gmra.mxu2 %vm366_vm0, %v10707_v57  ;;  %v10713_v57 = vld [vmem:[#allocation13_spill] sm:$0xff] }
 0x1e5   : > { %v1229_v39 = vpop.f32.mrf.mxu3  ;;  %v823_v30 = vpop.f32.mrf.mxu1 }
 0x1e6   : > { %v1275_v14 = vadd.f32 %v1229_v39, %v1050_v44  ;;  %v824_v18 = vadd.f32 %v823_v30, %v10708_v59  ;;  %v1017_v41 = vpop.f32.mrf.mxu2  ;;  %v10710_v44 = vld [vmem:[#allocation14_spill] sm:$0xff] }
 0x1e8   : > { %v1053_v35 = vadd.f32 %v1012_v60, %v824_v18  ;;  %7611 = vmatmul.msk.bf16.gmra.mxu1 %vm366_vm0, %v10705_v29  ;;  %v8802_v42 = vadd.f32 %v1450_v4, %v1275_v14  ;;  %v1962_v4 = vld [vmem:[#allocation2 + $0xa9] sm:$0xff] }
 0x1e9   : > { %v1458_v2 = vpop.f32.mrf.mxu0  ;;  %v1989_v63 = vpack.c.bf16 %v1963_v61, %v1962_v4 }
 0x1ea   : > { %7642 = vmatmul.msk.bf16.gmra.mxu3 %vm366_vm0, %v1988_v27 }
 0x1ec   : > { %7659 = vmatmul.msk.bf16.gmra.mxu0 %vm366_vm0, %v10709_v11 }
 0x1ed   : > { %v1232_v10 = vpop.f32.mrf.mxu3  ;;  %v825_v8 = vpop.f32.mrf.mxu1 }
 0x1ee   : > { %v1276_v17 = vadd.f32 %v1232_v10, %v1051_v0  ;;  %v826_v56 = vadd.f32 %v825_v8, %v10710_v44  ;;  %v1019_v50 = vpop.f32.mrf.mxu2 }
 0x1f0   : > { %v1054_v48 = vadd.f32 %v1014_v32, %v826_v56  ;;  %v8808_v12 = vadd.f32 %v1453_v7, %v1276_v17  ;;  %v10716_v17 = vld [vmem:[#allocation19_spill] sm:$0xff] }
 0x1f1   : > { %v1460_v47 = vpop.f32.mrf.mxu0 }
 0x1f2   : > { %7629 = vmatmul.msk.bf16.gmra.mxu2 %vm366_vm0, %v10711_v40  ;;  %v10717_v40 = vld [vmem:[#allocation16_spill] sm:$0xff] }
 0x1f5   : > { %v1234_v60 = vpop.f32.mrf.mxu3  ;;  %v828_v29 = vpop.f32.mrf.mxu1 }
 0x1f6   : > { %v1277_v62 = vadd.f32 %v1234_v60, %v1052_v9  ;;  %v829_v23 = vadd.f32 %v828_v29, %v10712_v49  ;;  %v1022_v13 = vpop.f32.mrf.mxu2  ;;  %v10714_v9 = vld [vmem:[#allocation18_spill] sm:$0xff] }
 0x1f7   : > { %v10718_v60 = vld [vmem:[#allocation22_spill] sm:$0xff] }
 0x1f8   : > { %v1055_v0 = vadd.f32 %v1017_v41, %v829_v23  ;;  %7612 = vmatmul.msk.bf16.gmra.mxu1 %vm366_vm0, %v10709_v11  ;;  %v8815_v32 = vadd.f32 %v1455_v45, %v1277_v62  ;;  %v1964_v45 = vld [vmem:[#allocation2 + $0xc1] sm:$0xff]  ;;  %v1965_v41 = vld [vmem:[#allocation2 + $0xc9] sm:$0xff]  ;;  %v10715_v11 = vmov 0.0  }
 0x1f9   : > { %v1463_v7 = vpop.f32.mrf.mxu0  ;;  %2471 = vst.msk [vmem:[#allocation3 + $0x18] sm:$0xff] %vm2466_vm3, %v10715_v11 }
 0x1fa   : > { %7643 = vmatmul.msk.bf16.gmra.mxu3 %vm366_vm0, %v1989_v63  ;;  %2472 = vst.msk [vmem:[#allocation3 + $0x20] sm:$0xff] %vm2466_vm3, %v10715_v11 }
 0x1fb   : > { %2467 = vst.msk [vmem:[#allocation3] sm:$0xff] %vm2466_vm3, %v10715_v11 }
 0x1fc   : > { %7660 = vmatmul.msk.bf16.gmra.mxu0 %vm366_vm0, %v10713_v57  ;;  %2468 = vst.msk [vmem:[#allocation3 + $0x8] sm:$0xff] %vm2466_vm3, %v10715_v11 }
 0x1fd   : > { %v1237_v6 = vpop.f32.mrf.mxu3  ;;  %v830_v37 = vpop.f32.mrf.mxu1  ;;  %2474 = vst.msk [vmem:[#allocation3 + $0x30] sm:$0xff] %vm2466_vm3, %v10715_v11 }
 0x1fe   : > { %v1278_v39 = vadd.f32 %v1237_v6, %v1053_v35  ;;  %v831_v30 = vadd.f32 %v830_v37, %v10714_v9  ;;  %v1024_v14 = vpop.f32.mrf.mxu2  ;;  %2475 = vst.msk [vmem:[#allocation3 + $0x38] sm:$0xff] %vm2466_vm3, %v10715_v11  ;;  %v2193_v6 = vld [vmem:[#allocation2 + $0xf2] sm:$0xff]  ;;  %v2194_v37 = vld [vmem:[#allocation2 + $0xfa] sm:$0xff] }
 0x1ff   : > { %2477 = vst.msk [vmem:[#allocation3 + $0x48] sm:$0xff] %vm2466_vm3, %v10715_v11 }
 0x200   : > { %v1056_v59 = vadd.f32 %v1019_v50, %v831_v30  ;;  %v8821_v18 = vadd.f32 %v1458_v2, %v1278_v39  ;;  %v1990_v2 = vpack.c.bf16 %v1965_v41, %v1964_v45  ;;  %2478 = vst.msk [vmem:[#allocation3 + $0x50] sm:$0xff] %vm2466_vm3, %v10715_v11  ;;  %v2217_v30 = vpack.c.bf16 %v2194_v37, %v2193_v6  ;;  %v1754_v6 = vld [vmem:[#allocation2 + $0x140] sm:$0xff] }
 0x201   : > { %v1465_v27 = vpop.f32.mrf.mxu0  ;;  %2480 = vst.msk [vmem:[#allocation3 + $0x60] sm:$0xff] %vm2466_vm3, %v10715_v11 }
 0x202   : > { %7630 = vmatmul.msk.bf16.gmra.mxu2 %vm366_vm0, %v8635_v15  ;;  %2481 = vst.msk [vmem:[#allocation3 + $0x68] sm:$0xff] %vm2466_vm3, %v10715_v11 }
 0x203   : > { %2483 = vst.msk [vmem:[#allocation3 + $0x78] sm:$0xff] %vm2466_vm3, %v10715_v11 }
 0x204   : > { %2484 = vst.msk [vmem:[#allocation3 + $0x80] sm:$0xff] %vm2466_vm3, %v10715_v11 }
 0x205   : > { %v1239_v10 = vpop.f32.mrf.mxu3  ;;  %v833_v8 = vpop.f32.mrf.mxu1  ;;  %2486 = vst.msk [vmem:[#allocation3 + $0x90] sm:$0xff] %vm2466_vm3, %v10715_v11 }
 0x206   : > { %v1279_v35 = vadd.f32 %v1239_v10, %v1054_v48  ;;  %v834_v44 = vadd.f32 %v833_v8, %v10716_v17  ;;  %v8830_v56 = vpop.f32.mrf.mxu2  ;;  %2487 = vst.msk [vmem:[#allocation3 + $0x98] sm:$0xff] %vm2466_vm3, %v10715_v11  ;;  %v1968_v17 = vld [vmem:[#allocation2 + $0xf1] sm:$0xff] }
 0x207   : > { %2489 = vst.msk [vmem:[#allocation3 + $0xa8] sm:$0xff] %vm2466_vm3, %v10715_v11 }
 0x208   : > { %v1057_v15 = vadd.f32 %v1022_v13, %v834_v44  ;;  %7613 = vmatmul.msk.bf16.gmra.mxu1 %vm366_vm0, %v10713_v57  ;;  %v8840_v50 = vadd.f32 %v1460_v47, %v1279_v35  ;;  %v1966_v13 = vld [vmem:[#allocation2 + $0xd9] sm:$0xff]  ;;  %2490 = vst.msk [vmem:[#allocation3 + $0xb0] sm:$0xff] %vm2466_vm3, %v10715_v11 }
 0x209   : > { %v1468_v48 = vpop.f32.mrf.mxu0  ;;  %2492 = vst.msk [vmem:[#allocation3 + $0xc0] sm:$0xff] %vm2466_vm3, %v10715_v11  ;;  %v1969_v44 = vld [vmem:[#allocation2 + $0xf9] sm:$0xff] }
 0x20a   : > { %7644 = vmatmul.msk.bf16.gmra.mxu3 %vm366_vm0, %v1990_v2  ;;  %2493 = vst.msk [vmem:[#allocation3 + $0xc8] sm:$0xff] %vm2466_vm3, %v10715_v11 }
 0x20b   : > { %2495 = vst.msk [vmem:[#allocation3 + $0xd8] sm:$0xff] %vm2466_vm3, %v10715_v11 }
 0x20c   : > { %7661 = vmatmul.msk.bf16.gmra.mxu0 %vm366_vm0, %v10717_v40  ;;  %2496 = vst.msk [vmem:[#allocation3 + $0xe0] sm:$0xff] %vm2466_vm3, %v10715_v11 }
 0x20d   : > { %v1242_v47 = vpop.f32.mrf.mxu3  ;;  %v835_v4 = vpop.f32.mrf.mxu1  ;;  %2498 = vst.msk [vmem:[#allocation3 + $0xf0] sm:$0xff] %vm2466_vm3, %v10715_v11 }
 0x20e   : > { %v1280_v61 = vadd.f32 %v1242_v47, %v1055_v0  ;;  %v836_v29 = vadd.f32 %v835_v4, %v10718_v60  ;;  %v8856_v62 = vpop.f32.mrf.mxu2  ;;  %v1967_v0 = vld [vmem:[#allocation2 + $0xe1] sm:$0xff]  ;;  %2499 = vst.msk [vmem:[#allocation3 + $0xf8] sm:$0xff] %vm2466_vm3, %v10715_v11  ;;  %v1525_v47 = vld [vmem:[#allocation2 + $0x10a] sm:$0xff]  ;;  %v1526_v4 = vld [vmem:[#allocation2 + $0x112] sm:$0xff] }
 0x20f   : > { %2501 = vst.msk [vmem:[#allocation3 + $0x108] sm:$0xff] %vm2466_vm3, %v10715_v11  ;;  %v10719_v60 = vld [vmem:[#allocation20_spill] sm:$0xff] }
 0x210   : > { %v1058_v49 = vadd.f32 %v1024_v14, %v836_v29  ;;  %v8864_v23 = vadd.f32 %v1463_v7, %v1280_v61  ;;  %2502 = vst.msk [vmem:[#allocation3 + $0x110] sm:$0xff] %vm2466_vm3, %v10715_v11  ;;  %v2619_v29 = vld [vmem:[#allocation3 + $0x1] sm:$0xff] }
 0x211   : > { %v1470_v63 = vpop.f32.mrf.mxu0  ;;  %2504 = vst.msk [vmem:[#allocation3 + $0x120] sm:$0xff] %vm2466_vm3, %v10715_v11 }
 0x212   : > { %7631 = vmatmul.msk.bf16.gmra.mxu2 %vm366_vm0, %v8650_v31  ;;  %v1991_v31 = vpack.c.bf16 %v1967_v0, %v1966_v13  ;;  %2505 = vst.msk [vmem:[#allocation3 + $0x128] sm:$0xff] %vm2466_vm3, %v10715_v11  ;;  %v2683_v0 = vld [vmem:[#allocation3 + $0x2] sm:$0xff] }
 0x213   : > { %2507 = vst.msk [vmem:[#allocation3 + $0x138] sm:$0xff] %vm2466_vm3, %v10715_v11  ;;  %v2715_v37 = vpack.c.bf16 %v2683_v0, %v2683_v0  ;;  %v1971_v0 = vld [vmem:[#allocation2 + $0x111] sm:$0xff] }
 0x214   : > { %2508 = vst.msk [vmem:[#allocation3 + $0x140] sm:$0xff] %vm2466_vm3, %v10715_v11 }
 0x215   : > { %v1244_v7 = vpop.f32.mrf.mxu3  ;;  %v1618_v57 = vpop.f32.mrf.mxu1  ;;  %2510 = vst.msk [vmem:[#allocation3 + $0x150] sm:$0xff] %vm2466_vm3, %v10715_v11 }
 0x216   : > { %v1281_v39 = vadd.f32 %v1244_v7, %v1056_v59  ;;  %v8878_v9 = vpop.f32.mrf.mxu2  ;;  %2511 = vst.msk [vmem:[#allocation3 + $0x158] sm:$0xff] %vm2466_vm3, %v10715_v11  ;;  %v1698_v61 = vadd.f32 %v1618_v57, %v8632_v28  ;;  %v1547_v28 = vpack.c.bf16 %v1526_v4, %v1525_v47  ;;  %v2651_v7 = vpack.c.bf16 %v2619_v29, %v2619_v29  ;;  %v1753_v57 = vld [vmem:[#allocation2 + $0x138] sm:$0xff] }
 0x217   : > { %2513 = vst.msk [vmem:[#allocation3 + $0x168] sm:$0xff] %vm2466_vm3, %v10715_v11 }
 0x218   : > { %7614 = vmatmul.msk.bf16.gmra.mxu1 %vm366_vm0, %v10717_v40  ;;  %v8888_v14 = vadd.f32 %v1465_v27, %v1281_v39  ;;  %2514 = vst.msk [vmem:[#allocation3 + $0x170] sm:$0xff] %vm2466_vm3, %v10715_v11  ;;  %v1992_v40 = vpack.c.bf16 %v1969_v44, %v1968_v17 }
 0x219   : > { %v8890_v45 = vpop.f32.mrf.mxu0  ;;  %2516 = vst.msk [vmem:[#allocation3 + $0x180] sm:$0xff] %vm2466_vm3, %v10715_v11 }
 0x21a   : > { %7645 = vmatmul.msk.bf16.gmra.mxu3 %vm366_vm0, %v1991_v31  ;;  %2517 = vst.msk [vmem:[#allocation3 + $0x188] sm:$0xff] %vm2466_vm3, %v10715_v11 }
 0x21b   : > { %2519 = vst.msk [vmem:[#allocation3 + $0x198] sm:$0xff] %vm2466_vm3, %v10715_v11 }
 0x21c   : > { %7662 = vmatmul.msk.bf16.gmra.mxu0 %vm366_vm0, %v2217_v30  ;;  %2520 = vst.msk [vmem:[#allocation3 + $0x1a0] sm:$0xff] %vm2466_vm3, %v10715_v11 }
 0x21d   : > { %v1247_v59 = vpop.f32.mrf.mxu3  ;;  %v1620_v27 = vpop.f32.mrf.mxu1  ;;  %2470 = vst.msk [vmem:[#allocation3 + $0x10] sm:$0x3] %vm2469_vm4, %v10715_v11 }
 0x21e   : > { %v1282_v41 = vadd.f32 %v1247_v59, %v1057_v15  ;;  %v8906_v10 = vpop.f32.mrf.mxu2  ;;  %2473 = vst.msk [vmem:[#allocation3 + $0x28] sm:$0x3] %vm2469_vm4, %v10715_v11  ;;  %v8963_v59 = vld [vmem:[%s10668_s2] ss:$0 sm:$0xff]  ;;  %v1699_v17 = vadd.f32 %v1620_v27, %v8640_v22 }
 0x21f   : > { %2476 = vst.msk [vmem:[#allocation3 + $0x40] sm:$0x3] %vm2469_vm4, %v10715_v11 }
 0x220   : > { %v8912_v8 = vadd.f32 %v1468_v48, %v1282_v41  ;;  %2479 = vst.msk [vmem:[#allocation3 + $0x58] sm:$0x3] %vm2469_vm4, %v10715_v11  ;;  %v1774_v41 = vpack.c.bf16 %v1754_v6, %v1753_v57 }
 0x221   : > { %v8916_v35 = vpop.f32.mrf.mxu0  ;;  %2482 = vst.msk [vmem:[#allocation3 + $0x70] sm:$0x3] %vm2469_vm4, %v10715_v11 }
 0x222   : > { %7632 = vmatmul.msk.bf16.gmra.mxu2 %vm366_vm0, %v8680_v19  ;;  %2485 = vst.msk [vmem:[#allocation3 + $0x88] sm:$0x3] %vm2469_vm4, %v10715_v11 }
 0x223   : > { %2488 = vst.msk [vmem:[#allocation3 + $0xa0] sm:$0x3] %vm2469_vm4, %v10715_v11 }
 0x224   : > { %v2620_v44 = vld [vmem:[#allocation3 + $0x9] sm:$0xff]  ;;  %2491 = vst.msk [vmem:[#allocation3 + $0xb8] sm:$0x3] %vm2469_vm4, %v10715_v11 }
 0x225   : > { %v1249_v2 = vpop.f32.mrf.mxu3  ;;  %v8926_v15 = vpop.f32.mrf.mxu1  ;;  %v2652_v47 = vpack.c.bf16 %v2620_v44, %v2620_v44  ;;  %2494 = vst.msk [vmem:[#allocation3 + $0xd0] sm:$0x3] %vm2469_vm4, %v10715_v11  ;;  %v1528_v44 = vld [vmem:[#allocation2 + $0x12a] sm:$0xff] }
 0x226   : > { %v1283_v48 = vadd.f32 %v1249_v2, %v1058_v49  ;;  %v8932_v19 = vpop.f32.mrf.mxu2  ;;  %v3244_v2 = vunpack.c.l.b16 %v2651_v7  ;;  %2497 = vst.msk [vmem:[#allocation3 + $0xe8] sm:$0x3] %vm2469_vm4, %v10715_v11  ;;  %v1921_v7 = vadd.f32 %v8856_v62, %v1699_v17  ;;  %v1527_v17 = vld [vmem:[#allocation2 + $0x122] sm:$0xff] }
 0x227   : > { %v3245_v27 = vunpack.c.l.b16 %v2652_v47  ;;  %2500 = vst.msk [vmem:[#allocation3 + $0x100] sm:$0x3] %vm2469_vm4, %v10715_v11 }
 0x228   : > { %7615 = vmatmul.msk.bf16.gmra.mxu1 %vm366_vm0, %v10719_v60  ;;  %v8941_v49 = vadd.f32 %v1470_v63, %v1283_v48  ;;  %v1920_v63 = vadd.f32 %v8830_v56, %v1698_v61  ;;  %v2684_v48 = vld [vmem:[#allocation3 + $0xa] sm:$0xff]  ;;  %v3356_v61 = vunpack.c.l.b16 %v2715_v37  ;;  %2503 = vst.msk [vmem:[#allocation3 + $0x118] sm:$0x3] %vm2469_vm4, %v10715_v11 }
 0x229   : > { %v8945_v13 = vpop.f32.mrf.mxu0  ;;  %v2716_v4 = vpack.c.bf16 %v2684_v48, %v2684_v48  ;;  %v3276_v6 = vpack.c.b16 %v3245_v27, %v3244_v2  ;;  %2506 = vst.msk [vmem:[#allocation3 + $0x130] sm:$0x3] %vm2469_vm4, %v10715_v11  ;;  %v1700_v2 = vadd.f32 %v8926_v15, %v8647_v20  ;;  %v1548_v20 = vpack.c.bf16 %v1528_v44, %v1527_v17  ;;  %v1755_v15 = vld [vmem:[#allocation2 + $0x150] sm:$0xff] }
 0x22a   : > { %7646 = vmatmul.msk.bf16.gmra.mxu3 %vm366_vm0, %v1992_v40  ;;  %2509 = vst.msk [vmem:[#allocation3 + $0x148] sm:$0x3] %vm2469_vm4, %v10715_v11 }
 0x22b   : > { %v3357_v29 = vunpack.c.l.b16 %v2716_v4  ;;  %3292 = vrot.lane.b32.xlu1 %v3276_v6, %s8099_s18  ;;  %2512 = vst.msk [vmem:[#allocation3 + $0x160] sm:$0x3] %vm2469_vm4, %v10715_v11  ;;  %v1756_v4 = vld [vmem:[#allocation2 + $0x158] sm:$0xff] }
 0x22c   : > { %7663 = vmatmul.msk.bf16.gmra.mxu0 %vm366_vm0, %v1547_v28  ;;  %2515 = vst.msk [vmem:[#allocation3 + $0x178] sm:$0x3] %vm2469_vm4, %v10715_v11 }
 0x22d   : > { %v2065_v39 = vpop.f32.mrf.mxu3  ;;  %v8956_v31 = vpop.f32.mrf.mxu1  ;;  %2518 = vst.msk [vmem:[#allocation3 + $0x190] sm:$0x3] %vm2469_vm4, %v10715_v11 }
 0x22e   : > { %v2145_v30 = vadd.f32 %v2065_v39, %v1920_v63  ;;  %v8967_v56 = vpop.f32.mrf.mxu2  ;;  %v3388_v63 = vpack.c.b16 %v3357_v29, %v3356_v61  ;;  %2521 = vst.msk [vmem:[#allocation3 + $0x1a8] sm:$0x3] %vm2469_vm4, %v10715_v11  ;;  %v1922_v61 = vadd.f32 %v8878_v9, %v1700_v2 }
 0x22f   : > { %4797 = vst.msk [vmem:[#allocation4] sm:$0xff] %vm4092_vm5, %v10715_v11 }
 0x230   : > { %v2366_v40 = vadd.f32 %v8890_v45, %v2145_v30  ;;  %v1970_v45 = vld [vmem:[#allocation2 + $0x109] sm:$0xff]  ;;  %3404 = vrot.lane.b32.xlu2 %v3388_v63, %s8100_s22  ;;  %v1972_v63 = vld [vmem:[#allocation2 + $0x121] sm:$0xff]  ;;  %4798 = vst.msk [vmem:[#allocation4 + $0x8] sm:$0xff] %vm4092_vm5, %v10715_v11 }
 0x231   : > { %v8977_v60 = vpop.f32.mrf.mxu0  ;;  %4801 = vst.msk [vmem:[#allocation4 + $0x18] sm:$0xff] %vm4092_vm5, %v10715_v11 }
 0x232   : > { %v2402_v22 = vadd.f32 %v8963_v59, %v2366_v40  ;;  %7633 = vmatmul.msk.bf16.gmra.mxu2 %vm366_vm0, %v1774_v41  ;;  %v1993_v41 = vpack.c.bf16 %v1971_v0, %v1970_v45  ;;  %v1775_v45 = vpack.c.bf16 %v1756_v4, %v1755_v15  ;;  %v1701_v0 = vadd.f32 %v8956_v31, %v8658_v3 }
 0x233   : > { %4802 = vst.msk [vmem:[#allocation4 + $0x20] sm:$0xff] %vm4092_vm5, %v10715_v11 }
 0x234   : > { %v2434_v57 = vmax.f32 %v2402_v22, 0.0  ;;  %4804 = vst.msk [vmem:[#allocation4 + $0x30] sm:$0xff] %vm4092_vm5, %v10715_v11 }
 0x235   : > { %v2067_v37 = vpop.f32.mrf.mxu3  ;;  %v1628_v39 = vpop.f32.mrf.mxu1  ;;  %4805 = vst.msk [vmem:[#allocation4 + $0x38] sm:$0xff] %vm4092_vm5, %v10715_v11 }
 0x236   : > { %2523 = vst.msk [vmem:[#allocation3 + $0x19] sm:$0xff] %vm2466_vm3, %v2434_v57  ;;  %v2146_v30 = vadd.f32 %v2067_v37, %v1921_v7  ;;  %v8993_v62 = vpop.f32.mrf.mxu2  ;;  %v1973_v37 = vld [vmem:[#allocation2 + $0x129] sm:$0xff] }
 0x237   : > { %4807 = vst.msk [vmem:[#allocation4 + $0x48] sm:$0xff] %vm4092_vm5, %v10715_v11 }
 0x238   : > { %v2367_v48 = vadd.f32 %v8916_v35, %v2146_v30  ;;  %7616 = vmatmul.msk.bf16.gmra.mxu1 %vm366_vm0, %v1547_v28  ;;  %v1923_v30 = vadd.f32 %v8906_v10, %v1701_v0  ;;  %v1702_v10 = vadd.f32 %v1628_v39, %v8675_v55  ;;  %v1758_v55 = vld [vmem:[#allocation2 + $0x170] sm:$0xff]  ;;  %4808 = vst.msk [vmem:[#allocation4 + $0x50] sm:$0xff] %vm4092_vm5, %v10715_v11 }
 0x239   : > { %v9005_v40 = vpop.f32.mrf.mxu0  ;;  %4810 = vst.msk [vmem:[#allocation4 + $0x60] sm:$0xff] %vm4092_vm5, %v10715_v11 }
 0x23a   : > { %v2403_v47 = vadd.f32 %v8963_v59, %v2367_v48  ;;  %7647 = vmatmul.msk.bf16.gmra.mxu3 %vm366_vm0, %v1993_v41  ;;  %4811 = vst.msk [vmem:[#allocation4 + $0x68] sm:$0xff] %vm4092_vm5, %v10715_v11 }
 0x23b   : > { %4813 = vst.msk [vmem:[#allocation4 + $0x78] sm:$0xff] %vm4092_vm5, %v10715_v11 }
 0x23c   : > { %v2435_v35 = vmax.f32 %v2403_v47, 0.0  ;;  %7664 = vmatmul.msk.bf16.gmra.mxu0 %vm366_vm0, %v1548_v20  ;;  %v1994_v47 = vpack.c.bf16 %v1973_v37, %v1972_v63  ;;  %4814 = vst.msk [vmem:[#allocation4 + $0x80] sm:$0xff] %vm4092_vm5, %v10715_v11 }
 0x23d   : > { %v2070_v28 = vpop.f32.mrf.mxu3  ;;  %v1630_v22 = vpop.f32.mrf.mxu1  ;;  %v2747_v6 = vld [vmem:[#allocation3 + $0x18] sm:$0xff]  ;;  %4816 = vst.msk [vmem:[#allocation4 + $0x90] sm:$0xff] %vm4092_vm5, %v10715_v11 }
 0x23e   : > { %2524 = vst.msk [vmem:[#allocation3 + $0x21] sm:$0xff] %vm2466_vm3, %v2435_v35  ;;  %v2147_v27 = vadd.f32 %v2070_v28, %v1922_v61  ;;  %v9014_v29 = vpop.f32.mrf.mxu2  ;;  %v2779_v31 = vpack.c.bf16 %v2747_v6, %v2747_v6  ;;  %v1529_v28 = vld [vmem:[#allocation2 + $0x13a] sm:$0xff] }
 0x23f   : > { %4817 = vst.msk [vmem:[#allocation4 + $0x98] sm:$0xff] %vm4092_vm5, %v10715_v11 }
 0x240   : > { %v2368_v7 = vadd.f32 %v8945_v13, %v2147_v27  ;;  %v1530_v27 = vld [vmem:[#allocation2 + $0x142] sm:$0xff]  ;;  %4819 = vst.msk [vmem:[#allocation4 + $0xa8] sm:$0xff] %vm4092_vm5, %v10715_v11 }
 0x241   : > { %v9019_v57 = vpop.f32.mrf.mxu0  ;;  %4820 = vst.msk [vmem:[#allocation4 + $0xb0] sm:$0xff] %vm4092_vm5, %v10715_v11 }
 0x242   : > { %v2404_v9 = vadd.f32 %v8963_v59, %v2368_v7  ;;  %7634 = vmatmul.msk.bf16.gmra.mxu2 %vm366_vm0, %v1775_v45  ;;  %4822 = vst.msk [vmem:[#allocation4 + $0xc0] sm:$0xff] %vm4092_vm5, %v10715_v11 }
 0x243   : > { %4823 = vst.msk [vmem:[#allocation4 + $0xc8] sm:$0xff] %vm4092_vm5, %v10715_v11 }
 0x244   : > { %v2436_v41 = vmax.f32 %v2404_v9, 0.0  ;;  %v3468_v9 = vunpack.c.l.b16 %v2779_v31  ;;  %4825 = vst.msk [vmem:[#allocation4 + $0xd8] sm:$0xff] %vm4092_vm5, %v10715_v11 }
 0x245   : > { %v2072_v17 = vpop.f32.mrf.mxu3  ;;  %v9024_v44 = vpop.f32.mrf.mxu1  ;;  %v2875_v2 = vld [vmem:[#allocation3 + $0x1a] sm:$0xff]  ;;  %v2876_v48 = vld [vmem:[#allocation3 + $0x22] sm:$0xff]  ;;  %4826 = vst.msk [vmem:[#allocation4 + $0xe0] sm:$0xff] %vm4092_vm5, %v10715_v11 }
 0x246   : > { %v2748_v3 = vld [vmem:[#allocation3 + $0x20] sm:$0xff]  ;;  %2525 = vst.msk [vmem:[#allocation3 + $0x31] sm:$0xff] %vm2466_vm3, %v2436_v41  ;;  %v2148_v13 = vadd.f32 %v2072_v17, %v1923_v30  ;;  %v2907_v15 = vpack.c.bf16 %v2875_v2, %v2875_v2  ;;  %v2908_v4 = vpack.c.bf16 %v2876_v48, %v2876_v48  ;;  %v9027_v61 = vpop.f32.mrf.mxu2  ;;  %v1549_v30 = vpack.c.bf16 %v1530_v27, %v1529_v28  ;;  %v1757_v2 = vld [vmem:[#allocation2 + $0x168] sm:$0xff]  ;;  %v1974_v27 = vld [vmem:[#allocation2 + $0x139] sm:$0xff] }
 0x247   : > { %v2780_v35 = vpack.c.bf16 %v2748_v3, %v2748_v3  ;;  %4828 = vst.msk [vmem:[#allocation4 + $0xf0] sm:$0xff] %vm4092_vm5, %v10715_v11 }
 0x248   : > { %v2369_v45 = vadd.f32 %v8977_v60, %v2148_v13  ;;  %7617 = vmatmul.msk.bf16.gmra.mxu1 %vm366_vm0, %v1548_v20  ;;  %v3660_v0 = vunpack.c.l.b16 %v2907_v15  ;;  %v3661_v7 = vunpack.c.l.b16 %v2908_v4  ;;  %v1924_v60 = vadd.f32 %v8932_v19, %v1702_v10  ;;  %v1975_v10 = vld [vmem:[#allocation2 + $0x141] sm:$0xff]  ;;  %4829 = vst.msk [vmem:[#allocation4 + $0xf8] sm:$0xff] %vm4092_vm5, %v10715_v11 }
 0x249   : > { %v3469_v6 = vunpack.c.l.b16 %v2780_v35  ;;  %v9032_v41 = vpop.f32.mrf.mxu0  ;;  %v1776_v13 = vpack.c.bf16 %v1758_v55, %v1757_v2  ;;  %v1703_v19 = vadd.f32 %v1630_v22, %v8686_v43  ;;  %4831 = vst.msk [vmem:[#allocation4 + $0x108] sm:$0xff] %vm4092_vm5, %v10715_v11 }
 0x24a   : > { %v2405_v63 = vadd.f32 %v8963_v59, %v2369_v45  ;;  %7648 = vmatmul.msk.bf16.gmra.mxu3 %vm366_vm0, %v1994_v47  ;;  %v9036_v37 = vpack.c.b16 %v3661_v7, %v3660_v0  ;;  %4832 = vst.msk [vmem:[#allocation4 + $0x110] sm:$0xff] %vm4092_vm5, %v10715_v11 }
 0x24b   : > { %v3500_v17 = vpack.c.b16 %v3469_v6, %v3468_v9  ;;  %v1925_v0 = vadd.f32 %v8967_v56, %v1703_v19  ;;  %v2622_v56 = vld [vmem:[#allocation3 + $0x21] sm:$0xff]  ;;  %4834 = vst.msk [vmem:[#allocation4 + $0x120] sm:$0xff] %vm4092_vm5, %v10715_v11 }
 0x24c   : > { %v2437_v39 = vmax.f32 %v2405_v63, 0.0  ;;  %3708 = vrot.lane.b32.xlu0 %v9036_v37, %s8099_s18  ;;  %7665 = vmatmul.msk.bf16.gmra.mxu0 %vm366_vm0, %v1549_v30  ;;  %4835 = vst.msk [vmem:[#allocation4 + $0x128] sm:$0xff] %vm4092_vm5, %v10715_v11 }
 0x24d   : > { %3516 = vrot.lane.b32.xlu2 %v3500_v17, %s8101_s23  ;;  %v2075_v20 = vpop.f32.mrf.mxu3  ;;  %v9043_v48 = vpop.f32.mrf.mxu1  ;;  %v3004_v15 = vld [vmem:[#allocation3 + $0x31] sm:$0xff]  ;;  %v1995_v17 = vpack.c.bf16 %v1975_v10, %v1974_v27  ;;  %4837 = vst.msk [vmem:[#allocation4 + $0x138] sm:$0xff] %vm4092_vm5, %v10715_v11 }
 0x24e   : > { %2526 = vst.msk [vmem:[#allocation3 + $0x39] sm:$0xff] %vm2466_vm3, %v2437_v39  ;;  %v2149_v3 = vadd.f32 %v2075_v20, %v1924_v60  ;;  %v9046_v31 = vpop.f32.mrf.mxu2  ;;  %v2940_v4 = vld [vmem:[#allocation3 + $0x30] sm:$0xff]  ;;  %v3036_v45 = vpack.c.bf16 %v3004_v15, %v3004_v15  ;;  %v1704_v39 = vadd.f32 %v9024_v44, %v8693_v58  ;;  %v1531_v15 = vld [vmem:[#allocation2 + $0x152] sm:$0xff]  ;;  %v2654_v44 = vpack.c.bf16 %v2622_v56, %v2622_v56 }
 0x24f   : > { %v2972_v9 = vpack.c.bf16 %v2940_v4, %v2940_v4  ;;  %v1532_v4 = vld [vmem:[#allocation2 + $0x15a] sm:$0xff]  ;;  %4838 = vst.msk [vmem:[#allocation4 + $0x140] sm:$0xff] %vm4092_vm5, %v10715_v11 }
 0x250   : > { %v2370_v47 = vadd.f32 %v9005_v40, %v2149_v3  ;;  %v3884_v20 = vunpack.c.l.b16 %v3036_v45  ;;  %v1550_v45 = vpack.c.bf16 %v1532_v4, %v1531_v15  ;;  %4840 = vst.msk [vmem:[#allocation4 + $0x150] sm:$0xff] %vm4092_vm5, %v10715_v11 }
 0x251   : > { %v9050_v35 = vpop.f32.mrf.mxu0  ;;  %v3772_v19 = vunpack.c.l.b16 %v2972_v9  ;;  %4841 = vst.msk [vmem:[#allocation4 + $0x158] sm:$0xff] %vm4092_vm5, %v10715_v11 }
 0x252   : > { %v2406_v28 = vadd.f32 %v8963_v59, %v2370_v47  ;;  %7635 = vmatmul.msk.bf16.gmra.mxu2 %vm366_vm0, %v1776_v13  ;;  %4843 = vst.msk [vmem:[#allocation4 + $0x168] sm:$0xff] %vm4092_vm5, %v10715_v11 }
 0x253   : > { %4844 = vst.msk [vmem:[#allocation4 + $0x170] sm:$0xff] %vm4092_vm5, %v10715_v11 }
 0x254   : > { %v2438_v7 = vmax.f32 %v2406_v28, 0.0  ;;  %v2621_v28 = vld [vmem:[#allocation3 + $0x19] sm:$0xff]  ;;  %4846 = vst.msk [vmem:[#allocation4 + $0x180] sm:$0xff] %vm4092_vm5, %v10715_v11 }
 0x255   : > { %v2077_v6 = vpop.f32.mrf.mxu3  ;;  %v9055_v63 = vpop.f32.mrf.mxu1  ;;  %v3005_v43 = vld [vmem:[#allocation3 + $0x39] sm:$0xff]  ;;  %4847 = vst.msk [vmem:[#allocation4 + $0x188] sm:$0xff] %vm4092_vm5, %v10715_v11 }
 0x256   : > { %v2941_v40 = vld [vmem:[#allocation3 + $0x38] sm:$0xff]  ;;  %2527 = vst.msk [vmem:[#allocation3 + $0x49] sm:$0xff] %vm2466_vm3, %v2438_v7  ;;  %v2150_v22 = vadd.f32 %v2077_v6, %v1925_v0  ;;  %v3037_v2 = vpack.c.bf16 %v3005_v43, %v3005_v43  ;;  %v9058_v60 = vpop.f32.mrf.mxu2  ;;  %v2653_v6 = vpack.c.bf16 %v2621_v28, %v2621_v28 }
 0x257   : > { %v2973_v55 = vpack.c.bf16 %v2941_v40, %v2941_v40  ;;  %v1760_v7 = vld [vmem:[#allocation2 + $0x188] sm:$0xff]  ;;  %4849 = vst.msk [vmem:[#allocation4 + $0x198] sm:$0xff] %vm4092_vm5, %v10715_v11 }
 0x258   : > { %v2371_v3 = vadd.f32 %v9019_v57, %v2150_v22  ;;  %7618 = vmatmul.msk.bf16.gmra.mxu1 %vm366_vm0, %v1549_v30  ;;  %v3885_v13 = vunpack.c.l.b16 %v3037_v2  ;;  %v1759_v57 = vld [vmem:[#allocation2 + $0x180] sm:$0xff]  ;;  %v1926_v30 = vadd.f32 %v8993_v62, %v1704_v39  ;;  %v2878_v39 = vld [vmem:[#allocation3 + $0x3a] sm:$0xff]  ;;  %4850 = vst.msk [vmem:[#allocation4 + $0x1a0] sm:$0xff] %vm4092_vm5, %v10715_v11 }
 0x259   : > { %v3773_v47 = vunpack.c.l.b16 %v2973_v55  ;;  %v9064_v27 = vpop.f32.mrf.mxu0  ;;  %v2877_v2 = vld [vmem:[#allocation3 + $0x32] sm:$0xff]  ;;  %v1777_v55 = vpack.c.bf16 %v1760_v7, %v1759_v57  ;;  %4800 = vst.msk [vmem:[#allocation4 + $0x10] sm:$0x3] %vm4799_vm7, %v10715_v11 }
 0x25a   : > { %v2407_v10 = vadd.f32 %v8963_v59, %v2371_v3  ;;  %7649 = vmatmul.msk.bf16.gmra.mxu3 %vm366_vm0, %v1995_v17  ;;  %v9068_v0 = vpack.c.b16 %v3885_v13, %v3884_v20  ;;  %v3247_v17 = vunpack.c.l.b16 %v2654_v44  ;;  %v1705_v20 = vadd.f32 %v9043_v48, %v8698_v34  ;;  %4803 = vst.msk [vmem:[#allocation4 + $0x28] sm:$0x3] %vm4799_vm7, %v10715_v11 }
 0x25b   : > { %v3804_v58 = vpack.c.b16 %v3773_v47, %v3772_v19  ;;  %v3246_v3 = vunpack.c.l.b16 %v2653_v6  ;;  %v2909_v19 = vpack.c.bf16 %v2877_v2, %v2877_v2  ;;  %v2910_v44 = vpack.c.bf16 %v2878_v39, %v2878_v39  ;;  %4806 = vst.msk [vmem:[#allocation4 + $0x40] sm:$0x3] %vm4799_vm7, %v10715_v11 }
 0x25c   : > { %v2439_v9 = vmax.f32 %v2407_v10, 0.0  ;;  %3932 = vrot.lane.b32.xlu1 %v9068_v0, %s8101_s23  ;;  %7666 = vmatmul.msk.bf16.gmra.mxu0 %vm366_vm0, %v1550_v45  ;;  %v1976_v10 = vld [vmem:[#allocation2 + $0x151] sm:$0xff]  ;;  %v1927_v7 = vadd.f32 %v9014_v29, %v1705_v20  ;;  %4809 = vst.msk [vmem:[#allocation4 + $0x58] sm:$0x3] %vm4799_vm7, %v10715_v11 }
 0x25d   : > { %3820 = vrot.lane.b32.xlu0 %v3804_v58, %s8100_s22  ;;  %3518 = vrot.lane.b32.xlu2 %v3804_v58, %s8101_s23  ;;  %v2080_v43 = vpop.f32.mrf.mxu3  ;;  %v9075_v40 = vpop.f32.mrf.mxu1  ;;  %v2942_v13 = vld [vmem:[#allocation3 + $0x48] sm:$0xff]  ;;  %v3277_v28 = vpack.c.b16 %v3247_v17, %v3246_v3  ;;  %4812 = vst.msk [vmem:[#allocation4 + $0x70] sm:$0x3] %vm4799_vm7, %v10715_v11 }
 0x25e   : > { %2528 = vst.msk [vmem:[#allocation3 + $0x51] sm:$0xff] %vm2466_vm3, %v2439_v9  ;;  %v2151_v22 = vadd.f32 %v2080_v43, %v1926_v30  ;;  %v9079_v62 = vpop.f32.mrf.mxu2  ;;  %v3006_v47 = vld [vmem:[#allocation3 + $0x49] sm:$0xff]  ;;  %v2974_v57 = vpack.c.bf16 %v2942_v13, %v2942_v13  ;;  %v3662_v43 = vunpack.c.l.b16 %v2909_v19 }
 0x25f   : > { %v1977_v58 = vld [vmem:[#allocation2 + $0x159] sm:$0xff]  ;;  %4815 = vst.msk [vmem:[#allocation4 + $0x88] sm:$0x3] %vm4799_vm7, %v10715_v11 }
 0x260   : > { %v2372_v56 = vadd.f32 %v9032_v41, %v2151_v22  ;;  %v3038_v41 = vpack.c.bf16 %v3006_v47, %v3006_v47  ;;  %v1996_v9 = vpack.c.bf16 %v1977_v58, %v1976_v10  ;;  %v3774_v20 = vunpack.c.l.b16 %v2974_v57  ;;  %v1533_v47 = vld [vmem:[#allocation2 + $0x16a] sm:$0xff]  ;;  %v1762_v57 = vld [vmem:[#allocation2 + $0x1a0] sm:$0xff]  ;;  %4818 = vst.msk [vmem:[#allocation4 + $0xa0] sm:$0x3] %vm4799_vm7, %v10715_v11 }
 0x261   : > { %v9084_v15 = vpop.f32.mrf.mxu0  ;;  %4821 = vst.msk [vmem:[#allocation4 + $0xb8] sm:$0x3] %vm4799_vm7, %v10715_v11 }
 0x262   : > { %v2408_v4 = vadd.f32 %v8963_v59, %v2372_v56  ;;  %7636 = vmatmul.msk.bf16.gmra.mxu2 %vm366_vm0, %v1777_v55  ;;  %v3663_v55 = vunpack.c.l.b16 %v2910_v44  ;;  %v3886_v13 = vunpack.c.l.b16 %v3038_v41  ;;  %4824 = vst.msk [vmem:[#allocation4 + $0xd0] sm:$0x3] %vm4799_vm7, %v10715_v11 }
 0x263   : > { %4827 = vst.msk [vmem:[#allocation4 + $0xe8] sm:$0x3] %vm4799_vm7, %v10715_v11 }
 0x264   : > { %v2440_v34 = vmax.f32 %v2408_v4, 0.0  ;;  %3406 = vrot.lane.b32.xlu1 %v9036_v37, %s8100_s22  ;;  %v1706_v37 = vadd.f32 %v9055_v63, %v8707_v21  ;;  %v1534_v4 = vld [vmem:[#allocation2 + $0x172] sm:$0xff]  ;;  %v9105_v44 = vpack.c.b16 %v3663_v55, %v3662_v43  ;;  %4830 = vst.msk [vmem:[#allocation4 + $0x100] sm:$0x3] %vm4799_vm7, %v10715_v11 }
 0x265   : > { %3294 = vrot.lane.b32.xlu0 %v3277_v28, %s8099_s18  ;;  %v2082_v48 = vpop.f32.mrf.mxu3  ;;  %v9092_v30 = vpop.f32.mrf.mxu1  ;;  %v2943_v6 = vld [vmem:[#allocation3 + $0x50] sm:$0xff]  ;;  %v1551_v63 = vpack.c.bf16 %v1534_v4, %v1533_v47  ;;  %4833 = vst.msk [vmem:[#allocation4 + $0x118] sm:$0x3] %vm4799_vm7, %v10715_v11 }
 0x266   : > { %v3007_v22 = vld [vmem:[#allocation3 + $0x51] sm:$0xff]  ;;  %2529 = vst.msk [vmem:[#allocation3 + $0x61] sm:$0xff] %vm2466_vm3, %v2440_v34  ;;  %v2152_v17 = vadd.f32 %v2082_v48, %v1927_v7  ;;  %v2975_v2 = vpack.c.bf16 %v2943_v6, %v2943_v6  ;;  %v9095_v39 = vpop.f32.mrf.mxu2  ;;  %v1928_v7 = vadd.f32 %v9027_v61, %v1706_v37 }
 0x267   : > { %v3039_v29 = vpack.c.bf16 %v3007_v22, %v3007_v22  ;;  %v2879_v6 = vld [vmem:[#allocation3 + $0x4a] sm:$0xff]  ;;  %v2880_v22 = vld [vmem:[#allocation3 + $0x52] sm:$0xff]  ;;  %4836 = vst.msk [vmem:[#allocation4 + $0x130] sm:$0x3] %vm4799_vm7, %v10715_v11 }
 0x268   : > { %v2373_v56 = vadd.f32 %v9050_v35, %v2152_v17  ;;  %7619 = vmatmul.msk.bf16.gmra.mxu1 %vm366_vm0, %v1550_v45  ;;  %v3775_v3 = vunpack.c.l.b16 %v2975_v2  ;;  %v1761_v35 = vld [vmem:[#allocation2 + $0x198] sm:$0xff]  ;;  %v7929_v17 = vld [vmem:[%s10669_s3 + $0x30] sm:$0xff]  ;;  %v1707_v2 = vadd.f32 %v9075_v40, %v8713_v51  ;;  %v2912_v47 = vpack.c.bf16 %v2880_v22, %v2880_v22  ;;  %v7928_v51 = vld [vmem:[%s10669_s3 + $0x28] sm:$0xff]  ;;  %4839 = vst.msk [vmem:[#allocation4 + $0x148] sm:$0x3] %vm4799_vm7, %v10715_v11 }
 0x269   : > { %v3887_v19 = vunpack.c.l.b16 %v3039_v29  ;;  %v9101_v28 = vpop.f32.mrf.mxu0  ;;  %v7930_v45 = vld [vmem:[%s10669_s3 + $0x38] sm:$0xff]  ;;  %v1778_v61 = vpack.c.bf16 %v1762_v57, %v1761_v35  ;;  %4842 = vst.msk [vmem:[#allocation4 + $0x160] sm:$0x3] %vm4799_vm7, %v10715_v11 }
 0x26a   : > { %v2409_v10 = vadd.f32 %v8963_v59, %v2373_v56  ;;  %7650 = vmatmul.msk.bf16.gmra.mxu3 %vm366_vm0, %v1996_v9  ;;  %v3805_v58 = vpack.c.b16 %v3775_v3, %v3774_v20  ;;  %4498 = vmatpush.bf16.msrb.mxu1 %v7930_v45  ;;  %v2911_v20 = vpack.c.bf16 %v2879_v6, %v2879_v6 }
 0x26b   : > { %v9107_v21 = vpack.c.b16 %v3887_v19, %v3886_v13  ;;  %v1978_v13 = vld [vmem:[#allocation2 + $0x169] sm:$0xff]  ;;  %v1979_v19 = vld [vmem:[#allocation2 + $0x171] sm:$0xff]  ;;  %4845 = vst.msk [vmem:[#allocation4 + $0x178] sm:$0x3] %vm4799_vm7, %v10715_v11 }
 0x26c   : > { %v2441_v34 = vmax.f32 %v2409_v10, 0.0  ;;  %3822 = vrot.lane.b32.xlu1 %v3805_v58, %s8100_s22  ;;  %7667 = vmatmul.msk.bf16.gmra.mxu0 %vm366_vm0, %v1551_v63  ;;  %v1997_v45 = vpack.c.bf16 %v1979_v19, %v1978_v13  ;;  %v1535_v13 = vld [vmem:[#allocation2 + $0x182] sm:$0xff]  ;;  %v1536_v19 = vld [vmem:[#allocation2 + $0x18a] sm:$0xff]  ;;  %4848 = vst.msk [vmem:[#allocation4 + $0x190] sm:$0x3] %vm4799_vm7, %v10715_v11 }
 0x26d   : > { %3710 = vrot.lane.b32.xlu0 %v9105_v44, %s8099_s18  ;;  %3934 = vrot.lane.b32.xlu2 %v9107_v21, %s8101_s23  ;;  %v2085_v41 = vpop.f32.mrf.mxu3  ;;  %v9118_v48 = vpop.f32.mrf.mxu1  ;;  %v3008_v29 = vld [vmem:[#allocation3 + $0x61] sm:$0xff]  ;;  %4851 = vst.msk [vmem:[#allocation4 + $0x1a8] sm:$0x3] %vm4799_vm7, %v10715_v11 }
 0x26e   : > { %2530 = vst.msk [vmem:[#allocation3 + $0x69] sm:$0xff] %vm2466_vm3, %v2441_v34  ;;  %v2153_v9 = vadd.f32 %v2085_v41, %v1928_v7  ;;  %v9122_v43 = vpop.f32.mrf.mxu2  ;;  %v2944_v37 = vld [vmem:[#allocation3 + $0x60] sm:$0xff]  ;;  %v3040_v4 = vpack.c.bf16 %v3008_v29, %v3008_v29  ;;  %4499 = vmatpush.bf16.msrb.mxu1 %v7929_v17  ;;  %v3664_v41 = vunpack.c.l.b16 %v2911_v20  ;;  %v1708_v17 = vadd.f32 %v9092_v30, %v8719_v26 }
 0x26f   : > { %v2976_v10 = vpack.c.bf16 %v2944_v37, %v2944_v37 }
 0x270   : > { %v2374_v55 = vadd.f32 %v9064_v27, %v2153_v9  ;;  %v1929_v27 = vadd.f32 %v9046_v31, %v1707_v2  ;;  %v3888_v2 = vunpack.c.l.b16 %v3040_v4 }
 0x271   : > { %v9130_v56 = vpop.f32.mrf.mxu0  ;;  %v3776_v20 = vunpack.c.l.b16 %v2976_v10 }
 0x272   : > { %v2410_v3 = vadd.f32 %v8963_v59, %v2374_v55  ;;  %7637 = vmatmul.msk.bf16.gmra.mxu2 %vm366_vm0, %v1778_v61  ;;  %v3665_v61 = vunpack.c.l.b16 %v2912_v47  ;;  %4500 = vmatpush.bf16.msrb.mxu1 %v7928_v51  ;;  %v7927_v55 = vld [vmem:[%s10669_s3 + $0x20] sm:$0xff] }
 0x274   : > { %v2442_v40 = vmax.f32 %v2410_v3, 0.0  ;;  %3408 = vrot.lane.b32.xlu1 %v9105_v44, %s8100_s22  ;;  %v9167_v51 = vpack.c.b16 %v3665_v61, %v3664_v41  ;;  %v7925_v41 = vld [vmem:[%s10669_s3 + $0x10] sm:$0xff] }
 0x275   : > { %3296 = vrot.lane.b32.xlu0 %v9068_v0, %s8099_s18  ;;  %3520 = vrot.lane.b32.xlu2 %v3805_v58, %s8101_s23  ;;  %v2087_v35 = vpop.f32.mrf.mxu3  ;;  %v9143_v57 = vpop.f32.mrf.mxu1  ;;  %v3009_v7 = vld [vmem:[#allocation3 + $0x69] sm:$0xff]  ;;  %v7940_v58 = vld [vmem:[%s10669_s3 + $0x88] sm:$0xff] }
 0x276   : > { %v2945_v34 = vld [vmem:[#allocation3 + $0x68] sm:$0xff]  ;;  %2531 = vst.msk [vmem:[#allocation3 + $0x79] sm:$0xff] %vm2466_vm3, %v2442_v40  ;;  %v2154_v31 = vadd.f32 %v2087_v35, %v1929_v27  ;;  %v3041_v9 = vpack.c.bf16 %v3009_v7, %v3009_v7  ;;  %v9146_v22 = vpop.f32.mrf.mxu2  ;;  %4682 = vmatpush.bf16.msrb.mxu3 %v7940_v58  ;;  %4501 = vmatpush.bf16.msrb.mxu1 %v7927_v55  ;;  %v1980_v55 = vld [vmem:[#allocation2 + $0x181] sm:$0xff] }
 0x277   : > { %v2977_v6 = vpack.c.bf16 %v2945_v34, %v2945_v34  ;;  %v7938_v0 = vld [vmem:[%s10669_s3 + $0x78] sm:$0xff]  ;;  %v1930_v27 = vadd.f32 %v9058_v60, %v1708_v17 }
 0x278   : > { %v2375_v29 = vadd.f32 %v9084_v15, %v2154_v31  ;;  %7620 = vmatmul.msk.bf16.gmra.mxu1 %vm366_vm0, %v1551_v63  ;;  %v3889_v37 = vunpack.c.l.b16 %v3041_v9  ;;  %4587 = vmatpush.bf16.msrb.mxu2 %v7938_v0  ;;  %v1552_v15 = vpack.c.bf16 %v1536_v19, %v1535_v13  ;;  %v7926_v63 = vld [vmem:[%s10669_s3 + $0x18] sm:$0xff]  ;;  %v1709_v31 = vadd.f32 %v9118_v48, %v8725_v5 }
 0x279   : > { %v3777_v3 = vunpack.c.l.b16 %v2977_v6  ;;  %v9161_v47 = vpop.f32.mrf.mxu0  ;;  %v2881_v7 = vld [vmem:[#allocation3 + $0x62] sm:$0xff]  ;;  %v2882_v34 = vld [vmem:[#allocation3 + $0x6a] sm:$0xff] }
 0x27a   : > { %v2411_v26 = vadd.f32 %v8963_v59, %v2375_v29  ;;  %7651 = vmatmul.msk.bf16.gmra.mxu3 %vm366_vm0, %v1997_v45  ;;  %v9165_v30 = vpack.c.b16 %v3889_v37, %v3888_v2  ;;  %4502 = vmatpush.bf16.msrb.mxu1 %v7926_v63  ;;  %v2913_v0 = vpack.c.bf16 %v2881_v7, %v2881_v7  ;;  %v1981_v29 = vld [vmem:[#allocation2 + $0x189] sm:$0xff]  ;;  %v2207_v7 = vld [vmem:[#allocation2 + $0x19a] sm:$0xff] }
 0x27b   : > { %v3806_v4 = vpack.c.b16 %v3777_v3, %v3776_v20  ;;  %v2914_v58 = vpack.c.bf16 %v2882_v34, %v2882_v34  ;;  %v7924_v20 = vld [vmem:[%s10669_s3 + $0x8] sm:$0xff]  ;;  %v1931_v5 = vadd.f32 %v9079_v62, %v1709_v31 }
 0x27c   : > { %v2443_v40 = vmax.f32 %v2411_v26, 0.0  ;;  %7668 = vmatmul.msk.bf16.gmra.mxu0 %vm366_vm0, %v1552_v15  ;;  %v3666_v63 = vunpack.c.l.b16 %v2913_v0  ;;  %v2208_v34 = vld [vmem:[#allocation2 + $0x1a2] sm:$0xff] }
 0x27d   : > { %3824 = vrot.lane.b32.xlu1 %v3806_v4, %s8100_s22  ;;  %3712 = vrot.lane.b32.xlu0 %v9167_v51, %s8099_s18  ;;  %v2090_v10 = vpop.f32.mrf.mxu3  ;;  %v9178_v35 = vpop.f32.mrf.mxu1  ;;  %v3010_v6 = vld [vmem:[#allocation3 + $0x79] sm:$0xff] }
 0x27e   : > { %3936 = vrot.lane.b32.xlu2 %v9165_v30, %s8101_s23  ;;  %2532 = vst.msk [vmem:[#allocation3 + $0x81] sm:$0xff] %vm2466_vm3, %v2443_v40  ;;  %v2155_v45 = vadd.f32 %v2090_v10, %v1930_v27  ;;  %v9182_v60 = vpop.f32.mrf.mxu2  ;;  %v2946_v61 = vld [vmem:[#allocation3 + $0x78] sm:$0xff]  ;;  %v3042_v37 = vpack.c.bf16 %v3010_v6, %v3010_v6  ;;  %4503 = vmatpush.bf16.msrb.mxu1 %v7925_v41  ;;  %v3667_v27 = vunpack.c.l.b16 %v2914_v58 }
 0x27f   : > { %v1998_v40 = vpack.c.bf16 %v1981_v29, %v1980_v55 }
 0x280   : > { %v2376_v9 = vadd.f32 %v9101_v28, %v2155_v45  ;;  %v2978_v28 = vpack.c.bf16 %v2946_v61, %v2946_v61  ;;  %v3890_v41 = vunpack.c.l.b16 %v3042_v37  ;;  %v9214_v58 = vpack.c.b16 %v3667_v27, %v3666_v63 }
 0x281   : > { %v9190_v17 = vpop.f32.mrf.mxu0 }
 0x282   : > { %v2412_v2 = vadd.f32 %v8963_v59, %v2376_v9  ;;  %4504 = vmatpush.bf16.msrb.mxu1 %v7924_v20  ;;  %v3778_v6 = vunpack.c.l.b16 %v2978_v28 }
 0x284   : > { %v2444_v48 = vmax.f32 %v2412_v2, 0.0 }
 0x285   : > { %3410 = vrot.lane.b32.xlu1 %v9167_v51, %s8100_s22  ;;  %3298 = vrot.lane.b32.xlu0 %v9107_v21, %s8099_s18  ;;  %v2092_v3 = vpop.f32.mrf.mxu3  ;;  %v9202_v13 = vpop.f32.mrf.mxu1  ;;  %v3011_v19 = vld [vmem:[#allocation3 + $0x81] sm:$0xff]  ;;  %v1710_v21 = vadd.f32 %v9143_v57, %v8730_v52  ;;  %v2224_v52 = vpack.c.bf16 %v2208_v34, %v2207_v7  ;;  %v7939_v57 = vld [vmem:[%s10669_s3 + $0x80] sm:$0xff] }
 0x286   : > { %3522 = vrot.lane.b32.xlu2 %v3806_v4, %s8101_s23  ;;  %v2947_v26 = vld [vmem:[#allocation3 + $0x80] sm:$0xff]  ;;  %2533 = vst.msk [vmem:[#allocation3 + $0x91] sm:$0xff] %vm2466_vm3, %v2444_v48  ;;  %v2156_v62 = vadd.f32 %v2092_v3, %v1931_v5  ;;  %v3043_v10 = vpack.c.bf16 %v3011_v19, %v3011_v19  ;;  %v7923_v4 = vld [vmem:[%s10669_s3] sm:$0xff]  ;;  %v9212_v0 = vpop.f32.mrf.mxu2  ;;  %4683 = vmatpush.bf16.msrb.mxu3 %v7939_v57 }
 0x287   : > { %v2979_v45 = vpack.c.bf16 %v2947_v26, %v2947_v26  ;;  %4505 = vmatpush.bf16.msrb.mxu1 %v7923_v4  ;;  %v1932_v29 = vadd.f32 %v9095_v39, %v1710_v21  ;;  %v2883_v48 = vld [vmem:[#allocation3 + $0x7a] sm:$0xff]  ;;  %v2884_v28 = vld [vmem:[#allocation3 + $0x82] sm:$0xff]  ;;  %v1711_v3 = vadd.f32 %v9178_v35, %v8737_v53 }
 0x288   : > { %v2377_v31 = vadd.f32 %v9130_v56, %v2156_v62  ;;  %7621 = vmatmul.msk.bf16.gmra.mxu1 %vm366_vm0, %v1552_v15  ;;  %v3891_v9 = vunpack.c.l.b16 %v3043_v10  ;;  %v2915_v27 = vpack.c.bf16 %v2883_v48, %v2883_v48  ;;  %v2916_v62 = vpack.c.bf16 %v2884_v28, %v2884_v28  ;;  %v1982_v53 = vld [vmem:[#allocation2 + $0x199] sm:$0xff] }
 0x289   : > { %v3779_v61 = vunpack.c.l.b16 %v2979_v45  ;;  %v9216_v2 = vpop.f32.mrf.mxu0  ;;  %v1933_v7 = vadd.f32 %v9122_v43, %v1711_v3 }
 0x28a   : > { %v2413_v55 = vadd.f32 %v8963_v59, %v2377_v31  ;;  %7652 = vmatmul.msk.bf16.gmra.mxu3 %vm366_vm0, %v1998_v40  ;;  %v9223_v56 = vpack.c.b16 %v3891_v9, %v3890_v41  ;;  %v3669_v43 = vunpack.c.l.b16 %v2916_v62 }
 0x28b   : > { %v3807_v15 = vpack.c.b16 %v3779_v61, %v3778_v6  ;;  %v3668_v6 = vunpack.c.l.b16 %v2915_v27 }
 0x28c   : > { %v2445_v37 = vmax.f32 %v2413_v55, 0.0  ;;  %7669 = vmatmul.msk.bf16.gmra.mxu0 %vm366_vm0, %v2224_v52  ;;  %v7937_v55 = vld [vmem:[%s10669_s3 + $0x70] sm:$0xff] }
 0x28d   : > { %3826 = vrot.lane.b32.xlu1 %v3807_v15, %s8100_s22  ;;  %3714 = vrot.lane.b32.xlu0 %v9214_v58, %s8099_s18  ;;  %v2095_v20 = vpop.f32.mrf.mxu3  ;;  %v9237_v5 = vpop.f32.mrf.mxu1  ;;  %v3012_v26 = vld [vmem:[#allocation3 + $0x91] sm:$0xff]  ;;  %v9284_v28 = vpack.c.b16 %v3669_v43, %v3668_v6 }
 0x28e   : > { %3938 = vrot.lane.b32.xlu2 %v9223_v56, %s8101_s23  ;;  %2534 = vst.msk [vmem:[#allocation3 + $0x99] sm:$0xff] %vm2466_vm3, %v2445_v37  ;;  %v2157_v39 = vadd.f32 %v2095_v20, %v1932_v29  ;;  %v2948_v63 = vld [vmem:[#allocation3 + $0x90] sm:$0xff]  ;;  %v9255_v45 = vpop.f32.mrf.mxu2  ;;  %v3044_v35 = vpack.c.bf16 %v3012_v26, %v3012_v26  ;;  %4588 = vmatpush.bf16.msrb.mxu2 %v7937_v55  ;;  %v2555_v26 = vld [vmem:[#allocation3] sm:$0xff] }
 0x28f   : > { %v2980_v21 = vpack.c.bf16 %v2948_v63, %v2948_v63  ;;  %v7935_v6 = vld [vmem:[%s10669_s3 + $0x60] sm:$0xff] }
 0x290   : > { %v2378_v19 = vadd.f32 %v9161_v47, %v2157_v39  ;;  %v1983_v47 = vld [vmem:[#allocation2 + $0x1a1] sm:$0xff]  ;;  %v3892_v29 = vunpack.c.l.b16 %v3044_v35  ;;  %v2587_v35 = vpack.c.bf16 %v2555_v26, %v2555_v26 }
 0x291   : > { %v9252_v40 = vpop.f32.mrf.mxu0  ;;  %v3780_v39 = vunpack.c.l.b16 %v2980_v21 }
 0x292   : > { %v2414_v10 = vadd.f32 %v8963_v59, %v2378_v19  ;;  %v2556_v19 = vld [vmem:[#allocation3 + $0x8] sm:$0xff] }
 0x294   : > { %v2446_v34 = vmax.f32 %v2414_v10, 0.0  ;;  %v7936_v10 = vld [vmem:[%s10669_s3 + $0x68] sm:$0xff] }
 0x295   : > { %3412 = vrot.lane.b32.xlu1 %v9214_v58, %s8100_s22  ;;  %3300 = vrot.lane.b32.xlu0 %v9165_v30, %s8099_s18  ;;  %v2097_v41 = vpop.f32.mrf.mxu3  ;;  %v9269_v4 = vpop.f32.mrf.mxu1  ;;  %v3013_v31 = vld [vmem:[#allocation3 + $0x99] sm:$0xff]  ;;  %v1999_v30 = vpack.c.bf16 %v1983_v47, %v1982_v53  ;;  %v2588_v47 = vpack.c.bf16 %v2556_v19, %v2556_v19 }
 0x296   : > { %3524 = vrot.lane.b32.xlu2 %v3807_v15, %s8101_s23  ;;  %v2949_v9 = vld [vmem:[#allocation3 + $0x98] sm:$0xff]  ;;  %2535 = vst.msk [vmem:[#allocation3 + $0xa9] sm:$0xff] %vm2466_vm3, %v2446_v34  ;;  %v2158_v61 = vadd.f32 %v2097_v41, %v1933_v7  ;;  %v3045_v52 = vpack.c.bf16 %v3013_v31, %v3013_v31  ;;  %v1712_v15 = vadd.f32 %v9202_v13, %v8743_v33  ;;  %v9304_v62 = vpop.f32.mrf.mxu2  ;;  %v3405_v34 = vpop.permute.xlu2 %3404 }
 0x297   : > { %v2981_v57 = vpack.c.bf16 %v2949_v9, %v2949_v9  ;;  %v2885_v21 = vld [vmem:[#allocation3 + $0x92] sm:$0xff]  ;;  %v2886_v41 = vld [vmem:[#allocation3 + $0x9a] sm:$0xff]  ;;  %4589 = vmatpush.bf16.msrb.mxu2 %v7936_v10  ;;  %v1713_v31 = vadd.f32 %v9237_v5, %v8750_v16  ;;  %v3165_v43 = vunpack.c.l.b16 %v2588_v47  ;;  %v1714_v10 = vadd.f32 %v9269_v4, %v8756_v1 }
 0x298   : > { %v2379_v37 = vadd.f32 %v9190_v17, %v2158_v61  ;;  %v3893_v20 = vunpack.c.l.b16 %v3045_v52  ;;  %v1934_v63 = vadd.f32 %v9146_v22, %v1712_v15  ;;  %v3164_v61 = vunpack.c.l.b16 %v2587_v35  ;;  %v7933_v1 = vld [vmem:[%s10669_s3 + $0x50] sm:$0xff] }
 0x299   : > { %v3781_v48 = vunpack.c.l.b16 %v2981_v57  ;;  %v9288_v3 = vpop.f32.mrf.mxu0  ;;  %v2917_v52 = vpack.c.bf16 %v2885_v21, %v2885_v21  ;;  %v2918_v57 = vpack.c.bf16 %v2886_v41, %v2886_v41  ;;  %v1935_v5 = vadd.f32 %v9182_v60, %v1713_v31 }
 0x29a   : > { %v2415_v33 = vadd.f32 %v8963_v59, %v2379_v37  ;;  %7653 = vmatmul.msk.bf16.gmra.mxu3 %vm366_vm0, %v1999_v30  ;;  %v9292_v13 = vpack.c.b16 %v3893_v20, %v3892_v29  ;;  %v7934_v29 = vld [vmem:[%s10669_s3 + $0x58] sm:$0xff]  ;;  %v3196_v37 = vpack.c.b16 %v3165_v43, %v3164_v61 }
 0x29b   : > { %v3808_v17 = vpack.c.b16 %v3781_v48, %v3780_v39  ;;  %4590 = vmatpush.bf16.msrb.mxu2 %v7935_v6  ;;  %v3671_v19 = vunpack.c.l.b16 %v2918_v57  ;;  %v1936_v57 = vadd.f32 %v9212_v0, %v1714_v10 }
 0x29c   : > { %v2447_v27 = vmax.f32 %v2415_v33, 0.0  ;;  %v3670_v33 = vunpack.c.l.b16 %v2917_v52 }
 0x29d   : > { %3828 = vrot.lane.b32.xlu1 %v3808_v17, %s8100_s22  ;;  %3716 = vrot.lane.b32.xlu0 %v9284_v28, %s8099_s18  ;;  %v2100_v53 = vpop.f32.mrf.mxu3  ;;  %v9311_v22 = vpop.f32.mrf.mxu1  ;;  %v3014_v30 = vld [vmem:[#allocation3 + $0xa9] sm:$0xff] }
 0x29e   : > { %3940 = vrot.lane.b32.xlu2 %v9292_v13, %s8101_s23  ;;  %2536 = vst.msk [vmem:[#allocation3 + $0xb1] sm:$0xff] %vm2466_vm3, %v2447_v27  ;;  %v2159_v7 = vadd.f32 %v2100_v53, %v1934_v63  ;;  %v3293_v53 = vpop.permute.xlu1 %3292 }
 0x29f   : > { %4591 = vmatpush.bf16.msrb.mxu2 %v7934_v29  ;;  %v4046_v4 = vsel %vm2466_vm3, %v3196_v37, %v3293_v53  ;;  %v1715_v29 = vadd.f32 %v9311_v22, %v8763_v36 }
 0x2a0   : > { %v2380_v9 = vadd.f32 %v9216_v2, %v2159_v7  ;;  %v2950_v2 = vld [vmem:[#allocation3 + $0xa8] sm:$0xff]  ;;  %v4094_v43 = vsel %vm4092_vm5, %v4046_v4, %v3405_v34 }
 0x2a1   : > { %v9328_v55 = vpop.f32.mrf.mxu0 }
 0x2a2   : > { %v2416_v16 = vadd.f32 %v8963_v59, %v2380_v9  ;;  %v3046_v59 = vpack.c.bf16 %v3014_v30, %v3014_v30  ;;  %v9366_v9 = vpack.c.b16 %v3671_v19, %v3670_v33 }
 0x2a3   : > { %4592 = vmatpush.bf16.msrb.mxu2 %v7933_v1 }
 0x2a4   : > { %v2448_v15 = vmax.f32 %v2416_v16, 0.0  ;;  %v3894_v7 = vunpack.c.l.b16 %v3046_v59 }
 0x2a5   : > { %3414 = vrot.lane.b32.xlu1 %v9284_v28, %s8100_s22  ;;  %3302 = vrot.lane.b32.xlu0 %v9223_v56, %s8099_s18  ;;  %v2102_v20 = vpop.f32.mrf.mxu3  ;;  %v9348_v60 = vpop.f32.mrf.mxu1  ;;  %v3015_v39 = vld [vmem:[#allocation3 + $0xb1] sm:$0xff]  ;;  %v2982_v56 = vpack.c.bf16 %v2950_v2, %v2950_v2 }
 0x2a6   : > { %3526 = vrot.lane.b32.xlu2 %v3808_v17, %s8101_s23  ;;  %v2951_v48 = vld [vmem:[#allocation3 + $0xb0] sm:$0xff]  ;;  %2537 = vst.msk [vmem:[#allocation3 + $0xc1] sm:$0xff] %vm2466_vm3, %v2448_v15  ;;  %v2160_v26 = vadd.f32 %v2102_v20, %v1935_v5  ;;  %v3047_v63 = vpack.c.bf16 %v3015_v39, %v3015_v39  ;;  %v9355_v17 = vpop.f32.mrf.mxu2 }
 0x2a7   : > { %v2983_v27 = vpack.c.bf16 %v2951_v48, %v2951_v48  ;;  %v3517_v47 = vpop.permute.xlu2 %3516  ;;  %v3782_v31 = vunpack.c.l.b16 %v2982_v56  ;;  %v2887_v15 = vld [vmem:[#allocation3 + $0xaa] sm:$0xff]  ;;  %v2888_v59 = vld [vmem:[#allocation3 + $0xb2] sm:$0xff] }
 0x2a8   : > { %v2381_v35 = vadd.f32 %v9252_v40, %v2160_v26  ;;  %v3895_v21 = vunpack.c.l.b16 %v3047_v63  ;;  %v9376_v40 = vld [vmem:[%s10668_s2] ss:$0 sm:$0xff]  ;;  %v4127_v52 = vsel %vm4125_vm6, %v4094_v43, %v3517_v47  ;;  %v2919_v36 = vpack.c.bf16 %v2887_v15, %v2887_v15 }
 0x2a9   : > { %v3783_v41 = vunpack.c.l.b16 %v2983_v27  ;;  %v9368_v6 = vpop.f32.mrf.mxu0  ;;  %4506 = vmatmul.bf16.vlgmr.msrb.gmra.mxu1 %v4127_v52  ;;  %v7931_v20 = vld [vmem:[%s10669_s3 + $0x40] sm:$0xff]  ;;  %v2920_v22 = vpack.c.bf16 %v2888_v59, %v2888_v59 }
 0x2aa   : > { %v2417_v61 = vadd.f32 %v9376_v40, %v2381_v35  ;;  %7742 = vmatmul.msk.bf16.vlgmr.msrb.gmra.mxu3 %vm2466_vm3, %v9105_v44  ;;  %v9381_v30 = vpack.c.b16 %v3895_v21, %v3894_v7  ;;  %v7932_v44 = vld [vmem:[%s10669_s3 + $0x48] sm:$0xff]  ;;  %v3672_v53 = vunpack.c.l.b16 %v2919_v36 }
 0x2ab   : > { %v3809_v34 = vpack.c.b16 %v3783_v41, %v3782_v31  ;;  %4593 = vmatpush.bf16.msrb.mxu2 %v7932_v44  ;;  %v3673_v47 = vunpack.c.l.b16 %v2920_v22 }
 0x2ac   : > { %v2449_v2 = vmax.f32 %v2417_v61, 0.0 }
 0x2ad   : > { %3718 = vrot.lane.b32.xlu0 %v9366_v9, %s8099_s18  ;;  %3830 = vrot.lane.b32.xlu1 %v3809_v34, %s8100_s22  ;;  %v2105_v0 = vpop.f32.mrf.mxu3  ;;  %v1665_v16 = vpop.f32.mrf.mxu1  ;;  %v3016_v19 = vld [vmem:[#allocation3 + $0xc1] sm:$0xff]  ;;  %v9436_v61 = vpack.c.b16 %v3673_v47, %v3672_v53 }
 0x2ae   : > { %3942 = vrot.lane.b32.xlu2 %v9381_v30, %s8101_s23  ;;  %v2161_v5 = vadd.f32 %v2105_v0, %v1936_v57  ;;  %2538 = vst.msk [vmem:[#allocation3 + $0xc9] sm:$0xff] %vm2466_vm3, %v2449_v2  ;;  %v9417_v56 = vpop.f32.mrf.mxu2  ;;  %v2952_v27 = vld [vmem:[#allocation3 + $0xc0] sm:$0xff]  ;;  %v3048_v35 = vpack.c.bf16 %v3016_v19, %v3016_v19 }
 0x2af   : > { %4594 = vmatpush.bf16.msrb.mxu2 %v7931_v20  ;;  %v2984_v7 = vpack.c.bf16 %v2952_v27, %v2952_v27  ;;  %v2812_v20 = vld [vmem:[#allocation3 + $0x21] sm:$0xff] }
 0x2b0   : > { %v2382_v37 = vadd.f32 %v9288_v3, %v2161_v5  ;;  %v1937_v3 = vadd.f32 %v9255_v45, %v1715_v29  ;;  %v1716_v45 = vadd.f32 %v9348_v60, %v8769_v38  ;;  %v3896_v38 = vunpack.c.l.b16 %v3048_v35 }
 0x2b1   : > { %v9413_v39 = vpop.f32.mrf.mxu0  ;;  %v2844_v27 = vpack.c.bf16 %v2812_v20, %v2812_v20  ;;  %v2557_v20 = vld [vmem:[#allocation3 + $0x18] sm:$0xff] }
 0x2b2   : > { %v2418_v48 = vadd.f32 %v9376_v40, %v2382_v37  ;;  %v1938_v52 = vadd.f32 %v9304_v62, %v1716_v45  ;;  %v1717_v37 = vadd.f32 %v1665_v16, %v8776_v54 }
 0x2b4   : > { %v2450_v33 = vmax.f32 %v2418_v48, 0.0  ;;  %v1939_v54 = vadd.f32 %v9355_v17, %v1717_v37 }
 0x2b5   : > { %3304 = vrot.lane.b32.xlu0 %v9292_v13, %s8099_s18  ;;  %3416 = vrot.lane.b32.xlu1 %v9366_v9, %s8100_s22  ;;  %v2107_v26 = vpop.f32.mrf.mxu3  ;;  %v9425_v63 = vpop.f32.mrf.mxu1  ;;  %v3017_v21 = vld [vmem:[#allocation3 + $0xc9] sm:$0xff] }
 0x2b6   : > { %3528 = vrot.lane.b32.xlu2 %v3809_v34, %s8101_s23  ;;  %2539 = vst.msk [vmem:[#allocation3 + $0xd9] sm:$0xff] %vm2466_vm3, %v2450_v33  ;;  %v2162_v10 = vadd.f32 %v2107_v26, %v1937_v3  ;;  %v2953_v41 = vld [vmem:[#allocation3 + $0xc8] sm:$0xff]  ;;  %v3049_v31 = vpack.c.bf16 %v3017_v21, %v3017_v21  ;;  %v9441_v44 = vpop.f32.mrf.mxu2  ;;  %v2811_v33 = vld [vmem:[#allocation3 + $0x19] sm:$0xff] }
 0x2b7   : > { %v2985_v43 = vpack.c.bf16 %v2953_v41, %v2953_v41  ;;  %v2889_v62 = vld [vmem:[#allocation3 + $0xc2] sm:$0xff]  ;;  %v2890_v59 = vld [vmem:[#allocation3 + $0xca] sm:$0xff]  ;;  %v9448_v29 = vpop.permute.xlu2 %3518  ;;  %v2843_v53 = vpack.c.bf16 %v2811_v33, %v2811_v33 }
 0x2b8   : > { %v2383_v13 = vadd.f32 %v9328_v55, %v2162_v10  ;;  %v3897_v34 = vunpack.c.l.b16 %v3049_v31  ;;  %v3784_v55 = vunpack.c.l.b16 %v2984_v7  ;;  %v2921_v36 = vpack.c.bf16 %v2889_v62, %v2889_v62 }
 0x2b9   : > { %v9431_v1 = vpop.f32.mrf.mxu0  ;;  %v3785_v57 = vunpack.c.l.b16 %v2985_v43  ;;  %v2922_v22 = vpack.c.bf16 %v2890_v59, %v2890_v59 }
 0x2ba   : > { %v2419_v4 = vadd.f32 %v9376_v40, %v2383_v13  ;;  %7743 = vmatmul.msk.bf16.gmra.mxu3 %vm2466_vm3, %v9167_v51  ;;  %v9446_v51 = vpack.c.b16 %v3897_v34, %v3896_v38  ;;  %v3674_v7 = vunpack.c.l.b16 %v2921_v36 }
 0x2bb   : > { %v3810_v5 = vpack.c.b16 %v3785_v57, %v3784_v55  ;;  %v3675_v21 = vunpack.c.l.b16 %v2922_v22 }
 0x2bc   : > { %v2451_v60 = vmax.f32 %v2419_v4, 0.0 }
 0x2bd   : > { %3720 = vrot.lane.b32.xlu0 %v9436_v61, %s8099_s18  ;;  %v2110_v0 = vpop.f32.mrf.mxu3  ;;  %v9443_v2 = vpop.f32.mrf.mxu1  ;;  %3832 = vrot.lane.b32.xlu1 %v3810_v5, %s8100_s22  ;;  %v3018_v26 = vld [vmem:[#allocation3 + $0xd9] sm:$0xff] }
 0x2be   : > { %2540 = vst.msk [vmem:[#allocation3 + $0xe1] sm:$0xff] %vm2466_vm3, %v2451_v60  ;;  %v2163_v15 = vadd.f32 %v2110_v0, %v1938_v52  ;;  %3944 = vrot.lane.b32.xlu2 %v9446_v51, %s8101_s23  ;;  %v2954_v10 = vld [vmem:[#allocation3 + $0xd8] sm:$0xff]  ;;  %v3050_v35 = vpack.c.bf16 %v3018_v26, %v3018_v26  ;;  %v3709_v41 = vpop.permute.xlu0 %3708  ;;  %v3581_v52 = vunpack.c.l.b16 %v2844_v27  ;;  %v1718_v60 = vadd.f32 %v9425_v63, %v8782_v24  ;;  %v2558_v0 = vld [vmem:[#allocation3 + $0x20] sm:$0xff] }
 0x2bf   : > { %v2986_v43 = vpack.c.bf16 %v2954_v10, %v2954_v10  ;;  %v9479_v63 = vpack.c.b16 %v3675_v21, %v3674_v7 }
 0x2c0   : > { %v2384_v48 = vadd.f32 %v9368_v6, %v2163_v15  ;;  %v3580_v15 = vunpack.c.l.b16 %v2843_v53  ;;  %v3898_v37 = vunpack.c.l.b16 %v3050_v35  ;;  %v1719_v35 = vadd.f32 %v9443_v2, %v8789_v25  ;;  %v2814_v25 = vld [vmem:[#allocation3 + $0x39] sm:$0xff] }
 0x2c1   : > { %v9455_v3 = vpop.f32.mrf.mxu0  ;;  %v3786_v24 = vunpack.c.l.b16 %v2986_v43 }
 0x2c2   : > { %v2420_v19 = vadd.f32 %v9376_v40, %v2384_v48  ;;  %v2590_v48 = vpack.c.bf16 %v2558_v0, %v2558_v0 }
 0x2c4   : > { %v2452_v16 = vmax.f32 %v2420_v19, 0.0  ;;  %v3167_v21 = vunpack.c.l.b16 %v2590_v48  ;;  %v2846_v48 = vpack.c.bf16 %v2814_v25, %v2814_v25 }
 0x2c5   : > { %3306 = vrot.lane.b32.xlu0 %v9381_v30, %s8099_s18  ;;  %v2112_v47 = vpop.f32.mrf.mxu3  ;;  %v9461_v45 = vpop.f32.mrf.mxu1  ;;  %v3019_v6 = vld [vmem:[#allocation3 + $0xe1] sm:$0xff]  ;;  %3418 = vrot.lane.b32.xlu1 %v9436_v61, %s8100_s22 }
 0x2c6   : > { %v2955_v13 = vld [vmem:[#allocation3 + $0xe0] sm:$0xff]  ;;  %2541 = vst.msk [vmem:[#allocation3 + $0xf1] sm:$0xff] %vm2466_vm3, %v2452_v16  ;;  %v2164_v4 = vadd.f32 %v2112_v47, %v1939_v54  ;;  %v3051_v31 = vpack.c.bf16 %v3019_v6, %v3019_v6  ;;  %v9466_v30 = vpop.f32.mrf.mxu2  ;;  %3530 = vrot.lane.b32.xlu2 %v3810_v5, %s8101_s23  ;;  %v3612_v5 = vpack.c.b16 %v3581_v52, %v3580_v15 }
 0x2c7   : > { %v2987_v17 = vpack.c.bf16 %v2955_v13, %v2955_v13  ;;  %v9464_v38 = vpop.permute.xlu2 %3934  ;;  %v2589_v16 = vpack.c.bf16 %v2557_v20, %v2557_v20  ;;  %v2891_v53 = vld [vmem:[#allocation3 + $0xda] sm:$0xff] }
 0x2c8   : > { %v2385_v34 = vadd.f32 %v9413_v39, %v2164_v4  ;;  %v3899_v55 = vunpack.c.l.b16 %v3051_v31  ;;  %v1940_v39 = vadd.f32 %v9417_v56, %v1718_v60  ;;  %v2892_v56 = vld [vmem:[#allocation3 + $0xe2] sm:$0xff]  ;;  %v2923_v4 = vpack.c.bf16 %v2891_v53, %v2891_v53 }
 0x2c9   : > { %v3787_v57 = vunpack.c.l.b16 %v2987_v17  ;;  %v9474_v62 = vpop.f32.mrf.mxu0  ;;  %v2924_v31 = vpack.c.bf16 %v2892_v56, %v2892_v56  ;;  %v3166_v17 = vunpack.c.l.b16 %v2589_v16  ;;  %v1720_v16 = vadd.f32 %v9461_v45, %v8795_v46 }
 0x2ca   : > { %v2421_v59 = vadd.f32 %v9376_v40, %v2385_v34  ;;  %7744 = vmatmul.msk.bf16.gmra.mxu3 %vm2466_vm3, %v9214_v58  ;;  %v9482_v22 = vpack.c.b16 %v3899_v55, %v3898_v37  ;;  %v4176_v58 = vsel %vm2466_vm3, %v3612_v5, %v3709_v41  ;;  %v1941_v34 = vadd.f32 %v9441_v44, %v1719_v35  ;;  %v2560_v35 = vld [vmem:[#allocation3 + $0x38] sm:$0xff] }
 0x2cb   : > { %v3811_v33 = vpack.c.b16 %v3787_v57, %v3786_v24  ;;  %v2813_v57 = vld [vmem:[#allocation3 + $0x31] sm:$0xff]  ;;  %v3676_v5 = vunpack.c.l.b16 %v2923_v4  ;;  %v3677_v20 = vunpack.c.l.b16 %v2924_v31 }
 0x2cc   : > { %v2453_v36 = vmax.f32 %v2421_v59, 0.0 }
 0x2cd   : > { %3722 = vrot.lane.b32.xlu0 %v9479_v63, %s8099_s18  ;;  %v2115_v19 = vpop.f32.mrf.mxu3  ;;  %v9486_v26 = vpop.f32.mrf.mxu1  ;;  %3834 = vrot.lane.b32.xlu1 %v3811_v33, %s8100_s22  ;;  %v3020_v52 = vld [vmem:[#allocation3 + $0xf1] sm:$0xff] }
 0x2ce   : > { %2542 = vst.msk [vmem:[#allocation3 + $0xf9] sm:$0xff] %vm2466_vm3, %v2453_v36  ;;  %v2165_v27 = vadd.f32 %v2115_v19, %v1940_v39  ;;  %v3933_v10 = vpop.permute.xlu1 %3932  ;;  %3946 = vrot.lane.b32.xlu2 %v9482_v22, %s8101_s23  ;;  %v9500_v41 = vpop.f32.mrf.mxu2  ;;  %v2956_v2 = vld [vmem:[#allocation3 + $0xf0] sm:$0xff]  ;;  %v3052_v37 = vpack.c.bf16 %v3020_v52, %v3020_v52  ;;  %v1942_v52 = vadd.f32 %v9466_v30, %v1720_v16 }
 0x2cf   : > { %v3821_v54 = vpop.permute.xlu0 %3820  ;;  %v9491_v6 = vpop.permute.xlu2 %3520 }
 0x2d0   : > { %v4223_v47 = vsel %vm4092_vm5, %v4176_v58, %v3821_v54  ;;  %v2386_v7 = vadd.f32 %v9431_v1, %v2165_v27  ;;  %v3197_v1 = vpack.c.b16 %v3167_v21, %v3166_v17  ;;  %v2988_v58 = vpack.c.bf16 %v2956_v2, %v2956_v2 }
 0x2d1   : > { %v4255_v13 = vsel %vm4125_vm6, %v4223_v47, %v3933_v10  ;;  %v9503_v60 = vpop.f32.mrf.mxu0  ;;  %v2845_v54 = vpack.c.bf16 %v2813_v57, %v2813_v57  ;;  %v3583_v21 = vunpack.c.l.b16 %v2846_v48  ;;  %v3900_v46 = vunpack.c.l.b16 %v3052_v37 }
 0x2d2   : > { %4595 = vmatmul.bf16.vlgmr.msrb.gmra.mxu2 %v4255_v13  ;;  %v2422_v43 = vadd.f32 %v9376_v40, %v2386_v7  ;;  %v3788_v45 = vunpack.c.l.b16 %v2988_v58  ;;  %v2592_v17 = vpack.c.bf16 %v2560_v35, %v2560_v35  ;;  %v1721_v48 = vadd.f32 %v9486_v26, %v8802_v42  ;;  %v2816_v26 = vld [vmem:[#allocation3 + $0x51] sm:$0xff] }
 0x2d3   : > { %v3582_v31 = vunpack.c.l.b16 %v2845_v54 }
 0x2d4   : > { %v2454_v55 = vmax.f32 %v2422_v43, 0.0  ;;  %v2559_v43 = vld [vmem:[#allocation3 + $0x30] sm:$0xff] }
 0x2d5   : > { %3308 = vrot.lane.b32.xlu0 %v9446_v51, %s8099_s18  ;;  %v2117_v0 = vpop.f32.mrf.mxu3  ;;  %v9508_v15 = vpop.f32.mrf.mxu1  ;;  %v3021_v59 = vld [vmem:[#allocation3 + $0xf9] sm:$0xff]  ;;  %3420 = vrot.lane.b32.xlu1 %v9479_v63, %s8100_s22 }
 0x2d6   : > { %v2957_v24 = vld [vmem:[#allocation3 + $0xf8] sm:$0xff]  ;;  %2543 = vst.msk [vmem:[#allocation3 + $0x109] sm:$0xff] %vm2466_vm3, %v2454_v55  ;;  %v2166_v39 = vadd.f32 %v2117_v0, %v1941_v34  ;;  %v3407_v36 = vpop.permute.xlu1 %3406  ;;  %v3053_v19 = vpack.c.bf16 %v3021_v59, %v3021_v59  ;;  %3532 = vrot.lane.b32.xlu2 %v3811_v33, %s8101_s23  ;;  %v9526_v33 = vpack.c.b16 %v3677_v20, %v3676_v5 }
 0x2d7   : > { %v3295_v44 = vpop.permute.xlu0 %3294  ;;  %v2989_v27 = vpack.c.bf16 %v2957_v24, %v2957_v24  ;;  %v2591_v59 = vpack.c.bf16 %v2559_v43, %v2559_v43  ;;  %v2893_v37 = vld [vmem:[#allocation3 + $0xf2] sm:$0xff]  ;;  %v2894_v24 = vld [vmem:[#allocation3 + $0xfa] sm:$0xff] }
 0x2d8   : > { %v4049_v51 = vsel %vm2466_vm3, %v3197_v1, %v3295_v44  ;;  %v9512_v10 = vpop.permute.xlu2 %3936  ;;  %v2387_v53 = vadd.f32 %v9455_v3, %v2166_v39  ;;  %v3901_v47 = vunpack.c.l.b16 %v3053_v19  ;;  %v9528_v3 = vpop.f32.mrf.mxu2  ;;  %v3169_v44 = vunpack.c.l.b16 %v2592_v17 }
 0x2d9   : > { %v4096_v56 = vsel %vm4092_vm5, %v4049_v51, %v3407_v36  ;;  %v3789_v7 = vunpack.c.l.b16 %v2989_v27  ;;  %v9535_v55 = vpop.f32.mrf.mxu0  ;;  %v2925_v58 = vpack.c.bf16 %v2893_v37, %v2893_v37  ;;  %v2926_v27 = vpack.c.bf16 %v2894_v24, %v2894_v24  ;;  %v2562_v37 = vld [vmem:[#allocation3 + $0x50] sm:$0xff] }
 0x2da   : > { %v4130_v13 = vsel %vm4125_vm6, %v4096_v56, %v9448_v29  ;;  %v2423_v4 = vadd.f32 %v9376_v40, %v2387_v53  ;;  %7745 = vmatmul.msk.bf16.gmra.mxu3 %vm2466_vm3, %v9284_v28  ;;  %v9531_v25 = vpack.c.b16 %v3901_v47, %v3900_v46  ;;  %v3613_v28 = vpack.c.b16 %v3583_v21, %v3582_v31  ;;  %v2815_v47 = vld [vmem:[#allocation3 + $0x49] sm:$0xff] }
 0x2db   : > { %4511 = vmatmul.bf16.gmra.mxu1 %v4130_v13  ;;  %v3812_v2 = vpack.c.b16 %v3789_v7, %v3788_v45  ;;  %v3168_v54 = vunpack.c.l.b16 %v2591_v59  ;;  %v1943_v53 = vadd.f32 %v9500_v41, %v1721_v48  ;;  %v3679_v46 = vunpack.c.l.b16 %v2926_v27 }
 0x2dc   : > { %v2455_v29 = vmax.f32 %v2423_v4, 0.0  ;;  %v3678_v4 = vunpack.c.l.b16 %v2925_v58  ;;  %v2848_v45 = vpack.c.bf16 %v2816_v26, %v2816_v26  ;;  %v2594_v58 = vpack.c.bf16 %v2562_v37, %v2562_v37 }
 0x2dd   : > { %3724 = vrot.lane.b32.xlu0 %v9526_v33, %s8099_s18  ;;  %v2120_v34 = vpop.f32.mrf.mxu3  ;;  %v9541_v20 = vpop.f32.mrf.mxu1  ;;  %3836 = vrot.lane.b32.xlu1 %v3812_v2, %s8100_s22  ;;  %v3022_v42 = vld [vmem:[#allocation3 + $0x109] sm:$0xff] }
 0x2de   : > { %2544 = vst.msk [vmem:[#allocation3 + $0x111] sm:$0xff] %vm2466_vm3, %v2455_v29  ;;  %v2167_v1 = vadd.f32 %v2120_v34, %v1942_v52  ;;  %v3823_v57 = vpop.permute.xlu1 %3822  ;;  %3948 = vrot.lane.b32.xlu2 %v9531_v25, %s8101_s23  ;;  %v2958_v16 = vld [vmem:[#allocation3 + $0x108] sm:$0xff]  ;;  %v3054_v7 = vpack.c.bf16 %v3022_v42, %v3022_v42 }
 0x2df   : > { %v3711_v0 = vpop.permute.xlu0 %3710  ;;  %v2990_v52 = vpack.c.bf16 %v2958_v16, %v2958_v16 }
 0x2e0   : > { %v4179_v30 = vsel %vm2466_vm3, %v3613_v28, %v3711_v0  ;;  %v9539_v5 = vpop.permute.xlu2 %3522  ;;  %v2388_v39 = vadd.f32 %v9474_v62, %v2167_v1  ;;  %v3198_v62 = vpack.c.b16 %v3169_v44, %v3168_v54  ;;  %v9556_v35 = vpop.f32.mrf.mxu2  ;;  %v2847_v28 = vpack.c.bf16 %v2815_v47, %v2815_v47 }
 0x2e1   : > { %v4225_v36 = vsel %vm4092_vm5, %v4179_v30, %v3823_v57  ;;  %v1722_v1 = vadd.f32 %v9508_v15, %v8808_v12  ;;  %v9569_v24 = vpop.f32.mrf.mxu0  ;;  %v9575_v12 = vpack.c.b16 %v3679_v46, %v3678_v4  ;;  %v3585_v15 = vunpack.c.l.b16 %v2848_v45 }
 0x2e2   : > { %v4258_v19 = vsel %vm4125_vm6, %v4225_v36, %v9464_v38  ;;  %v2424_v51 = vadd.f32 %v9376_v40, %v2388_v39  ;;  %v3790_v36 = vunpack.c.l.b16 %v2990_v52  ;;  %v3584_v44 = vunpack.c.l.b16 %v2847_v28 }
 0x2e3   : > { %4600 = vmatmul.bf16.gmra.mxu2 %v4258_v19  ;;  %v2561_v19 = vld [vmem:[#allocation3 + $0x48] sm:$0xff]  ;;  %v3171_v46 = vunpack.c.l.b16 %v2594_v58 }
 0x2e4   : > { %v2456_v56 = vmax.f32 %v2424_v51, 0.0  ;;  %v3614_v42 = vpack.c.b16 %v3585_v15, %v3584_v44 }
 0x2e5   : > { %3310 = vrot.lane.b32.xlu0 %v9482_v22, %s8099_s18  ;;  %v2122_v38 = vpop.f32.mrf.mxu3  ;;  %v3023_v13 = vld [vmem:[#allocation3 + $0x111] sm:$0xff]  ;;  %3422 = vrot.lane.b32.xlu1 %v9526_v33, %s8100_s22  ;;  %v9571_v30 = vpop.f32.mrf.mxu1 }
 0x2e6   : > { %v2959_v21 = vld [vmem:[#allocation3 + $0x110] sm:$0xff]  ;;  %2545 = vst.msk [vmem:[#allocation3 + $0x121] sm:$0xff] %vm2466_vm3, %v2456_v56  ;;  %v2168_v31 = vadd.f32 %v2122_v38, %v1943_v53  ;;  %v3409_v43 = vpop.permute.xlu1 %3408  ;;  %v3055_v17 = vpack.c.bf16 %v3023_v13, %v3023_v13  ;;  %3534 = vrot.lane.b32.xlu2 %v3812_v2, %s8101_s23  ;;  %v2593_v53 = vpack.c.bf16 %v2561_v19, %v2561_v19 }
 0x2e7   : > { %v3297_v41 = vpop.permute.xlu0 %3296  ;;  %v2991_v29 = vpack.c.bf16 %v2959_v21, %v2959_v21  ;;  %v2895_v56 = vld [vmem:[#allocation3 + $0x10a] sm:$0xff] }
 0x2e8   : > { %v9559_v22 = vpop.permute.xlu2 %3938  ;;  %v4052_v34 = vsel %vm2466_vm3, %v3198_v62, %v3297_v41  ;;  %v2389_v57 = vadd.f32 %v9503_v60, %v2168_v31  ;;  %v3903_v59 = vunpack.c.l.b16 %v3055_v17  ;;  %v3902_v60 = vunpack.c.l.b16 %v3054_v7  ;;  %v2896_v62 = vld [vmem:[#allocation3 + $0x112] sm:$0xff]  ;;  %v9594_v47 = vpop.f32.mrf.mxu2  ;;  %v2818_v17 = vld [vmem:[#allocation3 + $0x69] sm:$0xff] }
 0x2e9   : > { %v4098_v0 = vsel %vm4092_vm5, %v4052_v34, %v3409_v43  ;;  %v3791_v39 = vunpack.c.l.b16 %v2991_v29  ;;  %v1723_v7 = vadd.f32 %v9541_v20, %v8815_v32  ;;  %v2927_v31 = vpack.c.bf16 %v2895_v56, %v2895_v56  ;;  %v9614_v52 = vpop.f32.mrf.mxu0 }
 0x2ea   : > { %v4133_v48 = vsel %vm4125_vm6, %v4098_v0, %v9491_v6  ;;  %v2425_v2 = vadd.f32 %v9376_v40, %v2389_v57  ;;  %7746 = vmatmul.msk.bf16.gmra.mxu3 %vm2466_vm3, %v9366_v9  ;;  %v1944_v6 = vadd.f32 %v9528_v3, %v1722_v1  ;;  %v9583_v51 = vpack.c.b16 %v3903_v59, %v3902_v60  ;;  %v2817_v1 = vld [vmem:[#allocation3 + $0x61] sm:$0xff] }
 0x2eb   : > { %4516 = vmatmul.bf16.gmra.mxu1 %v4133_v48  ;;  %v9585_v54 = vpack.c.b16 %v3791_v39, %v3790_v36  ;;  %v2928_v43 = vpack.c.bf16 %v2896_v62, %v2896_v62  ;;  %v3170_v20 = vunpack.c.l.b16 %v2593_v53  ;;  %v3680_v48 = vunpack.c.l.b16 %v2927_v31 }
 0x2ec   : > { %v2457_v27 = vmax.f32 %v2425_v2, 0.0  ;;  %v2850_v15 = vpack.c.bf16 %v2818_v17, %v2818_v17 }
 0x2ed   : > { %3726 = vrot.lane.b32.xlu0 %v9575_v12, %s8099_s18  ;;  %v2125_v9 = vpop.f32.mrf.mxu3  ;;  %3838 = vrot.lane.b32.xlu1 %v9585_v54, %s8100_s22  ;;  %v3024_v41 = vld [vmem:[#allocation3 + $0x121] sm:$0xff]  ;;  %v3199_v28 = vpack.c.b16 %v3171_v46, %v3170_v20  ;;  %v3681_v39 = vunpack.c.l.b16 %v2928_v43 }
 0x2ee   : > { %2546 = vst.msk [vmem:[#allocation3 + $0x129] sm:$0xff] %vm2466_vm3, %v2457_v27  ;;  %v2169_v26 = vadd.f32 %v2125_v9, %v1944_v6  ;;  %3950 = vrot.lane.b32.xlu2 %v9583_v51, %s8101_s23  ;;  %v2960_v29 = vld [vmem:[#allocation3 + $0x120] sm:$0xff]  ;;  %v3056_v59 = vpack.c.bf16 %v3024_v41, %v3024_v41  ;;  %v2849_v6 = vpack.c.bf16 %v2817_v1, %v2817_v1  ;;  %v3587_v62 = vunpack.c.l.b16 %v2850_v15 }
 0x2ef   : > { %v3825_v3 = vpop.permute.xlu1 %3824  ;;  %v3713_v16 = vpop.permute.xlu0 %3712  ;;  %v2992_v36 = vpack.c.bf16 %v2960_v29, %v2960_v29  ;;  %v1724_v27 = vadd.f32 %v9571_v30, %v8821_v18 }
 0x2f0   : > { %v9596_v38 = vpop.permute.xlu2 %3524  ;;  %v4182_v13 = vsel %vm2466_vm3, %v3614_v42, %v3713_v16  ;;  %v2390_v21 = vadd.f32 %v9535_v55, %v2169_v26  ;;  %v9618_v55 = vpop.f32.mrf.mxu1 }
 0x2f1   : > { %v4227_v4 = vsel %vm4092_vm5, %v4182_v13, %v3825_v3  ;;  %v2564_v3 = vld [vmem:[#allocation3 + $0x68] sm:$0xff]  ;;  %v1907_v16 = vpop.f32.mrf.mxu2  ;;  %v3792_v30 = vunpack.c.l.b16 %v2992_v36  ;;  %v3586_v13 = vunpack.c.l.b16 %v2849_v6  ;;  %v1725_v1 = vadd.f32 %v9618_v55, %v8840_v50  ;;  %v2819_v36 = vld [vmem:[#allocation3 + $0x79] sm:$0xff] }
 0x2f2   : > { %v4261_v45 = vsel %vm4125_vm6, %v4227_v4, %v9512_v10  ;;  %v2426_v32 = vadd.f32 %v9376_v40, %v2390_v21  ;;  %v1945_v10 = vadd.f32 %v9556_v35, %v1723_v7  ;;  %v2596_v7 = vpack.c.bf16 %v2564_v3, %v2564_v3 }
 0x2f3   : > { %4605 = vmatmul.bf16.gmra.mxu2 %v4261_v45  ;;  %v1946_v21 = vadd.f32 %v9594_v47, %v1724_v27 }
 0x2f4   : > { %v2458_v34 = vmax.f32 %v2426_v32, 0.0  ;;  %v3615_v32 = vpack.c.b16 %v3587_v62, %v3586_v13 }
 0x2f5   : > { %3312 = vrot.lane.b32.xlu0 %v9531_v25, %s8099_s18  ;;  %v2127_v57 = vpop.f32.mrf.mxu3  ;;  %v3025_v0 = vld [vmem:[#allocation3 + $0x129] sm:$0xff]  ;;  %3424 = vrot.lane.b32.xlu1 %v9575_v12, %s8100_s22 }
 0x2f6   : > { %v2961_v37 = vld [vmem:[#allocation3 + $0x128] sm:$0xff]  ;;  %2547 = vst.msk [vmem:[#allocation3 + $0x139] sm:$0xff] %vm2466_vm3, %v2458_v34  ;;  %v2170_v35 = vadd.f32 %v2127_v57, %v1945_v10  ;;  %v3057_v60 = vpack.c.bf16 %v3025_v0, %v3025_v0  ;;  %3536 = vrot.lane.b32.xlu2 %v9585_v54, %s8101_s23  ;;  %v9650_v54 = vpack.c.b16 %v3681_v39, %v3680_v48 }
 0x2f7   : > { %v3411_v2 = vpop.permute.xlu1 %3410  ;;  %v3299_v25 = vpop.permute.xlu0 %3298  ;;  %v2993_v44 = vpack.c.bf16 %v2961_v37, %v2961_v37  ;;  %v2897_v29 = vld [vmem:[#allocation3 + $0x122] sm:$0xff]  ;;  %v2898_v10 = vld [vmem:[#allocation3 + $0x12a] sm:$0xff] }
 0x2f8   : > { %v9630_v19 = vpop.permute.xlu2 %3940  ;;  %v4055_v58 = vsel %vm2466_vm3, %v3199_v28, %v3299_v25  ;;  %v2391_v9 = vadd.f32 %v9569_v24, %v2170_v35  ;;  %v3905_v26 = vunpack.c.l.b16 %v3057_v60  ;;  %v3904_v24 = vunpack.c.l.b16 %v3056_v59  ;;  %v1688_v31 = vpop.f32.mrf.mxu1  ;;  %v2820_v35 = vld [vmem:[#allocation3 + $0x81] sm:$0xff] }
 0x2f9   : > { %v4100_v42 = vsel %vm4092_vm5, %v4055_v58, %v3411_v2  ;;  %v3793_v56 = vunpack.c.l.b16 %v2993_v44  ;;  %v3173_v59 = vunpack.c.l.b16 %v2596_v7  ;;  %v2929_v48 = vpack.c.bf16 %v2897_v29, %v2897_v29  ;;  %v4949_v44 = vld [vmem:[#allocation4 + $0x1] sm:$0xff]  ;;  %v4950_v58 = vld [vmem:[#allocation4 + $0x9] sm:$0xff] }
 0x2fa   : > { %v4136_v53 = vsel %vm4125_vm6, %v4100_v42, %v9539_v5  ;;  %v2427_v18 = vadd.f32 %v9376_v40, %v2391_v9  ;;  %7747 = vmatmul.msk.bf16.gmra.mxu3 %vm2466_vm3, %v9436_v61  ;;  %v2563_v5 = vld [vmem:[#allocation3 + $0x60] sm:$0xff]  ;;  %v9657_v46 = vpack.c.b16 %v3905_v26, %v3904_v24  ;;  %v9663_v61 = vpop.f32.mrf.mxu0  ;;  %v2930_v39 = vpack.c.bf16 %v2898_v10, %v2898_v10 }
 0x2fb   : > { %4521 = vmatmul.bf16.gmra.mxu1 %v4136_v53  ;;  %v9659_v45 = vpack.c.b16 %v3793_v56, %v3792_v30  ;;  %v2595_v17 = vpack.c.bf16 %v2563_v5, %v2563_v5  ;;  %v1947_v25 = vadd.f32 %v1907_v16, %v1725_v1  ;;  %v3682_v26 = vunpack.c.l.b16 %v2929_v48  ;;  %v2565_v48 = vld [vmem:[#allocation3 + $0x78] sm:$0xff] }
 0x2fc   : > { %v2459_v4 = vmax.f32 %v2427_v18, 0.0  ;;  %v3683_v3 = vunpack.c.l.b16 %v2930_v39  ;;  %v2852_v53 = vpack.c.bf16 %v2820_v35, %v2820_v35  ;;  %v2851_v30 = vpack.c.bf16 %v2819_v36, %v2819_v36 }
 0x2fd   : > { %3728 = vrot.lane.b32.xlu0 %v9650_v54, %s8099_s18  ;;  %v2130_v43 = vpop.f32.mrf.mxu3  ;;  %3840 = vrot.lane.b32.xlu1 %v9659_v45, %s8100_s22  ;;  %v3172_v55 = vunpack.c.l.b16 %v2595_v17  ;;  %v3026_v15 = vld [vmem:[#allocation3 + $0x139] sm:$0xff]  ;;  %v4981_v5 = vpack.c.bf16 %v4949_v44, %v4949_v44  ;;  %v4982_v7 = vpack.c.bf16 %v4950_v58, %v4950_v58 }
 0x2fe   : > { %2548 = vst.msk [vmem:[#allocation3 + $0x141] sm:$0xff] %vm2466_vm3, %v2459_v4  ;;  %v2171_v47 = vadd.f32 %v2130_v43, %v1946_v21  ;;  %3952 = vrot.lane.b32.xlu2 %v9657_v46, %s8101_s23  ;;  %v2962_v2 = vld [vmem:[#allocation3 + $0x138] sm:$0xff]  ;;  %v3058_v9 = vpack.c.bf16 %v3026_v15, %v3026_v15  ;;  %v1726_v21 = vadd.f32 %v1688_v31, %v8864_v23  ;;  %v3589_v29 = vunpack.c.l.b16 %v2852_v53 }
 0x2ff   : > { %v3827_v20 = vpop.permute.xlu1 %3826  ;;  %v3715_v41 = vpop.permute.xlu0 %3714  ;;  %v2994_v18 = vpack.c.bf16 %v2962_v2, %v2962_v2  ;;  %v9708_v10 = vpack.c.b16 %v3683_v3, %v3682_v26  ;;  %v5574_v1 = vunpack.c.l.b16 %v4981_v5  ;;  %v2822_v3 = vld [vmem:[#allocation3 + $0x99] sm:$0xff] }
 0x300   : > { %v9670_v34 = vpop.permute.xlu2 %3526  ;;  %v4185_v28 = vsel %vm2466_vm3, %v3615_v32, %v3715_v41  ;;  %v2392_v57 = vadd.f32 %v9614_v52, %v2171_v47  ;;  %v1910_v52 = vpop.f32.mrf.mxu2  ;;  %v2854_v5 = vpack.c.bf16 %v2822_v3, %v2822_v3 }
 0x301   : > { %v4229_v0 = vsel %vm4092_vm5, %v4185_v28, %v3827_v20  ;;  %v1690_v4 = vpop.f32.mrf.mxu1  ;;  %v3794_v31 = vunpack.c.l.b16 %v2994_v18  ;;  %v3588_v28 = vunpack.c.l.b16 %v2851_v30  ;;  %v2821_v18 = vld [vmem:[#allocation3 + $0x91] sm:$0xff] }
 0x302   : > { %v4264_v37 = vsel %vm4125_vm6, %v4229_v0, %v9559_v22  ;;  %v2428_v50 = vadd.f32 %v9376_v40, %v2392_v57  ;;  %v3200_v22 = vpack.c.b16 %v3173_v59, %v3172_v55  ;;  %v2356_v13 = vpop.f32.mrf.mxu0  ;;  %v5575_v57 = vunpack.c.l.b16 %v4982_v7 }
 0x303   : > { %4610 = vmatmul.bf16.gmra.mxu2 %v4264_v37  ;;  %v1948_v0 = vadd.f32 %v1910_v52, %v1726_v21 }
 0x304   : > { %v2460_v60 = vmax.f32 %v2428_v50, 0.0  ;;  %v3616_v50 = vpack.c.b16 %v3589_v29, %v3588_v28 }
 0x305   : > { %3314 = vrot.lane.b32.xlu0 %v9583_v51, %s8099_s18  ;;  %v2132_v6 = vpop.f32.mrf.mxu3  ;;  %v3027_v27 = vld [vmem:[#allocation3 + $0x141] sm:$0xff]  ;;  %3426 = vrot.lane.b32.xlu1 %v9650_v54, %s8100_s22 }
 0x306   : > { %v2963_v42 = vld [vmem:[#allocation3 + $0x140] sm:$0xff]  ;;  %2549 = vst.msk [vmem:[#allocation3 + $0x151] sm:$0xff] %vm2466_vm3, %v2460_v60  ;;  %v2172_v11 = vadd.f32 %v2132_v6, %v1947_v25  ;;  %v3059_v62 = vpack.c.bf16 %v3027_v27, %v3027_v27  ;;  %3538 = vrot.lane.b32.xlu2 %v9659_v45, %s8101_s23  ;;  %v3906_v45 = vunpack.c.l.b16 %v3058_v9  ;;  %v5606_v25 = vpack.c.b16 %v5575_v57, %v5574_v1 }
 0x307   : > { %v3413_v56 = vpop.permute.xlu1 %3412  ;;  %v3301_v16 = vpop.permute.xlu0 %3300  ;;  %v2995_v24 = vpack.c.bf16 %v2963_v42, %v2963_v42  ;;  %v2597_v60 = vpack.c.bf16 %v2565_v48, %v2565_v48  ;;  %v2899_v26 = vld [vmem:[#allocation3 + $0x13a] sm:$0xff]  ;;  %v3591_v57 = vunpack.c.l.b16 %v2854_v5 }
 0x308   : > { %v4058_v51 = vsel %vm2466_vm3, %v3200_v22, %v3301_v16  ;;  %v2393_v43 = vadd.f32 %v9663_v61, %v2172_v11  ;;  %v3907_v47 = vunpack.c.l.b16 %v3059_v62  ;;  %v9701_v20 = vpop.permute.xlu2 %3942  ;;  %v2566_v61 = vld [vmem:[#allocation3 + $0x80] sm:$0xff]  ;;  %v1912_v39 = vpop.f32.mrf.mxu2  ;;  %v1727_v22 = vadd.f32 %v1690_v4, %v8888_v14 }
 0x309   : > { %v4102_v32 = vsel %vm4092_vm5, %v4058_v51, %v3413_v56  ;;  %v3795_v17 = vunpack.c.l.b16 %v2995_v24  ;;  %v2598_v55 = vpack.c.bf16 %v2566_v61, %v2566_v61  ;;  %v1693_v9 = vpop.f32.mrf.mxu1  ;;  %v2900_v14 = vld [vmem:[#allocation3 + $0x142] sm:$0xff]  ;;  %v3174_v11 = vunpack.c.l.b16 %v2597_v60  ;;  %v2567_v60 = vld [vmem:[#allocation3 + $0x90] sm:$0xff] }
 0x30a   : > { %v4139_v41 = vsel %vm4125_vm6, %v4102_v32, %v9596_v38  ;;  %v2429_v23 = vadd.f32 %v9376_v40, %v2393_v43  ;;  %7748 = vmatmul.msk.bf16.gmra.mxu3 %vm2466_vm3, %v9479_v63  ;;  %v9710_v37 = vpack.c.b16 %v3907_v47, %v3906_v45  ;;  %v2358_v27 = vpop.f32.mrf.mxu0  ;;  %v1949_v16 = vadd.f32 %v1912_v39, %v1727_v22  ;;  %v2568_v39 = vld [vmem:[#allocation3 + $0x98] sm:$0xff] }
 0x30b   : > { %4526 = vmatmul.bf16.gmra.mxu1 %v4139_v41  ;;  %v9712_v38 = vpack.c.b16 %v3795_v17, %v3794_v31  ;;  %v3175_v6 = vunpack.c.l.b16 %v2598_v55  ;;  %v2931_v30 = vpack.c.bf16 %v2899_v26, %v2899_v26  ;;  %v2853_v41 = vpack.c.bf16 %v2821_v18, %v2821_v18 }
 0x30c   : > { %v2461_v59 = vmax.f32 %v2429_v23, 0.0  ;;  %v1728_v29 = vadd.f32 %v1693_v9, %v8912_v8  ;;  %v9743_v8 = vld [vmem:[%s10668_s2] ss:$0 sm:$0xff] }
 0x30d   : > { %3730 = vrot.lane.b32.xlu0 %v9708_v10, %s8099_s18  ;;  %v2135_v63 = vpop.f32.mrf.mxu3  ;;  %3842 = vrot.lane.b32.xlu1 %v9712_v38, %s8100_s22  ;;  %v2964_v56 = vld [vmem:[#allocation3 + $0x150] sm:$0xff]  ;;  %v3684_v28 = vunpack.c.l.b16 %v2931_v30 }
 0x30e   : > { %2550 = vst.msk [vmem:[#allocation3 + $0x159] sm:$0xff] %vm2466_vm3, %v2461_v59  ;;  %v2173_v15 = vadd.f32 %v2135_v63, %v1948_v0  ;;  %3954 = vrot.lane.b32.xlu2 %v9710_v37, %s8101_s23  ;;  %v2996_v4 = vpack.c.bf16 %v2964_v56, %v2964_v56  ;;  %v3028_v0 = vld [vmem:[#allocation3 + $0x151] sm:$0xff]  ;;  %v3590_v63 = vunpack.c.l.b16 %v2853_v41 }
 0x30f   : > { %v3829_v35 = vpop.permute.xlu1 %3828  ;;  %v3717_v2 = vpop.permute.xlu0 %3716 }
 0x310   : > { %v4188_v52 = vsel %vm2466_vm3, %v3616_v50, %v3717_v2  ;;  %v2394_v36 = vadd.f32 %v2356_v13, %v2173_v15  ;;  %v9727_v53 = vpop.permute.xlu2 %3528  ;;  %v2932_v13 = vpack.c.bf16 %v2900_v14, %v2900_v14  ;;  %v1915_v32 = vpop.f32.mrf.mxu2 }
 0x311   : > { %v4231_v44 = vsel %vm4092_vm5, %v4188_v52, %v3829_v35  ;;  %v1950_v15 = vadd.f32 %v1915_v32, %v1728_v29  ;;  %v1695_v35 = vpop.f32.mrf.mxu1  ;;  %v2823_v32 = vld [vmem:[#allocation3 + $0xa9] sm:$0xff] }
 0x312   : > { %v4267_v58 = vsel %vm4125_vm6, %v4231_v44, %v9630_v19  ;;  %v2430_v42 = vadd.f32 %v9376_v40, %v2394_v36  ;;  %v3201_v19 = vpack.c.b16 %v3175_v6, %v3174_v11  ;;  %v3685_v1 = vunpack.c.l.b16 %v2932_v13 }
 0x313   : > { %4615 = vmatmul.bf16.gmra.mxu2 %v4267_v58  ;;  %v3617_v44 = vpack.c.b16 %v3591_v57, %v3590_v63  ;;  %v2600_v58 = vpack.c.bf16 %v2568_v39, %v2568_v39  ;;  %v1729_v11 = vadd.f32 %v1695_v35, %v8941_v49 }
 0x314   : > { %v2462_v62 = vmax.f32 %v2430_v42, 0.0 }
 0x315   : > { %5622 = vrot.lane.b32.xlu0 %v5606_v25, %s8100_s22  ;;  %v2137_v24 = vpop.f32.mrf.mxu3  ;;  %v2965_v51 = vld [vmem:[#allocation3 + $0x158] sm:$0xff]  ;;  %3316 = vrot.lane.b32.xlu1 %v9657_v46, %s8099_s18  ;;  %v3796_v46 = vunpack.c.l.b16 %v2996_v4  ;;  %v3060_v25 = vpack.c.bf16 %v3028_v0, %v3028_v0  ;;  %v2855_v0 = vpack.c.bf16 %v2823_v32, %v2823_v32 }
 0x316   : > { %2551 = vst.msk [vmem:[#allocation3 + $0x169] sm:$0xff] %vm2466_vm3, %v2462_v62  ;;  %v2174_v40 = vadd.f32 %v2137_v24, %v1949_v16  ;;  %v2997_v43 = vpack.c.bf16 %v2965_v51, %v2965_v51  ;;  %v3029_v17 = vld [vmem:[#allocation3 + $0x159] sm:$0xff]  ;;  %3428 = vrot.lane.b32.xlu2 %v9708_v10, %s8100_s22 }
 0x317   : > { %v3415_v7 = vpop.permute.xlu1 %3414  ;;  %v3303_v21 = vpop.permute.xlu0 %3302  ;;  %v3061_v48 = vpack.c.bf16 %v3029_v17, %v3029_v17  ;;  %v2901_v50 = vld [vmem:[#allocation3 + $0x152] sm:$0xff]  ;;  %v2902_v55 = vld [vmem:[#allocation3 + $0x15a] sm:$0xff]  ;;  %v3908_v62 = vunpack.c.l.b16 %v3060_v25 }
 0x318   : > { %v4061_v47 = vsel %vm2466_vm3, %v3201_v19, %v3303_v21  ;;  %v2395_v23 = vadd.f32 %v2358_v27, %v2174_v40  ;;  %v3797_v31 = vunpack.c.l.b16 %v2997_v43  ;;  %v9752_v22 = vpop.permute.xlu2 %3944  ;;  %v2933_v9 = vpack.c.bf16 %v2901_v50, %v2901_v50  ;;  %v1917_v18 = vpop.f32.mrf.mxu2 }
 0x319   : > { %v4104_v45 = vsel %vm4092_vm5, %v4061_v47, %v3415_v7  ;;  %v2934_v42 = vpack.c.bf16 %v2902_v55, %v2902_v55  ;;  %v3909_v26 = vunpack.c.l.b16 %v3061_v48  ;;  %v3177_v19 = vunpack.c.l.b16 %v2600_v58  ;;  %v2824_v7 = vld [vmem:[#allocation3 + $0xb1] sm:$0xff] }
 0x31a   : > { %v4142_v61 = vsel %vm4125_vm6, %v4104_v45, %v9670_v34  ;;  %v2431_v59 = vadd.f32 %v9743_v8, %v2395_v23  ;;  %7749 = vmatmul.msk.bf16.gmra.mxu3 %vm2466_vm3, %v9526_v33  ;;  %v2361_v34 = vpop.f32.mrf.mxu0  ;;  %v9748_v52 = vpack.c.b16 %v3797_v31, %v3796_v46  ;;  %v9754_v33 = vpack.c.b16 %v3685_v1, %v3684_v28 }
 0x31b   : > { %4531 = vmatmul.bf16.gmra.mxu1 %v4142_v61  ;;  %v3686_v49 = vunpack.c.l.b16 %v2933_v9  ;;  %v3687_v13 = vunpack.c.l.b16 %v2934_v42  ;;  %v9767_v5 = vpack.c.b16 %v3909_v26, %v3908_v62  ;;  %v1951_v21 = vadd.f32 %v1917_v18, %v1729_v11 }
 0x31c   : > { %v2463_v2 = vmax.f32 %v2431_v59, 0.0  ;;  %v2856_v61 = vpack.c.bf16 %v2824_v7, %v2824_v7 }
 0x31d   : > { %3540 = vrot.lane.b32.xlu0 %v9712_v38, %s8101_s23  ;;  %v2140_v36 = vpop.f32.mrf.mxu3  ;;  %v2599_v38 = vpack.c.bf16 %v2567_v60, %v2567_v60  ;;  %3732 = vrot.lane.b32.xlu1 %v9754_v33, %s8099_s18  ;;  %v2966_v51 = vld [vmem:[#allocation3 + $0x168] sm:$0xff]  ;;  %v9772_v29 = vpack.c.b16 %v3687_v13, %v3686_v49 }
 0x31e   : > { %2552 = vst.msk [vmem:[#allocation3 + $0x171] sm:$0xff] %vm2466_vm3, %v2463_v2  ;;  %v2175_v6 = vadd.f32 %v2140_v36, %v1950_v15  ;;  %3844 = vrot.lane.b32.xlu2 %v9748_v52, %s8100_s22  ;;  %v2998_v43 = vpack.c.bf16 %v2966_v51, %v2966_v51  ;;  %v3593_v55 = vunpack.c.l.b16 %v2856_v61  ;;  %v2570_v15 = vld [vmem:[#allocation3 + $0xb0] sm:$0xff]  ;;  %v3592_v2 = vunpack.c.l.b16 %v2855_v0  ;;  %v2569_v60 = vld [vmem:[#allocation3 + $0xa8] sm:$0xff] }
 0x31f   : > { %v3719_v27 = vpop.permute.xlu0 %3718  ;;  %v3831_v14 = vpop.permute.xlu1 %3830  ;;  %v3176_v40 = vunpack.c.l.b16 %v2599_v38  ;;  %v2602_v36 = vpack.c.bf16 %v2570_v15, %v2570_v15  ;;  %v2826_v38 = vld [vmem:[#allocation3 + $0xc9] sm:$0xff] }
 0x320   : > { %v4191_v3 = vsel %vm2466_vm3, %v3617_v44, %v3719_v27  ;;  %v2396_v56 = vadd.f32 %v2361_v34, %v2175_v6  ;;  %v3531_v28 = vpop.permute.xlu2 %3530  ;;  %v3798_v48 = vunpack.c.l.b16 %v2998_v43  ;;  %v2601_v6 = vpack.c.bf16 %v2569_v60, %v2569_v60 }
 0x321   : > { %v4233_v16 = vsel %vm4092_vm5, %v4191_v3, %v3831_v14  ;;  %v3179_v42 = vunpack.c.l.b16 %v2602_v36  ;;  %v2858_v51 = vpack.c.bf16 %v2826_v38, %v2826_v38 }
 0x322   : > { %v4270_v24 = vsel %vm4125_vm6, %v4233_v16, %v9701_v20  ;;  %v2432_v30 = vadd.f32 %v9743_v8, %v2396_v56  ;;  %v3202_v20 = vpack.c.b16 %v3177_v19, %v3176_v40  ;;  %v2363_v41 = vpop.f32.mrf.mxu0  ;;  %v3178_v56 = vunpack.c.l.b16 %v2601_v6  ;;  %v2825_v16 = vld [vmem:[#allocation3 + $0xc1] sm:$0xff] }
 0x323   : > { %4620 = vmatmul.bf16.gmra.mxu2 %v4270_v24  ;;  %v2857_v49 = vpack.c.bf16 %v2825_v16, %v2825_v16  ;;  %v3595_v40 = vunpack.c.l.b16 %v2858_v51 }
 0x324   : > { %v2464_v4 = vmax.f32 %v2432_v30, 0.0  ;;  %v3203_v62 = vpack.c.b16 %v3179_v42, %v3178_v56 }
 0x325   : > { %3956 = vrot.lane.b32.xlu0 %v9767_v5, %s8101_s23  ;;  %v2142_v47 = vpop.f32.mrf.mxu3  ;;  %v2967_v17 = vld [vmem:[#allocation3 + $0x170] sm:$0xff]  ;;  %v3594_v32 = vunpack.c.l.b16 %v2857_v49 }
 0x326   : > { %2553 = vst.msk [vmem:[#allocation3 + $0x181] sm:$0xff] %vm2466_vm3, %v2464_v4  ;;  %v2176_v23 = vadd.f32 %v2142_v47, %v1951_v21  ;;  %v2999_v31 = vpack.c.bf16 %v2967_v17, %v2967_v17  ;;  %3734 = vrot.lane.b32.xlu2 %v9772_v29, %s8099_s18  ;;  %v2903_v44 = vld [vmem:[#allocation3 + $0x16a] sm:$0xff]  ;;  %v2904_v58 = vld [vmem:[#allocation3 + $0x172] sm:$0xff]  ;;  %v2571_v47 = vld [vmem:[#allocation3 + $0xc0] sm:$0xff] }
 0x327   : > { %v3305_v45 = vpop.permute.xlu0 %3304  ;;  %v3417_v1 = vpop.permute.xlu1 %3416  ;;  %v2935_v26 = vpack.c.bf16 %v2903_v44, %v2903_v44  ;;  %v2936_v14 = vpack.c.bf16 %v2904_v58, %v2904_v58  ;;  %v2572_v4 = vld [vmem:[#allocation3 + $0xc8] sm:$0xff]  ;;  %v2573_v58 = vld [vmem:[#allocation3 + $0xd8] sm:$0xff] }
 0x328   : > { %v4064_v57 = vsel %vm2466_vm3, %v3202_v20, %v3305_v45  ;;  %v2397_v59 = vadd.f32 %v2363_v41, %v2176_v23  ;;  %v3799_v39 = vunpack.c.l.b16 %v2999_v31  ;;  %v3947_v27 = vpop.permute.xlu2 %3946  ;;  %v3619_v20 = vpack.c.b16 %v3595_v40, %v3594_v32 }
 0x329   : > { %v4106_v46 = vsel %vm4092_vm5, %v4064_v57, %v3417_v1  ;;  %v3688_v24 = vunpack.c.l.b16 %v2935_v26  ;;  %v3689_v19 = vunpack.c.l.b16 %v2936_v14  ;;  %v2604_v17 = vpack.c.bf16 %v2572_v4, %v2572_v4  ;;  %v2828_v57 = vld [vmem:[#allocation3 + $0xe1] sm:$0xff] }
 0x32a   : > { %v4145_v63 = vsel %vm4125_vm6, %v4106_v46, %v9727_v53  ;;  %v2433_v34 = vadd.f32 %v9743_v8, %v2397_v59  ;;  %7750 = vmatmul.msk.bf16.gmra.mxu3 %vm2466_vm3, %v9575_v12  ;;  %v9783_v50 = vpack.c.b16 %v3799_v39, %v3798_v48  ;;  %v3618_v53 = vpack.c.b16 %v3593_v55, %v3592_v2  ;;  %v4507_v59 = vpop.f32.mrf.mxu1  ;;  %v2827_v48 = vld [vmem:[#allocation3 + $0xd9] sm:$0xff] }
 0x32b   : > { %4536 = vmatmul.bf16.gmra.mxu1 %v4145_v63  ;;  %v2603_v45 = vpack.c.bf16 %v2571_v47, %v2571_v47  ;;  %v3181_v61 = vunpack.c.l.b16 %v2604_v17  ;;  %v2859_v15 = vpack.c.bf16 %v2827_v48, %v2827_v48  ;;  %v2605_v14 = vpack.c.bf16 %v2573_v58, %v2573_v58  ;;  %v2831_v58 = vld [vmem:[#allocation3 + $0x109] sm:$0xff] }
 0x32c   : > { %v2465_v35 = vmax.f32 %v2433_v34, 0.0  ;;  %v2860_v34 = vpack.c.bf16 %v2828_v57, %v2828_v57 }
 0x32d   : > { %3846 = vrot.lane.b32.xlu0 %v9783_v50, %s8100_s22  ;;  %v9787_v25 = vpop.f32.mrf.mxu3  ;;  %v3180_v0 = vunpack.c.l.b16 %v2603_v45  ;;  %v3596_v44 = vunpack.c.l.b16 %v2859_v15  ;;  %v2576_v45 = vld [vmem:[#allocation3 + $0xf8] sm:$0xff] }
 0x32e   : > { %2554 = vst.msk [vmem:[#allocation3 + $0x189] sm:$0xff] %vm2466_vm3, %v2465_v35  ;;  %3318 = vrot.lane.b32.xlu2 %v9710_v37, %s8099_s18  ;;  %v3597_v60 = vunpack.c.l.b16 %v2860_v34 }
 0x32f   : > { %v3721_v8 = vpop.permute.xlu0 %3720  ;;  %v3833_v9 = vpop.permute.xlu1 %3832  ;;  %v3204_v39 = vpack.c.b16 %v3181_v61, %v3180_v0 }
 0x330   : > { %v4194_v12 = vsel %vm2466_vm3, %v3618_v53, %v3721_v8  ;;  %v3533_v7 = vpop.permute.xlu2 %3532  ;;  %v2574_v8 = vld [vmem:[#allocation3 + $0xe0] sm:$0xff] }
 0x331   : > { %v4235_v3 = vsel %vm4092_vm5, %v4194_v12, %v3833_v9  ;;  %v3620_v12 = vpack.c.b16 %v3597_v60, %v3596_v44  ;;  %v9826_v9 = vld [vmem:[%s10670_s4] ss:$0 sm:$0xff] }
 0x332   : > { %v4273_v11 = vsel %vm4125_vm6, %v4235_v3, %v9752_v22  ;;  %v9803_v22 = vpack.c.b16 %v3689_v19, %v3688_v24  ;;  %v4509_v42 = vpop.f32.mrf.mxu1  ;;  %v3182_v19 = vunpack.c.l.b16 %v2605_v14 }
 0x333   : > { %4625 = vmatmul.bf16.gmra.mxu2 %v4273_v11  ;;  %v4508_v11 = vadd.f32 %v9826_v9, %v4507_v59  ;;  %v4510_v17 = vadd.f32 %v9826_v9, %v4509_v42 }
 0x335   : > { %3430 = vrot.lane.b32.xlu0 %v9754_v33, %s8100_s22  ;;  %v9798_v37 = vpop.f32.mrf.mxu3 }
 0x337   : > { %v3307_v18 = vpop.permute.xlu0 %3306  ;;  %v3419_v13 = vpop.permute.xlu1 %3418 }
 0x338   : > { %v4067_v30 = vsel %vm2466_vm3, %v3203_v62, %v3307_v18  ;;  %v3949_v46 = vpop.permute.xlu2 %3948  ;;  %v2830_v62 = vld [vmem:[#allocation3 + $0xf9] sm:$0xff] }
 0x339   : > { %v4108_v21 = vsel %vm4092_vm5, %v4067_v30, %v3419_v13  ;;  %v2829_v30 = vld [vmem:[#allocation3 + $0xf1] sm:$0xff]  ;;  %v2862_v40 = vpack.c.bf16 %v2830_v62, %v2830_v62 }
 0x33a   : > { %7751 = vmatmul.msk.bf16.gmra.mxu3 %vm2466_vm3, %v9650_v54  ;;  %v4148_v43 = vsel %vm4125_vm6, %v4108_v21, %v3531_v28 }
 0x33b   : > { %4541 = vmatmul.bf16.gmra.mxu1 %v4148_v43  ;;  %v2861_v43 = vpack.c.bf16 %v2829_v30, %v2829_v30 }
 0x33d   : > { %3736 = vrot.lane.b32.xlu0 %v9803_v22, %s8099_s18  ;;  %v9809_v23 = vpop.f32.mrf.mxu3  ;;  %v3598_v61 = vunpack.c.l.b16 %v2861_v43 }
 0x33f   : > { %v3723_v41 = vpop.permute.xlu0 %3722  ;;  %v3835_v31 = vpop.permute.xlu1 %3834 }
 0x340   : > { %v4197_v54 = vsel %vm2466_vm3, %v3619_v20, %v3723_v41  ;;  %v3535_v26 = vpop.permute.xlu2 %3534  ;;  %v3599_v41 = vunpack.c.l.b16 %v2862_v40 }
 0x341   : > { %v4237_v1 = vsel %vm4092_vm5, %v4197_v54, %v3835_v31 }
 0x342   : > { %v4276_v28 = vsel %vm4125_vm6, %v4237_v1, %v3947_v27  ;;  %v2606_v27 = vpack.c.bf16 %v2574_v8, %v2574_v8  ;;  %v3621_v0 = vpack.c.b16 %v3599_v41, %v3598_v61 }
 0x343   : > { %4630 = vmatmul.bf16.gmra.mxu2 %v4276_v28  ;;  %v2575_v28 = vld [vmem:[#allocation3 + $0xf0] sm:$0xff] }
 0x344   : > { %v3183_v38 = vunpack.c.l.b16 %v2606_v27 }
 0x345   : > { %3320 = vrot.lane.b32.xlu0 %v9767_v5, %s8099_s18  ;;  %v9817_v35 = vpop.f32.mrf.mxu3 }
 0x346   : > { %v3205_v49 = vpack.c.b16 %v3183_v38, %v3182_v19 }
 0x347   : > { %v3309_v63 = vpop.permute.xlu0 %3308  ;;  %v3421_v2 = vpop.permute.xlu1 %3420 }
 0x348   : > { %v4070_v55 = vsel %vm2466_vm3, %v3204_v39, %v3309_v63  ;;  %v3951_v32 = vpop.permute.xlu2 %3950  ;;  %v2607_v63 = vpack.c.bf16 %v2575_v28, %v2575_v28 }
 0x349   : > { %v4110_v53 = vsel %vm4092_vm5, %v4070_v55, %v3421_v2 }
 0x34a   : > { %7752 = vmatmul.msk.bf16.gmra.mxu3 %vm2466_vm3, %v9708_v10  ;;  %v4151_v36 = vsel %vm4125_vm6, %v4110_v53, %v3533_v7  ;;  %v2832_v53 = vld [vmem:[#allocation3 + $0x111] sm:$0xff]  ;;  %v3184_v44 = vunpack.c.l.b16 %v2607_v63 }
 0x34b   : > { %4546 = vmatmul.bf16.gmra.mxu1 %v4151_v36  ;;  %v2864_v42 = vpack.c.bf16 %v2832_v53, %v2832_v53 }
 0x34d   : > { %v9830_v56 = vpop.f32.mrf.mxu3 }
 0x34f   : > { %v3725_v6 = vpop.permute.xlu0 %3724  ;;  %v3837_v3 = vpop.permute.xlu1 %3836 }
 0x350   : > { %v4200_v10 = vsel %vm2466_vm3, %v3620_v12, %v3725_v6  ;;  %v3537_v2 = vpop.permute.xlu2 %3536 }
 0x351   : > { %v4239_v16 = vsel %vm4092_vm5, %v4200_v10, %v3837_v3 }
 0x352   : > { %v4279_v18 = vsel %vm4125_vm6, %v4239_v16, %v3949_v46 }
 0x353   : > { %4635 = vmatmul.bf16.gmra.mxu2 %v4279_v18 }
 0x355   : > { %v4596_v24 = vpop.f32.mrf.mxu2  ;;  %v9842_v1 = vpop.f32.mrf.mxu3 }
 0x356   : > { %v4597_v51 = vadd.f32 %v4596_v24, %v4508_v11  ;;  %v2863_v11 = vpack.c.bf16 %v2831_v58, %v2831_v58  ;;  %v3601_v24 = vunpack.c.l.b16 %v2864_v42 }
 0x357   : > { %v3311_v13 = vpop.permute.xlu0 %3310  ;;  %v3423_v20 = vpop.permute.xlu1 %3422 }
 0x358   : > { %v4686_v7 = vadd.f32 %v9787_v25, %v4597_v51  ;;  %v4512_v21 = vpop.f32.mrf.mxu1  ;;  %v4073_v4 = vsel %vm2466_vm3, %v3205_v49, %v3311_v13  ;;  %v2578_v49 = vld [vmem:[#allocation3 + $0x110] sm:$0xff]  ;;  %v3600_v40 = vunpack.c.l.b16 %v2863_v11 }
 0x359   : > { %v4112_v54 = vsel %vm4092_vm5, %v4073_v4, %v3423_v20  ;;  %v4513_v8 = vadd.f32 %v9826_v9, %v4512_v21  ;;  %v3953_v21 = vpop.permute.xlu2 %3952 }
 0x35a   : > { %v4765_v47 = vmax.f32 %v4686_v7, 0.0  ;;  %7753 = vmatmul.msk.bf16.gmra.mxu3 %vm2466_vm3, %v9754_v33  ;;  %v4154_v25 = vsel %vm4125_vm6, %v4112_v54, %v3535_v26  ;;  %v2608_v33 = vpack.c.bf16 %v2576_v45, %v2576_v45  ;;  %v3031_v7 = vld [vmem:[#allocation3 + $0x171] sm:$0xff]  ;;  %v3622_v41 = vpack.c.b16 %v3601_v24, %v3600_v40  ;;  %v3030_v45 = vld [vmem:[#allocation3 + $0x169] sm:$0xff] }
 0x35b   : > { %4551 = vmatmul.bf16.gmra.mxu1 %v4154_v25  ;;  %v2610_v54 = vpack.c.bf16 %v2578_v49, %v2578_v49  ;;  %v3063_v61 = vpack.c.bf16 %v3031_v7, %v3031_v7  ;;  %v3097_v40 = vld [vmem:[#allocation3 + $0x18a] sm:$0xff] }
 0x35c   : > { %4853 = vst.msk [vmem:[#allocation4 + $0x19] sm:$0xff] %vm4092_vm5, %v4765_v47  ;;  %v3185_v15 = vunpack.c.l.b16 %v2608_v33  ;;  %v2577_v47 = vld [vmem:[#allocation3 + $0x108] sm:$0xff]  ;;  %v3062_v33 = vpack.c.bf16 %v3030_v45, %v3030_v45 }
 0x35d   : > { %v4598_v31 = vpop.f32.mrf.mxu2  ;;  %v9850_v10 = vpop.f32.mrf.mxu3  ;;  %v3033_v7 = vld [vmem:[#allocation3 + $0x189] sm:$0xff] }
 0x35e   : > { %v4599_v57 = vadd.f32 %v4598_v31, %v4510_v17  ;;  %v3206_v6 = vpack.c.b16 %v3185_v15, %v3184_v44  ;;  %v3910_v53 = vunpack.c.l.b16 %v3062_v33  ;;  %v3065_v33 = vpack.c.bf16 %v3033_v7, %v3033_v7 }
 0x35f   : > { %v3727_v59 = vpop.permute.xlu0 %3726  ;;  %v3839_v55 = vpop.permute.xlu1 %3838 }
 0x360   : > { %v4688_v46 = vadd.f32 %v9798_v37, %v4599_v57  ;;  %v4514_v48 = vpop.f32.mrf.mxu1  ;;  %v4203_v39 = vsel %vm2466_vm3, %v3621_v0, %v3727_v59  ;;  %v2609_v0 = vpack.c.bf16 %v2577_v47, %v2577_v47 }
 0x361   : > { %v4241_v60 = vsel %vm4092_vm5, %v4203_v39, %v3839_v55  ;;  %v4515_v13 = vadd.f32 %v9826_v9, %v4514_v48  ;;  %v3187_v39 = vunpack.c.l.b16 %v2610_v54  ;;  %v2834_v55 = vld [vmem:[#allocation3 + $0x129] sm:$0xff] }
 0x362   : > { %v4766_v34 = vmax.f32 %v4688_v46, 0.0  ;;  %v4282_v36 = vsel %vm4125_vm6, %v4241_v60, %v3951_v32  ;;  %v2866_v58 = vpack.c.bf16 %v2834_v55, %v2834_v55 }
 0x363   : > { %4640 = vmatmul.bf16.gmra.mxu2 %v4282_v36  ;;  %v4951_v26 = vld [vmem:[#allocation4 + $0x19] sm:$0xff] }
 0x364   : > { %4854 = vst.msk [vmem:[#allocation4 + $0x21] sm:$0xff] %vm4092_vm5, %v4766_v34  ;;  %v4983_v16 = vpack.c.bf16 %v4951_v26, %v4951_v26  ;;  %v3911_v34 = vunpack.c.l.b16 %v3063_v61 }
 0x365   : > { %v9862_v59 = vpop.f32.mrf.mxu3 }
 0x366   : > { %v4601_v37 = vpop.f32.mrf.mxu2  ;;  %v5576_v43 = vunpack.c.l.b16 %v4983_v16  ;;  %v3603_v16 = vunpack.c.l.b16 %v2866_v58 }
 0x367   : > { %v4602_v12 = vadd.f32 %v4601_v37, %v4513_v8  ;;  %v3313_v27 = vpop.permute.xlu0 %3312  ;;  %v3425_v18 = vpop.permute.xlu1 %3424  ;;  %v2833_v8 = vld [vmem:[#allocation3 + $0x121] sm:$0xff] }
 0x368   : > { %v4517_v14 = vpop.f32.mrf.mxu1  ;;  %v4076_v38 = vsel %vm2466_vm3, %v3206_v6, %v3313_v27  ;;  %v9869_v27 = vpack.c.b16 %v3911_v34, %v3910_v53 }
 0x369   : > { %v4691_v3 = vadd.f32 %v9809_v23, %v4602_v12  ;;  %v4114_v51 = vsel %vm4092_vm5, %v4076_v38, %v3425_v18  ;;  %v4518_v15 = vadd.f32 %v9826_v9, %v4517_v14  ;;  %v3539_v12 = vpop.permute.xlu2 %3538 }
 0x36a   : > { %7754 = vmatmul.msk.bf16.gmra.mxu3 %vm2466_vm3, %v9772_v29  ;;  %v4157_v23 = vsel %vm4125_vm6, %v4114_v51, %v3537_v2  ;;  %v3186_v2 = vunpack.c.l.b16 %v2609_v0  ;;  %v2579_v0 = vld [vmem:[#allocation3 + $0x120] sm:$0xff] }
 0x36b   : > { %v4767_v62 = vmax.f32 %v4691_v3, 0.0  ;;  %v4952_v19 = vld [vmem:[#allocation4 + $0x21] sm:$0xff]  ;;  %4556 = vmatmul.bf16.gmra.mxu1 %v4157_v23  ;;  %v2865_v3 = vpack.c.bf16 %v2833_v8, %v2833_v8  ;;  %v3096_v23 = vld [vmem:[#allocation3 + $0x182] sm:$0xff] }
 0x36c   : > { %v4984_v30 = vpack.c.bf16 %v4952_v19, %v4952_v19  ;;  %v3207_v44 = vpack.c.b16 %v3187_v39, %v3186_v2  ;;  %v3128_v45 = vpack.c.bf16 %v3096_v23, %v3096_v23 }
 0x36d   : > { %4855 = vst.msk [vmem:[#allocation4 + $0x31] sm:$0xff] %vm4092_vm5, %v4767_v62  ;;  %v9877_v18 = vpop.f32.mrf.mxu3 }
 0x36e   : > { %v4603_v4 = vpop.f32.mrf.mxu2  ;;  %v5577_v32 = vunpack.c.l.b16 %v4984_v30  ;;  %v3602_v30 = vunpack.c.l.b16 %v2865_v3  ;;  %v4024_v2 = vunpack.c.l.b16 %v3128_v45 }
 0x36f   : > { %v4604_v20 = vadd.f32 %v4603_v4, %v4515_v13  ;;  %v3729_v17 = vpop.permute.xlu0 %3728  ;;  %v3841_v48 = vpop.permute.xlu1 %3840  ;;  %v2969_v13 = vld [vmem:[#allocation3 + $0x188] sm:$0xff] }
 0x370   : > { %v4519_v25 = vpop.f32.mrf.mxu1  ;;  %v5607_v31 = vpack.c.b16 %v5577_v32, %v5576_v43  ;;  %v4206_v28 = vsel %vm2466_vm3, %v3622_v41, %v3729_v17  ;;  %v3623_v4 = vpack.c.b16 %v3603_v16, %v3602_v30  ;;  %v2968_v41 = vld [vmem:[#allocation3 + $0x180] sm:$0xff]  ;;  %v3001_v54 = vpack.c.bf16 %v2969_v13, %v2969_v13 }
 0x371   : > { %v4693_v57 = vadd.f32 %v9817_v35, %v4604_v20  ;;  %v4243_v63 = vsel %vm4092_vm5, %v4206_v28, %v3841_v48  ;;  %v2580_v20 = vld [vmem:[#allocation3 + $0x128] sm:$0xff]  ;;  %v3000_v39 = vpack.c.bf16 %v2968_v41, %v2968_v41 }
 0x372   : > { %5624 = vrot.lane.b32.xlu1 %v5607_v31, %s8100_s22  ;;  %v4285_v35 = vsel %vm4125_vm6, %v4243_v63, %v3953_v21  ;;  %v3032_v31 = vld [vmem:[#allocation3 + $0x181] sm:$0xff]  ;;  %v2612_v48 = vpack.c.bf16 %v2580_v20, %v2580_v20 }
 0x373   : > { %v4768_v46 = vmax.f32 %v4693_v57, 0.0  ;;  %4645 = vmatmul.bf16.gmra.mxu2 %v4285_v35  ;;  %v3064_v55 = vpack.c.bf16 %v3032_v31, %v3032_v31  ;;  %v2611_v35 = vpack.c.bf16 %v2579_v0, %v2579_v0 }
 0x374   : > { %v4953_v42 = vld [vmem:[#allocation4 + $0x31] sm:$0xff]  ;;  %v3189_v58 = vunpack.c.l.b16 %v2612_v48 }
 0x375   : > { %4856 = vst.msk [vmem:[#allocation4 + $0x39] sm:$0xff] %vm4092_vm5, %v4768_v46  ;;  %v4985_v62 = vpack.c.bf16 %v4953_v42, %v4953_v42  ;;  %v3955_v46 = vpop.permute.xlu2 %3954  ;;  %v3188_v3 = vunpack.c.l.b16 %v2611_v35 }
 0x376   : > { %v4606_v60 = vpop.f32.mrf.mxu2 }
 0x377   : > { %v4607_v36 = vadd.f32 %v4606_v60, %v4518_v15  ;;  %v3315_v37 = vpop.permute.xlu0 %3314  ;;  %v3427_v11 = vpop.permute.xlu1 %3426  ;;  %v5578_v32 = vunpack.c.l.b16 %v4985_v62 }
 0x378   : > { %v4522_v6 = vpop.f32.mrf.mxu1  ;;  %v4079_v14 = vsel %vm2466_vm3, %v3207_v44, %v3315_v37  ;;  %v9895_v44 = vpop.f32.mrf.mxu3 }
 0x379   : > { %v4696_v26 = vadd.f32 %v9830_v56, %v4607_v36  ;;  %v4116_v24 = vsel %vm4092_vm5, %v4079_v14, %v3427_v11  ;;  %v4520_v56 = vadd.f32 %v9826_v9, %v4519_v25  ;;  %v3129_v25 = vpack.c.bf16 %v3097_v40, %v3097_v40  ;;  %v7948_v36 = vld [vmem:[%s10671_s5 + $0x38] sm:$0xff] }
 0x37a   : > { %3958 = vrot.lane.b32.xlu1 %v9869_v27, %s8101_s23  ;;  %7755 = vmatmul.msk.bf16.gmra.mxu3 %vm2466_vm3, %v9803_v22  ;;  %v4160_v51 = vsel %vm4125_vm6, %v4116_v24, %v3539_v12  ;;  %v4523_v60 = vadd.f32 %v9826_v9, %v4522_v6  ;;  %v3800_v12 = vunpack.c.l.b16 %v3000_v39  ;;  %v3912_v6 = vunpack.c.l.b16 %v3064_v55  ;;  %v2836_v14 = vld [vmem:[#allocation3 + $0x141] sm:$0xff] }
 0x37b   : > { %v4769_v38 = vmax.f32 %v4696_v26, 0.0  ;;  %4561 = vmatmul.bf16.gmra.mxu1 %v4160_v51  ;;  %v4025_v8 = vunpack.c.l.b16 %v3129_v25  ;;  %6906 = vmatpush.bf16.msrb.mxu0 %v7948_v36  ;;  %v3208_v51 = vpack.c.b16 %v3189_v58, %v3188_v3  ;;  %v2868_v30 = vpack.c.bf16 %v2836_v14, %v2836_v14  ;;  %v7943_v14 = vld [vmem:[%s10671_s5 + $0x10] sm:$0xff] }
 0x37c   : > { %v4954_v19 = vld [vmem:[#allocation4 + $0x39] sm:$0xff] }
 0x37d   : > { %4857 = vst.msk [vmem:[#allocation4 + $0x49] sm:$0xff] %vm4092_vm5, %v4769_v38  ;;  %v4986_v49 = vpack.c.bf16 %v4954_v19, %v4954_v19  ;;  %v9900_v24 = vpack.c.b16 %v4025_v8, %v4024_v2  ;;  %v3429_v40 = vpop.permute.xlu2 %3428  ;;  %v3605_v20 = vunpack.c.l.b16 %v2868_v30  ;;  %v7942_v30 = vld [vmem:[%s10671_s5 + $0x8] sm:$0xff] }
 0x37e   : > { %v4608_v22 = vpop.f32.mrf.mxu2 }
 0x37f   : > { %v4609_v21 = vadd.f32 %v4608_v22, %v4520_v56  ;;  %v3731_v43 = vpop.permute.xlu0 %3730  ;;  %v5579_v47 = vunpack.c.l.b16 %v4986_v49  ;;  %v3843_v34 = vpop.permute.xlu1 %3842  ;;  %v2835_v56 = vld [vmem:[#allocation3 + $0x139] sm:$0xff] }
 0x380   : > { %v4524_v17 = vpop.f32.mrf.mxu1  ;;  %v4209_v57 = vsel %vm2466_vm3, %v3623_v4, %v3731_v43  ;;  %v2867_v7 = vpack.c.bf16 %v2835_v56, %v2835_v56 }
 0x381   : > { %v4698_v61 = vadd.f32 %v9842_v1, %v4609_v21  ;;  %v5608_v28 = vpack.c.b16 %v5579_v47, %v5578_v32  ;;  %v4245_v15 = vsel %vm4092_vm5, %v4209_v57, %v3843_v34  ;;  %v3801_v1 = vunpack.c.l.b16 %v3001_v54  ;;  %v7946_v32 = vld [vmem:[%s10671_s5 + $0x28] sm:$0xff] }
 0x382   : > { %3542 = vrot.lane.b32.xlu1 %v9748_v52, %s8101_s23  ;;  %v4288_v53 = vsel %vm4125_vm6, %v4245_v15, %v3955_v46  ;;  %v3913_v52 = vunpack.c.l.b16 %v3065_v33  ;;  %v4525_v4 = vadd.f32 %v9826_v9, %v4524_v17  ;;  %v3604_v57 = vunpack.c.l.b16 %v2867_v7  ;;  %v4885_v15 = vld [vmem:[#allocation4] sm:$0xff] }
 0x383   : > { %v4770_v63 = vmax.f32 %v4698_v61, 0.0  ;;  %5626 = vrot.lane.b32.xlu2 %v5608_v28, %s8100_s22  ;;  %4650 = vmatmul.bf16.gmra.mxu2 %v4288_v53  ;;  %v3818_v11 = vpack.c.b16 %v3801_v1, %v3800_v12  ;;  %v9916_v61 = vpop.f32.mrf.mxu3  ;;  %v4917_v36 = vpack.c.bf16 %v4885_v15, %v4885_v15 }
 0x384   : > { %v4955_v16 = vld [vmem:[#allocation4 + $0x49] sm:$0xff]  ;;  %v3930_v19 = vpack.c.b16 %v3913_v52, %v3912_v6  ;;  %v3624_v46 = vpack.c.b16 %v3605_v20, %v3604_v57 }
 0x385   : > { %4858 = vst.msk [vmem:[#allocation4 + $0x51] sm:$0xff] %vm4092_vm5, %v4770_v63  ;;  %v4987_v23 = vpack.c.bf16 %v4955_v16, %v4955_v16  ;;  %v7945_v63 = vld [vmem:[%s10671_s5 + $0x20] sm:$0xff]  ;;  %v3845_v55 = vpop.permute.xlu2 %3844 }
 0x386   : > { %v4611_v37 = vpop.f32.mrf.mxu2 }
 0x387   : > { %v4612_v42 = vadd.f32 %v4611_v37, %v4523_v60  ;;  %v9897_v26 = vpop.permute.xlu0 %5622  ;;  %v3317_v13 = vpop.permute.xlu1 %3316  ;;  %v5580_v25 = vunpack.c.l.b16 %v4987_v23 }
 0x388   : > { %v4527_v38 = vpop.f32.mrf.mxu1  ;;  %v4082_v22 = vsel %vm2466_vm3, %v3208_v51, %v3317_v13 }
 0x389   : > { %v4701_v62 = vadd.f32 %v9850_v10, %v4612_v42  ;;  %v7947_v10 = vld [vmem:[%s10671_s5 + $0x30] sm:$0xff]  ;;  %v4118_v45 = vsel %vm4092_vm5, %v4082_v22, %v3429_v40  ;;  %v4528_v34 = vadd.f32 %v9826_v9, %v4527_v38  ;;  %v5494_v38 = vunpack.c.l.b16 %v4917_v36  ;;  %v7941_v22 = vld [vmem:[%s10671_s5] sm:$0xff] }
 0x38a   : > { %3848 = vrot.lane.b32.xlu1 %v3818_v11, %s8100_s22  ;;  %7756 = vmatmul.msk.bf16.gmra.mxu3 %vm2466_vm3, %v9900_v24 }
 0x38b   : > { %v4771_v49 = vmax.f32 %v4701_v62, 0.0  ;;  %3960 = vrot.lane.b32.xlu2 %v3930_v19, %s8101_s23  ;;  %6907 = vmatpush.bf16.msrb.mxu0 %v7947_v10  ;;  %v4712_v12 = vpop.f32.mrf.mxu3 }
 0x38c   : > { %v4956_v21 = vld [vmem:[#allocation4 + $0x51] sm:$0xff] }
 0x38d   : > { %4859 = vst.msk [vmem:[#allocation4 + $0x61] sm:$0xff] %vm4092_vm5, %v4771_v49  ;;  %v4988_v43 = vpack.c.bf16 %v4956_v21, %v4956_v21 }
 0x38e   : > { %v4613_v47 = vpop.f32.mrf.mxu2 }
 0x38f   : > { %v4614_v41 = vadd.f32 %v4613_v47, %v4525_v4  ;;  %v3541_v54 = vpop.permute.xlu0 %3540  ;;  %v5581_v31 = vunpack.c.l.b16 %v4988_v43  ;;  %6908 = vmatpush.bf16.msrb.mxu0 %v7946_v32  ;;  %v3733_v39 = vpop.permute.xlu1 %3732 }
 0x390   : > { %v4529_v17 = vpop.f32.mrf.mxu1  ;;  %v4163_v28 = vsel %vm4125_vm6, %v4118_v45, %v3541_v54 }
 0x391   : > { %v4703_v0 = vadd.f32 %v9862_v59, %v4614_v41  ;;  %4566 = vmatmul.bf16.gmra.mxu1 %v4163_v28  ;;  %v5609_v33 = vpack.c.b16 %v5581_v31, %v5580_v25  ;;  %v4212_v59 = vsel %vm2466_vm3, %v3624_v46, %v3733_v39  ;;  %v4530_v16 = vadd.f32 %v9826_v9, %v4529_v17 }
 0x392   : > { %3432 = vrot.lane.b32.xlu1 %v9772_v29, %s8100_s22  ;;  %v7944_v29 = vld [vmem:[%s10671_s5 + $0x18] sm:$0xff]  ;;  %v4247_v60 = vsel %vm4092_vm5, %v4212_v59, %v3845_v55 }
 0x393   : > { %v4772_v48 = vmax.f32 %v4703_v0, 0.0  ;;  %3544 = vrot.lane.b32.xlu2 %v9783_v50, %s8101_s23  ;;  %5628 = vrot.lane.b32.xlu0 %v5609_v33, %s8100_s22  ;;  %v4886_v50 = vld [vmem:[#allocation4 + $0x8] sm:$0xff]  ;;  %v4715_v7 = vpop.f32.mrf.mxu3 }
 0x394   : > { %6909 = vmatpush.bf16.msrb.mxu0 %v7945_v63  ;;  %v4957_v52 = vld [vmem:[#allocation4 + $0x61] sm:$0xff]  ;;  %v4918_v37 = vpack.c.bf16 %v4886_v50, %v4886_v50 }
 0x395   : > { %4860 = vst.msk [vmem:[#allocation4 + $0x69] sm:$0xff] %vm4092_vm5, %v4772_v48  ;;  %v4989_v6 = vpack.c.bf16 %v4957_v52, %v4957_v52 }
 0x396   : > { %v4616_v35 = vpop.f32.mrf.mxu2  ;;  %v5495_v11 = vunpack.c.l.b16 %v4918_v37 }
 0x397   : > { %v4617_v1 = vadd.f32 %v4616_v35, %v4528_v34  ;;  %v3957_v2 = vpop.permute.xlu0 %3956  ;;  %v5582_v56 = vunpack.c.l.b16 %v4989_v6 }
 0x398   : > { %v4532_v53 = vpop.f32.mrf.mxu1  ;;  %v4291_v8 = vsel %vm4125_vm6, %v4247_v60, %v3957_v2  ;;  %6910 = vmatpush.bf16.msrb.mxu0 %v7944_v29  ;;  %v5526_v13 = vpack.c.b16 %v5495_v11, %v5494_v38 }
 0x399   : > { %v4706_v58 = vadd.f32 %v9877_v18, %v4617_v1  ;;  %4655 = vmatmul.bf16.gmra.mxu2 %v4291_v8  ;;  %v4533_v4 = vadd.f32 %v9826_v9, %v4532_v53 }
 0x39a   : > { %v6312_v21 = vsel %vm4092_vm5, %v5526_v13, %v9897_v26 }
 0x39b   : > { %v4773_v42 = vmax.f32 %v4706_v58, 0.0  ;;  %v4717_v31 = vpop.f32.mrf.mxu3 }
 0x39c   : > { %v4958_v3 = vld [vmem:[#allocation4 + $0x69] sm:$0xff]  ;;  %6911 = vmatpush.bf16.msrb.mxu0 %v7943_v14 }
 0x39d   : > { %4861 = vst.msk [vmem:[#allocation4 + $0x79] sm:$0xff] %vm4092_vm5, %v4773_v42  ;;  %v4990_v62 = vpack.c.bf16 %v4958_v3, %v4958_v3 }
 0x39e   : > { %v4618_v19 = vpop.f32.mrf.mxu2 }
 0x39f   : > { %v4619_v18 = vadd.f32 %v4618_v19, %v4530_v16  ;;  %v5583_v51 = vunpack.c.l.b16 %v4990_v62 }
 0x3a0   : > { %v4534_v49 = vpop.f32.mrf.mxu1  ;;  %6912 = vmatpush.bf16.msrb.mxu0 %v7942_v30 }
 0x3a1   : > { %v4708_v23 = vadd.f32 %v9895_v44, %v4619_v18  ;;  %v5610_v10 = vpack.c.b16 %v5583_v51, %v5582_v56  ;;  %v4535_v25 = vadd.f32 %v9826_v9, %v4534_v49 }
 0x3a3   : > { %v4774_v40 = vmax.f32 %v4708_v23, 0.0  ;;  %5630 = vrot.lane.b32.xlu1 %v5610_v10, %s8100_s22 }
 0x3a4   : > { %6913 = vmatpush.bf16.msrb.mxu0 %v7941_v22  ;;  %v4959_v47 = vld [vmem:[#allocation4 + $0x79] sm:$0xff] }
 0x3a5   : > { %4862 = vst.msk [vmem:[#allocation4 + $0x81] sm:$0xff] %vm4092_vm5, %v4774_v40  ;;  %v4991_v54 = vpack.c.bf16 %v4959_v47, %v4959_v47 }
 0x3a6   : > { %v4621_v43 = vpop.f32.mrf.mxu2 }
 0x3a7   : > { %v4622_v44 = vadd.f32 %v4621_v43, %v4533_v4  ;;  %6914 = vmatmul.bf16.vlgmr.msrb.gmra.mxu0 %v6312_v21  ;;  %v5584_v28 = vunpack.c.l.b16 %v4991_v54 }
 0x3a8   : > { %v4537_v32 = vpop.f32.mrf.mxu1 }
 0x3a9   : > { %v4711_v20 = vadd.f32 %v9916_v61, %v4622_v44  ;;  %v4720_v61 = vpop.f32.mrf.mxu3  ;;  %v4538_v63 = vadd.f32 %v9826_v9, %v4537_v32  ;;  %v4888_v32 = vld [vmem:[#allocation4 + $0x20] sm:$0xff] }
 0x3ab   : > { %v4775_v41 = vmax.f32 %v4711_v20, 0.0 }
 0x3ac   : > { %v4960_v45 = vld [vmem:[#allocation4 + $0x81] sm:$0xff] }
 0x3ad   : > { %4863 = vst.msk [vmem:[#allocation4 + $0x91] sm:$0xff] %vm4092_vm5, %v4775_v41  ;;  %v4992_v26 = vpack.c.bf16 %v4960_v45, %v4960_v45  ;;  %v4887_v41 = vld [vmem:[#allocation4 + $0x18] sm:$0xff] }
 0x3ae   : > { %v4623_v57 = vpop.f32.mrf.mxu2 }
 0x3af   : > { %v4624_v17 = vadd.f32 %v4623_v57, %v4535_v25  ;;  %v5585_v0 = vunpack.c.l.b16 %v4992_v26  ;;  %v4920_v25 = vpack.c.bf16 %v4888_v32, %v4888_v32  ;;  %v3735_v57 = vpop.permute.xlu2 %3734 }
 0x3b0   : > { %v4539_v46 = vpop.f32.mrf.mxu1 }
 0x3b1   : > { %v4713_v33 = vadd.f32 %v4712_v12, %v4624_v17  ;;  %v5611_v48 = vpack.c.b16 %v5585_v0, %v5584_v28  ;;  %v4540_v8 = vadd.f32 %v9826_v9, %v4539_v46  ;;  %v4722_v37 = vpop.f32.mrf.mxu3  ;;  %v3847_v0 = vpop.permute.xlu0 %3846  ;;  %v5497_v46 = vunpack.c.l.b16 %v4920_v25 }
 0x3b3   : > { %v4776_v39 = vmax.f32 %v4713_v33, 0.0  ;;  %5632 = vrot.lane.b32.xlu2 %v5611_v48, %s8100_s22 }
 0x3b4   : > { %v4961_v59 = vld [vmem:[#allocation4 + $0x91] sm:$0xff] }
 0x3b5   : > { %4864 = vst.msk [vmem:[#allocation4 + $0x99] sm:$0xff] %vm4092_vm5, %v4776_v39  ;;  %v4993_v15 = vpack.c.bf16 %v4961_v59, %v4961_v59 }
 0x3b6   : > { %v4626_v34 = vpop.f32.mrf.mxu2 }
 0x3b7   : > { %v4627_v29 = vadd.f32 %v4626_v34, %v4538_v63  ;;  %v5586_v60 = vunpack.c.l.b16 %v4993_v15 }
 0x3b8   : > { %v4542_v55 = vpop.f32.mrf.mxu1 }
 0x3b9   : > { %v4716_v50 = vadd.f32 %v4715_v7, %v4627_v29  ;;  %v4543_v14 = vadd.f32 %v9826_v9, %v4542_v55  ;;  %v4725_v62 = vpop.f32.mrf.mxu3 }
 0x3bb   : > { %v4777_v2 = vmax.f32 %v4716_v50, 0.0 }
 0x3bc   : > { %v4962_v35 = vld [vmem:[#allocation4 + $0x99] sm:$0xff] }
 0x3bd   : > { %v4994_v1 = vpack.c.bf16 %v4962_v35, %v4962_v35  ;;  %4865 = vst.msk [vmem:[#allocation4 + $0xa9] sm:$0xff] %vm4092_vm5, %v4777_v2 }
 0x3be   : > { %v4628_v52 = vpop.f32.mrf.mxu2 }
 0x3bf   : > { %v5587_v53 = vunpack.c.l.b16 %v4994_v1  ;;  %v4629_v58 = vadd.f32 %v4628_v52, %v4540_v8  ;;  %v2581_v52 = vld [vmem:[#allocation3 + $0x138] sm:$0xff] }
 0x3c0   : > { %v4544_v12 = vpop.f32.mrf.mxu1 }
 0x3c1   : > { %v5612_v36 = vpack.c.b16 %v5587_v53, %v5586_v60  ;;  %v4718_v42 = vadd.f32 %v4717_v31, %v4629_v58  ;;  %v4545_v30 = vadd.f32 %v9826_v9, %v4544_v12  ;;  %v4727_v4 = vpop.f32.mrf.mxu3  ;;  %v4919_v31 = vpack.c.bf16 %v4887_v41, %v4887_v41  ;;  %v2582_v53 = vld [vmem:[#allocation3 + $0x140] sm:$0xff]  ;;  %v3431_v12 = vpop.permute.xlu0 %3430 }
 0x3c2   : > { %v2614_v58 = vpack.c.bf16 %v2582_v53, %v2582_v53 }
 0x3c3   : > { %5634 = vrot.lane.b32.xlu0 %v5612_v36, %s8100_s22  ;;  %v4778_v6 = vmax.f32 %v4718_v42, 0.0  ;;  %v5496_v59 = vunpack.c.l.b16 %v4919_v31  ;;  %v3319_v36 = vpop.permute.xlu2 %3318 }
 0x3c4   : > { %v4963_v16 = vld [vmem:[#allocation4 + $0xa9] sm:$0xff] }
 0x3c5   : > { %4866 = vst.msk [vmem:[#allocation4 + $0xb1] sm:$0xff] %vm4092_vm5, %v4778_v6  ;;  %v4995_v56 = vpack.c.bf16 %v4963_v16, %v4963_v16  ;;  %v9972_v15 = vpack.c.b16 %v5497_v46, %v5496_v59  ;;  %v4890_v6 = vld [vmem:[#allocation4 + $0x38] sm:$0xff]  ;;  %v2584_v46 = vld [vmem:[#allocation3 + $0x158] sm:$0xff] }
 0x3c6   : > { %v4631_v3 = vpop.f32.mrf.mxu2  ;;  %v2616_v59 = vpack.c.bf16 %v2584_v46, %v2584_v46 }
 0x3c7   : > { %v4632_v38 = vadd.f32 %v4631_v3, %v4543_v14  ;;  %v5588_v10 = vunpack.c.l.b16 %v4995_v56 }
 0x3c8   : > { %v4547_v11 = vpop.f32.mrf.mxu1 }
 0x3c9   : > { %v4721_v19 = vadd.f32 %v4720_v61, %v4632_v38  ;;  %v4548_v44 = vadd.f32 %v9826_v9, %v4547_v11  ;;  %v4730_v48 = vpop.f32.mrf.mxu3  ;;  %v4215_v38 = vsel %vm2466_vm3, %v9767_v5, %v3735_v57  ;;  %v2613_v11 = vpack.c.bf16 %v2581_v52, %v2581_v52  ;;  %v3737_v25 = vpop.permute.xlu0 %3736 }
 0x3ca   : > { %v4218_v53 = vsel %vm2466_vm3, %v9869_v27, %v3737_v25 }
 0x3cb   : > { %v4779_v18 = vmax.f32 %v4721_v19, 0.0  ;;  %v4249_v19 = vsel %vm4092_vm5, %v4215_v38, %v3847_v0 }
 0x3cc   : > { %v4964_v51 = vld [vmem:[#allocation4 + $0xb1] sm:$0xff] }
 0x3cd   : > { %4867 = vst.msk [vmem:[#allocation4 + $0xc1] sm:$0xff] %vm4092_vm5, %v4779_v18  ;;  %v4996_v49 = vpack.c.bf16 %v4964_v51, %v4964_v51  ;;  %v4922_v51 = vpack.c.bf16 %v4890_v6, %v4890_v6 }
 0x3ce   : > { %v4633_v13 = vpop.f32.mrf.mxu2 }
 0x3cf   : > { %v4634_v23 = vadd.f32 %v4633_v13, %v4545_v30  ;;  %v5589_v40 = vunpack.c.l.b16 %v4996_v49  ;;  %v3191_v30 = vunpack.c.l.b16 %v2614_v58 }
 0x3d0   : > { %v4549_v22 = vpop.f32.mrf.mxu1 }
 0x3d1   : > { %v4723_v7 = vadd.f32 %v4722_v37, %v4634_v23  ;;  %v5613_v21 = vpack.c.b16 %v5589_v40, %v5588_v10  ;;  %v4550_v39 = vadd.f32 %v9826_v9, %v4549_v22  ;;  %v4732_v14 = vpop.f32.mrf.mxu3  ;;  %v3190_v40 = vunpack.c.l.b16 %v2613_v11  ;;  %v3321_v58 = vpop.permute.xlu0 %3320 }
 0x3d3   : > { %v4780_v43 = vmax.f32 %v4723_v7, 0.0  ;;  %5636 = vrot.lane.b32.xlu1 %v5613_v21, %s8100_s22 }
 0x3d4   : > { %v4965_v45 = vld [vmem:[#allocation4 + $0xc1] sm:$0xff] }
 0x3d5   : > { %4868 = vst.msk [vmem:[#allocation4 + $0xc9] sm:$0xff] %vm4092_vm5, %v4780_v43  ;;  %v4997_v28 = vpack.c.bf16 %v4965_v45, %v4965_v45  ;;  %v3209_v43 = vpack.c.b16 %v3191_v30, %v3190_v40 }
 0x3d6   : > { %v4636_v47 = vpop.f32.mrf.mxu2 }
 0x3d7   : > { %v4637_v20 = vadd.f32 %v4636_v47, %v4548_v44  ;;  %v5590_v29 = vunpack.c.l.b16 %v4997_v28  ;;  %v4085_v45 = vsel %vm2466_vm3, %v3209_v43, %v3319_v36 }
 0x3d8   : > { %v4552_v54 = vpop.f32.mrf.mxu1 }
 0x3d9   : > { %v4726_v26 = vadd.f32 %v4725_v62, %v4637_v20  ;;  %v4553_v37 = vadd.f32 %v9826_v9, %v4552_v54  ;;  %v4889_v62 = vld [vmem:[#allocation4 + $0x30] sm:$0xff]  ;;  %v4735_v31 = vpop.f32.mrf.mxu3 }
 0x3da   : > { %v4921_v10 = vpack.c.bf16 %v4889_v62, %v4889_v62 }
 0x3db   : > { %v4781_v17 = vmax.f32 %v4726_v26, 0.0  ;;  %v4120_v26 = vsel %vm4092_vm5, %v4085_v45, %v3431_v12  ;;  %v4894_v45 = vld [vmem:[#allocation4 + $0x68] sm:$0xff] }
 0x3dc   : > { %v4966_v33 = vld [vmem:[#allocation4 + $0xc9] sm:$0xff]  ;;  %v5498_v54 = vunpack.c.l.b16 %v4921_v10 }
 0x3dd   : > { %4869 = vst.msk [vmem:[#allocation4 + $0xd9] sm:$0xff] %vm4092_vm5, %v4781_v17  ;;  %v4998_v61 = vpack.c.bf16 %v4966_v33, %v4966_v33  ;;  %v5627_v44 = vpop.permute.xlu2 %5626 }
 0x3de   : > { %v4638_v63 = vpop.f32.mrf.mxu2 }
 0x3df   : > { %v4639_v34 = vadd.f32 %v4638_v63, %v4550_v39  ;;  %v5591_v55 = vunpack.c.l.b16 %v4998_v61  ;;  %v2583_v61 = vld [vmem:[#allocation3 + $0x150] sm:$0xff] }
 0x3e0   : > { %v4554_v2 = vpop.f32.mrf.mxu1 }
 0x3e1   : > { %v4728_v50 = vadd.f32 %v4727_v4, %v4639_v34  ;;  %v5614_v35 = vpack.c.b16 %v5591_v55, %v5590_v29  ;;  %v4555_v5 = vadd.f32 %v9826_v9, %v4554_v2  ;;  %v5499_v4 = vunpack.c.l.b16 %v4922_v51  ;;  %v4892_v55 = vld [vmem:[#allocation4 + $0x50] sm:$0xff] }
 0x3e2   : > { %v4924_v36 = vpack.c.bf16 %v4892_v55, %v4892_v55 }
 0x3e3   : > { %v4782_v8 = vmax.f32 %v4728_v50, 0.0  ;;  %5638 = vrot.lane.b32.xlu2 %v5614_v35, %s8100_s22  ;;  %v9987_v0 = vpack.c.b16 %v5499_v4, %v5498_v54  ;;  %v2615_v35 = vpack.c.bf16 %v2583_v61, %v2583_v61  ;;  %v10014_v61 = vld [vmem:[%s10670_s4] ss:$0 sm:$0xff] }
 0x3e4   : > { %v5625_v1 = vpop.permute.xlu1 %5624  ;;  %v4967_v16 = vld [vmem:[#allocation4 + $0xd9] sm:$0xff] }
 0x3e5   : > { %v6316_v60 = vsel %vm4092_vm5, %v9972_v15, %v5625_v1  ;;  %4870 = vst.msk [vmem:[#allocation4 + $0xe1] sm:$0xff] %vm4092_vm5, %v4782_v8  ;;  %v4999_v23 = vpack.c.bf16 %v4967_v16, %v4967_v16  ;;  %v6320_v39 = vsel %vm4092_vm5, %v9987_v0, %v5627_v44  ;;  %v3961_v1 = vpop.permute.xlu2 %3960  ;;  %v3192_v11 = vunpack.c.l.b16 %v2615_v35 }
 0x3e6   : > { %6919 = vmatmul.bf16.gmra.mxu0 %v6316_v60  ;;  %v4641_v42 = vpop.f32.mrf.mxu2  ;;  %v4891_v60 = vld [vmem:[#allocation4 + $0x48] sm:$0xff] }
 0x3e7   : > { %v4642_v3 = vadd.f32 %v4641_v42, %v4553_v37  ;;  %v5592_v20 = vunpack.c.l.b16 %v4999_v23  ;;  %v3193_v37 = vunpack.c.l.b16 %v2616_v59  ;;  %v4737_v42 = vpop.f32.mrf.mxu3  ;;  %v4923_v38 = vpack.c.bf16 %v4891_v60, %v4891_v60 }
 0x3e8   : > { %v4557_v22 = vpop.f32.mrf.mxu1 }
 0x3e9   : > { %v4731_v18 = vadd.f32 %v4730_v48, %v4642_v3  ;;  %v4558_v63 = vadd.f32 %v9826_v9, %v4557_v22 }
 0x3eb   : > { %v4783_v13 = vmax.f32 %v4731_v18, 0.0  ;;  %v3210_v18 = vpack.c.b16 %v3193_v37, %v3192_v11 }
 0x3ec   : > { %v3959_v56 = vpop.permute.xlu1 %3958  ;;  %v4968_v7 = vld [vmem:[#allocation4 + $0xe1] sm:$0xff] }
 0x3ed   : > { %v4294_v49 = vsel %vm4125_vm6, %v4249_v19, %v3959_v56  ;;  %4871 = vst.msk [vmem:[#allocation4 + $0xf1] sm:$0xff] %vm4092_vm5, %v4783_v13  ;;  %v5000_v21 = vpack.c.bf16 %v4968_v7, %v4968_v7  ;;  %v5501_v19 = vunpack.c.l.b16 %v4924_v36  ;;  %v5500_v13 = vunpack.c.l.b16 %v4923_v38 }
 0x3ee   : > { %4660 = vmatmul.bf16.gmra.mxu2 %v4294_v49  ;;  %v4643_v32 = vpop.f32.mrf.mxu2  ;;  %v4088_v10 = vsel %vm2466_vm3, %v3210_v18, %v3321_v58  ;;  %v4896_v58 = vld [vmem:[#allocation4 + $0x80] sm:$0xff] }
 0x3ef   : > { %v4644_v47 = vadd.f32 %v4643_v32, %v4555_v5  ;;  %v5593_v41 = vunpack.c.l.b16 %v5000_v21  ;;  %v10002_v5 = vpack.c.b16 %v5501_v19, %v5500_v13  ;;  %v3545_v21 = vpop.permute.xlu2 %3544  ;;  %v4928_v38 = vpack.c.bf16 %v4896_v58, %v4896_v58  ;;  %v2713_v58 = vld [vmem:[#allocation3 + $0x16a] sm:$0xff] }
 0x3f0   : > { %v4559_v34 = vpop.f32.mrf.mxu1 }
 0x3f1   : > { %v4733_v57 = vadd.f32 %v4732_v14, %v4644_v47  ;;  %v5615_v17 = vpack.c.b16 %v5593_v41, %v5592_v20  ;;  %v4560_v62 = vadd.f32 %v9826_v9, %v4559_v34  ;;  %v4740_v20 = vpop.f32.mrf.mxu3 }
 0x3f3   : > { %v4784_v48 = vmax.f32 %v4733_v57, 0.0  ;;  %5640 = vrot.lane.b32.xlu0 %v5615_v17, %s8100_s22  ;;  %v4926_v17 = vpack.c.bf16 %v4894_v45, %v4894_v45  ;;  %v4897_v45 = vld [vmem:[#allocation4 + $0x90] sm:$0xff] }
 0x3f4   : > { %v3543_v28 = vpop.permute.xlu1 %3542  ;;  %v4969_v2 = vld [vmem:[#allocation4 + $0xf1] sm:$0xff] }
 0x3f5   : > { %v4166_v33 = vsel %vm4125_vm6, %v4120_v26, %v3543_v28  ;;  %4872 = vst.msk [vmem:[#allocation4 + $0xf9] sm:$0xff] %vm4092_vm5, %v4784_v48  ;;  %v5001_v3 = vpack.c.bf16 %v4969_v2, %v4969_v2  ;;  %v5503_v59 = vunpack.c.l.b16 %v4926_v17 }
 0x3f6   : > { %4571 = vmatmul.bf16.gmra.mxu1 %v4166_v33  ;;  %6924 = vmatmul.bf16.gmra.mxu0 %v6320_v39  ;;  %v4646_v29 = vpop.f32.mrf.mxu2 }
 0x3f7   : > { %v4647_v50 = vadd.f32 %v4646_v29, %v4558_v63  ;;  %v5594_v30 = vunpack.c.l.b16 %v5001_v3 }
 0x3f8   : > { %v4562_v23 = vpop.f32.mrf.mxu1 }
 0x3f9   : > { %v4736_v8 = vadd.f32 %v4735_v31, %v4647_v50  ;;  %v4563_v41 = vadd.f32 %v9826_v9, %v4562_v23  ;;  %v4893_v31 = vld [vmem:[#allocation4 + $0x60] sm:$0xff]  ;;  %v4742_v29 = vpop.f32.mrf.mxu3 }
 0x3fa   : > { %v4925_v48 = vpack.c.bf16 %v4893_v31, %v4893_v31 }
 0x3fb   : > { %v4785_v6 = vmax.f32 %v4736_v8, 0.0 }
 0x3fc   : > { %v3849_v52 = vpop.permute.xlu1 %3848  ;;  %v4970_v16 = vld [vmem:[#allocation4 + $0xf9] sm:$0xff] }
 0x3fd   : > { %v4251_v12 = vsel %vm4092_vm5, %v4218_v53, %v3849_v52  ;;  %4873 = vst.msk [vmem:[#allocation4 + $0x109] sm:$0xff] %vm4092_vm5, %v4785_v6  ;;  %v5002_v27 = vpack.c.bf16 %v4970_v16, %v4970_v16  ;;  %v4895_v6 = vld [vmem:[#allocation4 + $0x78] sm:$0xff] }
 0x3fe   : > { %v4297_v14 = vsel %vm4125_vm6, %v4251_v12, %v3961_v1  ;;  %v4648_v56 = vpop.f32.mrf.mxu2  ;;  %v5502_v1 = vunpack.c.l.b16 %v4925_v48 }
 0x3ff   : > { %4665 = vmatmul.bf16.gmra.mxu2 %v4297_v14  ;;  %v4649_v51 = vadd.f32 %v4648_v56, %v4560_v62  ;;  %v5595_v49 = vunpack.c.l.b16 %v5002_v27  ;;  %v4927_v62 = vpack.c.bf16 %v4895_v6, %v4895_v6  ;;  %v4899_v6 = vld [vmem:[#allocation4 + $0xa8] sm:$0xff] }
 0x400   : > { %v4564_v28 = vpop.f32.mrf.mxu1  ;;  %v10018_v53 = vpack.c.b16 %v5503_v59, %v5502_v1  ;;  %v2971_v59 = vld [vmem:[#allocation3 + $0x1a0] sm:$0xff] }
 0x401   : > { %v4738_v40 = vadd.f32 %v4737_v42, %v4649_v51  ;;  %v5616_v22 = vpack.c.b16 %v5595_v49, %v5594_v30  ;;  %v4565_v9 = vadd.f32 %v10014_v61, %v4564_v28  ;;  %v4745_v14 = vpop.f32.mrf.mxu3  ;;  %v5505_v51 = vunpack.c.l.b16 %v4928_v38 }
 0x402   : > { %v5504_v23 = vunpack.c.l.b16 %v4927_v62 }
 0x403   : > { %v4786_v44 = vmax.f32 %v4738_v40, 0.0  ;;  %5642 = vrot.lane.b32.xlu1 %v5616_v22, %s8100_s22 }
 0x404   : > { %v3433_v7 = vpop.permute.xlu1 %3432  ;;  %v4971_v26 = vld [vmem:[#allocation4 + $0x109] sm:$0xff] }
 0x405   : > { %v4122_v4 = vsel %vm4092_vm5, %v4088_v10, %v3433_v7  ;;  %v5629_v43 = vpop.permute.xlu0 %5628  ;;  %4874 = vst.msk [vmem:[#allocation4 + $0x111] sm:$0xff] %vm4092_vm5, %v4786_v44  ;;  %v5003_v46 = vpack.c.bf16 %v4971_v26, %v4971_v26 }
 0x406   : > { %v4169_v32 = vsel %vm4125_vm6, %v4122_v4, %v3545_v21  ;;  %v6324_v47 = vsel %vm4092_vm5, %v10002_v5, %v5629_v43  ;;  %v4651_v54 = vpop.f32.mrf.mxu2  ;;  %v10027_v21 = vpack.c.b16 %v5505_v51, %v5504_v23 }
 0x407   : > { %4576 = vmatmul.bf16.gmra.mxu1 %v4169_v32  ;;  %6929 = vmatmul.bf16.gmra.mxu0 %v6324_v47  ;;  %v4652_v25 = vadd.f32 %v4651_v54, %v4563_v41  ;;  %v5596_v50 = vunpack.c.l.b16 %v5003_v46  ;;  %v4898_v41 = vld [vmem:[#allocation4 + $0x98] sm:$0xff] }
 0x408   : > { %v2649_v54 = vld [vmem:[#allocation3 + $0x169] sm:$0xff]  ;;  %v4930_v26 = vpack.c.bf16 %v4898_v41, %v4898_v41 }
 0x409   : > { %v4741_v57 = vadd.f32 %v4740_v20, %v4652_v25  ;;  %v4747_v43 = vpop.f32.mrf.mxu3  ;;  %v2650_v20 = vld [vmem:[#allocation3 + $0x171] sm:$0xff]  ;;  %v2681_v31 = vpack.c.bf16 %v2649_v54, %v2649_v54 }
 0x40a   : > { %v2682_v25 = vpack.c.bf16 %v2650_v20, %v2650_v20 }
 0x40b   : > { %v4787_v33 = vmax.f32 %v4741_v57, 0.0  ;;  %v4929_v57 = vpack.c.bf16 %v4897_v45, %v4897_v45  ;;  %v3274_v48 = vunpack.c.l.b16 %v2681_v31  ;;  %v5209_v31 = vld [vmem:[#allocation4 + $0x4a] sm:$0xff] }
 0x40c   : > { %v4972_v39 = vld [vmem:[#allocation4 + $0x111] sm:$0xff]  ;;  %v3275_v28 = vunpack.c.l.b16 %v2682_v25 }
 0x40d   : > { %4875 = vst.msk [vmem:[#allocation4 + $0x121] sm:$0xff] %vm4092_vm5, %v4787_v33  ;;  %v5004_v63 = vpack.c.bf16 %v4972_v39, %v4972_v39  ;;  %v5633_v10 = vpop.permute.xlu2 %5632  ;;  %v5507_v33 = vunpack.c.l.b16 %v4930_v26  ;;  %v5506_v39 = vunpack.c.l.b16 %v4929_v57  ;;  %v5210_v57 = vld [vmem:[#allocation4 + $0x52] sm:$0xff] }
 0x40e   : > { %v4653_v34 = vpop.f32.mrf.mxu2  ;;  %v4567_v52 = vpop.f32.mrf.mxu1  ;;  %v6332_v44 = vsel %vm4092_vm5, %v10027_v21, %v5633_v10 }
 0x40f   : > { %v4654_v55 = vadd.f32 %v4653_v34, %v4565_v9  ;;  %v5597_v35 = vunpack.c.l.b16 %v5004_v63  ;;  %v4568_v12 = vadd.f32 %v10014_v61, %v4567_v52  ;;  %v2970_v63 = vld [vmem:[#allocation3 + $0x198] sm:$0xff] }
 0x411   : > { %v4743_v2 = vadd.f32 %v4742_v29, %v4654_v55  ;;  %v5617_v60 = vpack.c.b16 %v5597_v35, %v5596_v50  ;;  %v3291_v29 = vpack.c.b16 %v3275_v28, %v3274_v48  ;;  %v10035_v55 = vpack.c.b16 %v5507_v33, %v5506_v39 }
 0x412   : > { %v5241_v48 = vpack.c.bf16 %v5209_v31, %v5209_v31  ;;  %v5242_v39 = vpack.c.bf16 %v5210_v57, %v5210_v57 }
 0x413   : > { %v4788_v36 = vmax.f32 %v4743_v2, 0.0  ;;  %5644 = vrot.lane.b32.xlu2 %v5617_v60, %s8100_s22  ;;  %v3002_v2 = vpack.c.bf16 %v2970_v63, %v2970_v63 }
 0x414   : > { %v4973_v42 = vld [vmem:[#allocation4 + $0x121] sm:$0xff]  ;;  %v5962_v63 = vunpack.c.l.b16 %v5241_v48 }
 0x415   : > { %v5631_v8 = vpop.permute.xlu1 %5630  ;;  %4876 = vst.msk [vmem:[#allocation4 + $0x129] sm:$0xff] %vm4092_vm5, %v4788_v36  ;;  %v5005_v16 = vpack.c.bf16 %v4973_v42, %v4973_v42  ;;  %v3802_v52 = vunpack.c.l.b16 %v3002_v2 }
 0x416   : > { %v6328_v37 = vsel %vm4092_vm5, %v10018_v53, %v5631_v8  ;;  %v4569_v18 = vpop.f32.mrf.mxu1 }
 0x417   : > { %6934 = vmatmul.bf16.gmra.mxu0 %v6328_v37  ;;  %v5598_v49 = vunpack.c.l.b16 %v5005_v16  ;;  %v4570_v40 = vadd.f32 %v10014_v61, %v4569_v18  ;;  %v4900_v37 = vld [vmem:[#allocation4 + $0xb0] sm:$0xff]  ;;  %v5206_v18 = vld [vmem:[#allocation4 + $0x22] sm:$0xff] }
 0x41c   : > { %v4656_v3 = vpop.f32.mrf.mxu2  ;;  %v4974_v19 = vld [vmem:[#allocation4 + $0x129] sm:$0xff] }
 0x41d   : > { %v4657_v11 = vadd.f32 %v4656_v3, %v4568_v12  ;;  %v5006_v56 = vpack.c.bf16 %v4974_v19, %v4974_v19  ;;  %v2714_v12 = vld [vmem:[#allocation3 + $0x172] sm:$0xff]  ;;  %v2745_v3 = vpack.c.bf16 %v2713_v58, %v2713_v58  ;;  %v5205_v19 = vld [vmem:[#allocation4 + $0x1a] sm:$0xff] }
 0x41e   : > { %v2746_v38 = vpack.c.bf16 %v2714_v12, %v2714_v12  ;;  %v5213_v58 = vld [vmem:[#allocation4 + $0x7a] sm:$0xff]  ;;  %v5214_v12 = vld [vmem:[#allocation4 + $0x82] sm:$0xff] }
 0x41f   : > { %v4746_v27 = vadd.f32 %v4745_v14, %v4657_v11  ;;  %v5599_v13 = vunpack.c.l.b16 %v5006_v56  ;;  %v4932_v14 = vpack.c.bf16 %v4900_v37, %v4900_v37  ;;  %v4931_v11 = vpack.c.bf16 %v4899_v6, %v4899_v6 }
 0x420   : > { %v3386_v62 = vunpack.c.l.b16 %v2745_v3  ;;  %v5245_v3 = vpack.c.bf16 %v5213_v58, %v5213_v58 }
 0x421   : > { %v4789_v30 = vmax.f32 %v4746_v27, 0.0  ;;  %v5618_v22 = vpack.c.b16 %v5599_v13, %v5598_v49  ;;  %v5509_v16 = vunpack.c.l.b16 %v4932_v14  ;;  %v3387_v27 = vunpack.c.l.b16 %v2746_v38 }
 0x422   : > { %v5508_v56 = vunpack.c.l.b16 %v4931_v11  ;;  %v5237_v49 = vpack.c.bf16 %v5205_v19, %v5205_v19  ;;  %v5238_v13 = vpack.c.bf16 %v5206_v18, %v5206_v18  ;;  %v5246_v38 = vpack.c.bf16 %v5214_v12, %v5214_v12  ;;  %v4906_v19 = vld [vmem:[#allocation4 + $0xf8] sm:$0xff] }
 0x423   : > { %4877 = vst.msk [vmem:[#allocation4 + $0x139] sm:$0xff] %vm4092_vm5, %v4789_v30  ;;  %5646 = vrot.lane.b32.xlu0 %v5618_v22, %s8100_s22  ;;  %v3403_v30 = vpack.c.b16 %v3387_v27, %v3386_v62  ;;  %v5966_v62 = vunpack.c.l.b16 %v5245_v3  ;;  %v5215_v18 = vld [vmem:[#allocation4 + $0x92] sm:$0xff] }
 0x424   : > { %v4658_v7 = vpop.f32.mrf.mxu2  ;;  %v10042_v51 = vpack.c.b16 %v5509_v16, %v5508_v56  ;;  %v5959_v22 = vunpack.c.l.b16 %v5238_v13  ;;  %v5967_v27 = vunpack.c.l.b16 %v5246_v38  ;;  %v5216_v56 = vld [vmem:[#allocation4 + $0x9a] sm:$0xff]  ;;  %v4938_v13 = vpack.c.bf16 %v4906_v19, %v4906_v19 }
 0x425   : > { %v4659_v4 = vadd.f32 %v4658_v7, %v4570_v40  ;;  %v5958_v40 = vunpack.c.l.b16 %v5237_v49  ;;  %v4902_v7 = vld [vmem:[#allocation4 + $0xc8] sm:$0xff]  ;;  %v5221_v38 = vld [vmem:[#allocation4 + $0xda] sm:$0xff] }
 0x426   : > { %v5994_v49 = vpack.c.b16 %v5967_v27, %v5966_v62 }
 0x427   : > { %v4748_v32 = vadd.f32 %v4747_v43, %v4659_v4  ;;  %6939 = vmatmul.bf16.gmra.mxu0 %v6332_v44  ;;  %v5207_v4 = vld [vmem:[#allocation4 + $0x32] sm:$0xff]  ;;  %v5208_v43 = vld [vmem:[#allocation4 + $0x3a] sm:$0xff] }
 0x428   : > { %v4901_v44 = vld [vmem:[#allocation4 + $0xc0] sm:$0xff]  ;;  %v5239_v20 = vpack.c.bf16 %v5207_v4, %v5207_v4  ;;  %v5240_v41 = vpack.c.bf16 %v5208_v43, %v5208_v43  ;;  %v4750_v4 = vpop.f32.mrf.mxu3 }
 0x429   : > { %v4790_v47 = vmax.f32 %v4748_v32, 0.0  ;;  %v5990_v32 = vpack.c.b16 %v5959_v22, %v5958_v40  ;;  %v4933_v54 = vpack.c.bf16 %v4901_v44, %v4901_v44  ;;  %v10059_v40 = vpop.f32.mrf.mxu0  ;;  %v5515_v44 = vunpack.c.l.b16 %v4938_v13 }
 0x42a   : > { %v4975_v17 = vld [vmem:[#allocation4 + $0x139] sm:$0xff]  ;;  %v5960_v25 = vunpack.c.l.b16 %v5239_v20  ;;  %v5961_v26 = vunpack.c.l.b16 %v5240_v41  ;;  %v5217_v41 = vld [vmem:[#allocation4 + $0xaa] sm:$0xff] }
 0x42b   : > { %4878 = vst.msk [vmem:[#allocation4 + $0x141] sm:$0xff] %vm4092_vm5, %v4790_v47  ;;  %3738 = vrot.lane.b32.xlu0 %v9900_v24, %s8099_s18  ;;  %v5007_v46 = vpack.c.bf16 %v4975_v17, %v4975_v17  ;;  %v3003_v24 = vpack.c.bf16 %v2971_v59, %v2971_v59  ;;  %v4934_v47 = vpack.c.bf16 %v4902_v7, %v4902_v7  ;;  %v5510_v17 = vunpack.c.l.b16 %v4933_v54  ;;  %v5218_v54 = vld [vmem:[#allocation4 + $0xb2] sm:$0xff] }
 0x42c   : > { %v5963_v59 = vunpack.c.l.b16 %v5242_v39  ;;  %v5249_v57 = vpack.c.bf16 %v5217_v41, %v5217_v41 }
 0x42d   : > { %v5600_v35 = vunpack.c.l.b16 %v5007_v46  ;;  %v3803_v36 = vunpack.c.l.b16 %v3003_v24  ;;  %v5511_v45 = vunpack.c.l.b16 %v4934_v47  ;;  %v5991_v46 = vpack.c.b16 %v5961_v26, %v5960_v25 }
 0x42f   : > { %v3819_v42 = vpack.c.b16 %v3803_v36, %v3802_v52  ;;  %v10048_v33 = vpack.c.b16 %v5511_v45, %v5510_v17  ;;  %v5250_v17 = vpack.c.bf16 %v5218_v54, %v5218_v54 }
 0x431   : > { %v10068_v39 = vpop.f32.mrf.mxu0 }
 0x432   : > { %v4976_v9 = vld [vmem:[#allocation4 + $0x141] sm:$0xff] }
 0x433   : > { %v5008_v34 = vpack.c.bf16 %v4976_v9, %v4976_v9  ;;  %3322 = vrot.lane.b32.xlu0 %v3291_v29, %s8099_s18  ;;  %v5211_v29 = vld [vmem:[#allocation4 + $0x62] sm:$0xff] }
 0x434   : > { %v5243_v24 = vpack.c.bf16 %v5211_v29, %v5211_v29  ;;  %v5971_v29 = vunpack.c.l.b16 %v5250_v17 }
 0x435   : > { %v5635_v50 = vpop.permute.xlu0 %5634  ;;  %v5601_v1 = vunpack.c.l.b16 %v5008_v34  ;;  %v4904_v34 = vld [vmem:[#allocation4 + $0xe0] sm:$0xff] }
 0x436   : > { %v6336_v60 = vsel %vm4092_vm5, %v10035_v55, %v5635_v50  ;;  %v5212_v50 = vld [vmem:[#allocation4 + $0x6a] sm:$0xff]  ;;  %v4936_v2 = vpack.c.bf16 %v4904_v34, %v4904_v34  ;;  %v5964_v36 = vunpack.c.l.b16 %v5243_v24  ;;  %v5970_v34 = vunpack.c.l.b16 %v5249_v57 }
 0x437   : > { %6944 = vmatmul.bf16.gmra.mxu0 %v6336_v60  ;;  %v5619_v8 = vpack.c.b16 %v5601_v1, %v5600_v35  ;;  %v4903_v35 = vld [vmem:[#allocation4 + $0xd8] sm:$0xff]  ;;  %v5992_v1 = vpack.c.b16 %v5963_v59, %v5962_v63  ;;  %v5244_v60 = vpack.c.bf16 %v5212_v50, %v5212_v50  ;;  %v4752_v50 = vpop.f32.mrf.mxu3  ;;  %v5220_v24 = vld [vmem:[#allocation4 + $0xca] sm:$0xff] }
 0x438   : > { %v5513_v52 = vunpack.c.l.b16 %v4936_v2  ;;  %v5219_v2 = vld [vmem:[#allocation4 + $0xc2] sm:$0xff]  ;;  %v5252_v58 = vpack.c.bf16 %v5220_v24, %v5220_v24 }
 0x439   : > { %5648 = vrot.lane.b32.xlu1 %v5619_v8, %s8100_s22  ;;  %v4935_v8 = vpack.c.bf16 %v4903_v35, %v4903_v35  ;;  %v5965_v37 = vunpack.c.l.b16 %v5244_v60 }
 0x43a   : > { %v5973_v27 = vunpack.c.l.b16 %v5252_v58 }
 0x43b   : > { %v5993_v14 = vpack.c.b16 %v5965_v37, %v5964_v36  ;;  %v5251_v37 = vpack.c.bf16 %v5219_v2, %v5219_v2 }
 0x43d   : > { %v5639_v28 = vpop.permute.xlu2 %5638  ;;  %v5972_v62 = vunpack.c.l.b16 %v5251_v37 }
 0x43e   : > { %v6344_v9 = vsel %vm4092_vm5, %v10048_v33, %v5639_v28 }
 0x441   : > { %3850 = vrot.lane.b32.xlu1 %v3819_v42, %s8100_s22  ;;  %v5512_v42 = vunpack.c.l.b16 %v4935_v8  ;;  %v4907_v8 = vld [vmem:[#allocation4 + $0x108] sm:$0xff] }
 0x443   : > { %v10054_v6 = vpack.c.b16 %v5513_v52, %v5512_v42  ;;  %v5996_v52 = vpack.c.b16 %v5971_v29, %v5970_v34  ;;  %v4939_v42 = vpack.c.bf16 %v4907_v8, %v4907_v8 }
 0x445   : > { %v5637_v23 = vpop.permute.xlu1 %5636 }
 0x446   : > { %v6340_v10 = vsel %vm4092_vm5, %v10042_v51, %v5637_v23  ;;  %v5247_v23 = vpack.c.bf16 %v5215_v18, %v5215_v18 }
 0x447   : > { %6949 = vmatmul.bf16.gmra.mxu0 %v6340_v10  ;;  %v5248_v10 = vpack.c.bf16 %v5216_v56, %v5216_v56 }
 0x449   : > { %3434 = vrot.lane.b32.xlu1 %v3403_v30, %s8100_s22  ;;  %v4905_v30 = vld [vmem:[#allocation4 + $0xf0] sm:$0xff]  ;;  %v5969_v47 = vunpack.c.l.b16 %v5248_v10 }
 0x44a   : > { %v4937_v7 = vpack.c.bf16 %v4905_v30, %v4905_v30  ;;  %v5516_v30 = vunpack.c.l.b16 %v4939_v42 }
 0x44c   : > { %v5514_v45 = vunpack.c.l.b16 %v4937_v7 }
 0x44e   : > { %v10063_v26 = vpack.c.b16 %v5515_v44, %v5514_v45 }
 0x451   : > { %6006 = vrot.lane.b32.xlu1 %v5990_v32, %s8100_s22  ;;  %v5968_v32 = vunpack.c.l.b16 %v5247_v23  ;;  %v4755_v23 = vpop.f32.mrf.mxu3 }
 0x453   : > { %v5995_v31 = vpack.c.b16 %v5969_v47, %v5968_v32 }
 0x457   : > { %6954 = vmatmul.bf16.gmra.mxu0 %v6344_v9 }
 0x459   : > { %6008 = vrot.lane.b32.xlu1 %v5991_v46, %s8100_s22 }
 0x461   : > { %6010 = vrot.lane.b32.xlu1 %v5992_v1, %s8100_s22  ;;  %v4908_v1 = vld [vmem:[#allocation4 + $0x110] sm:$0xff] }
 0x462   : > { %v4940_v36 = vpack.c.bf16 %v4908_v1, %v4908_v1 }
 0x465   : > { %v5641_v11 = vpop.permute.xlu0 %5640 }
 0x466   : > { %v6348_v16 = vsel %vm4092_vm5, %v10054_v6, %v5641_v11  ;;  %v5222_v11 = vld [vmem:[#allocation4 + $0xe2] sm:$0xff] }
 0x467   : > { %6959 = vmatmul.bf16.gmra.mxu0 %v6348_v16  ;;  %v5517_v16 = vunpack.c.l.b16 %v4940_v36  ;;  %v5254_v13 = vpack.c.bf16 %v5222_v11, %v5222_v11  ;;  %v4757_v36 = vpop.f32.mrf.mxu3 }
 0x469   : > { %6012 = vrot.lane.b32.xlu1 %v5993_v14, %s8100_s22  ;;  %v10073_v14 = vpop.f32.mrf.mxu0  ;;  %v10077_v7 = vpack.c.b16 %v5517_v16, %v5516_v30 }
 0x46d   : > { %v5645_v10 = vpop.permute.xlu2 %5644 }
 0x46e   : > { %v6356_v32 = vsel %vm4092_vm5, %v10077_v7, %v5645_v10 }
 0x471   : > { %v4661_v22 = vpop.f32.mrf.mxu2  ;;  %6014 = vrot.lane.b32.xlu1 %v5994_v49, %s8100_s22  ;;  %v5253_v49 = vpack.c.bf16 %v5221_v38, %v5221_v38  ;;  %v10082_v57 = vpop.f32.mrf.mxu0 }
 0x473   : > { %v4572_v43 = vpop.f32.mrf.mxu1  ;;  %v5974_v47 = vunpack.c.l.b16 %v5253_v49 }
 0x474   : > { %v4573_v20 = vadd.f32 %v10014_v61, %v4572_v43 }
 0x475   : > { %v5643_v46 = vpop.permute.xlu1 %5642 }
 0x476   : > { %v4662_v25 = vadd.f32 %v4661_v22, %v4573_v20  ;;  %v6352_v48 = vsel %vm4092_vm5, %v10063_v26, %v5643_v46  ;;  %v5975_v20 = vunpack.c.l.b16 %v5254_v13  ;;  %v4910_v46 = vld [vmem:[#allocation4 + $0x128] sm:$0xff] }
 0x477   : > { %6964 = vmatmul.bf16.gmra.mxu0 %v6352_v48  ;;  %v5223_v48 = vld [vmem:[#allocation4 + $0xf2] sm:$0xff] }
 0x478   : > { %v4751_v28 = vadd.f32 %v4750_v4, %v4662_v25  ;;  %v5997_v4 = vpack.c.b16 %v5973_v27, %v5972_v62  ;;  %v3034_v25 = vld [vmem:[#allocation3 + $0x199] sm:$0xff]  ;;  %v5255_v8 = vpack.c.bf16 %v5223_v48, %v5223_v48  ;;  %v5226_v27 = vld [vmem:[#allocation4 + $0x112] sm:$0xff] }
 0x479   : > { %6016 = vrot.lane.b32.xlu1 %v5995_v31, %s8100_s22  ;;  %v4663_v63 = vpop.f32.mrf.mxu2  ;;  %v3035_v31 = vld [vmem:[#allocation3 + $0x1a1] sm:$0xff]  ;;  %v3066_v1 = vpack.c.bf16 %v3034_v25, %v3034_v25  ;;  %v5258_v13 = vpack.c.bf16 %v5226_v27, %v5226_v27 }
 0x47a   : > { %v4791_v9 = vmax.f32 %v4751_v28, 0.0  ;;  %v3067_v2 = vpack.c.bf16 %v3035_v31, %v3035_v31  ;;  %v5976_v11 = vunpack.c.l.b16 %v5255_v8  ;;  %v5225_v62 = vld [vmem:[#allocation4 + $0x10a] sm:$0xff]  ;;  %v5227_v31 = vld [vmem:[#allocation4 + $0x122] sm:$0xff]  ;;  %v4911_v8 = vld [vmem:[#allocation4 + $0x138] sm:$0xff] }
 0x47b   : > { %v4574_v59 = vpop.f32.mrf.mxu1  ;;  %v5257_v49 = vpack.c.bf16 %v5225_v62, %v5225_v62 }
 0x47c   : > { %4879 = vst.msk [vmem:[#allocation4 + $0x151] sm:$0xff] %vm4092_vm5, %v4791_v9  ;;  %v4575_v35 = vadd.f32 %v10014_v61, %v4574_v59  ;;  %v5224_v9 = vld [vmem:[#allocation4 + $0xfa] sm:$0xff]  ;;  %v5998_v59 = vpack.c.b16 %v5975_v20, %v5974_v47  ;;  %v3915_v42 = vunpack.c.l.b16 %v3067_v2  ;;  %v5979_v20 = vunpack.c.l.b16 %v5258_v13 }
 0x47d   : > { %v5978_v47 = vunpack.c.l.b16 %v5257_v49 }
 0x47e   : > { %v4664_v60 = vadd.f32 %v4663_v63, %v4575_v35  ;;  %v4909_v35 = vld [vmem:[#allocation4 + $0x120] sm:$0xff] }
 0x47f   : > { %v6000_v48 = vpack.c.b16 %v5979_v20, %v5978_v47 }
 0x480   : > { %v4753_v12 = vadd.f32 %v4752_v50, %v4664_v60  ;;  %v4942_v60 = vpack.c.bf16 %v4910_v46, %v4910_v46  ;;  %v5335_v46 = vld [vmem:[#allocation4 + $0x39] sm:$0xff] }
 0x481   : > { %6018 = vrot.lane.b32.xlu1 %v5996_v52, %s8100_s22  ;;  %v5256_v52 = vpack.c.bf16 %v5224_v9, %v5224_v9 }
 0x482   : > { %v4792_v3 = vmax.f32 %v4753_v12, 0.0  ;;  %v4666_v19 = vpop.f32.mrf.mxu2  ;;  %v4941_v12 = vpack.c.bf16 %v4909_v35, %v4909_v35  ;;  %v5519_v38 = vunpack.c.l.b16 %v4942_v60  ;;  %v4912_v35 = vld [vmem:[#allocation4 + $0x140] sm:$0xff] }
 0x483   : > { %v4977_v43 = vld [vmem:[#allocation4 + $0x151] sm:$0xff]  ;;  %v5977_v16 = vunpack.c.l.b16 %v5256_v52 }
 0x484   : > { %4880 = vst.msk [vmem:[#allocation4 + $0x159] sm:$0xff] %vm4092_vm5, %v4792_v3  ;;  %v4577_v18 = vpop.f32.mrf.mxu1  ;;  %v5009_v41 = vpack.c.bf16 %v4977_v43, %v4977_v43 }
 0x485   : > { %v4578_v56 = vadd.f32 %v10014_v61, %v4577_v18  ;;  %v2778_v18 = vld [vmem:[#allocation3 + $0x188] sm:$0xff]  ;;  %v5999_v10 = vpack.c.b16 %v5977_v16, %v5976_v11 }
 0x486   : > { %v5602_v29 = vunpack.c.l.b16 %v5009_v41  ;;  %v2810_v43 = vpack.c.bf16 %v2778_v18, %v2778_v18  ;;  %v5337_v11 = vld [vmem:[#allocation4 + $0x51] sm:$0xff] }
 0x487   : > { %v4667_v22 = vadd.f32 %v4666_v19, %v4578_v56  ;;  %6969 = vmatmul.bf16.gmra.mxu0 %v6356_v32  ;;  %v5518_v19 = vunpack.c.l.b16 %v4941_v12  ;;  %v10092_v56 = vpop.f32.mrf.mxu0 }
 0x489   : > { %v4756_v44 = vadd.f32 %v4755_v23, %v4667_v22  ;;  %6020 = vrot.lane.b32.xlu1 %v5997_v4, %s8100_s22  ;;  %v10094_v23 = vpack.c.b16 %v5519_v38, %v5518_v19  ;;  %v2777_v22 = vld [vmem:[#allocation3 + $0x180] sm:$0xff]  ;;  %v5230_v38 = vld [vmem:[#allocation4 + $0x142] sm:$0xff] }
 0x48a   : > { %v4668_v34 = vpop.f32.mrf.mxu2  ;;  %v2809_v41 = vpack.c.bf16 %v2777_v22, %v2777_v22  ;;  %v5262_v18 = vpack.c.bf16 %v5230_v38, %v5230_v38 }
 0x48b   : > { %v4793_v54 = vmax.f32 %v4756_v44, 0.0  ;;  %v4978_v45 = vld [vmem:[#allocation4 + $0x159] sm:$0xff] }
 0x48c   : > { %v4579_v17 = vpop.f32.mrf.mxu1  ;;  %v5010_v28 = vpack.c.bf16 %v4978_v45, %v4978_v45  ;;  %v3499_v45 = vunpack.c.l.b16 %v2810_v43  ;;  %v3498_v9 = vunpack.c.l.b16 %v2809_v41  ;;  %v5983_v47 = vunpack.c.l.b16 %v5262_v18  ;;  %v5342_v18 = vld [vmem:[#allocation4 + $0x91] sm:$0xff] }
 0x48d   : > { %4881 = vst.msk [vmem:[#allocation4 + $0x169] sm:$0xff] %vm4092_vm5, %v4793_v54  ;;  %v4580_v63 = vadd.f32 %v10014_v61, %v4579_v17  ;;  %v3914_v61 = vunpack.c.l.b16 %v3066_v1  ;;  %v5228_v17 = vld [vmem:[#allocation4 + $0x12a] sm:$0xff] }
 0x48e   : > { %v5603_v50 = vunpack.c.l.b16 %v5010_v28  ;;  %v3515_v2 = vpack.c.b16 %v3499_v45, %v3498_v9  ;;  %v5232_v45 = vld [vmem:[#allocation4 + $0x15a] sm:$0xff] }
 0x48f   : > { %v4669_v24 = vadd.f32 %v4668_v34, %v4580_v63  ;;  %v3931_v30 = vpack.c.b16 %v3915_v42, %v3914_v61  ;;  %v5259_v34 = vpack.c.bf16 %v5227_v31, %v5227_v31  ;;  %v10100_v1 = vpop.f32.mrf.mxu0  ;;  %v4943_v42 = vpack.c.bf16 %v4911_v8, %v4911_v8 }
 0x490   : > { %v10086_v37 = vpack.c.b16 %v5603_v50, %v5602_v29  ;;  %v5260_v29 = vpack.c.bf16 %v5228_v17, %v5228_v17  ;;  %v5334_v50 = vld [vmem:[#allocation4 + $0x31] sm:$0xff] }
 0x491   : > { %v4758_v58 = vadd.f32 %v4757_v36, %v4669_v24  ;;  %6022 = vrot.lane.b32.xlu1 %v5998_v59, %s8100_s22  ;;  %v5367_v24 = vpack.c.bf16 %v5335_v46, %v5335_v46  ;;  %v5366_v52 = vpack.c.bf16 %v5334_v50, %v5334_v50  ;;  %v4944_v36 = vpack.c.bf16 %v4912_v35, %v4912_v35 }
 0x492   : > { %5650 = vrot.lane.b32.xlu2 %v10086_v37, %s8100_s22  ;;  %v5981_v12 = vunpack.c.l.b16 %v5260_v29  ;;  %v5520_v13 = vunpack.c.l.b16 %v4943_v42  ;;  %v5264_v46 = vpack.c.bf16 %v5232_v45, %v5232_v45 }
 0x493   : > { %v4794_v3 = vmax.f32 %v4758_v58, 0.0  ;;  %v5980_v58 = vunpack.c.l.b16 %v5259_v34  ;;  %v6151_v61 = vunpack.c.l.b16 %v5367_v24  ;;  %v6150_v16 = vunpack.c.l.b16 %v5366_v52  ;;  %v5341_v24 = vld [vmem:[#allocation4 + $0x81] sm:$0xff] }
 0x494   : > { %v4979_v44 = vld [vmem:[#allocation4 + $0x169] sm:$0xff]  ;;  %v5521_v62 = vunpack.c.l.b16 %v4944_v36  ;;  %v5985_v34 = vunpack.c.l.b16 %v5264_v46  ;;  %v5373_v42 = vpack.c.bf16 %v5341_v24, %v5341_v24  ;;  %v7961_v24 = vld [vmem:[%s10671_s5 + $0xa0] sm:$0xff] }
 0x495   : > { %4882 = vst.msk [vmem:[#allocation4 + $0x171] sm:$0xff] %vm4092_vm5, %v4794_v3  ;;  %v5647_v4 = vpop.permute.xlu0 %5646  ;;  %v5011_v54 = vpack.c.bf16 %v4979_v44, %v4979_v44  ;;  %v5229_v3 = vld [vmem:[#allocation4 + $0x13a] sm:$0xff]  ;;  %v6001_v27 = vpack.c.b16 %v5981_v12, %v5980_v58  ;;  %v10108_v49 = vpack.c.b16 %v6151_v61, %v6150_v16 }
 0x496   : > { %v6360_v32 = vsel %vm4092_vm5, %v10094_v23, %v5647_v4  ;;  %v5261_v19 = vpack.c.bf16 %v5229_v3, %v5229_v3  ;;  %v10115_v4 = vpack.c.b16 %v5521_v62, %v5520_v13  ;;  %v5340_v12 = vld [vmem:[#allocation4 + $0x79] sm:$0xff] }
 0x497   : > { %6974 = vmatmul.bf16.gmra.mxu0 %v6360_v32  ;;  %v5604_v63 = vunpack.c.l.b16 %v5011_v54  ;;  %v10111_v22 = vpop.f32.mrf.mxu0  ;;  %v5231_v54 = vld [vmem:[#allocation4 + $0x152] sm:$0xff] }
 0x498   : > { %v5982_v32 = vunpack.c.l.b16 %v5261_v19  ;;  %v5343_v16 = vld [vmem:[#allocation4 + $0x99] sm:$0xff] }
 0x499   : > { %6024 = vrot.lane.b32.xlu1 %v5999_v10, %s8100_s22  ;;  %v5369_v10 = vpack.c.bf16 %v5337_v11, %v5337_v11  ;;  %v6157_v11 = vunpack.c.l.b16 %v5373_v42  ;;  %v5375_v13 = vpack.c.bf16 %v5343_v16, %v5343_v16  ;;  %v5348_v16 = vld [vmem:[#allocation4 + $0xd9] sm:$0xff] }
 0x49a   : > { %3962 = vrot.lane.b32.xlu2 %v3931_v30, %s8101_s23  ;;  %v5336_v30 = vld [vmem:[#allocation4 + $0x49] sm:$0xff]  ;;  %v6002_v17 = vpack.c.b16 %v5983_v47, %v5982_v32  ;;  %v5345_v47 = vld [vmem:[#allocation4 + $0xb1] sm:$0xff] }
 0x49b   : > { %v5368_v43 = vpack.c.bf16 %v5336_v30, %v5336_v30  ;;  %v6153_v41 = vunpack.c.l.b16 %v5369_v10  ;;  %v7964_v10 = vld [vmem:[%s10671_s5 + $0xb8] sm:$0xff]  ;;  %v6159_v32 = vunpack.c.l.b16 %v5375_v13 }
 0x49c   : > { %v4980_v25 = vld [vmem:[#allocation4 + $0x171] sm:$0xff]  ;;  %7084 = vmatpush.bf16.msra.mxu2 %v7964_v10  ;;  %v5380_v10 = vpack.c.bf16 %v5348_v16, %v5348_v16  ;;  %v7953_v16 = vld [vmem:[%s10671_s5 + $0x60] sm:$0xff] }
 0x49d   : > { %v5012_v28 = vpack.c.bf16 %v4980_v25, %v4980_v25  ;;  %v5339_v25 = vld [vmem:[#allocation4 + $0x69] sm:$0xff]  ;;  %v6152_v31 = vunpack.c.l.b16 %v5368_v43  ;;  %v5374_v43 = vpack.c.bf16 %v5342_v18, %v5342_v18  ;;  %v7960_v18 = vld [vmem:[%s10671_s5 + $0x98] sm:$0xff] }
 0x49e   : > { %v5233_v35 = vld [vmem:[#allocation4 + $0x16a] sm:$0xff]  ;;  %v7968_v13 = vld [vmem:[%s10671_s5 + $0xd8] sm:$0xff] }
 0x49f   : > { %v5605_v59 = vunpack.c.l.b16 %v5012_v28  ;;  %v5263_v28 = vpack.c.bf16 %v5231_v54, %v5231_v54  ;;  %v10121_v9 = vpack.c.b16 %v6153_v41, %v6152_v31  ;;  %v10128_v29 = vpop.f32.mrf.mxu0  ;;  %v5265_v36 = vpack.c.bf16 %v5233_v35, %v5233_v35  ;;  %v5344_v41 = vld [vmem:[#allocation4 + $0xa9] sm:$0xff]  ;;  %v7976_v31 = vld [vmem:[%s10671_s5 + $0x118] sm:$0xff] }
 0x4a0   : > { %7266 = vmatpush.bf16.msra.mxu0 %v7976_v31  ;;  %v7970_v35 = vld [vmem:[%s10671_s5 + $0xe8] sm:$0xff] }
 0x4a1   : > { %6026 = vrot.lane.b32.xlu1 %v6000_v48, %s8100_s22  ;;  %v10103_v60 = vpack.c.b16 %v5605_v59, %v5604_v63  ;;  %v5338_v48 = vld [vmem:[#allocation4 + $0x61] sm:$0xff]  ;;  %v5371_v63 = vpack.c.bf16 %v5339_v25, %v5339_v25  ;;  %v5984_v59 = vunpack.c.l.b16 %v5263_v28  ;;  %v5986_v3 = vunpack.c.l.b16 %v5265_v36  ;;  %v7971_v28 = vld [vmem:[%s10671_s5 + $0xf0] sm:$0xff] }
 0x4a2   : > { %3546 = vrot.lane.b32.xlu2 %v3515_v2, %s8101_s23  ;;  %v5234_v2 = vld [vmem:[#allocation4 + $0x172] sm:$0xff]  ;;  %v5377_v25 = vpack.c.bf16 %v5345_v47, %v5345_v47  ;;  %v7958_v31 = vld [vmem:[%s10671_s5 + $0x88] sm:$0xff] }
 0x4a3   : > { %5652 = vrot.lane.b32.xlu0 %v10103_v60, %s8100_s22  ;;  %v6155_v50 = vunpack.c.l.b16 %v5371_v63  ;;  %v6003_v52 = vpack.c.b16 %v5985_v34, %v5984_v59  ;;  %v5266_v58 = vpack.c.bf16 %v5234_v2, %v5234_v2  ;;  %v3099_v36 = vld [vmem:[#allocation3 + $0x1a2] sm:$0xff] }
 0x4a4   : > { %v6161_v46 = vunpack.c.l.b16 %v5377_v25  ;;  %v3131_v42 = vpack.c.bf16 %v3099_v36, %v3099_v36  ;;  %v5351_v47 = vld [vmem:[#allocation4 + $0xf9] sm:$0xff] }
 0x4a5   : > { %v5987_v38 = vunpack.c.l.b16 %v5266_v58  ;;  %v5383_v25 = vpack.c.bf16 %v5351_v47, %v5351_v47  ;;  %v5354_v47 = vld [vmem:[#allocation4 + $0x121] sm:$0xff] }
 0x4a7   : > { %v10137_v62 = vpop.f32.mrf.mxu0  ;;  %v6004_v19 = vpack.c.b16 %v5987_v38, %v5986_v3 }
 0x4a9   : > { %6028 = vrot.lane.b32.xlu1 %v6001_v27, %s8100_s22 }
 0x4aa   : > { %6198 = vrot.lane.b32.xlu2 %v10108_v49, %s8100_s22 }
 0x4ab   : > { %v5649_v44 = vpop.permute.xlu1 %5648  ;;  %5814 = vrot.lane.b32.xlu0 %v9972_v15, %s8100_s22  ;;  %v5370_v15 = vpack.c.bf16 %v5338_v48, %v5338_v48  ;;  %v5347_v48 = vld [vmem:[#allocation4 + $0xc9] sm:$0xff] }
 0x4ac   : > { %v6364_v20 = vsel %vm4092_vm5, %v10115_v4, %v5649_v44  ;;  %v7956_v44 = vld [vmem:[%s10671_s5 + $0x78] sm:$0xff]  ;;  %v5379_v34 = vpack.c.bf16 %v5347_v48, %v5347_v48 }
 0x4ad   : > { %6979 = vmatmul.bf16.gmra.mxu0 %v6364_v20  ;;  %v6154_v8 = vunpack.c.l.b16 %v5370_v15  ;;  %6995 = vmatpush.bf16.msra.mxu1 %v7956_v44  ;;  %v6158_v20 = vunpack.c.l.b16 %v5374_v43  ;;  %v5346_v15 = vld [vmem:[#allocation4 + $0xc1] sm:$0xff] }
 0x4ae   : > { %v6163_v58 = vunpack.c.l.b16 %v5379_v34 }
 0x4af   : > { %v10130_v61 = vpack.c.b16 %v6155_v50, %v6154_v8  ;;  %v10155_v54 = vpop.f32.mrf.mxu0  ;;  %v6186_v45 = vpack.c.b16 %v6159_v32, %v6158_v20  ;;  %v7962_v50 = vld [vmem:[%s10671_s5 + $0xa8] sm:$0xff]  ;;  %v7969_v8 = vld [vmem:[%s10671_s5 + $0xe0] sm:$0xff]  ;;  %v7967_v32 = vld [vmem:[%s10671_s5 + $0xd0] sm:$0xff]  ;;  %v6164_v20 = vunpack.c.l.b16 %v5380_v10  ;;  %v3739_v10 = vpop.permute.xlu0 %3738 }
 0x4b1   : > { %6030 = vrot.lane.b32.xlu1 %v6002_v17, %s8100_s22  ;;  %v5376_v17 = vpack.c.bf16 %v5344_v41, %v5344_v41  ;;  %v5350_v41 = vld [vmem:[#allocation4 + $0xf1] sm:$0xff] }
 0x4b2   : > { %6200 = vrot.lane.b32.xlu2 %v10121_v9, %s8100_s22 }
 0x4b3   : > { %5816 = vrot.lane.b32.xlu0 %v9987_v0, %s8100_s22  ;;  %v5372_v0 = vpack.c.bf16 %v5340_v12, %v5340_v12  ;;  %v6160_v63 = vunpack.c.l.b16 %v5376_v17  ;;  %v7966_v17 = vld [vmem:[%s10671_s5 + $0xc8] sm:$0xff] }
 0x4b5   : > { %v6156_v27 = vunpack.c.l.b16 %v5372_v0  ;;  %v6187_v59 = vpack.c.b16 %v6161_v46, %v6160_v63  ;;  %v5349_v0 = vld [vmem:[#allocation4 + $0xe1] sm:$0xff]  ;;  %v7955_v46 = vld [vmem:[%s10671_s5 + $0x70] sm:$0xff] }
 0x4b6   : > { %v7957_v63 = vld [vmem:[%s10671_s5 + $0x80] sm:$0xff]  ;;  %6996 = vmatpush.bf16.msra.mxu1 %v7955_v46 }
 0x4b7   : > { %v10139_v30 = vpack.c.b16 %v6157_v11, %v6156_v27  ;;  %v10175_v2 = vpop.f32.mrf.mxu0  ;;  %v4027_v11 = vunpack.c.l.b16 %v3131_v42 }
 0x4b9   : > { %6032 = vrot.lane.b32.xlu1 %v6003_v52, %s8100_s22  ;;  %v3098_v52 = vld [vmem:[#allocation3 + $0x19a] sm:$0xff] }
 0x4ba   : > { %6202 = vrot.lane.b32.xlu2 %v10130_v61, %s8100_s22  ;;  %v3130_v12 = vpack.c.bf16 %v3098_v52, %v3098_v52  ;;  %v2841_v52 = vld [vmem:[#allocation3 + $0x181] sm:$0xff] }
 0x4bb   : > { %5818 = vrot.lane.b32.xlu0 %v10002_v5, %s8100_s22  ;;  %v7972_v5 = vld [vmem:[%s10671_s5 + $0xf8] sm:$0xff] }
 0x4bc   : > { %7173 = vmatpush.bf16.msra.mxu3 %v7972_v5  ;;  %v4026_v38 = vunpack.c.l.b16 %v3130_v12  ;;  %v7959_v5 = vld [vmem:[%s10671_s5 + $0x90] sm:$0xff]  ;;  %v7954_v12 = vld [vmem:[%s10671_s5 + $0x68] sm:$0xff] }
 0x4bd   : > { %6997 = vmatpush.bf16.msra.mxu1 %v7954_v12 }
 0x4bf   : > { %v10199_v43 = vpop.f32.mrf.mxu0 }
 0x4c0   : > { %7174 = vmatpush.bf16.msra.mxu3 %v7971_v28  ;;  %v4913_v28 = vld [vmem:[#allocation4 + $0x150] sm:$0xff] }
 0x4c1   : > { %6034 = vrot.lane.b32.xlu1 %v6004_v19, %s8100_s22  ;;  %v5381_v19 = vpack.c.bf16 %v5349_v0, %v5349_v0  ;;  %v4945_v34 = vpack.c.bf16 %v4913_v28, %v4913_v28  ;;  %6998 = vmatpush.bf16.msra.mxu1 %v7953_v16 }
 0x4c2   : > { %6204 = vrot.lane.b32.xlu2 %v10139_v30, %s8100_s22 }
 0x4c3   : > { %5820 = vrot.lane.b32.xlu0 %v10018_v53, %s8100_s22  ;;  %v7963_v53 = vld [vmem:[%s10671_s5 + $0xb0] sm:$0xff]  ;;  %v6165_v44 = vunpack.c.l.b16 %v5381_v19  ;;  %v5522_v0 = vunpack.c.l.b16 %v4945_v34 }
 0x4c4   : > { %7085 = vmatpush.bf16.msra.mxu2 %v7963_v53  ;;  %7175 = vmatpush.bf16.msra.mxu3 %v7970_v35  ;;  %v5382_v53 = vpack.c.bf16 %v5350_v41, %v5350_v41  ;;  %v2842_v35 = vld [vmem:[#allocation3 + $0x189] sm:$0xff] }
 0x4c5   : > { %v2874_v42 = vpack.c.bf16 %v2842_v35, %v2842_v35  ;;  %v5357_v35 = vld [vmem:[#allocation4 + $0x141] sm:$0xff] }
 0x4c6   : > { %v5389_v12 = vpack.c.bf16 %v5357_v35, %v5357_v35 }
 0x4c8   : > { %7086 = vmatpush.bf16.msra.mxu2 %v7962_v50  ;;  %7176 = vmatpush.bf16.msra.mxu3 %v7969_v8  ;;  %v5353_v50 = vld [vmem:[#allocation4 + $0x111] sm:$0xff]  ;;  %v5352_v8 = vld [vmem:[#allocation4 + $0x109] sm:$0xff] }
 0x4ca   : > { %6206 = vrot.lane.b32.xlu2 %v6186_v45, %s8100_s22  ;;  %v6189_v45 = vpack.c.b16 %v6165_v44, %v6164_v20  ;;  %v3851_v44 = vpop.permute.xlu1 %3850  ;;  %v2585_v20 = vld [vmem:[#allocation3 + $0x168] sm:$0xff] }
 0x4cb   : > { %5822 = vrot.lane.b32.xlu0 %v10027_v21, %s8100_s22  ;;  %v5378_v21 = vpack.c.bf16 %v5346_v15, %v5346_v15  ;;  %v6167_v15 = vunpack.c.l.b16 %v5383_v25  ;;  %v2617_v46 = vpack.c.bf16 %v2585_v20, %v2585_v20 }
 0x4cc   : > { %7087 = vmatpush.bf16.msra.mxu2 %v7961_v24  ;;  %7177 = vmatpush.bf16.msra.mxu3 %v7968_v13  ;;  %v6166_v24 = vunpack.c.l.b16 %v5382_v53  ;;  %v5355_v13 = vld [vmem:[#allocation4 + $0x129] sm:$0xff]  ;;  %v5386_v53 = vpack.c.bf16 %v5354_v47, %v5354_v47 }
 0x4cd   : > { %v6162_v3 = vunpack.c.l.b16 %v5378_v21  ;;  %v10222_v21 = vpop.f32.mrf.mxu0  ;;  %v5387_v25 = vpack.c.bf16 %v5355_v13, %v5355_v13 }
 0x4ce   : > { %v6190_v36 = vpack.c.b16 %v6167_v15, %v6166_v24  ;;  %v6170_v24 = vunpack.c.l.b16 %v5386_v53 }
 0x4cf   : > { %v6188_v27 = vpack.c.b16 %v6163_v58, %v6162_v3  ;;  %v5385_v58 = vpack.c.bf16 %v5353_v50, %v5353_v50  ;;  %v5384_v3 = vpack.c.bf16 %v5352_v8, %v5352_v8  ;;  %v5356_v8 = vld [vmem:[#allocation4 + $0x139] sm:$0xff] }
 0x4d0   : > { %7088 = vmatpush.bf16.msra.mxu2 %v7960_v18  ;;  %7178 = vmatpush.bf16.msra.mxu3 %v7967_v32 }
 0x4d1   : > { %v6169_v19 = vunpack.c.l.b16 %v5385_v58  ;;  %v6168_v32 = vunpack.c.l.b16 %v5384_v3 }
 0x4d2   : > { %6208 = vrot.lane.b32.xlu2 %v6187_v59, %s8100_s22  ;;  %v7965_v59 = vld [vmem:[%s10671_s5 + $0xc0] sm:$0xff] }
 0x4d3   : > { %5824 = vrot.lane.b32.xlu0 %v10035_v55, %s8100_s22  ;;  %v4043_v55 = vpack.c.b16 %v4027_v11, %v4026_v38  ;;  %v2873_v38 = vpack.c.bf16 %v2841_v52, %v2841_v52  ;;  %v3323_v52 = vpop.permute.xlu0 %3322 }
 0x4d4   : > { %7089 = vmatpush.bf16.msra.mxu2 %v7959_v5  ;;  %7179 = vmatpush.bf16.msra.mxu3 %v7966_v17  ;;  %v2586_v5 = vld [vmem:[#allocation3 + $0x170] sm:$0xff] }
 0x4d5   : > { %7757 = vmatmul.msk.bf16.gmra.mxu3 %vm2466_vm3, %v4043_v55  ;;  %v3611_v55 = vunpack.c.l.b16 %v2874_v42  ;;  %v10237_v41 = vpop.f32.mrf.mxu0  ;;  %v2618_v17 = vpack.c.bf16 %v2586_v5, %v2586_v5  ;;  %v5271_v42 = vld [vmem:[#allocation4 + $0x38] sm:$0xff]  ;;  %v7975_v5 = vld [vmem:[%s10671_s5 + $0x110] sm:$0xff] }
 0x4d6   : > { %v5303_v13 = vpack.c.bf16 %v5271_v42, %v5271_v42  ;;  %7267 = vmatpush.bf16.msra.mxu0 %v7975_v5 }
 0x4d7   : > { %v3195_v34 = vunpack.c.l.b16 %v2618_v17  ;;  %v7974_v17 = vld [vmem:[%s10671_s5 + $0x108] sm:$0xff] }
 0x4d8   : > { %7090 = vmatpush.bf16.msra.mxu2 %v7958_v31  ;;  %7180 = vmatpush.bf16.msra.mxu3 %v7965_v59  ;;  %v6171_v59 = vunpack.c.l.b16 %v5387_v25 }
 0x4da   : > { %6210 = vrot.lane.b32.xlu2 %v6188_v27, %s8100_s22  ;;  %v6192_v58 = vpack.c.b16 %v6171_v59, %v6170_v24  ;;  %7268 = vmatpush.bf16.msra.mxu0 %v7974_v17  ;;  %v5273_v24 = vld [vmem:[#allocation4 + $0x50] sm:$0xff] }
 0x4db   : > { %5826 = vrot.lane.b32.xlu0 %v10042_v51, %s8100_s22  ;;  %v4914_v51 = vld [vmem:[#allocation4 + $0x158] sm:$0xff] }
 0x4dc   : > { %v4946_v48 = vpack.c.bf16 %v4914_v51, %v4914_v51  ;;  %7091 = vmatpush.bf16.msra.mxu2 %v7957_v63  ;;  %v7952_v51 = vld [vmem:[%s10671_s5 + $0x58] sm:$0xff] }
 0x4dd   : > { %6999 = vmatpush.bf16.msra.mxu1 %v7952_v51  ;;  %v10254_v16 = vpop.f32.mrf.mxu0  ;;  %v6071_v51 = vunpack.c.l.b16 %v5303_v13 }
 0x4e2   : > { %6212 = vrot.lane.b32.xlu2 %v6189_v45, %s8100_s22  ;;  %v6191_v45 = vpack.c.b16 %v6169_v19, %v6168_v32  ;;  %v5270_v19 = vld [vmem:[#allocation4 + $0x30] sm:$0xff] }
 0x4e3   : > { %5828 = vrot.lane.b32.xlu0 %v10048_v33, %s8100_s22  ;;  %v5523_v33 = vunpack.c.l.b16 %v4946_v48  ;;  %v7951_v48 = vld [vmem:[%s10671_s5 + $0x50] sm:$0xff] }
 0x4e4   : > { %7000 = vmatpush.bf16.msra.mxu1 %v7951_v48 }
 0x4e5   : > { %v10230_v11 = vpack.c.b16 %v5523_v33, %v5522_v0  ;;  %v3194_v33 = vunpack.c.l.b16 %v2617_v46  ;;  %v7950_v0 = vld [vmem:[%s10671_s5 + $0x48] sm:$0xff]  ;;  %v10277_v59 = vpop.f32.mrf.mxu0 }
 0x4e7   : > { %v3211_v3 = vpack.c.b16 %v3195_v34, %v3194_v33  ;;  %v4916_v33 = vld [vmem:[#allocation4 + $0x170] sm:$0xff] }
 0x4e8   : > { %7001 = vmatpush.bf16.msra.mxu1 %v7950_v0  ;;  %v5013_v0 = vld [vmem:[#allocation4 + $0x2] sm:$0xff] }
 0x4ea   : > { %6214 = vrot.lane.b32.xlu2 %v6190_v36, %s8100_s22  ;;  %v3435_v36 = vpop.permute.xlu1 %3434 }
 0x4eb   : > { %5830 = vrot.lane.b32.xlu0 %v10054_v6, %s8100_s22  ;;  %v3610_v6 = vunpack.c.l.b16 %v2873_v38  ;;  %v5141_v38 = vld [vmem:[#allocation4 + $0x19] sm:$0xff] }
 0x4ec   : > { %v5651_v27 = vpop.permute.xlu2 %5650  ;;  %v5173_v47 = vpack.c.bf16 %v5141_v38, %v5141_v38 }
 0x4ed   : > { %v6368_v18 = vsel %vm4092_vm5, %v10230_v11, %v5651_v27  ;;  %v3627_v31 = vpack.c.b16 %v3611_v55, %v3610_v6  ;;  %v5388_v27 = vpack.c.bf16 %v5356_v8, %v5356_v8  ;;  %v4091_v55 = vsel %vm2466_vm3, %v3211_v3, %v3323_v52  ;;  %v4915_v52 = vld [vmem:[#allocation4 + $0x168] sm:$0xff] }
 0x4ee   : > { %6984 = vmatmul.bf16.gmra.mxu0 %v6368_v18  ;;  %v6173_v6 = vunpack.c.l.b16 %v5389_v12  ;;  %v5878_v53 = vunpack.c.l.b16 %v5173_v47  ;;  %v5305_v8 = vpack.c.bf16 %v5273_v24, %v5273_v24  ;;  %v4947_v12 = vpack.c.bf16 %v4915_v52, %v4915_v52  ;;  %v5014_v3 = vld [vmem:[#allocation4 + $0xa] sm:$0xff]  ;;  %v5016_v24 = vld [vmem:[#allocation4 + $0x22] sm:$0xff] }
 0x4ef   : > { %v4221_v28 = vsel %vm2466_vm3, %v3627_v31, %v3739_v10  ;;  %v7949_v10 = vld [vmem:[%s10671_s5 + $0x40] sm:$0xff] }
 0x4f0   : > { %v4253_v63 = vsel %vm4092_vm5, %v4221_v28, %v3851_v44  ;;  %v4124_v44 = vsel %vm4092_vm5, %v4091_v55, %v3435_v36  ;;  %7002 = vmatpush.bf16.msra.mxu1 %v7949_v10  ;;  %v4948_v36 = vpack.c.bf16 %v4916_v33, %v4916_v33  ;;  %v6073_v42 = vunpack.c.l.b16 %v5305_v8 }
 0x4f2   : > { %6216 = vrot.lane.b32.xlu2 %v6191_v45, %s8100_s22  ;;  %v5302_v45 = vpack.c.bf16 %v5270_v19, %v5270_v19  ;;  %v6007_v46 = vpop.permute.xlu1 %6006  ;;  %v5525_v38 = vunpack.c.l.b16 %v4948_v36  ;;  %v5048_v36 = vpack.c.bf16 %v5016_v24, %v5016_v24 }
 0x4f3   : > { %5832 = vrot.lane.b32.xlu0 %v10063_v26, %s8100_s22  ;;  %v5142_v26 = vld [vmem:[#allocation4 + $0x21] sm:$0xff] }
 0x4f4   : > { %v3963_v15 = vpop.permute.xlu2 %3962  ;;  %v5174_v18 = vpack.c.bf16 %v5142_v26, %v5142_v26  ;;  %v6070_v28 = vunpack.c.l.b16 %v5302_v45  ;;  %v5275_v45 = vld [vmem:[#allocation4 + $0x68] sm:$0xff] }
 0x4f5   : > { %v4300_v50 = vsel %vm4125_vm6, %v4253_v63, %v3963_v15  ;;  %v7973_v15 = vld [vmem:[%s10671_s5 + $0x100] sm:$0xff] }
 0x4f6   : > { %4670 = vmatmul.bf16.gmra.mxu2 %v4300_v50  ;;  %v5879_v25 = vunpack.c.l.b16 %v5174_v18  ;;  %v6102_v63 = vpack.c.b16 %v6071_v51, %v6070_v28  ;;  %7269 = vmatpush.bf16.msra.mxu0 %v7973_v15  ;;  %v5045_v18 = vpack.c.bf16 %v5013_v0, %v5013_v0  ;;  %v5399_v51 = vld [vmem:[#allocation4 + $0x3a] sm:$0xff] }
 0x4f7   : > { %v5431_v28 = vpack.c.bf16 %v5399_v51, %v5399_v51 }
 0x4f8   : > { %v5910_v48 = vpack.c.b16 %v5879_v25, %v5878_v53  ;;  %v5686_v47 = vunpack.c.l.b16 %v5045_v18  ;;  %v5398_v25 = vld [vmem:[#allocation4 + $0x32] sm:$0xff] }
 0x4f9   : > { %v5430_v53 = vpack.c.bf16 %v5398_v25, %v5398_v25 }
 0x4fa   : > { %6218 = vrot.lane.b32.xlu2 %v6192_v58, %s8100_s22  ;;  %v6440_v50 = vsel %vm4092_vm5, %v5910_v48, %v6007_v46  ;;  %v10285_v58 = vpop.f32.mrf.mxu0  ;;  %v6009_v19 = vpop.permute.xlu1 %6008 }
 0x4fb   : > { %5834 = vrot.lane.b32.xlu0 %v10077_v7, %s8100_s22  ;;  %v6172_v7 = vunpack.c.l.b16 %v5388_v27 }
 0x4fc   : > { %v3547_v32 = vpop.permute.xlu2 %3546 }
 0x4fd   : > { %v4172_v20 = vsel %vm4125_vm6, %v4124_v44, %v3547_v32  ;;  %v6193_v31 = vpack.c.b16 %v6173_v6, %v6172_v7  ;;  %v6444_v44 = vsel %vm4092_vm5, %v10108_v49, %v6009_v19  ;;  %v5400_v19 = vld [vmem:[#allocation4 + $0x4a] sm:$0xff] }
 0x4fe   : > { %4581 = vmatmul.bf16.gmra.mxu1 %v4172_v20 }
 0x502   : > { %6220 = vrot.lane.b32.xlu2 %v6193_v31, %s8100_s22  ;;  %v10295_v20 = vpop.f32.mrf.mxu0  ;;  %v5307_v31 = vpack.c.bf16 %v5275_v45, %v5275_v45 }
 0x503   : > { %5836 = vrot.lane.b32.xlu0 %v10094_v23, %s8100_s22  ;;  %v5272_v23 = vld [vmem:[#allocation4 + $0x48] sm:$0xff] }
 0x504   : > { %v6199_v34 = vpop.permute.xlu2 %6198  ;;  %v5304_v26 = vpack.c.bf16 %v5272_v23, %v5272_v23  ;;  %v6075_v48 = vunpack.c.l.b16 %v5307_v31 }
 0x505   : > { %v6504_v35 = vsel %vm4092_vm5, %v6102_v63, %v6199_v34  ;;  %v6011_v63 = vpop.permute.xlu1 %6010  ;;  %v6262_v34 = vunpack.c.l.b16 %v5430_v53  ;;  %v5278_v53 = vld [vmem:[#allocation4 + $0x90] sm:$0xff] }
 0x506   : > { %7092 = vmatmul.bf16.vlgmr.msra.gmra.mxu2 %v6440_v50  ;;  %7181 = vmatmul.bf16.vlgmr.msra.gmra.mxu3 %v6504_v35  ;;  %v6072_v27 = vunpack.c.l.b16 %v5304_v26  ;;  %v6263_v50 = vunpack.c.l.b16 %v5431_v28  ;;  %v5015_v35 = vld [vmem:[#allocation4 + $0x1a] sm:$0xff]  ;;  %v6448_v26 = vsel %vm4092_vm5, %v10121_v9, %v6011_v63  ;;  %v5432_v9 = vpack.c.bf16 %v5400_v19, %v5400_v19  ;;  %v5402_v28 = vld [vmem:[#allocation4 + $0x62] sm:$0xff] }
 0x507   : > { %v5047_v52 = vpack.c.bf16 %v5015_v35, %v5015_v35  ;;  %v5404_v19 = vld [vmem:[#allocation4 + $0x7a] sm:$0xff] }
 0x508   : > { %v6103_v13 = vpack.c.b16 %v6073_v42, %v6072_v27  ;;  %v6294_v42 = vpack.c.b16 %v6263_v50, %v6262_v34  ;;  %v5276_v27 = vld [vmem:[#allocation4 + $0x78] sm:$0xff]  ;;  %v5434_v34 = vpack.c.bf16 %v5402_v28, %v5402_v28 }
 0x509   : > { %v5688_v0 = vunpack.c.l.b16 %v5047_v52 }
 0x50a   : > { %6222 = vrot.lane.b32.xlu2 %v10086_v37, %s8100_s22  ;;  %v5524_v37 = vunpack.c.l.b16 %v4947_v12  ;;  %v10299_v33 = vpop.f32.mrf.mxu0 }
 0x50b   : > { %5838 = vrot.lane.b32.xlu0 %v10115_v4, %s8100_s22  ;;  %v5046_v4 = vpack.c.bf16 %v5014_v3, %v5014_v3  ;;  %v5689_v3 = vunpack.c.l.b16 %v5048_v36 }
 0x50c   : > { %v6201_v55 = vpop.permute.xlu2 %6200  ;;  %v5541_v10 = vpack.c.b16 %v5525_v38, %v5524_v37  ;;  %v5277_v38 = vld [vmem:[#allocation4 + $0x80] sm:$0xff] }
 0x50d   : > { %v6508_v32 = vsel %vm4092_vm5, %v6103_v13, %v6201_v55  ;;  %v5401_v55 = vld [vmem:[#allocation4 + $0x52] sm:$0xff]  ;;  %v5309_v18 = vpack.c.bf16 %v5277_v38, %v5277_v38  ;;  %v5719_v13 = vpack.c.b16 %v5689_v3, %v5688_v0  ;;  %v6013_v45 = vpop.permute.xlu1 %6012 }
 0x50e   : > { %v6452_v25 = vsel %vm4092_vm5, %v10130_v61, %v6013_v45 }
 0x512   : > { %6224 = vrot.lane.b32.xlu2 %v10103_v60, %s8100_s22  ;;  %v5687_v60 = vunpack.c.l.b16 %v5046_v4  ;;  %v10305_v4 = vpop.f32.mrf.mxu0 }
 0x513   : > { %5840 = vrot.lane.b32.xlu0 %v10230_v11, %s8100_s22  ;;  %v5274_v11 = vld [vmem:[#allocation4 + $0x60] sm:$0xff] }
 0x514   : > { %v5718_v7 = vpack.c.b16 %v5687_v60, %v5686_v47  ;;  %v5306_v17 = vpack.c.bf16 %v5274_v11, %v5274_v11  ;;  %v6203_v23 = vpop.permute.xlu2 %6202  ;;  %v6264_v47 = vunpack.c.l.b16 %v5432_v9 }
 0x515   : > { %v5653_v5 = vpop.permute.xlu0 %5652  ;;  %v6015_v36 = vpop.permute.xlu1 %6014 }
 0x516   : > { %7097 = vmatmul.bf16.gmra.mxu2 %v6444_v44  ;;  %7186 = vmatmul.bf16.gmra.mxu3 %v6508_v32  ;;  %v6372_v6 = vsel %vm4092_vm5, %v5541_v10, %v5653_v5  ;;  %v6074_v15 = vunpack.c.l.b16 %v5306_v17  ;;  %v5433_v5 = vpack.c.bf16 %v5401_v55, %v5401_v55  ;;  %v6077_v32 = vunpack.c.l.b16 %v5309_v18  ;;  %v5279_v17 = vld [vmem:[#allocation4 + $0x98] sm:$0xff]  ;;  %v5280_v18 = vld [vmem:[#allocation4 + $0xa8] sm:$0xff] }
 0x517   : > { %6989 = vmatmul.bf16.gmra.mxu0 %v6372_v6  ;;  %v5311_v63 = vpack.c.bf16 %v5279_v17, %v5279_v17  ;;  %v6456_v0 = vsel %vm4092_vm5, %v10139_v30, %v6015_v36  ;;  %v5312_v30 = vpack.c.bf16 %v5280_v18, %v5280_v18 }
 0x518   : > { %v6104_v8 = vpack.c.b16 %v6075_v48, %v6074_v15  ;;  %v6265_v60 = vunpack.c.l.b16 %v5433_v5  ;;  %v5310_v15 = vpack.c.bf16 %v5278_v53, %v5278_v53 }
 0x519   : > { %v6079_v35 = vunpack.c.l.b16 %v5311_v63 }
 0x51a   : > { %v6512_v12 = vsel %vm4092_vm5, %v6104_v8, %v6203_v23  ;;  %v6295_v31 = vpack.c.b16 %v6265_v60, %v6264_v47  ;;  %v6078_v23 = vunpack.c.l.b16 %v5310_v15  ;;  %v6266_v8 = vunpack.c.l.b16 %v5434_v34 }
 0x51b   : > { %5842 = vrot.lane.b32.xlu0 %v5541_v10, %s8100_s22  ;;  %v5308_v10 = vpack.c.bf16 %v5276_v27, %v5276_v27  ;;  %v5281_v27 = vld [vmem:[#allocation4 + $0xb0] sm:$0xff] }
 0x51c   : > { %v5313_v5 = vpack.c.bf16 %v5281_v27, %v5281_v27 }
 0x51d   : > { %v5815_v49 = vpop.permute.xlu0 %5814  ;;  %v6076_v6 = vunpack.c.l.b16 %v5308_v10  ;;  %v6017_v17 = vpop.permute.xlu1 %6016 }
 0x51e   : > { %v6376_v46 = vsel %vm4092_vm5, %v5718_v7, %v5815_v49  ;;  %v6205_v7 = vpop.permute.xlu2 %6204  ;;  %v10311_v49 = vpop.f32.mrf.mxu0  ;;  %v6081_v45 = vunpack.c.l.b16 %v5313_v5 }
 0x51f   : > { %7003 = vmatmul.bf16.vlgmr.msra.gmra.mxu1 %v6376_v46  ;;  %v6105_v11 = vpack.c.b16 %v6077_v32, %v6076_v6  ;;  %v5403_v46 = vld [vmem:[#allocation4 + $0x6a] sm:$0xff]  ;;  %v5436_v32 = vpack.c.bf16 %v5404_v19, %v5404_v19 }
 0x520   : > { %v5435_v50 = vpack.c.bf16 %v5403_v46, %v5403_v46 }
 0x521   : > { %v6516_v51 = vsel %vm4092_vm5, %v6105_v11, %v6205_v7  ;;  %v6080_v11 = vunpack.c.l.b16 %v5312_v30 }
 0x522   : > { %v6267_v52 = vunpack.c.l.b16 %v5435_v50  ;;  %v5283_v50 = vld [vmem:[#allocation4 + $0xc8] sm:$0xff] }
 0x523   : > { %v6107_v46 = vpack.c.b16 %v6081_v45, %v6080_v11  ;;  %v5285_v11 = vld [vmem:[#allocation4 + $0xe0] sm:$0xff] }
 0x524   : > { %v6296_v38 = vpack.c.b16 %v6267_v52, %v6266_v8  ;;  %v5407_v8 = vld [vmem:[#allocation4 + $0x9a] sm:$0xff] }
 0x525   : > { %v5817_v37 = vpop.permute.xlu0 %5816 }
 0x526   : > { %7102 = vmatmul.bf16.gmra.mxu2 %v6448_v26  ;;  %7191 = vmatmul.bf16.gmra.mxu3 %v6512_v12  ;;  %v6380_v44 = vsel %vm4092_vm5, %v5719_v13, %v5817_v37  ;;  %v10315_v24 = vpop.f32.mrf.mxu0  ;;  %v6207_v26 = vpop.permute.xlu2 %6206  ;;  %v6106_v12 = vpack.c.b16 %v6079_v35, %v6078_v23  ;;  %v5151_v37 = vld [vmem:[#allocation4 + $0x91] sm:$0xff]  ;;  %v5405_v13 = vld [vmem:[#allocation4 + $0x82] sm:$0xff] }
 0x527   : > { %7902 = vmatmul.msk.bf16.vlgmr.msra.gmra.mxu0 %vm4092_vm5, %v6294_v42  ;;  %v5437_v6 = vpack.c.bf16 %v5405_v13, %v5405_v13  ;;  %v5153_v35 = vld [vmem:[#allocation4 + $0xa9] sm:$0xff]  ;;  %v5282_v23 = vld [vmem:[#allocation4 + $0xc0] sm:$0xff] }
 0x528   : > { %v6520_v3 = vsel %vm4092_vm5, %v6106_v12, %v6207_v26  ;;  %v5315_v26 = vpack.c.bf16 %v5283_v50, %v5283_v50  ;;  %v5185_v12 = vpack.c.bf16 %v5153_v35, %v5153_v35 }
 0x52a   : > { %v6083_v18 = vunpack.c.l.b16 %v5315_v26  ;;  %v5890_v13 = vunpack.c.l.b16 %v5185_v12 }
 0x52d   : > { %v5819_v48 = vpop.permute.xlu0 %5818 }
 0x52e   : > { %v6384_v61 = vsel %vm4092_vm5, %v6294_v42, %v5819_v48  ;;  %v5152_v42 = vld [vmem:[#allocation4 + $0x99] sm:$0xff]  ;;  %v10321_v55 = vpop.f32.mrf.mxu0  ;;  %v6209_v53 = vpop.permute.xlu2 %6208 }
 0x52f   : > { %7008 = vmatmul.bf16.gmra.mxu1 %v6380_v44  ;;  %v5184_v9 = vpack.c.bf16 %v5152_v42, %v5152_v42  ;;  %v5183_v44 = vpack.c.bf16 %v5151_v37, %v5151_v37  ;;  %v6524_v15 = vsel %vm4092_vm5, %v6107_v46, %v6209_v53  ;;  %v5439_v42 = vpack.c.bf16 %v5407_v8, %v5407_v8  ;;  %v5409_v53 = vld [vmem:[#allocation4 + $0xb2] sm:$0xff] }
 0x531   : > { %v5889_v60 = vunpack.c.l.b16 %v5184_v9  ;;  %v5888_v7 = vunpack.c.l.b16 %v5183_v44  ;;  %v6271_v5 = vunpack.c.l.b16 %v5439_v42  ;;  %v6019_v44 = vpop.permute.xlu1 %6018 }
 0x533   : > { %v5915_v28 = vpack.c.b16 %v5889_v60, %v5888_v7  ;;  %v5156_v7 = vld [vmem:[#allocation4 + $0xc9] sm:$0xff] }
 0x534   : > { %v5188_v46 = vpack.c.bf16 %v5156_v7, %v5156_v7 }
 0x535   : > { %v5821_v10 = vpop.permute.xlu0 %5820  ;;  %v6460_v63 = vsel %vm4092_vm5, %v5915_v28, %v6017_v17  ;;  %v5284_v17 = vld [vmem:[#allocation4 + $0xd8] sm:$0xff] }
 0x536   : > { %7107 = vmatmul.bf16.gmra.mxu2 %v6452_v25  ;;  %7196 = vmatmul.bf16.gmra.mxu3 %v6516_v51  ;;  %v6388_v47 = vsel %vm4092_vm5, %v6295_v31, %v5821_v10  ;;  %v6268_v25 = vunpack.c.l.b16 %v5436_v32  ;;  %v6269_v51 = vunpack.c.l.b16 %v5437_v6  ;;  %v10324_v48 = vpop.f32.mrf.mxu0  ;;  %v6211_v30 = vpop.permute.xlu2 %6210 }
 0x537   : > { %7903 = vmatmul.msk.bf16.gmra.mxu0 %vm4092_vm5, %v6295_v31  ;;  %v5154_v31 = vld [vmem:[#allocation4 + $0xb1] sm:$0xff] }
 0x538   : > { %v6297_v34 = vpack.c.b16 %v6269_v51, %v6268_v25  ;;  %v5186_v36 = vpack.c.bf16 %v5154_v31, %v5154_v31  ;;  %v5408_v25 = vld [vmem:[#allocation4 + $0xaa] sm:$0xff]  ;;  %v5155_v51 = vld [vmem:[#allocation4 + $0xc1] sm:$0xff]  ;;  %v5316_v31 = vpack.c.bf16 %v5284_v17, %v5284_v17  ;;  %v8032_v17 = vld [vmem:[%s10670_s4] ss:$0 sm:$0xff] }
 0x539   : > { %v5440_v50 = vpack.c.bf16 %v5408_v25, %v5408_v25 }
 0x53a   : > { %v5891_v37 = vunpack.c.l.b16 %v5186_v36  ;;  %v6084_v26 = vunpack.c.l.b16 %v5316_v31 }
 0x53b   : > { %v6272_v12 = vunpack.c.l.b16 %v5440_v50 }
 0x53c   : > { %v5916_v32 = vpack.c.b16 %v5891_v37, %v5890_v13 }
 0x53d   : > { %v5823_v52 = vpop.permute.xlu0 %5822 }
 0x53e   : > { %v10329_v27 = vpop.f32.mrf.mxu0  ;;  %v6392_v19 = vsel %vm4092_vm5, %v6296_v38, %v5823_v52  ;;  %v6213_v42 = vpop.permute.xlu2 %6212 }
 0x53f   : > { %7013 = vmatmul.bf16.gmra.mxu1 %v6384_v61  ;;  %v5406_v61 = vld [vmem:[#allocation4 + $0x92] sm:$0xff] }
 0x545   : > { %v5825_v28 = vpop.permute.xlu0 %5824 }
 0x546   : > { %7112 = vmatmul.bf16.gmra.mxu2 %v6456_v0  ;;  %7201 = vmatmul.bf16.gmra.mxu3 %v6520_v3  ;;  %v5314_v0 = vpack.c.bf16 %v5282_v23, %v5282_v23  ;;  %v5438_v3 = vpack.c.bf16 %v5406_v61, %v5406_v61  ;;  %v5441_v61 = vpack.c.bf16 %v5409_v53, %v5409_v53  ;;  %v5893_v23 = vunpack.c.l.b16 %v5188_v46 }
 0x547   : > { %7904 = vmatmul.msk.bf16.gmra.mxu0 %vm4092_vm5, %v6296_v38  ;;  %v10335_v38 = vpop.f32.mrf.mxu0  ;;  %v6396_v35 = vsel %vm4092_vm5, %v6297_v34, %v5825_v28 }
 0x548   : > { %v6082_v10 = vunpack.c.l.b16 %v5314_v0  ;;  %v6270_v9 = vunpack.c.l.b16 %v5438_v3  ;;  %v6273_v0 = vunpack.c.l.b16 %v5441_v61  ;;  %v6021_v3 = vpop.permute.xlu1 %6020 }
 0x54a   : > { %v6108_v6 = vpack.c.b16 %v6083_v18, %v6082_v10  ;;  %v6298_v45 = vpack.c.b16 %v6271_v5, %v6270_v9  ;;  %v10342_v10 = vpack.c.b16 %v6273_v0, %v6272_v12  ;;  %v5158_v9 = vld [vmem:[#allocation4 + $0xe1] sm:$0xff]  ;;  %v5287_v5 = vld [vmem:[#allocation4 + $0xf8] sm:$0xff] }
 0x54b   : > { %v5190_v25 = vpack.c.bf16 %v5158_v9, %v5158_v9 }
 0x54c   : > { %v6528_v60 = vsel %vm4092_vm5, %v6108_v6, %v6211_v30  ;;  %v5410_v30 = vld [vmem:[#allocation4 + $0xc2] sm:$0xff]  ;;  %v5157_v6 = vld [vmem:[#allocation4 + $0xd9] sm:$0xff] }
 0x54d   : > { %v5827_v7 = vpop.permute.xlu0 %5826  ;;  %v5189_v28 = vpack.c.bf16 %v5157_v6, %v5157_v6  ;;  %v5895_v61 = vunpack.c.l.b16 %v5190_v25  ;;  %v5413_v25 = vld [vmem:[#allocation4 + $0xe2] sm:$0xff] }
 0x54e   : > { %v6400_v50 = vsel %vm4092_vm5, %v6298_v45, %v5827_v7  ;;  %v5289_v7 = vld [vmem:[#allocation4 + $0x110] sm:$0xff] }
 0x54f   : > { %7018 = vmatmul.bf16.gmra.mxu1 %v6388_v47  ;;  %v6464_v47 = vsel %vm4092_vm5, %v5916_v32, %v6019_v44  ;;  %v10338_v52 = vpop.f32.mrf.mxu0  ;;  %v5894_v12 = vunpack.c.l.b16 %v5189_v28 }
 0x550   : > { %10720 = vst [vmem:[#allocation9_spill] sm:$0xff] %v10338_v52 }
 0x551   : > { %v5918_v9 = vpack.c.b16 %v5895_v61, %v5894_v12  ;;  %v5445_v61 = vpack.c.bf16 %v5413_v25, %v5413_v25 }
 0x556   : > { %7117 = vmatmul.bf16.gmra.mxu2 %v6460_v63  ;;  %7206 = vmatmul.bf16.gmra.mxu3 %v6524_v15  ;;  %v5317_v63 = vpack.c.bf16 %v5285_v11, %v5285_v11  ;;  %v5187_v15 = vpack.c.bf16 %v5155_v51, %v5155_v51  ;;  %v5319_v51 = vpack.c.bf16 %v5287_v5, %v5287_v5 }
 0x557   : > { %7905 = vmatmul.msk.bf16.gmra.mxu0 %vm4092_vm5, %v6297_v34  ;;  %v10346_v32 = vpop.f32.mrf.mxu0 }
 0x558   : > { %v6085_v8 = vunpack.c.l.b16 %v5317_v63  ;;  %v5892_v36 = vunpack.c.l.b16 %v5187_v15  ;;  %v4760_v34 = vpop.f32.mrf.mxu3  ;;  %10721 = vst [vmem:[#allocation11_spill] sm:$0xff] %v10346_v32  ;;  %v5442_v63 = vpack.c.bf16 %v5410_v30, %v5410_v30 }
 0x55a   : > { %v6109_v37 = vpack.c.b16 %v6085_v8, %v6084_v26 }
 0x55c   : > { %v6532_v13 = vsel %vm4092_vm5, %v6109_v37, %v6213_v42 }
 0x55f   : > { %7023 = vmatmul.bf16.gmra.mxu1 %v6392_v19  ;;  %v5917_v19 = vpack.c.b16 %v5893_v23, %v5892_v36  ;;  %v6023_v23 = vpop.permute.xlu1 %6022 }
 0x560   : > { %v4762_v36 = vpop.f32.mrf.mxu3 }
 0x561   : > { %v6468_v18 = vsel %vm4092_vm5, %v5917_v19, %v6021_v3  ;;  %v6274_v3 = vunpack.c.l.b16 %v5442_v63  ;;  %v6215_v19 = vpop.permute.xlu2 %6214  ;;  %v5288_v63 = vld [vmem:[#allocation4 + $0x108] sm:$0xff] }
 0x566   : > { %7122 = vmatmul.bf16.gmra.mxu2 %v6464_v47  ;;  %7211 = vmatmul.bf16.gmra.mxu3 %v6528_v60  ;;  %v5286_v47 = vld [vmem:[#allocation4 + $0xf0] sm:$0xff] }
 0x567   : > { %7906 = vmatmul.msk.bf16.gmra.mxu0 %vm4092_vm5, %v6298_v45  ;;  %v5411_v60 = vld [vmem:[#allocation4 + $0xca] sm:$0xff]  ;;  %v5318_v46 = vpack.c.bf16 %v5286_v47, %v5286_v47  ;;  %v5160_v47 = vld [vmem:[#allocation4 + $0xf9] sm:$0xff] }
 0x568   : > { %v5443_v15 = vpack.c.bf16 %v5411_v60, %v5411_v60 }
 0x569   : > { %v6086_v0 = vunpack.c.l.b16 %v5318_v46  ;;  %v5192_v46 = vpack.c.bf16 %v5160_v47, %v5160_v47  ;;  %v5364_v47 = vld [vmem:[#allocation4 + $0x199] sm:$0xff] }
 0x56a   : > { %v6275_v42 = vunpack.c.l.b16 %v5443_v15  ;;  %v5829_v15 = vpop.permute.xlu0 %5828 }
 0x56b   : > { %v10352_v37 = vpop.f32.mrf.mxu0 }
 0x56c   : > { %10722 = vst [vmem:[#allocation17_spill] sm:$0xff] %v10352_v37  ;;  %v10357_v30 = vpack.c.b16 %v6275_v42, %v6274_v3  ;;  %v6277_v3 = vunpack.c.l.b16 %v5445_v61 }
 0x56f   : > { %7028 = vmatmul.bf16.gmra.mxu1 %v6396_v35  ;;  %v6087_v35 = vunpack.c.l.b16 %v5319_v51 }
 0x571   : > { %v6110_v5 = vpack.c.b16 %v6087_v35, %v6086_v0 }
 0x573   : > { %v10365_v35 = vpop.f32.mrf.mxu0 }
 0x574   : > { %10723 = vst [vmem:[#allocation12_spill] sm:$0xff] %v10365_v35 }
 0x576   : > { %7127 = vmatmul.bf16.gmra.mxu2 %v6468_v18  ;;  %7216 = vmatmul.bf16.gmra.mxu3 %v6532_v13 }
 0x577   : > { %7907 = vmatmul.msk.bf16.gmra.mxu0 %vm4092_vm5, %v10342_v10 }
 0x579   : > { %v4671_v44 = vpop.f32.mrf.mxu2 }
 0x57b   : > { %v4582_v11 = vpop.f32.mrf.mxu1 }
 0x57c   : > { %v4583_v53 = vadd.f32 %v8032_v17, %v4582_v11  ;;  %v5412_v11 = vld [vmem:[#allocation4 + $0xda] sm:$0xff] }
 0x57e   : > { %v4672_v31 = vadd.f32 %v4671_v44, %v4583_v53  ;;  %v6472_v44 = vsel %vm4092_vm5, %v5918_v9, %v6023_v23  ;;  %v5159_v53 = vld [vmem:[#allocation4 + $0xf1] sm:$0xff] }
 0x57f   : > { %7033 = vmatmul.bf16.gmra.mxu1 %v6400_v50  ;;  %v5444_v50 = vpack.c.bf16 %v5412_v11, %v5412_v11  ;;  %v5191_v23 = vpack.c.bf16 %v5159_v53, %v5159_v53 }
 0x580   : > { %v4761_v8 = vadd.f32 %v4760_v34, %v4672_v31  ;;  %v6536_v34 = vsel %vm4092_vm5, %v6110_v5, %v6215_v19  ;;  %v5321_v31 = vpack.c.bf16 %v5289_v7, %v5289_v7  ;;  %v6025_v19 = vpop.permute.xlu1 %6024 }
 0x581   : > { %v4673_v26 = vpop.f32.mrf.mxu2  ;;  %v6276_v0 = vunpack.c.l.b16 %v5444_v50 }
 0x582   : > { %v4795_v18 = vmax.f32 %v4761_v8, 0.0  ;;  %v5320_v8 = vpack.c.bf16 %v5288_v63, %v5288_v63  ;;  %v6089_v12 = vunpack.c.l.b16 %v5321_v31 }
 0x583   : > { %v4584_v13 = vpop.f32.mrf.mxu1  ;;  %v10374_v7 = vpack.c.b16 %v6277_v3, %v6276_v0 }
 0x584   : > { %4883 = vst.msk [vmem:[#allocation4 + $0x181] sm:$0xff] %vm4092_vm5, %v4795_v18  ;;  %v4585_v45 = vadd.f32 %v8032_v17, %v4584_v13  ;;  %v5896_v18 = vunpack.c.l.b16 %v5191_v23 }
 0x586   : > { %v4674_v6 = vadd.f32 %v4673_v26, %v4585_v45  ;;  %7132 = vmatmul.bf16.gmra.mxu2 %v6472_v44  ;;  %7221 = vmatmul.bf16.gmra.mxu3 %v6536_v34  ;;  %v5897_v26 = vunpack.c.l.b16 %v5192_v46  ;;  %v6088_v45 = vunpack.c.l.b16 %v5320_v8  ;;  %v6217_v44 = vpop.permute.xlu2 %6216 }
 0x587   : > { %7908 = vmatmul.msk.bf16.gmra.mxu0 %vm4092_vm5, %v10357_v30 }
 0x588   : > { %v4763_v60 = vadd.f32 %v4762_v36, %v4674_v6  ;;  %v6404_v36 = vsel %vm4092_vm5, %v10342_v10, %v5829_v15  ;;  %v5919_v34 = vpack.c.b16 %v5897_v26, %v5896_v18  ;;  %v6111_v10 = vpack.c.b16 %v6089_v12, %v6088_v45  ;;  %v10383_v18 = vld [vmem:[%s10672_s6] ss:$0 sm:$0xff] }
 0x589   : > { %v10361_v51 = vpop.f32.mrf.mxu2  ;;  %v10363_v17 = vpop.f32.mrf.mxu3 }
 0x58a   : > { %v4796_v28 = vmax.f32 %v4763_v60, 0.0  ;;  %v5365_v60 = vld [vmem:[#allocation4 + $0x1a1] sm:$0xff]  ;;  %v6476_v63 = vsel %vm4092_vm5, %v5919_v34, %v6025_v19  ;;  %v6540_v23 = vsel %vm4092_vm5, %v6111_v10, %v6217_v44  ;;  %v5162_v34 = vld [vmem:[#allocation4 + $0x111] sm:$0xff] }
 0x58b   : > { %v5362_v42 = vld [vmem:[#allocation4 + $0x181] sm:$0xff]  ;;  %v5397_v26 = vpack.c.bf16 %v5365_v60, %v5365_v60 }
 0x58c   : > { %4884 = vst.msk [vmem:[#allocation4 + $0x189] sm:$0xff] %vm4092_vm5, %v4796_v28  ;;  %v5107_v13 = vld [vmem:[#allocation4 + $0x180] sm:$0xff]  ;;  %v5394_v6 = vpack.c.bf16 %v5362_v42, %v5362_v42 }
 0x58d   : > { %v5139_v28 = vpack.c.bf16 %v5107_v13, %v5107_v13 }
 0x58e   : > { %v6178_v12 = vunpack.c.l.b16 %v5394_v6 }
 0x58f   : > { %7038 = vmatmul.bf16.gmra.mxu1 %v6404_v36  ;;  %v5396_v36 = vpack.c.bf16 %v5364_v47, %v5364_v47  ;;  %v5796_v19 = vunpack.c.l.b16 %v5139_v28  ;;  %v5291_v47 = vld [vmem:[#allocation4 + $0x128] sm:$0xff]  ;;  %v5290_v28 = vld [vmem:[#allocation4 + $0x120] sm:$0xff] }
 0x591   : > { %v10370_v9 = vpop.f32.mrf.mxu2  ;;  %v10372_v5 = vpop.f32.mrf.mxu3 }
 0x593   : > { %v5363_v11 = vld [vmem:[#allocation4 + $0x189] sm:$0xff] }
 0x594   : > { %v5235_v25 = vld [vmem:[#allocation4 + $0x182] sm:$0xff]  ;;  %v5236_v53 = vld [vmem:[#allocation4 + $0x18a] sm:$0xff]  ;;  %v10376_v46 = vpop.f32.mrf.mxu0  ;;  %v5395_v15 = vpack.c.bf16 %v5363_v11, %v5363_v11  ;;  %v5414_v11 = vld [vmem:[#allocation4 + $0xf2] sm:$0xff] }
 0x595   : > { %10724 = vst [vmem:[#allocation10_spill] sm:$0xff] %v10376_v46  ;;  %v5267_v31 = vpack.c.bf16 %v5235_v25, %v5235_v25  ;;  %v5268_v50 = vpack.c.bf16 %v5236_v53, %v5236_v53  ;;  %v5108_v61 = vld [vmem:[#allocation4 + $0x188] sm:$0xff]  ;;  %v5415_v25 = vld [vmem:[#allocation4 + $0xfa] sm:$0xff] }
 0x596   : > { %v5140_v8 = vpack.c.bf16 %v5108_v61, %v5108_v61  ;;  %7137 = vmatmul.bf16.gmra.mxu2 %v6476_v63  ;;  %7226 = vmatmul.bf16.gmra.mxu3 %v6540_v23  ;;  %v6179_v0 = vunpack.c.l.b16 %v5395_v15  ;;  %v5161_v53 = vld [vmem:[#allocation4 + $0x109] sm:$0xff]  ;;  %v6180_v63 = vunpack.c.l.b16 %v5396_v36  ;;  %v6181_v15 = vunpack.c.l.b16 %v5397_v26 }
 0x597   : > { %v5988_v3 = vunpack.c.l.b16 %v5267_v31  ;;  %v5989_v42 = vunpack.c.l.b16 %v5268_v50  ;;  %7909 = vmatmul.msk.bf16.gmra.mxu0 %vm4092_vm5, %v10374_v7  ;;  %v6916_v31 = vadd.f32 %v10383_v18, %v10059_v40  ;;  %v5831_v50 = vpop.permute.xlu0 %5830  ;;  %v5194_v61 = vpack.c.bf16 %v5162_v34, %v5162_v34 }
 0x598   : > { %v5797_v13 = vunpack.c.l.b16 %v5140_v8  ;;  %v10387_v45 = vpack.c.b16 %v6179_v0, %v6178_v12  ;;  %v5323_v23 = vpack.c.bf16 %v5291_v47, %v5291_v47  ;;  %v5446_v0 = vpack.c.bf16 %v5414_v11, %v5414_v11 }
 0x599   : > { %v10389_v44 = vpack.c.b16 %v5989_v42, %v5988_v3  ;;  %v10391_v6 = vpop.f32.mrf.mxu2  ;;  %v10393_v60 = vpop.f32.mrf.mxu3  ;;  %v5447_v3 = vpack.c.bf16 %v5415_v25, %v5415_v25  ;;  %v6408_v36 = vsel %vm4092_vm5, %v10357_v30, %v5831_v50  ;;  %v6197_v26 = vpack.c.b16 %v6181_v15, %v6180_v63 }
 0x59a   : > { %v10395_v10 = vpack.c.b16 %v5797_v13, %v5796_v19  ;;  %6226 = vrot.lane.b32.xlu2 %v10387_v45, %s8100_s22  ;;  %v5193_v19 = vpack.c.bf16 %v5161_v53, %v5161_v53  ;;  %v5322_v13 = vpack.c.bf16 %v5290_v28, %v5290_v28  ;;  %v5899_v52 = vunpack.c.l.b16 %v5194_v61  ;;  %v6027_v28 = vpop.permute.xlu1 %6026 }
 0x59b   : > { %6036 = vrot.lane.b32.xlu1 %v10389_v44, %s8100_s22  ;;  %v6091_v32 = vunpack.c.l.b16 %v5323_v23  ;;  %v6278_v37 = vunpack.c.l.b16 %v5446_v0  ;;  %v6279_v34 = vunpack.c.l.b16 %v5447_v3  ;;  %v6918_v30 = vadd.f32 %v10383_v18, %v10068_v39  ;;  %v5164_v39 = vld [vmem:[#allocation4 + $0x129] sm:$0xff] }
 0x59c   : > { %5844 = vrot.lane.b32.xlu0 %v10395_v10, %s8100_s22  ;;  %v10405_v8 = vpop.f32.mrf.mxu0  ;;  %v7004_v12 = vpop.f32.mrf.mxu1  ;;  %v5898_v25 = vunpack.c.l.b16 %v5193_v19  ;;  %v6090_v53 = vunpack.c.l.b16 %v5322_v13  ;;  %v5416_v19 = vld [vmem:[#allocation4 + $0x10a] sm:$0xff]  ;;  %v5417_v13 = vld [vmem:[#allocation4 + $0x112] sm:$0xff] }
 0x59d   : > { %10725 = vst [vmem:[#allocation14_spill] sm:$0xff] %v10405_v8  ;;  %v7005_v42 = vadd.f32 %v7004_v12, %v6916_v31  ;;  %v6219_v31 = vpop.permute.xlu2 %6218  ;;  %v10418_v61 = vpack.c.b16 %v6279_v34, %v6278_v37  ;;  %v6921_v34 = vadd.f32 %v10383_v18, %v10073_v14 }
 0x59e   : > { %v6112_v63 = vpack.c.b16 %v6091_v32, %v6090_v53 }
 0x59f   : > { %v7094_v40 = vadd.f32 %v10361_v51, %v7005_v42  ;;  %7043 = vmatmul.bf16.gmra.mxu1 %v6408_v36  ;;  %v5920_v51 = vpack.c.b16 %v5899_v52, %v5898_v25  ;;  %v5293_v52 = vld [vmem:[#allocation4 + $0x140] sm:$0xff] }
 0x5a0   : > { %v5163_v36 = vld [vmem:[#allocation4 + $0x121] sm:$0xff] }
 0x5a1   : > { %v10410_v47 = vpop.f32.mrf.mxu2  ;;  %v10412_v8 = vpop.f32.mrf.mxu3  ;;  %v7183_v11 = vadd.f32 %v10363_v17, %v7094_v40  ;;  %v6480_v0 = vsel %vm4092_vm5, %v5920_v51, %v6027_v28  ;;  %v6544_v17 = vsel %vm4092_vm5, %v6112_v63, %v6219_v31  ;;  %v5292_v40 = vld [vmem:[#allocation4 + $0x138] sm:$0xff]  ;;  %v5448_v28 = vpack.c.bf16 %v5416_v19, %v5416_v19 }
 0x5a2   : > { %6228 = vrot.lane.b32.xlu2 %v6197_v26, %s8100_s22  ;;  %v5196_v26 = vpack.c.bf16 %v5164_v39, %v5164_v39  ;;  %v5449_v31 = vpack.c.bf16 %v5417_v13, %v5417_v13  ;;  %v5195_v63 = vpack.c.bf16 %v5163_v36, %v5163_v36  ;;  %s8048_s22 = sshra.s32 %s7460_s17, 4  ;;  %s8049_s22 = int_to_ptr.hbm [resolvable:$true] %s8048_s22 }
 0x5a3   : > { %s8050_s18 = scalar_lea.hbm %s8049_s22, 2  ;;  %p8055_p0 = scmp.lt.s32.totalorder %s8049_s22, %s10675_s9 }
 0x5a4   : > { %v7006_v15 = vpop.f32.mrf.mxu1  ;;  %v7271_v50 = vpop.f32.mrf.mxu0  ;;  %v6281_v39 = vunpack.c.l.b16 %v5449_v31  ;;  %v5900_v13 = vunpack.c.l.b16 %v5195_v63  ;;  %p8051_p11 = scmp.ne.s32.totalorder %s8049_s22, %s8050_s18  ;;  %p8056_p1 = scmp.lt.s32.totalorder %s8054_s26, %s8050_s18 }
 0x5a5   : > { %v7007_v23 = vadd.f32 %v7006_v15, %v6918_v30  ;;  %v7272_v12 = vadd.f32 %v7271_v50, %v7183_v11  ;;  %v5325_v11 = vpack.c.bf16 %v5293_v52, %v5293_v52  ;;  %v5324_v15 = vpack.c.bf16 %v5292_v40, %v5292_v40 }
 0x5a6   : > { %7142 = vmatmul.bf16.gmra.mxu2 %v6480_v0  ;;  %7231 = vmatmul.bf16.gmra.mxu3 %v6544_v17  ;;  %v5901_v50 = vunpack.c.l.b16 %v5196_v26  ;;  %v6221_v26 = vpop.permute.xlu2 %6220  ;;  %p8052_p12 = pnand %p8051_p11, %p8194_p5  ;;  %p8057_p2 = por %p8056_p1, %p8055_p0 }
 0x5a7   : > { %v7096_v3 = vadd.f32 %v10370_v9, %v7007_v23  ;;  %7910 = vmatmul.msk.bf16.gmra.mxu0 %vm4092_vm5, %v10418_v61  ;;  %v5833_v9 = vpop.permute.xlu0 %5832  ;;  %v7351_v23 = vmax.f32 %v7272_v12, 0.0  ;;  %v6093_v14 = vunpack.c.l.b16 %v5325_v11  ;;  %v6092_v36 = vunpack.c.l.b16 %v5324_v15 }
 0x5a8   : > { %v5921_v12 = vpack.c.b16 %v5901_v50, %v5900_v13  ;;  %v5418_v50 = vld [vmem:[#allocation4 + $0x122] sm:$0xff]  ;;  %p8053_p13 = pneg %p8052_p12 }
 0x5a9   : > { %v10425_v32 = vpop.f32.mrf.mxu2  ;;  %v10427_v42 = vpop.f32.mrf.mxu3  ;;  %v7185_v37 = vadd.f32 %v10372_v5, %v7096_v3  ;;  %v6412_v5 = vsel %vm4092_vm5, %v10374_v7, %v5833_v9  ;;  %v6280_v3 = vunpack.c.l.b16 %v5448_v28 }
 0x5aa   : > { %v6029_v7 = vpop.permute.xlu1 %6028  ;;  %p8058_p3 = pnand %p8057_p2, %p8053_p13 }
 0x5ab   : > { %v6484_v31 = vsel %vm4092_vm5, %v5921_v12, %v6029_v7 }
 0x5ac   : > { %v7009_v25 = vpop.f32.mrf.mxu1  ;;  %v7273_v53 = vpop.f32.mrf.mxu0 }
 0x5ad   : > { %v7010_v30 = vadd.f32 %v7009_v25, %v6921_v34  ;;  %v7274_v51 = vadd.f32 %v7273_v53, %v7185_v37  ;;  %v6113_v34 = vpack.c.b16 %v6093_v14, %v6092_v36  ;;  %v10444_v25 = vpack.c.b16 %v6281_v39, %v6280_v3  ;;  %v5294_v14 = vld [vmem:[#allocation4 + $0x150] sm:$0xff] }
 0x5ae   : > { %v6926_v3 = vadd.f32 %v10383_v18, %v10092_v56  ;;  %v5450_v36 = vpack.c.bf16 %v5418_v50, %v5418_v50 }
 0x5af   : > { %v7099_v0 = vadd.f32 %v10391_v6, %v7010_v30  ;;  %v7352_v17 = vmax.f32 %v7274_v51, 0.0  ;;  %7048 = vmatmul.bf16.gmra.mxu1 %v6412_v5  ;;  %v6923_v6 = vadd.f32 %v10383_v18, %v10082_v57  ;;  %v5166_v57 = vld [vmem:[#allocation4 + $0x141] sm:$0xff]  ;;  %v5295_v51 = vld [vmem:[#allocation4 + $0x158] sm:$0xff] }
 0x5b0   : > { %v5327_v39 = vpack.c.bf16 %v5295_v51, %v5295_v51 }
 0x5b1   : > { %v10435_v52 = vpop.f32.mrf.mxu2  ;;  %v10437_v19 = vpop.f32.mrf.mxu3  ;;  %v7188_v37 = vadd.f32 %v10393_v60, %v7099_v0  ;;  %v10440_v40 = vpack.c.bf16 %v7352_v17, %v7351_v23  ;;  %v6548_v60 = vsel %vm4092_vm5, %v6113_v34, %v6221_v26  ;;  %v5419_v23 = vld [vmem:[#allocation4 + $0x12a] sm:$0xff]  ;;  %v5165_v0 = vld [vmem:[#allocation4 + $0x139] sm:$0xff]  ;;  %v5198_v17 = vpack.c.bf16 %v5166_v57, %v5166_v57 }
 0x5b2   : > { %v5451_v7 = vpack.c.bf16 %v5419_v23, %v5419_v23  ;;  %v5197_v12 = vpack.c.bf16 %v5165_v0, %v5165_v0  ;;  %v5326_v34 = vpack.c.bf16 %v5294_v14, %v5294_v14  ;;  %v6095_v56 = vunpack.c.l.b16 %v5327_v39 }
 0x5b4   : > { %v7011_v9 = vpop.f32.mrf.mxu1  ;;  %v7276_v11 = vpop.f32.mrf.mxu0  ;;  %v5902_v50 = vunpack.c.l.b16 %v5197_v12  ;;  %v6094_v23 = vunpack.c.l.b16 %v5326_v34 }
 0x5b5   : > { %v7012_v53 = vadd.f32 %v7011_v9, %v6923_v6  ;;  %v7277_v28 = vadd.f32 %v7276_v11, %v7188_v37  ;;  %v5903_v9 = vunpack.c.l.b16 %v5198_v17  ;;  %v6223_v17 = vpop.permute.xlu2 %6222 }
 0x5b6   : > { %7147 = vmatmul.bf16.gmra.mxu2 %v6484_v31  ;;  %7236 = vmatmul.bf16.gmra.mxu3 %v6548_v60  ;;  %v6282_v60 = vunpack.c.l.b16 %v5450_v36  ;;  %v6114_v14 = vpack.c.b16 %v6095_v56, %v6094_v23  ;;  %v6931_v56 = vadd.f32 %v10383_v18, %v10111_v22 }
 0x5b7   : > { %v7101_v30 = vadd.f32 %v10410_v47, %v7012_v53  ;;  %7911 = vmatmul.msk.bf16.gmra.mxu0 %vm4092_vm5, %v10444_v25  ;;  %v5835_v47 = vpop.permute.xlu0 %5834  ;;  %v7353_v11 = vmax.f32 %v7277_v28, 0.0  ;;  %v5922_v28 = vpack.c.b16 %v5903_v9, %v5902_v50  ;;  %v5421_v9 = vld [vmem:[#allocation4 + $0x142] sm:$0xff] }
 0x5b8   : > { %v5453_v23 = vpack.c.bf16 %v5421_v9, %v5421_v9 }
 0x5b9   : > { %v10451_v63 = vpop.f32.mrf.mxu2  ;;  %v10453_v15 = vpop.f32.mrf.mxu3  ;;  %v7190_v5 = vadd.f32 %v10412_v8, %v7101_v30  ;;  %v6416_v8 = vsel %vm4092_vm5, %v10418_v61, %v5835_v47  ;;  %v6283_v30 = vunpack.c.l.b16 %v5451_v7 }
 0x5ba   : > { %v6031_v61 = vpop.permute.xlu1 %6030 }
 0x5bb   : > { %v10470_v39 = vpack.c.b16 %v6283_v30, %v6282_v60  ;;  %v6488_v36 = vsel %vm4092_vm5, %v5922_v28, %v6031_v61 }
 0x5bc   : > { %v7014_v37 = vpop.f32.mrf.mxu1  ;;  %v7278_v13 = vpop.f32.mrf.mxu0 }
 0x5bd   : > { %v7015_v26 = vadd.f32 %v7014_v37, %v6926_v3  ;;  %v7279_v6 = vadd.f32 %v7278_v13, %v7190_v5 }
 0x5bf   : > { %v7104_v53 = vadd.f32 %v10425_v32, %v7015_v26  ;;  %v7354_v31 = vmax.f32 %v7279_v6, 0.0  ;;  %7053 = vmatmul.bf16.gmra.mxu1 %v6416_v8  ;;  %v6928_v32 = vadd.f32 %v10383_v18, %v10100_v1  ;;  %v5168_v1 = vld [vmem:[#allocation4 + $0x159] sm:$0xff]  ;;  %v5297_v26 = vld [vmem:[#allocation4 + $0x170] sm:$0xff] }
 0x5c0   : > { %v5420_v8 = vld [vmem:[#allocation4 + $0x13a] sm:$0xff]  ;;  %v5329_v60 = vpack.c.bf16 %v5297_v26, %v5297_v26 }
 0x5c1   : > { %v10461_v57 = vpop.f32.mrf.mxu2  ;;  %v10463_v51 = vpop.f32.mrf.mxu3  ;;  %v7193_v5 = vadd.f32 %v10427_v42, %v7104_v53  ;;  %v10466_v0 = vpack.c.bf16 %v7354_v31, %v7353_v11  ;;  %v6552_v42 = vsel %vm4092_vm5, %v6114_v14, %v6223_v17  ;;  %v5167_v11 = vld [vmem:[#allocation4 + $0x151] sm:$0xff]  ;;  %v5200_v53 = vpack.c.bf16 %v5168_v1, %v5168_v1  ;;  %v5296_v31 = vld [vmem:[#allocation4 + $0x168] sm:$0xff] }
 0x5c2   : > { %v5452_v50 = vpack.c.bf16 %v5420_v8, %v5420_v8  ;;  %v5328_v28 = vpack.c.bf16 %v5296_v31, %v5296_v31  ;;  %v6097_v22 = vunpack.c.l.b16 %v5329_v60 }
 0x5c3   : > { %v5905_v14 = vunpack.c.l.b16 %v5200_v53 }
 0x5c4   : > { %v7016_v3 = vpop.f32.mrf.mxu1  ;;  %v7281_v47 = vpop.f32.mrf.mxu0  ;;  %v6096_v8 = vunpack.c.l.b16 %v5328_v28  ;;  %v5169_v28 = vld [vmem:[#allocation4 + $0x169] sm:$0xff] }
 0x5c5   : > { %v7017_v37 = vadd.f32 %v7016_v3, %v6928_v32  ;;  %v7282_v13 = vadd.f32 %v7281_v47, %v7193_v5  ;;  %v5199_v32 = vpack.c.bf16 %v5167_v11, %v5167_v11  ;;  %v6033_v11 = vpop.permute.xlu1 %6032 }
 0x5c6   : > { %7152 = vmatmul.bf16.gmra.mxu2 %v6488_v36  ;;  %7241 = vmatmul.bf16.gmra.mxu3 %v6552_v42  ;;  %v6284_v36 = vunpack.c.l.b16 %v5452_v50  ;;  %v6285_v42 = vunpack.c.l.b16 %v5453_v23  ;;  %v6115_v53 = vpack.c.b16 %v6097_v22, %v6096_v8 }
 0x5c7   : > { %v7106_v7 = vadd.f32 %v10435_v52, %v7017_v37  ;;  %7912 = vmatmul.msk.bf16.gmra.mxu0 %vm4092_vm5, %v10470_v39  ;;  %v5837_v52 = vpop.permute.xlu0 %5836  ;;  %v7355_v3 = vmax.f32 %v7282_v13, 0.0  ;;  %v6933_v13 = vadd.f32 %v10383_v18, %v10128_v29  ;;  %v5170_v29 = vld [vmem:[#allocation4 + $0x171] sm:$0xff] }
 0x5c9   : > { %v10477_v6 = vpop.f32.mrf.mxu2  ;;  %v10479_v12 = vpop.f32.mrf.mxu3  ;;  %v7195_v34 = vadd.f32 %v10437_v19, %v7106_v7  ;;  %v6420_v19 = vsel %vm4092_vm5, %v10444_v25, %v5837_v52  ;;  %v10494_v52 = vpack.c.b16 %v6285_v42, %v6284_v36 }
 0x5ca   : > { %v6225_v25 = vpop.permute.xlu2 %6224 }
 0x5cc   : > { %v7019_v30 = vpop.f32.mrf.mxu1  ;;  %v7283_v5 = vpop.f32.mrf.mxu0 }
 0x5cd   : > { %v7020_v61 = vadd.f32 %v7019_v30, %v6931_v56  ;;  %v7284_v17 = vadd.f32 %v7283_v5, %v7195_v34  ;;  %v5904_v34 = vunpack.c.l.b16 %v5199_v32  ;;  %v5422_v32 = vld [vmem:[#allocation4 + $0x152] sm:$0xff] }
 0x5ce   : > { %v5454_v22 = vpack.c.bf16 %v5422_v32, %v5422_v32 }
 0x5cf   : > { %v7109_v47 = vadd.f32 %v10451_v63, %v7020_v61  ;;  %v7356_v37 = vmax.f32 %v7284_v17, 0.0  ;;  %7058 = vmatmul.bf16.gmra.mxu1 %v6420_v19  ;;  %v5923_v63 = vpack.c.b16 %v5905_v14, %v5904_v34  ;;  %v5423_v19 = vld [vmem:[#allocation4 + $0x15a] sm:$0xff]  ;;  %v6936_v14 = vadd.f32 %v10383_v18, %v10137_v62 }
 0x5d0   : > { %v5455_v34 = vpack.c.bf16 %v5423_v19, %v5423_v19 }
 0x5d1   : > { %v7115_v7 = vpop.f32.mrf.mxu2  ;;  %v10487_v1 = vpop.f32.mrf.mxu3  ;;  %v7198_v26 = vadd.f32 %v10453_v15, %v7109_v47  ;;  %v10490_v9 = vpack.c.bf16 %v7356_v37, %v7355_v3  ;;  %v6492_v5 = vsel %vm4092_vm5, %v5923_v63, %v6033_v11  ;;  %v6556_v15 = vsel %vm4092_vm5, %v6115_v53, %v6225_v25 }
 0x5d2   : > { %v5839_v3 = vpop.permute.xlu0 %5838  ;;  %v5202_v47 = vpack.c.bf16 %v5170_v29, %v5170_v29  ;;  %v6286_v63 = vunpack.c.l.b16 %v5454_v22 }
 0x5d3   : > { %v6424_v8 = vsel %vm4092_vm5, %v10470_v39, %v5839_v3  ;;  %v6938_v39 = vadd.f32 %v10383_v18, %v10155_v54  ;;  %v5424_v3 = vld [vmem:[#allocation4 + $0x16a] sm:$0xff] }
 0x5d4   : > { %v7021_v31 = vpop.f32.mrf.mxu1  ;;  %v7286_v56 = vpop.f32.mrf.mxu0 }
 0x5d5   : > { %v7022_v60 = vadd.f32 %v7021_v31, %v6933_v13  ;;  %v7287_v30 = vadd.f32 %v7286_v56, %v7198_v26  ;;  %v5201_v26 = vpack.c.bf16 %v5169_v28, %v5169_v28  ;;  %v5907_v13 = vunpack.c.l.b16 %v5202_v47  ;;  %v5425_v47 = vld [vmem:[#allocation4 + $0x172] sm:$0xff] }
 0x5d6   : > { %7157 = vmatmul.bf16.gmra.mxu2 %v6492_v5  ;;  %7246 = vmatmul.bf16.gmra.mxu3 %v6556_v15  ;;  %v6035_v15 = vpop.permute.xlu1 %6034 }
 0x5d7   : > { %v7111_v50 = vadd.f32 %v10461_v57, %v7022_v60  ;;  %7913 = vmatmul.msk.bf16.gmra.mxu0 %vm4092_vm5, %v10494_v52  ;;  %v7357_v11 = vmax.f32 %v7287_v30, 0.0  ;;  %v5906_v56 = vunpack.c.l.b16 %v5201_v26  ;;  %v6287_v60 = vunpack.c.l.b16 %v5455_v34 }
 0x5d8   : > { %v5457_v26 = vpack.c.bf16 %v5425_v47, %v5425_v47 }
 0x5d9   : > { %v10501_v23 = vpop.f32.mrf.mxu2  ;;  %v10503_v61 = vpop.f32.mrf.mxu3  ;;  %v7200_v17 = vadd.f32 %v10463_v51, %v7111_v50  ;;  %v5924_v30 = vpack.c.b16 %v5907_v13, %v5906_v56  ;;  %v6306_v28 = vpack.c.b16 %v6287_v60, %v6286_v63  ;;  %v5300_v56 = vld [vmem:[#allocation4 + $0x198] sm:$0xff]  ;;  %v5301_v60 = vld [vmem:[#allocation4 + $0x1a0] sm:$0xff] }
 0x5db   : > { %v6496_v32 = vsel %vm4092_vm5, %v5924_v30, %v6035_v15  ;;  %v5332_v30 = vpack.c.bf16 %v5300_v56, %v5300_v56 }
 0x5dc   : > { %v7024_v37 = vpop.f32.mrf.mxu1  ;;  %v7288_v57 = vpop.f32.mrf.mxu0 }
 0x5dd   : > { %v7025_v36 = vadd.f32 %v7024_v37, %v6936_v14  ;;  %v7289_v42 = vadd.f32 %v7288_v57, %v7200_v17  ;;  %v5841_v37 = vpop.permute.xlu0 %5840 }
 0x5df   : > { %v7114_v51 = vadd.f32 %v10477_v6, %v7025_v36  ;;  %v7358_v25 = vmax.f32 %v7289_v42, 0.0  ;;  %7063 = vmatmul.bf16.gmra.mxu1 %v6424_v8  ;;  %v5456_v42 = vpack.c.bf16 %v5424_v3, %v5424_v3 }
 0x5e1   : > { %v10511_v62 = vpop.f32.mrf.mxu2  ;;  %v10513_v53 = vpop.f32.mrf.mxu3  ;;  %v7203_v31 = vadd.f32 %v10479_v12, %v7114_v51  ;;  %v10516_v5 = vpack.c.bf16 %v7358_v25, %v7357_v11  ;;  %v6288_v13 = vunpack.c.l.b16 %v5456_v42 }
 0x5e4   : > { %v7026_v6 = vpop.f32.mrf.mxu1  ;;  %v7291_v50 = vpop.f32.mrf.mxu0 }
 0x5e5   : > { %v7027_v29 = vadd.f32 %v7026_v6, %v6938_v39  ;;  %v7292_v17 = vadd.f32 %v7291_v50, %v7203_v31  ;;  %v5333_v6 = vpack.c.bf16 %v5301_v60, %v5301_v60 }
 0x5e6   : > { %7162 = vmatmul.bf16.gmra.mxu2 %v6496_v32  ;;  %v6100_v32 = vunpack.c.l.b16 %v5332_v30 }
 0x5e7   : > { %v7116_v19 = vadd.f32 %v7115_v7, %v7027_v29  ;;  %7914 = vmatmul.msk.bf16.gmra.mxu0 %vm4092_vm5, %v6306_v28  ;;  %v6428_v7 = vsel %vm4092_vm5, %v10494_v52, %v5841_v37  ;;  %v7359_v34 = vmax.f32 %v7292_v17, 0.0  ;;  %v5843_v17 = vpop.permute.xlu0 %5842 }
 0x5e8   : > { %v6432_v37 = vsel %vm4092_vm5, %v6306_v28, %v5843_v17 }
 0x5e9   : > { %v10522_v12 = vpop.f32.mrf.mxu2  ;;  %v10524_v14 = vpop.f32.mrf.mxu3  ;;  %v7205_v54 = vadd.f32 %v10487_v1, %v7116_v19  ;;  %v6289_v1 = vunpack.c.l.b16 %v5457_v26  ;;  %v6101_v19 = vunpack.c.l.b16 %v5333_v6 }
 0x5eb   : > { %v6307_v39 = vpack.c.b16 %v6289_v1, %v6288_v13 }
 0x5ec   : > { %v10527_v57 = vpop.f32.mrf.mxu1  ;;  %v7293_v22 = vpop.f32.mrf.mxu0 }
 0x5ed   : > { %v7294_v36 = vadd.f32 %v7293_v22, %v7205_v54  ;;  %v6117_v54 = vpack.c.b16 %v6101_v19, %v6100_v32 }
 0x5ef   : > { %v7360_v8 = vmax.f32 %v7294_v36, 0.0  ;;  %7068 = vmatmul.bf16.gmra.mxu1 %v6428_v7 }
 0x5f1   : > { %v10531_v11 = vpack.c.bf16 %v7360_v8, %v7359_v34  ;;  %v10533_v51 = vpop.f32.mrf.mxu2  ;;  %v10535_v25 = vpop.f32.mrf.mxu3  ;;  %v5428_v34 = vld [vmem:[#allocation4 + $0x19a] sm:$0xff]  ;;  %v5429_v8 = vld [vmem:[#allocation4 + $0x1a2] sm:$0xff] }
 0x5f2   : > { %v5461_v56 = vpack.c.bf16 %v5429_v8, %v5429_v8 }
 0x5f4   : > { %v6227_v63 = vpop.permute.xlu2 %6226  ;;  %v10537_v31 = vpop.f32.mrf.mxu1  ;;  %v6293_v19 = vunpack.c.l.b16 %v5461_v56 }
 0x5f5   : > { %v10539_v15 = vpop.f32.mrf.mxu0  ;;  %v6560_v52 = vsel %vm4092_vm5, %v10395_v10, %v6227_v63  ;;  %v5460_v63 = vpack.c.bf16 %v5428_v34, %v5428_v34 }
 0x5f6   : > { %7251 = vmatmul.bf16.gmra.mxu3 %v6560_v52 }
 0x5f7   : > { %7915 = vmatmul.msk.bf16.gmra.mxu0 %vm4092_vm5, %v6307_v39  ;;  %v6292_v32 = vunpack.c.l.b16 %v5460_v63  ;;  %v6946_v63 = vadd.f32 %v10383_v18, %v10222_v21 }
 0x5f9   : > { %v7128_v50 = vpop.f32.mrf.mxu2  ;;  %v7217_v29 = vpop.f32.mrf.mxu3  ;;  %v6309_v34 = vpack.c.b16 %v6293_v19, %v6292_v32 }
 0x5fc   : > { %v7034_v3 = vpop.f32.mrf.mxu1  ;;  %v6229_v22 = vpop.permute.xlu2 %6228 }
 0x5fd   : > { %v10544_v47 = vpop.f32.mrf.mxu0  ;;  %v6564_v42 = vsel %vm4092_vm5, %v6117_v54, %v6229_v22  ;;  %v6953_v22 = vadd.f32 %v10383_v18, %v10277_v59  ;;  %v6956_v59 = vadd.f32 %v10383_v18, %v10285_v58 }
 0x5ff   : > { %7073 = vmatmul.bf16.gmra.mxu1 %v6432_v37 }
 0x601   : > { %v7130_v10 = vpop.f32.mrf.mxu2  ;;  %v7219_v36 = vpop.f32.mrf.mxu3 }
 0x604   : > { %v7036_v26 = vpop.f32.mrf.mxu1 }
 0x605   : > { %v7301_v7 = vpop.f32.mrf.mxu0 }
 0x606   : > { %7256 = vmatmul.bf16.gmra.mxu3 %v6564_v42 }
 0x607   : > { %7916 = vmatmul.msk.bf16.gmra.mxu0 %vm4092_vm5, %v10389_v44  ;;  %v6951_v44 = vadd.f32 %v10383_v18, %v10254_v16 }
 0x609   : > { %v7133_v13 = vpop.f32.mrf.mxu2  ;;  %v7222_v1 = vpop.f32.mrf.mxu3 }
 0x60c   : > { %v7039_v60 = vpop.f32.mrf.mxu1 }
 0x60d   : > { %v6037_v28 = vpop.permute.xlu1 %6036  ;;  %v7303_v30 = vpop.f32.mrf.mxu0  ;;  %v7040_v54 = vadd.f32 %v7039_v60, %v6951_v44 }
 0x60e   : > { %v5845_v52 = vpop.permute.xlu0 %5844  ;;  %v6500_v6 = vsel %vm4092_vm5, %v10387_v45, %v6037_v28  ;;  %v6948_v45 = vadd.f32 %v10383_v18, %v10237_v41  ;;  %v7035_v28 = vadd.f32 %v7034_v3, %v6946_v63 }
 0x60f   : > { %7167 = vmatmul.bf16.gmra.mxu2 %v6500_v6  ;;  %v6436_v17 = vsel %vm4092_vm5, %v6307_v39, %v5845_v52  ;;  %v7129_v39 = vadd.f32 %v7128_v50, %v7040_v54  ;;  %v6943_v54 = vadd.f32 %v10383_v18, %v10199_v43 }
 0x610   : > { %7078 = vmatmul.bf16.gmra.mxu1 %v6436_v17  ;;  %v7037_v16 = vadd.f32 %v7036_v26, %v6948_v45  ;;  %v7124_v21 = vadd.f32 %v10522_v12, %v7035_v28  ;;  %v6958_v12 = vadd.f32 %v10383_v18, %v10295_v20  ;;  %v6961_v28 = vadd.f32 %v10383_v18, %v10299_v33 }
 0x611   : > { %v7135_v37 = vpop.f32.mrf.mxu2  ;;  %v7224_v42 = vpop.f32.mrf.mxu3  ;;  %v7218_v60 = vadd.f32 %v7217_v29, %v7129_v39  ;;  %v6941_v29 = vadd.f32 %v10383_v18, %v10175_v2  ;;  %v7032_v58 = vadd.f32 %v10537_v31, %v6943_v54  ;;  %v6963_v33 = vadd.f32 %v10383_v18, %v10305_v4 }
 0x612   : > { %v7126_v6 = vadd.f32 %v10533_v51, %v7037_v16 }
 0x613   : > { %v7030_v26 = vadd.f32 %v10527_v57, %v6941_v29 }
 0x614   : > { %v7041_v8 = vpop.f32.mrf.mxu1  ;;  %v7215_v51 = vadd.f32 %v10535_v25, %v7126_v6 }
 0x615   : > { %v7042_v35 = vadd.f32 %v7041_v8, %v6953_v22  ;;  %v7306_v46 = vpop.f32.mrf.mxu0  ;;  %v7213_v22 = vadd.f32 %v10524_v14, %v7124_v21  ;;  %v7121_v8 = vadd.f32 %v10511_v62, %v7032_v58  ;;  %v7119_v39 = vadd.f32 %v10501_v23, %v7030_v26 }
 0x616   : > { %v7307_v17 = vadd.f32 %v7306_v46, %v7218_v60 }
 0x617   : > { %7917 = vmatmul.msk.bf16.gmra.mxu0 %vm4092_vm5, %v6309_v34  ;;  %v7131_v56 = vadd.f32 %v7130_v10, %v7042_v35  ;;  %v7304_v34 = vadd.f32 %v7303_v30, %v7215_v51  ;;  %v7302_v2 = vadd.f32 %v7301_v7, %v7213_v22  ;;  %v7210_v14 = vadd.f32 %v10513_v53, %v7121_v8 }
 0x618   : > { %v7365_v46 = vmax.f32 %v7307_v17, 0.0  ;;  %v7208_v20 = vadd.f32 %v10503_v61, %v7119_v39  ;;  %v6968_v8 = vadd.f32 %v10383_v18, %v10315_v24 }
 0x619   : > { %v7138_v52 = vpop.f32.mrf.mxu2  ;;  %v7220_v19 = vadd.f32 %v7219_v36, %v7131_v56  ;;  %v7227_v41 = vpop.f32.mrf.mxu3  ;;  %v7363_v30 = vmax.f32 %v7302_v2, 0.0  ;;  %v7299_v62 = vadd.f32 %v10544_v47, %v7210_v14 }
 0x61a   : > { %v7297_v60 = vadd.f32 %v10539_v15, %v7208_v20 }
 0x61b   : > { %v7362_v17 = vmax.f32 %v7299_v62, 0.0 }
 0x61c   : > { %v7044_v32 = vpop.f32.mrf.mxu1 }
 0x61d   : > { %v7045_v50 = vadd.f32 %v7044_v32, %v6956_v59  ;;  %v7308_v44 = vpop.f32.mrf.mxu0 }
 0x61e   : > { %v7309_v35 = vadd.f32 %v7308_v44, %v7220_v19  ;;  %v7361_v19 = vmax.f32 %v7297_v60, 0.0 }
 0x61f   : > { %v7134_v3 = vadd.f32 %v7133_v13, %v7045_v50 }
 0x620   : > { %v7366_v10 = vmax.f32 %v7309_v35, 0.0  ;;  %v7389_v47 = vpack.c.bf16 %v7362_v17, %v7361_v19 }
 0x621   : > { %v7223_v36 = vadd.f32 %v7222_v1, %v7134_v3  ;;  %v7140_v31 = vpop.f32.mrf.mxu2  ;;  %v7364_v1 = vmax.f32 %v7304_v34, 0.0  ;;  %v7229_v57 = vpop.f32.mrf.mxu3 }
 0x622   : > { %v7391_v43 = vpack.c.bf16 %v7366_v10, %v7365_v46 }
 0x623   : > { %v7390_v7 = vpack.c.bf16 %v7364_v1, %v7363_v30  ;;  %v6971_v1 = vadd.f32 %v10383_v18, %v10321_v55 }
 0x624   : > { %7407 = vmatpush.bf16.xpose.msrb.mxu1 %v7391_v43  ;;  %v7046_v13 = vpop.f32.mrf.mxu1 }
 0x625   : > { %v7047_v45 = vadd.f32 %v7046_v13, %v6958_v12  ;;  %v7311_v25 = vpop.f32.mrf.mxu0 }
 0x626   : > { %v7312_v63 = vadd.f32 %v7311_v25, %v7223_v36 }
 0x627   : > { %v7136_v16 = vadd.f32 %v7135_v37, %v7047_v45 }
 0x629   : > { %v7225_v56 = vadd.f32 %v7224_v42, %v7136_v16  ;;  %v7143_v32 = vpop.f32.mrf.mxu2  ;;  %v7367_v42 = vmax.f32 %v7312_v63, 0.0  ;;  %v7232_v61 = vpop.f32.mrf.mxu3 }
 0x62c   : > { %7408 = vmatpush.bf16.xpose.msrb.mxu1 %v7390_v7  ;;  %v7049_v23 = vpop.f32.mrf.mxu1 }
 0x62d   : > { %v7050_v59 = vadd.f32 %v7049_v23, %v6961_v28  ;;  %v7313_v6 = vpop.f32.mrf.mxu0  ;;  %v6973_v28 = vadd.f32 %v10383_v18, %v10324_v48 }
 0x62e   : > { %v7314_v37 = vadd.f32 %v7313_v6, %v7225_v56 }
 0x62f   : > { %v7139_v53 = vadd.f32 %v7138_v52, %v7050_v59  ;;  %v6966_v52 = vadd.f32 %v10383_v18, %v10311_v49 }
 0x630   : > { %v7368_v50 = vmax.f32 %v7314_v37, 0.0 }
 0x631   : > { %v7228_v44 = vadd.f32 %v7227_v41, %v7139_v53  ;;  %v7145_v58 = vpop.f32.mrf.mxu2  ;;  %v7234_v46 = vpop.f32.mrf.mxu3 }
 0x632   : > { %v10584_v54 = vpack.c.bf16 %v7368_v50, %v7367_v42 }
 0x634   : > { %7409 = vmatpush.bf16.xpose.msrb.mxu1 %v7389_v47  ;;  %v7051_v15 = vpop.f32.mrf.mxu1 }
 0x635   : > { %v7052_v21 = vadd.f32 %v7051_v15, %v6963_v33  ;;  %v7316_v35 = vpop.f32.mrf.mxu0  ;;  %v6978_v15 = vadd.f32 %v10383_v18, %v10335_v38 }
 0x636   : > { %v7317_v29 = vadd.f32 %v7316_v35, %v7228_v44 }
 0x637   : > { %v7141_v3 = vadd.f32 %v7140_v31, %v7052_v21 }
 0x638   : > { %v7369_v4 = vmax.f32 %v7317_v29, 0.0 }
 0x639   : > { %v7230_v51 = vadd.f32 %v7229_v57, %v7141_v3  ;;  %v7148_v2 = vpop.f32.mrf.mxu2  ;;  %v7237_v13 = vpop.f32.mrf.mxu3 }
 0x63c   : > { %7410 = vmatpush.bf16.xpose.msrb.mxu1 %v10531_v11  ;;  %v7054_v41 = vpop.f32.mrf.mxu1 }
 0x63d   : > { %v7055_v10 = vadd.f32 %v7054_v41, %v6966_v52  ;;  %v7318_v36 = vpop.f32.mrf.mxu0 }
 0x63e   : > { %v7319_v26 = vadd.f32 %v7318_v36, %v7230_v51 }
 0x63f   : > { %v7144_v22 = vadd.f32 %v7143_v32, %v7055_v10  ;;  %v6976_v32 = vadd.f32 %v10383_v18, %v10329_v27 }
 0x640   : > { %v7370_v34 = vmax.f32 %v7319_v26, 0.0 }
 0x641   : > { %v7233_v43 = vadd.f32 %v7232_v61, %v7144_v22  ;;  %v7150_v57 = vpop.f32.mrf.mxu2  ;;  %v7239_v30 = vpop.f32.mrf.mxu3 }
 0x642   : > { %v10591_v12 = vpack.c.bf16 %v7370_v34, %v7369_v4 }
 0x644   : > { %7411 = vmatpush.bf16.xpose.msrb.mxu1 %v10516_v5  ;;  %v7056_v49 = vpop.f32.mrf.mxu1 }
 0x645   : > { %v7057_v31 = vadd.f32 %v7056_v49, %v6968_v8  ;;  %v7321_v11 = vpop.f32.mrf.mxu0 }
 0x646   : > { %v7322_v45 = vadd.f32 %v7321_v11, %v7233_v43 }
 0x647   : > { %v7146_v25 = vadd.f32 %v7145_v58, %v7057_v31 }
 0x648   : > { %v7371_v5 = vmax.f32 %v7322_v45, 0.0 }
 0x649   : > { %v7235_v39 = vadd.f32 %v7234_v46, %v7146_v25  ;;  %v7153_v59 = vpop.f32.mrf.mxu2  ;;  %v7242_v17 = vpop.f32.mrf.mxu3 }
 0x64c   : > { %7412 = vmatpush.bf16.xpose.msrb.mxu1 %v10490_v9  ;;  %v7059_v63 = vpop.f32.mrf.mxu1 }
 0x64d   : > { %v7060_v16 = vadd.f32 %v7059_v63, %v6971_v1  ;;  %v7323_v14 = vpop.f32.mrf.mxu0  ;;  %v10726_v63 = vld [vmem:[#allocation10_spill] sm:$0xff] }
 0x64e   : > { %v7324_v24 = vadd.f32 %v7323_v14, %v7235_v39 }
 0x64f   : > { %v7149_v56 = vadd.f32 %v7148_v2, %v7060_v16 }
 0x650   : > { %v7372_v20 = vmax.f32 %v7324_v24, 0.0 }
 0x651   : > { %v7238_v62 = vadd.f32 %v7237_v13, %v7149_v56  ;;  %v7155_v44 = vpop.f32.mrf.mxu2  ;;  %v7244_v21 = vpop.f32.mrf.mxu3 }
 0x652   : > { %v10599_v7 = vpack.c.bf16 %v7372_v20, %v7371_v5  ;;  %v10727_v20 = vld [vmem:[#allocation12_spill] sm:$0xff] }
 0x654   : > { %7413 = vmatpush.bf16.xpose.msrb.mxu1 %v10466_v0  ;;  %v7061_v55 = vpop.f32.mrf.mxu1 }
 0x655   : > { %v7062_v60 = vadd.f32 %v7061_v55, %v6973_v28  ;;  %v7326_v9 = vpop.f32.mrf.mxu0  ;;  %v10728_v28 = vld [vmem:[#allocation14_spill] sm:$0xff] }
 0x656   : > { %v7327_v23 = vadd.f32 %v7326_v9, %v7238_v62  ;;  %v6988_v62 = vadd.f32 %v10383_v18, %v10727_v20  ;;  %v6993_v55 = vadd.f32 %v10383_v18, %v10728_v28 }
 0x657   : > { %v7151_v6 = vadd.f32 %v7150_v57, %v7062_v60  ;;  %v6991_v57 = vadd.f32 %v10383_v18, %v10726_v63  ;;  %v10729_v60 = vld [vmem:[#allocation17_spill] sm:$0xff] }
 0x658   : > { %v7373_v61 = vmax.f32 %v7327_v23, 0.0  ;;  %v6986_v9 = vadd.f32 %v10383_v18, %v10729_v60  ;;  %v10731_v18 = vld [vmem:[#allocation9_spill] sm:$0xff] }
 0x659   : > { %v7240_v37 = vadd.f32 %v7239_v30, %v7151_v6  ;;  %v7158_v51 = vpop.f32.mrf.mxu2  ;;  %v7247_v46 = vpop.f32.mrf.mxu3 }
 0x65c   : > { %7414 = vmatpush.bf16.xpose.msrb.mxu1 %v10440_v40  ;;  %v7064_v53 = vpop.f32.mrf.mxu1 }
 0x65d   : > { %v7065_v19 = vadd.f32 %v7064_v53, %v6976_v32  ;;  %v7328_v42 = vpop.f32.mrf.mxu0 }
 0x65e   : > { %v7329_v50 = vadd.f32 %v7328_v42, %v7240_v37 }
 0x65f   : > { %v7154_v48 = vadd.f32 %v7153_v59, %v7065_v19 }
 0x660   : > { %v7374_v0 = vmax.f32 %v7329_v50, 0.0 }
 0x661   : > { %v7243_v47 = vadd.f32 %v7242_v17, %v7154_v48  ;;  %v7160_v34 = vpop.f32.mrf.mxu2  ;;  %v7249_v38 = vpop.f32.mrf.mxu3 }
 0x662   : > { %v10607_v33 = vpack.c.bf16 %v7374_v0, %v7373_v61  ;;  %v8033_v61 = vld [vmem:[%s10672_s6] ss:$0 sm:$0xff]  ;;  %v10730_v0 = vld [vmem:[#allocation11_spill] sm:$0xff] }
 0x664   : > { %v7066_v35 = vpop.f32.mrf.mxu1 }
 0x665   : > { %v7067_v29 = vadd.f32 %v7066_v35, %v6978_v15  ;;  %v7331_v27 = vpop.f32.mrf.mxu0 }
 0x666   : > { %v7332_v3 = vadd.f32 %v7331_v27, %v7243_v47 }
 0x667   : > { %v7156_v40 = vadd.f32 %v7155_v44, %v7067_v29  ;;  %v6983_v44 = vadd.f32 %v8033_v61, %v10730_v0 }
 0x668   : > { %v7375_v36 = vmax.f32 %v7332_v3, 0.0 }
 0x669   : > { %v7245_v58 = vadd.f32 %v7244_v21, %v7156_v40  ;;  %v7163_v49 = vpop.f32.mrf.mxu2  ;;  %v6981_v21 = vadd.f32 %v8033_v61, %v10731_v18 }
 0x66c   : > { %v7069_v52 = vpop.f32.mrf.mxu1 }
 0x66d   : > { %v7333_v41 = vpop.f32.mrf.mxu0  ;;  %v7070_v40 = vadd.f32 %v7069_v52, %v6981_v21  ;;  %v7383_v52 = vld [vmem:[%s10673_s7] sm:$0x1] }
 0x66e   : > { %v7334_v10 = vadd.f32 %v7333_v41, %v7245_v58  ;;  %7415 = vmatmul.bf16.vlgmr.msrb.gmra.mxu1 %v7383_v52 }
 0x670   : > { %v7376_v26 = vmax.f32 %v7334_v10, 0.0 }
 0x671   : > { %v7165_v45 = vpop.f32.mrf.mxu2 }
 0x672   : > { %v10611_v22 = vpack.c.bf16 %v7376_v26, %v7375_v36 }
 0x674   : > { %v7071_v4 = vpop.f32.mrf.mxu1 }
 0x675   : > { %v7336_v43 = vpop.f32.mrf.mxu0  ;;  %v7072_v35 = vadd.f32 %v7071_v4, %v6983_v44 }
 0x677   : > { %v7161_v36 = vadd.f32 %v7160_v34, %v7072_v35 }
 0x679   : > { %v7252_v13 = vpop.f32.mrf.mxu3 }
 0x67c   : > { %v7074_v8 = vpop.f32.mrf.mxu1 }
 0x67d   : > { %v7338_v2 = vpop.f32.mrf.mxu0  ;;  %v7075_v37 = vadd.f32 %v7074_v8, %v6986_v9  ;;  %v7159_v8 = vadd.f32 %v7158_v51, %v7070_v40  ;;  %v7400_v51 = vld [vmem:[#allocation5] sm:$0x1] }
 0x67f   : > { %v7164_v47 = vadd.f32 %v7163_v49, %v7075_v37  ;;  %v7248_v63 = vadd.f32 %v7247_v46, %v7159_v8  ;;  %v8102_v46 = vmov 0  }
 0x680   : > { %8024 = vset.pattern.permute.xlu1 %v8102_v46  ;;  %8025 = vset.pattern.permute.xlu0 %v8102_v46 }
 0x681   : > { %v7254_v25 = vpop.f32.mrf.mxu3  ;;  %v7253_v58 = vadd.f32 %v7252_v13, %v7164_v47  ;;  %7403 = vperm.xlu1 %8024, %v7400_v51  }
 0x684   : > { %v7076_v31 = vpop.f32.mrf.mxu1 }
 0x685   : > { %v7341_v11 = vpop.f32.mrf.mxu0  ;;  %v7077_v23 = vadd.f32 %v7076_v31, %v6988_v62 }
 0x686   : > { %v7342_v26 = vadd.f32 %v7341_v11, %v7253_v58 }
 0x687   : > { %v7166_v19 = vadd.f32 %v7165_v45, %v7077_v23  ;;  %v7250_v45 = vadd.f32 %v7249_v38, %v7161_v36 }
 0x689   : > { %v7257_v16 = vpop.f32.mrf.mxu3  ;;  %v7255_v29 = vadd.f32 %v7254_v25, %v7166_v19  ;;  %v7339_v49 = vadd.f32 %v7338_v2, %v7250_v45 }
 0x68b   : > { %v7378_v4 = vmax.f32 %v7339_v49, 0.0 }
 0x68d   : > { %v7079_v39 = vpop.f32.mrf.mxu1  ;;  %v7343_v1 = vpop.f32.mrf.mxu0 }
 0x68e   : > { %v7080_v24 = vadd.f32 %v7079_v39, %v6991_v57  ;;  %v7344_v41 = vadd.f32 %v7343_v1, %v7255_v29  ;;  %v7379_v39 = vmax.f32 %v7342_v26, 0.0 }
 0x690   : > { %v7380_v31 = vmax.f32 %v7344_v41, 0.0 }
 0x691   : > { %v7259_v53 = vpop.f32.mrf.mxu3 }
 0x692   : > { %v7168_v14 = vpop.f32.mrf.mxu2  ;;  %v7398_v57 = vpack.c.bf16 %v7380_v31, %v7379_v39 }
 0x693   : > { %v7169_v30 = vadd.f32 %v7168_v14, %v7080_v24 }
 0x695   : > { %v7081_v56 = vpop.f32.mrf.mxu1  ;;  %v7346_v5 = vpop.f32.mrf.mxu0  ;;  %v7258_v6 = vadd.f32 %v7257_v16, %v7169_v30  ;;  %v7337_v16 = vadd.f32 %v7336_v43, %v7248_v63 }
 0x696   : > { %v7082_v59 = vadd.f32 %v7081_v56, %v6993_v55 }
 0x697   : > { %v7347_v42 = vadd.f32 %v7346_v5, %v7258_v6  ;;  %v7377_v25 = vmax.f32 %v7337_v16, 0.0 }
 0x699   : > { %v7381_v27 = vmax.f32 %v7347_v42, 0.0  ;;  %v7397_v14 = vpack.c.bf16 %v7378_v4, %v7377_v25 }
 0x69a   : > { %v7170_v17 = vpop.f32.mrf.mxu2 }
 0x69b   : > { %v7171_v32 = vadd.f32 %v7170_v17, %v7082_v59 }
 0x69d   : > { %v7260_v50 = vadd.f32 %v7259_v53, %v7171_v32  ;;  %v7348_v48 = vpop.f32.mrf.mxu0 }
 0x69f   : > { %v7349_v15 = vadd.f32 %v7348_v48, %v7260_v50 }
 0x6a1   : > { %v7382_v3 = vmax.f32 %v7349_v15, 0.0 }
 0x6a3   : > { %v7399_v10 = vpack.c.bf16 %v7382_v3, %v7381_v27 }
 0x6a5   : > { %7420 = vmatpush.bf16.xpose.msrb.mxu2 %v7399_v10 }
 0x6ad   : > { %7421 = vmatpush.bf16.xpose.msrb.mxu2 %v7398_v57 }
 0x6b5   : > { %7422 = vmatpush.bf16.xpose.msrb.mxu2 %v7397_v14 }
 0x6bd   : > { %7423 = vmatpush.bf16.xpose.msrb.mxu2 %v10611_v22 }
 0x6c5   : > { %7424 = vmatpush.bf16.xpose.msrb.mxu2 %v10607_v33  ;;  %v7439_v33 = vlaneseq }
 0x6c7   : > { %vm7441_vm9 = vcmp.lt.s32.totalorder %v7439_v33, 256 }
 0x6cd   : > { %7425 = vmatpush.bf16.xpose.msrb.mxu2 %v10599_v7 }
 0x6d5   : > { %7426 = vmatpush.bf16.xpose.msrb.mxu2 %v10591_v12 }
 0x6dd   : > { %7427 = vmatpush.bf16.xpose.msrb.mxu2 %v10584_v54 }
 0x6e4   : > { %7428 = vmatmul.bf16.vlgmr.msrb.gmra.mxu2 %v7383_v52 }
 0x6eb   : > { %v7416_v22 = vpop.f32.mrf.mxu1 }
 0x6f3   : > { %v7418_v34 = vpop.f32.mrf.mxu1  ;;  %v7404_v43 = vpop.permute.xlu1 %7403 }
 0x6f4   : > { %v7406_v38 = vperm.slane %v7404_v43, 0 }
 0x6f6   : > { %v7417_v54 = vadd.f32 %v7416_v22, %v7406_v38 }
 0x767   : > { %v7429_v2 = vpop.f32.mrf.mxu2 }
 0x768   : > { %v7430_v13 = vadd.f32 %v7429_v2, %v7406_v38 }
 0x76a   : > { %v7435_v12 = vrot.slane %v7430_v13, 7 }
 0x76c   : > { %v7437_v7 = vsel %vm7436_vm8, %v7417_v54, %v7435_v12 }
 0x76d   : > { %7443 = vst.msk [vmem:[%s327_s15] sm:$0x3] %vm7441_vm9, %v7437_v7 }
 0x76e   : > { %8061 = shalt.err (!%p8058_p3)
}
 0x76f   : > { %7980 = dma.vmem_to_hbm [thread:$0]  (%p8194_p5), %s7458_s28, 32, %s7460_s17, %s7445_s8   ;;  %v7431_v11 = vpop.f32.mrf.mxu2 }
 0x770 PF: > { %p7986_p4 = scmp.ge.s32.totalorder %s8096_s14, 2  ;;  %s7471_s25 = sand.u32 1, %s8084_s11  }
 0x771   : > { %s7472_s30 = scalar_lea.sflag [#allocation7], %s7471_s25 }
 0x772   : > { %p7983_p7 = pnand %p7986_p4, %p8198_p6 }
 0x774   : > { %p7984_p8 = pneg %p7983_p7 }
 0x776   : > { %8079 = dma.done.wait (%p7984_p8), %s7472_s30, 32  }
 0x777   : > { %8081 = vsyncadd (%p7984_p8), %s7472_s30, 4294967264  ;;  %p21_p9 = scmp.ge.s32.totalorder %s8181_s16, 4   ;;  %s10732_s11 = smov %s8088_s12 }
 0x778   : > { %s10733_s12 = smov %s8092_s13  ;;  %s10734_s13 = smov %s8192_s19 }
 0x779   : > { %s10735_s14 = smov %s8181_s16  ;;  %23 = sbr.rel (!%p21_p9) target bundleno = 6 (0x6), region = 97 }
 0x77e   :  { %7478 = vsyncpa [#allocation7], 1 }
 0x77f   :  { %7480 = vsyncpa [#allocation7 + $0x1], 1 }

</bundles_post_ra>
